<compile_context>
chip_gen: v7x
topology: tpu7x:2x2x1
jax: 0.10.0
libtpu: 0.0.40
codegen_flags: <defaults>
</compile_context>

<pallas_src>
import math

import jax
import jax.numpy as jnp
from jax.experimental import pallas as pl
from jax.experimental.pallas import tpu as pltpu

HIDDEN = 128  # self.hidden_size in the PyTorch module


def _time_chunk(T):
    # 8 time steps per grid iteration when possible (amortizes the ~0.35us/step
    # grid overhead); otherwise fall back to the whole sequence in one chunk.
    return 8 if T % 8 == 0 else T


# ----------------------------------------------------------------------------
# Pallas kernels
# ----------------------------------------------------------------------------
def _gru1_kernel(xf_ref, xb_ref,
                 w1, b1, w2, b2, w3, b3, w4, b4, w5, b5,
                 wih_ref, whh_ref, bih_ref, bhh_ref,
                 of_ref, ob_ref, hf_scr, hb_scr):
    """fc1..fc5+ReLU fused with layer-1 bidirectional GRU.

    Grid axis 0 iterates time chunks (sequential). xf_ref/xb_ref are the raw
    batch-first (B, TC, 5) input chunks for the forward / backward direction.
    Outputs are time-major (TC, B, H). PyTorch gate order is (r, z, n).
    """
    H = HIDDEN
    TC = of_ref.shape[0]

    @pl.when(pl.program_id(0) == 0)
    def _():
        hf_scr[...] = jnp.zeros_like(hf_scr)
        hb_scr[...] = jnp.zeros_like(hb_scr)

    x_f = xf_ref[...]                      # (B, TC, 5)
    x_b = xb_ref[...]
    fc_params = ((w1[...], b1[...]), (w2[...], b2[...]), (w3[...], b3[...]),
                 (w4[...], b4[...]), (w5[...], b5[...]))
    wih = (wih_ref[0], wih_ref[1])         # (32, 3H) each
    whh = (whh_ref[0], whh_ref[1])         # (H, 3H)
    bih = (bih_ref[0], bih_ref[1])         # (1, 3H)
    bhh = (bhh_ref[0], bhh_ref[1])

    def mlp(x_t):                          # (B, 5) -> (B, 32), fc1..fc5 + ReLU
        h = x_t
        for w, b in fc_params:
            h = jnp.maximum(
                jnp.dot(h, w, preferred_element_type=jnp.float32) + b, 0.0)
        return h

    def cell(x_t, h_prev, d):
        gi = jnp.dot(x_t, wih[d], preferred_element_type=jnp.float32) + bih[d]
        gh = jnp.dot(h_prev, whh[d], preferred_element_type=jnp.float32) + bhh[d]
        r = jax.nn.sigmoid(gi[:, :H] + gh[:, :H])
        z = jax.nn.sigmoid(gi[:, H:2 * H] + gh[:, H:2 * H])
        n = jnp.tanh(gi[:, 2 * H:] + r * gh[:, 2 * H:])
        return (1.0 - z) * n + z * h_prev

    h_f = hf_scr[...]
    h_b = hb_scr[...]
    for tc in range(TC):                   # static unroll over the chunk
        h_f = cell(mlp(x_f[:, tc, :]), h_f, 0)
        of_ref[tc] = h_f
        tb = TC - 1 - tc
        h_b = cell(mlp(x_b[:, tb, :]), h_b, 1)
        ob_ref[tb] = h_b
    hf_scr[...] = h_f
    hb_scr[...] = h_b


def _gru2_kernel(xf1_ref, xb1_ref, xf2_ref, xb2_ref,
                 wihf_ref, wihb_ref, whh_ref, bih_ref, bhh_ref,
                 of_ref, ob_ref, hf_scr, hb_scr):
    """Layer-2 bidirectional GRU over (h1_fwd, h1_bwd) without concatenation.

    W_ih is split into the half applied to h1_fwd (wihf) and the half applied
    to h1_bwd (wihb); gi = h1f @ W_top + h1b @ W_bot + b_ih.
    """
    H = HIDDEN
    TC = of_ref.shape[0]

    @pl.when(pl.program_id(0) == 0)
    def _():
        hf_scr[...] = jnp.zeros_like(hf_scr)
        hb_scr[...] = jnp.zeros_like(hb_scr)

    xf1 = xf1_ref[...]                     # h1_fwd chunk, fwd-direction order
    xb1 = xb1_ref[...]                     # h1_bwd chunk, fwd-direction order
    xf2 = xf2_ref[...]                     # h1_fwd chunk, bwd-direction order
    xb2 = xb2_ref[...]                     # h1_bwd chunk, bwd-direction order

    wihf = (wihf_ref[0], wihf_ref[1])
    wihb = (wihb_ref[0], wihb_ref[1])
    whh = (whh_ref[0], whh_ref[1])
    bih = (bih_ref[0], bih_ref[1])
    bhh = (bhh_ref[0], bhh_ref[1])

    def cell(xf_t, xb_t, h_prev, d):
        gi = (jnp.dot(xf_t, wihf[d], preferred_element_type=jnp.float32)
              + jnp.dot(xb_t, wihb[d], preferred_element_type=jnp.float32)
              + bih[d])
        gh = jnp.dot(h_prev, whh[d], preferred_element_type=jnp.float32) + bhh[d]
        r = jax.nn.sigmoid(gi[:, :H] + gh[:, :H])
        z = jax.nn.sigmoid(gi[:, H:2 * H] + gh[:, H:2 * H])
        n = jnp.tanh(gi[:, 2 * H:] + r * gh[:, 2 * H:])
        return (1.0 - z) * n + z * h_prev

    h_f = hf_scr[...]
    h_b = hb_scr[...]
    for tc in range(TC):
        h_f = cell(xf1[tc], xb1[tc], h_f, 0)
        of_ref[tc] = h_f
        tb = TC - 1 - tc
        h_b = cell(xf2[tb], xb2[tb], h_b, 1)
        ob_ref[tb] = h_b
    hf_scr[...] = h_f
    hb_scr[...] = h_b


def _fc6_kernel(hf_ref, hb_ref, wf_ref, wb_ref, b_ref, out_ref):
    """fc6 as broadcast-multiply + lane reduction -> dense (T, B) output."""
    out_ref[...] = (jnp.sum(hf_ref[...] * wf_ref[...], axis=-1)
                    + jnp.sum(hb_ref[...] * wb_ref[...], axis=-1)
                    + b_ref[...])


# ----------------------------------------------------------------------------
# Wrappers around pallas_call
# ----------------------------------------------------------------------------
def gru1_call(inp, p):
    """inp: (B, T, 5) batch-first -> (h_fwd, h_bwd), each (T, B, H) time-major."""
    B, T, F = inp.shape
    H = HIDDEN
    TC = _time_chunk(T)
    C = T // TC

    w2 = lambda c: (0, 0)
    w3 = lambda c: (0, 0, 0)
    x_fwd = lambda c: (0, c, 0)
    x_bwd = lambda c: (0, C - 1 - c, 0)
    o_fwd = lambda c: (c, 0, 0)
    o_bwd = lambda c: (C - 1 - c, 0, 0)

    in_specs = [pl.BlockSpec((B, TC, F), x_fwd),
                pl.BlockSpec((B, TC, F), x_bwd)]
    fc_args = []
    for i, din in zip(range(1, 6), (5, 32, 32, 32, 32)):
        in_specs += [pl.BlockSpec((din, 32), w2), pl.BlockSpec((1, 32), w2)]
        fc_args += [p[f'fc{i}_w'], p[f'fc{i}_b']]
    in_specs += [pl.BlockSpec((2, 32, 3 * H), w3),
                 pl.BlockSpec((2, H, 3 * H), w3),
                 pl.BlockSpec((2, 1, 3 * H), w3),
                 pl.BlockSpec((2, 1, 3 * H), w3)]

    out_specs = (pl.BlockSpec((TC, B, H), o_fwd),
                 pl.BlockSpec((TC, B, H), o_bwd))
    out_shape = (jax.ShapeDtypeStruct((T, B, H), jnp.float32),
                 jax.ShapeDtypeStruct((T, B, H), jnp.float32))

    return pl.pallas_call(
        _gru1_kernel,
        out_shape=out_shape,
        grid=(C,),
        in_specs=in_specs,
        out_specs=out_specs,
        scratch_shapes=[pltpu.VMEM((B, H), jnp.float32),
                        pltpu.VMEM((B, H), jnp.float32)],
        compiler_params=pltpu.CompilerParams(
            dimension_semantics=("arbitrary",)),   # sequential recurrence
    )(inp, inp, *fc_args,
      p['gru1_w_ih'], p['gru1_w_hh'], p['gru1_b_ih'], p['gru1_b_hh'])


def gru2_call(h1f, h1b, p):
    """h1f/h1b: (T, B, H) time-major -> (h_fwd, h_bwd), each (T, B, H)."""
    T, B, H = h1f.shape
    TC = _time_chunk(T)
    C = T // TC

    w3 = lambda c: (0, 0, 0)
    t_fwd = lambda c: (c, 0, 0)
    t_bwd = lambda c: (C - 1 - c, 0, 0)

    x_spec_f = pl.BlockSpec((TC, B, H), t_fwd)
    x_spec_b = pl.BlockSpec((TC, B, H), t_bwd)
    in_specs = [x_spec_f, x_spec_f, x_spec_b, x_spec_b,
                pl.BlockSpec((2, H, 3 * H), w3),
                pl.BlockSpec((2, H, 3 * H), w3),
                pl.BlockSpec((2, H, 3 * H), w3),
                pl.BlockSpec((2, 1, 3 * H), w3),
                pl.BlockSpec((2, 1, 3 * H), w3)]
    out_specs = (pl.BlockSpec((TC, B, H), t_fwd),
                 pl.BlockSpec((TC, B, H), t_bwd))
    out_shape = (jax.ShapeDtypeStruct((T, B, H), jnp.float32),
                 jax.ShapeDtypeStruct((T, B, H), jnp.float32))

    return pl.pallas_call(
        _gru2_kernel,
        out_shape=out_shape,
        grid=(C,),
        in_specs=in_specs,
        out_specs=out_specs,
        scratch_shapes=[pltpu.VMEM((B, H), jnp.float32),
                        pltpu.VMEM((B, H), jnp.float32)],
        compiler_params=pltpu.CompilerParams(
            dimension_semantics=("arbitrary",)),
    )(h1f, h1b, h1f, h1b,
      p['gru2_w_ih_top'], p['gru2_w_ih_bot'], p['gru2_w_hh'],
      p['gru2_b_ih'], p['gru2_b_hh'])


def fc6_call(h2f, h2b, p):
    """h2f/h2b: (T, B, H) -> (T, B). Whole arrays fit in one block at these sizes."""
    T, B, _ = h2f.shape
    return pl.pallas_call(
        _fc6_kernel,
        out_shape=jax.ShapeDtypeStruct((T, B), jnp.float32),
    )(h2f, h2b, p['fc6_w_f'], p['fc6_w_b'], p['fc6_b'])


def stacked_gru_forward(params, inp):
    """inp: (B, T, 5) -> (B, T, 1), matching the PyTorch module."""
    B, T, F = inp.shape
    assert F == 5
    h1f, h1b = gru1_call(inp, params)            # (T, B, H) each
    h2f, h2b = gru2_call(h1f, h1b, params)       # (T, B, H) each
    out_tb = fc6_call(h2f, h2b, params)          # (T, B)
    return jnp.transpose(out_tb, (1, 0))[..., None]


# ----------------------------------------------------------------------------
# Deterministic synthetic parameter init (PyTorch-like uniform ranges)
# ----------------------------------------------------------------------------
def _uniform(key, shape, scale):
    return jax.random.uniform(key, shape, jnp.float32, -scale, scale)


def init_params(key):
    keys = iter(jax.random.split(key, 40))
    H = HIDDEN
    p = {}
    for i, din in zip(range(1, 6), (5, 32, 32, 32, 32)):
        s = 1.0 / math.sqrt(din)
        p[f'fc{i}_w'] = _uniform(next(keys), (din, 32), s)   # stored (in, out)
        p[f'fc{i}_b'] = _uniform(next(keys), (1, 32), s)

    sg = 1.0 / math.sqrt(H)
    # gru1: directions stacked on a leading axis; weights pre-transposed (in, 3H)
    p['gru1_w_ih'] = _uniform(next(keys), (2, 32, 3 * H), sg)
    p['gru1_w_hh'] = _uniform(next(keys), (2, H, 3 * H), sg)
    p['gru1_b_ih'] = _uniform(next(keys), (2, 1, 3 * H), sg)
    p['gru1_b_hh'] = _uniform(next(keys), (2, 1, 3 * H), sg)
    # gru2: W_ih^T pre-split into the half applied to h1_fwd (top) and h1_bwd (bottom)
    p['gru2_w_ih_top'] = _uniform(next(keys), (2, H, 3 * H), sg)
    p['gru2_w_ih_bot'] = _uniform(next(keys), (2, H, 3 * H), sg)
    p['gru2_w_hh'] = _uniform(next(keys), (2, H, 3 * H), sg)
    p['gru2_b_ih'] = _uniform(next(keys), (2, 1, 3 * H), sg)
    p['gru2_b_hh'] = _uniform(next(keys), (2, 1, 3 * H), sg)

    s6 = 1.0 / math.sqrt(2 * H)
    p['fc6_w_f'] = _uniform(next(keys), (1, H), s6)   # weight rows for h2_fwd
    p['fc6_w_b'] = _uniform(next(keys), (1, H), s6)   # weight rows for h2_bwd
    p['fc6_b'] = _uniform(next(keys), (1, 1), s6)
    return p


# ----------------------------------------------------------------------------
# Pure-JAX reference (same math, lax.scan recurrence) for correctness check
# ----------------------------------------------------------------------------
def _gru_dir_ref(x_btd, w_ih_t, w_hh_t, b_ih, b_hh, reverse):
    H = HIDDEN
    x_tbd = jnp.transpose(x_btd, (1, 0, 2))
    xs = x_tbd[::-1] if reverse else x_tbd

    def step(h, x):
        gi = x @ w_ih_t + b_ih
        gh = h @ w_hh_t + b_hh
        r = jax.nn.sigmoid(gi[:, :H] + gh[:, :H])
        z = jax.nn.sigmoid(gi[:, H:2 * H] + gh[:, H:2 * H])
        n = jnp.tanh(gi[:, 2 * H:] + r * gh[:, 2 * H:])
        hn = (1.0 - z) * n + z * h
        return hn, hn

    h0 = jnp.zeros((x_btd.shape[0], H), jnp.float32)
    _, hs = jax.lax.scan(step, h0, xs)
    hs = hs[::-1] if reverse else hs
    return jnp.transpose(hs, (1, 0, 2))                      # (B, T, H)


def reference_forward(p, inp):
    B, T, _ = inp.shape
    h = inp.reshape(B * T, 5)
    for i in range(1, 6):
        h = jnp.maximum(h @ p[f'fc{i}_w'] + p[f'fc{i}_b'], 0.0)
    feat = h.reshape(B, T, 32)

    h1f = _gru_dir_ref(feat, p['gru1_w_ih'][0], p['gru1_w_hh'][0],
                       p['gru1_b_ih'][0], p['gru1_b_hh'][0], False)
    h1b = _gru_dir_ref(feat, p['gru1_w_ih'][1], p['gru1_w_hh'][1],
                       p['gru1_b_ih'][1], p['gru1_b_hh'][1], True)
    h1 = jnp.concatenate([h1f, h1b], axis=-1)

    w2_ih = jnp.concatenate([p['gru2_w_ih_top'], p['gru2_w_ih_bot']], axis=1)
    h2f = _gru_dir_ref(h1, w2_ih[0], p['gru2_w_hh'][0],
                       p['gru2_b_ih'][0], p['gru2_b_hh'][0], False)
    h2b = _gru_dir_ref(h1, w2_ih[1], p['gru2_w_hh'][1],
                       p['gru2_b_ih'][1], p['gru2_b_hh'][1], True)

    out = (jnp.einsum('bth,h->bt', h2f, p['fc6_w_f'][0])
           + jnp.einsum('bth,h->bt', h2b, p['fc6_w_b'][0])
           + p['fc6_b'][0, 0])
    return out[..., None]


if __name__ == "__main__":
    key = jax.random.PRNGKey(0)
    k_inp, k_inp2, k_par = jax.random.split(key, 3)
    params = init_params(k_par)

    # Small shapes consistent with the module: batch=2, seq=8, 5 input features.
    B, T = 2, 8
    inp = jax.random.normal(k_inp, (B, T, 5), jnp.float32)
    out = jax.block_until_ready(stacked_gru_forward(params, inp))
    ref = reference_forward(params, inp)
    assert out.shape == (B, T, 1), out.shape
    assert jnp.allclose(out, ref, atol=1e-4, rtol=1e-4), \
        float(jnp.max(jnp.abs(out - ref)))

    # Second shape exercises the multi-chunk recurrence (T=16 -> 2 chunks of 8).
    inp2 = jax.random.normal(k_inp2, (2, 16, 5), jnp.float32)
    out2 = jax.block_until_ready(stacked_gru_forward(params, inp2))
    ref2 = reference_forward(params, inp2)
    assert out2.shape == (2, 16, 1), out2.shape
    assert jnp.allclose(out2, ref2, atol=1e-4, rtol=1e-4), \
        float(jnp.max(jnp.abs(out2 - ref2)))

    print("KERNEL_OK")
</pallas_src>

<mosaic_0001>
module attributes {stable_mosaic.version = 11 : i64} {
  func.func @_gru1_kernel(%arg0: i32, %arg1: memref<2x8x5xf32, #tpu.memory_space<vmem>>, %arg2: memref<2x8x5xf32, #tpu.memory_space<vmem>>, %arg3: memref<5x32xf32, #tpu.memory_space<vmem>>, %arg4: memref<1x32xf32, #tpu.memory_space<vmem>>, %arg5: memref<32x32xf32, #tpu.memory_space<vmem>>, %arg6: memref<1x32xf32, #tpu.memory_space<vmem>>, %arg7: memref<32x32xf32, #tpu.memory_space<vmem>>, %arg8: memref<1x32xf32, #tpu.memory_space<vmem>>, %arg9: memref<32x32xf32, #tpu.memory_space<vmem>>, %arg10: memref<1x32xf32, #tpu.memory_space<vmem>>, %arg11: memref<32x32xf32, #tpu.memory_space<vmem>>, %arg12: memref<1x32xf32, #tpu.memory_space<vmem>>, %arg13: memref<2x32x384xf32, #tpu.memory_space<vmem>>, %arg14: memref<2x128x384xf32, #tpu.memory_space<vmem>>, %arg15: memref<2x1x384xf32, #tpu.memory_space<vmem>>, %arg16: memref<2x1x384xf32, #tpu.memory_space<vmem>>, %arg17: memref<8x2x128xf32, #tpu.memory_space<vmem>>, %arg18: memref<8x2x128xf32, #tpu.memory_space<vmem>>, %arg19: memref<2x128xf32, #tpu.memory_space<vmem>>, %arg20: memref<2x128xf32, #tpu.memory_space<vmem>>) attributes {dimension_semantics = [#tpu.dimension_semantics<arbitrary>], iteration_bounds = array<i64: 1>, scalar_prefetch = 0 : i64, scratch_operands = 2 : i64, tpu.core_type = #tpu.core_type<tc>, window_params = [{transform_indices = @transform_0, window_bounds = array<i64: 2, 8, 5>}, {transform_indices = @transform_1, window_bounds = array<i64: 2, 8, 5>}, {pipeline_mode = #tpu.pipeline_mode<synchronous>, transform_indices = @transform_2, window_bounds = array<i64: 5, 32>}, {pipeline_mode = #tpu.pipeline_mode<synchronous>, transform_indices = @transform_3, window_bounds = array<i64: 1, 32>}, {pipeline_mode = #tpu.pipeline_mode<synchronous>, transform_indices = @transform_4, window_bounds = array<i64: 32, 32>}, {pipeline_mode = #tpu.pipeline_mode<synchronous>, transform_indices = @transform_5, window_bounds = array<i64: 1, 32>}, {pipeline_mode = #tpu.pipeline_mode<synchronous>, transform_indices = @transform_6, window_bounds = array<i64: 32, 32>}, {pipeline_mode = #tpu.pipeline_mode<synchronous>, transform_indices = @transform_7, window_bounds = array<i64: 1, 32>}, {pipeline_mode = #tpu.pipeline_mode<synchronous>, transform_indices = @transform_8, window_bounds = array<i64: 32, 32>}, {pipeline_mode = #tpu.pipeline_mode<synchronous>, transform_indices = @transform_9, window_bounds = array<i64: 1, 32>}, {pipeline_mode = #tpu.pipeline_mode<synchronous>, transform_indices = @transform_10, window_bounds = array<i64: 32, 32>}, {pipeline_mode = #tpu.pipeline_mode<synchronous>, transform_indices = @transform_11, window_bounds = array<i64: 1, 32>}, {pipeline_mode = #tpu.pipeline_mode<synchronous>, transform_indices = @transform_12, window_bounds = array<i64: 2, 32, 384>}, {pipeline_mode = #tpu.pipeline_mode<synchronous>, transform_indices = @transform_13, window_bounds = array<i64: 2, 128, 384>}, {pipeline_mode = #tpu.pipeline_mode<synchronous>, transform_indices = @transform_14, window_bounds = array<i64: 2, 1, 384>}, {pipeline_mode = #tpu.pipeline_mode<synchronous>, transform_indices = @transform_15, window_bounds = array<i64: 2, 1, 384>}, {transform_indices = @transform_16, window_bounds = array<i64: 8, 2, 128>}, {transform_indices = @transform_17, window_bounds = array<i64: 8, 2, 128>}]} {
    %c0_i32 = arith.constant 0 : i32
    %0 = arith.cmpi eq, %arg0, %c0_i32 : i32
    %1 = arith.extui %0 : i1 to i32
    %c0_i32_0 = arith.constant 0 : i32
    %2 = arith.cmpi ne, %1, %c0_i32_0 : i32
    scf.if %2 {
      %cst_338 = arith.constant 0.000000e+00 : f32
      %1027 = vector.broadcast %cst_338 : f32 to vector<2x128xf32>
      %c0_339 = arith.constant 0 : index
      %c0_340 = arith.constant 0 : index
      %1028 = vector.load %arg19[%c0_339, %c0_340] : memref<2x128xf32, #tpu.memory_space<vmem>>, vector<2x128xf32>
      tpu.vector_store %arg19[%c0_339, %c0_340], %1027 {strides = array<i32>} : memref<2x128xf32, #tpu.memory_space<vmem>>, vector<2x128xf32>,
      %cst_341 = arith.constant 0.000000e+00 : f32
      %1029 = vector.broadcast %cst_341 : f32 to vector<2x128xf32>
      %c0_342 = arith.constant 0 : index
      %c0_343 = arith.constant 0 : index
      %1030 = vector.load %arg20[%c0_342, %c0_343] : memref<2x128xf32, #tpu.memory_space<vmem>>, vector<2x128xf32>
      tpu.vector_store %arg20[%c0_342, %c0_343], %1029 {strides = array<i32>} : memref<2x128xf32, #tpu.memory_space<vmem>>, vector<2x128xf32>,
    } else {
    }
    %c0 = arith.constant 0 : index
    %c0_1 = arith.constant 0 : index
    %c0_2 = arith.constant 0 : index
    %3 = vector.load %arg1[%c0, %c0_1, %c0_2] : memref<2x8x5xf32, #tpu.memory_space<vmem>>, vector<2x8x5xf32>
    %c0_3 = arith.constant 0 : index
    %c0_4 = arith.constant 0 : index
    %c0_5 = arith.constant 0 : index
    %4 = vector.load %arg2[%c0_3, %c0_4, %c0_5] : memref<2x8x5xf32, #tpu.memory_space<vmem>>, vector<2x8x5xf32>
    %c0_6 = arith.constant 0 : index
    %c0_7 = arith.constant 0 : index
    %5 = vector.load %arg3[%c0_6, %c0_7] : memref<5x32xf32, #tpu.memory_space<vmem>>, vector<5x32xf32>
    %c0_8 = arith.constant 0 : index
    %c0_9 = arith.constant 0 : index
    %6 = vector.load %arg4[%c0_8, %c0_9] : memref<1x32xf32, #tpu.memory_space<vmem>>, vector<1x32xf32>
    %c0_10 = arith.constant 0 : index
    %c0_11 = arith.constant 0 : index
    %7 = vector.load %arg5[%c0_10, %c0_11] : memref<32x32xf32, #tpu.memory_space<vmem>>, vector<32x32xf32>
    %c0_12 = arith.constant 0 : index
    %c0_13 = arith.constant 0 : index
    %8 = vector.load %arg6[%c0_12, %c0_13] : memref<1x32xf32, #tpu.memory_space<vmem>>, vector<1x32xf32>
    %c0_14 = arith.constant 0 : index
    %c0_15 = arith.constant 0 : index
    %9 = vector.load %arg7[%c0_14, %c0_15] : memref<32x32xf32, #tpu.memory_space<vmem>>, vector<32x32xf32>
    %c0_16 = arith.constant 0 : index
    %c0_17 = arith.constant 0 : index
    %10 = vector.load %arg8[%c0_16, %c0_17] : memref<1x32xf32, #tpu.memory_space<vmem>>, vector<1x32xf32>
    %c0_18 = arith.constant 0 : index
    %c0_19 = arith.constant 0 : index
    %11 = vector.load %arg9[%c0_18, %c0_19] : memref<32x32xf32, #tpu.memory_space<vmem>>, vector<32x32xf32>
    %c0_20 = arith.constant 0 : index
    %c0_21 = arith.constant 0 : index
    %12 = vector.load %arg10[%c0_20, %c0_21] : memref<1x32xf32, #tpu.memory_space<vmem>>, vector<1x32xf32>
    %c0_22 = arith.constant 0 : index
    %c0_23 = arith.constant 0 : index
    %13 = vector.load %arg11[%c0_22, %c0_23] : memref<32x32xf32, #tpu.memory_space<vmem>>, vector<32x32xf32>
    %c0_24 = arith.constant 0 : index
    %c0_25 = arith.constant 0 : index
    %14 = vector.load %arg12[%c0_24, %c0_25] : memref<1x32xf32, #tpu.memory_space<vmem>>, vector<1x32xf32>
    %c0_26 = arith.constant 0 : index
    %c0_27 = arith.constant 0 : index
    %c0_28 = arith.constant 0 : index
    %15 = vector.load %arg13[%c0_26, %c0_27, %c0_28] : memref<2x32x384xf32, #tpu.memory_space<vmem>>, vector<1x32x384xf32>
    %16 = vector.shape_cast %15 : vector<1x32x384xf32> to vector<32x384xf32>
    %c1 = arith.constant 1 : index
    %c0_29 = arith.constant 0 : index
    %c0_30 = arith.constant 0 : index
    %17 = vector.load %arg13[%c1, %c0_29, %c0_30] : memref<2x32x384xf32, #tpu.memory_space<vmem>>, vector<1x32x384xf32>
    %18 = vector.shape_cast %17 : vector<1x32x384xf32> to vector<32x384xf32>
    %c0_31 = arith.constant 0 : index
    %c0_32 = arith.constant 0 : index
    %c0_33 = arith.constant 0 : index
    %19 = vector.load %arg14[%c0_31, %c0_32, %c0_33] : memref<2x128x384xf32, #tpu.memory_space<vmem>>, vector<1x128x384xf32>
    %20 = vector.shape_cast %19 : vector<1x128x384xf32> to vector<128x384xf32>
    %c1_34 = arith.constant 1 : index
    %c0_35 = arith.constant 0 : index
    %c0_36 = arith.constant 0 : index
    %21 = vector.load %arg14[%c1_34, %c0_35, %c0_36] : memref<2x128x384xf32, #tpu.memory_space<vmem>>, vector<1x128x384xf32>
    %22 = vector.shape_cast %21 : vector<1x128x384xf32> to vector<128x384xf32>
    %c0_37 = arith.constant 0 : index
    %c0_38 = arith.constant 0 : index
    %c0_39 = arith.constant 0 : index
    %23 = vector.load %arg15[%c0_37, %c0_38, %c0_39] : memref<2x1x384xf32, #tpu.memory_space<vmem>>, vector<1x1x384xf32>
    %24 = vector.shape_cast %23 : vector<1x1x384xf32> to vector<1x384xf32>
    %c1_40 = arith.constant 1 : index
    %c0_41 = arith.constant 0 : index
    %c0_42 = arith.constant 0 : index
    %25 = vector.load %arg15[%c1_40, %c0_41, %c0_42] : memref<2x1x384xf32, #tpu.memory_space<vmem>>, vector<1x1x384xf32>
    %26 = vector.shape_cast %25 : vector<1x1x384xf32> to vector<1x384xf32>
    %c0_43 = arith.constant 0 : index
    %c0_44 = arith.constant 0 : index
    %c0_45 = arith.constant 0 : index
    %27 = vector.load %arg16[%c0_43, %c0_44, %c0_45] : memref<2x1x384xf32, #tpu.memory_space<vmem>>, vector<1x1x384xf32>
    %28 = vector.shape_cast %27 : vector<1x1x384xf32> to vector<1x384xf32>
    %c1_46 = arith.constant 1 : index
    %c0_47 = arith.constant 0 : index
    %c0_48 = arith.constant 0 : index
    %29 = vector.load %arg16[%c1_46, %c0_47, %c0_48] : memref<2x1x384xf32, #tpu.memory_space<vmem>>, vector<1x1x384xf32>
    %30 = vector.shape_cast %29 : vector<1x1x384xf32> to vector<1x384xf32>
    %c0_49 = arith.constant 0 : index
    %c0_50 = arith.constant 0 : index
    %31 = vector.load %arg19[%c0_49, %c0_50] : memref<2x128xf32, #tpu.memory_space<vmem>>, vector<2x128xf32>
    %c0_51 = arith.constant 0 : index
    %c0_52 = arith.constant 0 : index
    %32 = vector.load %arg20[%c0_51, %c0_52] : memref<2x128xf32, #tpu.memory_space<vmem>>, vector<2x128xf32>
    %33 = vector.extract_strided_slice %3 {offsets = [0, 0, 0], sizes = [2, 1, 5], strides = [1, 1, 1]} : vector<2x8x5xf32> to vector<2x1x5xf32>
    %34 = vector.shape_cast %33 : vector<2x1x5xf32> to vector<2x5xf32>
    %cst = arith.constant dense<0.000000e+00> : vector<2x32xf32>
    %35 = tpu.matmul %34, %5, %cst {dimension_numbers = #tpu.dot_dimension_numbers<[1], [0], [0], [1], [0, 0, 1, 1], [], []>} : vector<2x5xf32>, vector<5x32xf32>, vector<2x32xf32> -> vector<2x32xf32>
    %36 = vector.broadcast %6 : vector<1x32xf32> to vector<2x32xf32>
    %37 = arith.addf %35, %36 : vector<2x32xf32>
    %cst_53 = arith.constant 0.000000e+00 : f32
    %38 = vector.broadcast %cst_53 : f32 to vector<2x32xf32>
    %39 = arith.maximumf %37, %38 : vector<2x32xf32>
    %cst_54 = arith.constant dense<0.000000e+00> : vector<2x32xf32>
    %40 = tpu.matmul %39, %7, %cst_54 {dimension_numbers = #tpu.dot_dimension_numbers<[1], [0], [0], [1], [0, 0, 1, 1], [], []>} : vector<2x32xf32>, vector<32x32xf32>, vector<2x32xf32> -> vector<2x32xf32>
    %41 = vector.broadcast %8 : vector<1x32xf32> to vector<2x32xf32>
    %42 = arith.addf %40, %41 : vector<2x32xf32>
    %cst_55 = arith.constant 0.000000e+00 : f32
    %43 = vector.broadcast %cst_55 : f32 to vector<2x32xf32>
    %44 = arith.maximumf %42, %43 : vector<2x32xf32>
    %cst_56 = arith.constant dense<0.000000e+00> : vector<2x32xf32>
    %45 = tpu.matmul %44, %9, %cst_56 {dimension_numbers = #tpu.dot_dimension_numbers<[1], [0], [0], [1], [0, 0, 1, 1], [], []>} : vector<2x32xf32>, vector<32x32xf32>, vector<2x32xf32> -> vector<2x32xf32>
    %46 = vector.broadcast %10 : vector<1x32xf32> to vector<2x32xf32>
    %47 = arith.addf %45, %46 : vector<2x32xf32>
    %cst_57 = arith.constant 0.000000e+00 : f32
    %48 = vector.broadcast %cst_57 : f32 to vector<2x32xf32>
    %49 = arith.maximumf %47, %48 : vector<2x32xf32>
    %cst_58 = arith.constant dense<0.000000e+00> : vector<2x32xf32>
    %50 = tpu.matmul %49, %11, %cst_58 {dimension_numbers = #tpu.dot_dimension_numbers<[1], [0], [0], [1], [0, 0, 1, 1], [], []>} : vector<2x32xf32>, vector<32x32xf32>, vector<2x32xf32> -> vector<2x32xf32>
    %51 = vector.broadcast %12 : vector<1x32xf32> to vector<2x32xf32>
    %52 = arith.addf %50, %51 : vector<2x32xf32>
    %cst_59 = arith.constant 0.000000e+00 : f32
    %53 = vector.broadcast %cst_59 : f32 to vector<2x32xf32>
    %54 = arith.maximumf %52, %53 : vector<2x32xf32>
    %cst_60 = arith.constant dense<0.000000e+00> : vector<2x32xf32>
    %55 = tpu.matmul %54, %13, %cst_60 {dimension_numbers = #tpu.dot_dimension_numbers<[1], [0], [0], [1], [0, 0, 1, 1], [], []>} : vector<2x32xf32>, vector<32x32xf32>, vector<2x32xf32> -> vector<2x32xf32>
    %56 = vector.broadcast %14 : vector<1x32xf32> to vector<2x32xf32>
    %57 = arith.addf %55, %56 : vector<2x32xf32>
    %cst_61 = arith.constant 0.000000e+00 : f32
    %58 = vector.broadcast %cst_61 : f32 to vector<2x32xf32>
    %59 = arith.maximumf %57, %58 : vector<2x32xf32>
    %cst_62 = arith.constant dense<0.000000e+00> : vector<2x384xf32>
    %60 = tpu.matmul %59, %16, %cst_62 {dimension_numbers = #tpu.dot_dimension_numbers<[1], [0], [0], [1], [0, 0, 1, 1], [], []>} : vector<2x32xf32>, vector<32x384xf32>, vector<2x384xf32> -> vector<2x384xf32>
    %61 = vector.broadcast %24 : vector<1x384xf32> to vector<2x384xf32>
    %62 = arith.addf %60, %61 : vector<2x384xf32>
    %cst_63 = arith.constant dense<0.000000e+00> : vector<2x384xf32>
    %63 = tpu.matmul %31, %20, %cst_63 {dimension_numbers = #tpu.dot_dimension_numbers<[1], [0], [0], [1], [0, 0, 1, 1], [], []>} : vector<2x128xf32>, vector<128x384xf32>, vector<2x384xf32> -> vector<2x384xf32>
    %64 = vector.broadcast %28 : vector<1x384xf32> to vector<2x384xf32>
    %65 = arith.addf %63, %64 : vector<2x384xf32>
    %66 = vector.extract_strided_slice %62 {offsets = [0, 0], sizes = [2, 128], strides = [1, 1]} : vector<2x384xf32> to vector<2x128xf32>
    %67 = vector.extract_strided_slice %65 {offsets = [0, 0], sizes = [2, 128], strides = [1, 1]} : vector<2x384xf32> to vector<2x128xf32>
    %68 = arith.addf %66, %67 : vector<2x128xf32>
    %69 = arith.negf %68 : vector<2x128xf32>
    %70 = math.exp %69 : vector<2x128xf32>
    %cst_64 = arith.constant 1.000000e+00 : f32
    %71 = vector.broadcast %cst_64 : f32 to vector<2x128xf32>
    %72 = arith.addf %71, %70 : vector<2x128xf32>
    %73 = arith.divf %71, %72 : vector<2x128xf32>
    %74 = vector.extract_strided_slice %62 {offsets = [0, 128], sizes = [2, 128], strides = [1, 1]} : vector<2x384xf32> to vector<2x128xf32>
    %75 = vector.extract_strided_slice %65 {offsets = [0, 128], sizes = [2, 128], strides = [1, 1]} : vector<2x384xf32> to vector<2x128xf32>
    %76 = arith.addf %74, %75 : vector<2x128xf32>
    %77 = arith.negf %76 : vector<2x128xf32>
    %78 = math.exp %77 : vector<2x128xf32>
    %cst_65 = arith.constant 1.000000e+00 : f32
    %79 = vector.broadcast %cst_65 : f32 to vector<2x128xf32>
    %80 = arith.addf %79, %78 : vector<2x128xf32>
    %81 = arith.divf %79, %80 : vector<2x128xf32>
    %82 = vector.extract_strided_slice %62 {offsets = [0, 256], sizes = [2, 128], strides = [1, 1]} : vector<2x384xf32> to vector<2x128xf32>
    %83 = vector.extract_strided_slice %65 {offsets = [0, 256], sizes = [2, 128], strides = [1, 1]} : vector<2x384xf32> to vector<2x128xf32>
    %84 = arith.mulf %73, %83 : vector<2x128xf32>
    %85 = arith.addf %82, %84 : vector<2x128xf32>
    %86 = math.tanh %85 : vector<2x128xf32>
    %cst_66 = arith.constant 1.000000e+00 : f32
    %87 = vector.broadcast %cst_66 : f32 to vector<2x128xf32>
    %88 = arith.subf %87, %81 : vector<2x128xf32>
    %89 = arith.mulf %88, %86 : vector<2x128xf32>
    %90 = arith.mulf %81, %31 : vector<2x128xf32>
    %91 = arith.addf %89, %90 : vector<2x128xf32>
    %c0_67 = arith.constant 0 : index
    %c0_68 = arith.constant 0 : index
    %c0_69 = arith.constant 0 : index
    %92 = vector.load %arg17[%c0_67, %c0_68, %c0_69] : memref<8x2x128xf32, #tpu.memory_space<vmem>>, vector<1x2x128xf32>
    %93 = vector.shape_cast %92 : vector<1x2x128xf32> to vector<2x128xf32>
    %94 = vector.shape_cast %91 : vector<2x128xf32> to vector<1x2x128xf32>
    tpu.vector_store %arg17[%c0_67, %c0_68, %c0_69], %94 {strides = array<i32>} : memref<8x2x128xf32, #tpu.memory_space<vmem>>, vector<1x2x128xf32>,
    %95 = vector.extract_strided_slice %4 {offsets = [0, 7, 0], sizes = [2, 1, 5], strides = [1, 1, 1]} : vector<2x8x5xf32> to vector<2x1x5xf32>
    %96 = vector.shape_cast %95 : vector<2x1x5xf32> to vector<2x5xf32>
    %cst_70 = arith.constant dense<0.000000e+00> : vector<2x32xf32>
    %97 = tpu.matmul %96, %5, %cst_70 {dimension_numbers = #tpu.dot_dimension_numbers<[1], [0], [0], [1], [0, 0, 1, 1], [], []>} : vector<2x5xf32>, vector<5x32xf32>, vector<2x32xf32> -> vector<2x32xf32>
    %98 = vector.broadcast %6 : vector<1x32xf32> to vector<2x32xf32>
    %99 = arith.addf %97, %98 : vector<2x32xf32>
    %cst_71 = arith.constant 0.000000e+00 : f32
    %100 = vector.broadcast %cst_71 : f32 to vector<2x32xf32>
    %101 = arith.maximumf %99, %100 : vector<2x32xf32>
    %cst_72 = arith.constant dense<0.000000e+00> : vector<2x32xf32>
    %102 = tpu.matmul %101, %7, %cst_72 {dimension_numbers = #tpu.dot_dimension_numbers<[1], [0], [0], [1], [0, 0, 1, 1], [], []>} : vector<2x32xf32>, vector<32x32xf32>, vector<2x32xf32> -> vector<2x32xf32>
    %103 = vector.broadcast %8 : vector<1x32xf32> to vector<2x32xf32>
    %104 = arith.addf %102, %103 : vector<2x32xf32>
    %cst_73 = arith.constant 0.000000e+00 : f32
    %105 = vector.broadcast %cst_73 : f32 to vector<2x32xf32>
    %106 = arith.maximumf %104, %105 : vector<2x32xf32>
    %cst_74 = arith.constant dense<0.000000e+00> : vector<2x32xf32>
    %107 = tpu.matmul %106, %9, %cst_74 {dimension_numbers = #tpu.dot_dimension_numbers<[1], [0], [0], [1], [0, 0, 1, 1], [], []>} : vector<2x32xf32>, vector<32x32xf32>, vector<2x32xf32> -> vector<2x32xf32>
    %108 = vector.broadcast %10 : vector<1x32xf32> to vector<2x32xf32>
    %109 = arith.addf %107, %108 : vector<2x32xf32>
    %cst_75 = arith.constant 0.000000e+00 : f32
    %110 = vector.broadcast %cst_75 : f32 to vector<2x32xf32>
    %111 = arith.maximumf %109, %110 : vector<2x32xf32>
    %cst_76 = arith.constant dense<0.000000e+00> : vector<2x32xf32>
    %112 = tpu.matmul %111, %11, %cst_76 {dimension_numbers = #tpu.dot_dimension_numbers<[1], [0], [0], [1], [0, 0, 1, 1], [], []>} : vector<2x32xf32>, vector<32x32xf32>, vector<2x32xf32> -> vector<2x32xf32>
    %113 = vector.broadcast %12 : vector<1x32xf32> to vector<2x32xf32>
    %114 = arith.addf %112, %113 : vector<2x32xf32>
    %cst_77 = arith.constant 0.000000e+00 : f32
    %115 = vector.broadcast %cst_77 : f32 to vector<2x32xf32>
    %116 = arith.maximumf %114, %115 : vector<2x32xf32>
    %cst_78 = arith.constant dense<0.000000e+00> : vector<2x32xf32>
    %117 = tpu.matmul %116, %13, %cst_78 {dimension_numbers = #tpu.dot_dimension_numbers<[1], [0], [0], [1], [0, 0, 1, 1], [], []>} : vector<2x32xf32>, vector<32x32xf32>, vector<2x32xf32> -> vector<2x32xf32>
    %118 = vector.broadcast %14 : vector<1x32xf32> to vector<2x32xf32>
    %119 = arith.addf %117, %118 : vector<2x32xf32>
    %cst_79 = arith.constant 0.000000e+00 : f32
    %120 = vector.broadcast %cst_79 : f32 to vector<2x32xf32>
    %121 = arith.maximumf %119, %120 : vector<2x32xf32>
    %cst_80 = arith.constant dense<0.000000e+00> : vector<2x384xf32>
    %122 = tpu.matmul %121, %18, %cst_80 {dimension_numbers = #tpu.dot_dimension_numbers<[1], [0], [0], [1], [0, 0, 1, 1], [], []>} : vector<2x32xf32>, vector<32x384xf32>, vector<2x384xf32> -> vector<2x384xf32>
    %123 = vector.broadcast %26 : vector<1x384xf32> to vector<2x384xf32>
    %124 = arith.addf %122, %123 : vector<2x384xf32>
    %cst_81 = arith.constant dense<0.000000e+00> : vector<2x384xf32>
    %125 = tpu.matmul %32, %22, %cst_81 {dimension_numbers = #tpu.dot_dimension_numbers<[1], [0], [0], [1], [0, 0, 1, 1], [], []>} : vector<2x128xf32>, vector<128x384xf32>, vector<2x384xf32> -> vector<2x384xf32>
    %126 = vector.broadcast %30 : vector<1x384xf32> to vector<2x384xf32>
    %127 = arith.addf %125, %126 : vector<2x384xf32>
    %128 = vector.extract_strided_slice %124 {offsets = [0, 0], sizes = [2, 128], strides = [1, 1]} : vector<2x384xf32> to vector<2x128xf32>
    %129 = vector.extract_strided_slice %127 {offsets = [0, 0], sizes = [2, 128], strides = [1, 1]} : vector<2x384xf32> to vector<2x128xf32>
    %130 = arith.addf %128, %129 : vector<2x128xf32>
    %131 = arith.negf %130 : vector<2x128xf32>
    %132 = math.exp %131 : vector<2x128xf32>
    %cst_82 = arith.constant 1.000000e+00 : f32
    %133 = vector.broadcast %cst_82 : f32 to vector<2x128xf32>
    %134 = arith.addf %133, %132 : vector<2x128xf32>
    %135 = arith.divf %133, %134 : vector<2x128xf32>
    %136 = vector.extract_strided_slice %124 {offsets = [0, 128], sizes = [2, 128], strides = [1, 1]} : vector<2x384xf32> to vector<2x128xf32>
    %137 = vector.extract_strided_slice %127 {offsets = [0, 128], sizes = [2, 128], strides = [1, 1]} : vector<2x384xf32> to vector<2x128xf32>
    %138 = arith.addf %136, %137 : vector<2x128xf32>
    %139 = arith.negf %138 : vector<2x128xf32>
    %140 = math.exp %139 : vector<2x128xf32>
    %cst_83 = arith.constant 1.000000e+00 : f32
    %141 = vector.broadcast %cst_83 : f32 to vector<2x128xf32>
    %142 = arith.addf %141, %140 : vector<2x128xf32>
    %143 = arith.divf %141, %142 : vector<2x128xf32>
    %144 = vector.extract_strided_slice %124 {offsets = [0, 256], sizes = [2, 128], strides = [1, 1]} : vector<2x384xf32> to vector<2x128xf32>
    %145 = vector.extract_strided_slice %127 {offsets = [0, 256], sizes = [2, 128], strides = [1, 1]} : vector<2x384xf32> to vector<2x128xf32>
    %146 = arith.mulf %135, %145 : vector<2x128xf32>
    %147 = arith.addf %144, %146 : vector<2x128xf32>
    %148 = math.tanh %147 : vector<2x128xf32>
    %cst_84 = arith.constant 1.000000e+00 : f32
    %149 = vector.broadcast %cst_84 : f32 to vector<2x128xf32>
    %150 = arith.subf %149, %143 : vector<2x128xf32>
    %151 = arith.mulf %150, %148 : vector<2x128xf32>
    %152 = arith.mulf %143, %32 : vector<2x128xf32>
    %153 = arith.addf %151, %152 : vector<2x128xf32>
    %c7 = arith.constant 7 : index
    %c0_85 = arith.constant 0 : index
    %c0_86 = arith.constant 0 : index
    %154 = vector.load %arg18[%c7, %c0_85, %c0_86] : memref<8x2x128xf32, #tpu.memory_space<vmem>>, vector<1x2x128xf32>
    %155 = vector.shape_cast %154 : vector<1x2x128xf32> to vector<2x128xf32>
    %156 = vector.shape_cast %153 : vector<2x128xf32> to vector<1x2x128xf32>
    tpu.vector_store %arg18[%c7, %c0_85, %c0_86], %156 {strides = array<i32>} : memref<8x2x128xf32, #tpu.memory_space<vmem>>, vector<1x2x128xf32>,
    %157 = vector.extract_strided_slice %3 {offsets = [0, 1, 0], sizes = [2, 1, 5], strides = [1, 1, 1]} : vector<2x8x5xf32> to vector<2x1x5xf32>
    %158 = vector.shape_cast %157 : vector<2x1x5xf32> to vector<2x5xf32>
    %cst_87 = arith.constant dense<0.000000e+00> : vector<2x32xf32>
    %159 = tpu.matmul %158, %5, %cst_87 {dimension_numbers = #tpu.dot_dimension_numbers<[1], [0], [0], [1], [0, 0, 1, 1], [], []>} : vector<2x5xf32>, vector<5x32xf32>, vector<2x32xf32> -> vector<2x32xf32>
    %160 = vector.broadcast %6 : vector<1x32xf32> to vector<2x32xf32>
    %161 = arith.addf %159, %160 : vector<2x32xf32>
    %cst_88 = arith.constant 0.000000e+00 : f32
    %162 = vector.broadcast %cst_88 : f32 to vector<2x32xf32>
    %163 = arith.maximumf %161, %162 : vector<2x32xf32>
    %cst_89 = arith.constant dense<0.000000e+00> : vector<2x32xf32>
    %164 = tpu.matmul %163, %7, %cst_89 {dimension_numbers = #tpu.dot_dimension_numbers<[1], [0], [0], [1], [0, 0, 1, 1], [], []>} : vector<2x32xf32>, vector<32x32xf32>, vector<2x32xf32> -> vector<2x32xf32>
    %165 = vector.broadcast %8 : vector<1x32xf32> to vector<2x32xf32>
    %166 = arith.addf %164, %165 : vector<2x32xf32>
    %cst_90 = arith.constant 0.000000e+00 : f32
    %167 = vector.broadcast %cst_90 : f32 to vector<2x32xf32>
    %168 = arith.maximumf %166, %167 : vector<2x32xf32>
    %cst_91 = arith.constant dense<0.000000e+00> : vector<2x32xf32>
    %169 = tpu.matmul %168, %9, %cst_91 {dimension_numbers = #tpu.dot_dimension_numbers<[1], [0], [0], [1], [0, 0, 1, 1], [], []>} : vector<2x32xf32>, vector<32x32xf32>, vector<2x32xf32> -> vector<2x32xf32>
    %170 = vector.broadcast %10 : vector<1x32xf32> to vector<2x32xf32>
    %171 = arith.addf %169, %170 : vector<2x32xf32>
    %cst_92 = arith.constant 0.000000e+00 : f32
    %172 = vector.broadcast %cst_92 : f32 to vector<2x32xf32>
    %173 = arith.maximumf %171, %172 : vector<2x32xf32>
    %cst_93 = arith.constant dense<0.000000e+00> : vector<2x32xf32>
    %174 = tpu.matmul %173, %11, %cst_93 {dimension_numbers = #tpu.dot_dimension_numbers<[1], [0], [0], [1], [0, 0, 1, 1], [], []>} : vector<2x32xf32>, vector<32x32xf32>, vector<2x32xf32> -> vector<2x32xf32>
    %175 = vector.broadcast %12 : vector<1x32xf32> to vector<2x32xf32>
    %176 = arith.addf %174, %175 : vector<2x32xf32>
    %cst_94 = arith.constant 0.000000e+00 : f32
    %177 = vector.broadcast %cst_94 : f32 to vector<2x32xf32>
    %178 = arith.maximumf %176, %177 : vector<2x32xf32>
    %cst_95 = arith.constant dense<0.000000e+00> : vector<2x32xf32>
    %179 = tpu.matmul %178, %13, %cst_95 {dimension_numbers = #tpu.dot_dimension_numbers<[1], [0], [0], [1], [0, 0, 1, 1], [], []>} : vector<2x32xf32>, vector<32x32xf32>, vector<2x32xf32> -> vector<2x32xf32>
    %180 = vector.broadcast %14 : vector<1x32xf32> to vector<2x32xf32>
    %181 = arith.addf %179, %180 : vector<2x32xf32>
    %cst_96 = arith.constant 0.000000e+00 : f32
    %182 = vector.broadcast %cst_96 : f32 to vector<2x32xf32>
    %183 = arith.maximumf %181, %182 : vector<2x32xf32>
    %cst_97 = arith.constant dense<0.000000e+00> : vector<2x384xf32>
    %184 = tpu.matmul %183, %16, %cst_97 {dimension_numbers = #tpu.dot_dimension_numbers<[1], [0], [0], [1], [0, 0, 1, 1], [], []>} : vector<2x32xf32>, vector<32x384xf32>, vector<2x384xf32> -> vector<2x384xf32>
    %185 = vector.broadcast %24 : vector<1x384xf32> to vector<2x384xf32>
    %186 = arith.addf %184, %185 : vector<2x384xf32>
    %cst_98 = arith.constant dense<0.000000e+00> : vector<2x384xf32>
    %187 = tpu.matmul %91, %20, %cst_98 {dimension_numbers = #tpu.dot_dimension_numbers<[1], [0], [0], [1], [0, 0, 1, 1], [], []>} : vector<2x128xf32>, vector<128x384xf32>, vector<2x384xf32> -> vector<2x384xf32>
    %188 = vector.broadcast %28 : vector<1x384xf32> to vector<2x384xf32>
    %189 = arith.addf %187, %188 : vector<2x384xf32>
    %190 = vector.extract_strided_slice %186 {offsets = [0, 0], sizes = [2, 128], strides = [1, 1]} : vector<2x384xf32> to vector<2x128xf32>
    %191 = vector.extract_strided_slice %189 {offsets = [0, 0], sizes = [2, 128], strides = [1, 1]} : vector<2x384xf32> to vector<2x128xf32>
    %192 = arith.addf %190, %191 : vector<2x128xf32>
    %193 = arith.negf %192 : vector<2x128xf32>
    %194 = math.exp %193 : vector<2x128xf32>
    %cst_99 = arith.constant 1.000000e+00 : f32
    %195 = vector.broadcast %cst_99 : f32 to vector<2x128xf32>
    %196 = arith.addf %195, %194 : vector<2x128xf32>
    %197 = arith.divf %195, %196 : vector<2x128xf32>
    %198 = vector.extract_strided_slice %186 {offsets = [0, 128], sizes = [2, 128], strides = [1, 1]} : vector<2x384xf32> to vector<2x128xf32>
    %199 = vector.extract_strided_slice %189 {offsets = [0, 128], sizes = [2, 128], strides = [1, 1]} : vector<2x384xf32> to vector<2x128xf32>
    %200 = arith.addf %198, %199 : vector<2x128xf32>
    %201 = arith.negf %200 : vector<2x128xf32>
    %202 = math.exp %201 : vector<2x128xf32>
    %cst_100 = arith.constant 1.000000e+00 : f32
    %203 = vector.broadcast %cst_100 : f32 to vector<2x128xf32>
    %204 = arith.addf %203, %202 : vector<2x128xf32>
    %205 = arith.divf %203, %204 : vector<2x128xf32>
    %206 = vector.extract_strided_slice %186 {offsets = [0, 256], sizes = [2, 128], strides = [1, 1]} : vector<2x384xf32> to vector<2x128xf32>
    %207 = vector.extract_strided_slice %189 {offsets = [0, 256], sizes = [2, 128], strides = [1, 1]} : vector<2x384xf32> to vector<2x128xf32>
    %208 = arith.mulf %197, %207 : vector<2x128xf32>
    %209 = arith.addf %206, %208 : vector<2x128xf32>
    %210 = math.tanh %209 : vector<2x128xf32>
    %cst_101 = arith.constant 1.000000e+00 : f32
    %211 = vector.broadcast %cst_101 : f32 to vector<2x128xf32>
    %212 = arith.subf %211, %205 : vector<2x128xf32>
    %213 = arith.mulf %212, %210 : vector<2x128xf32>
    %214 = arith.mulf %205, %91 : vector<2x128xf32>
    %215 = arith.addf %213, %214 : vector<2x128xf32>
    %c1_102 = arith.constant 1 : index
    %c0_103 = arith.constant 0 : index
    %c0_104 = arith.constant 0 : index
    %216 = vector.load %arg17[%c1_102, %c0_103, %c0_104] : memref<8x2x128xf32, #tpu.memory_space<vmem>>, vector<1x2x128xf32>
    %217 = vector.shape_cast %216 : vector<1x2x128xf32> to vector<2x128xf32>
    %218 = vector.shape_cast %215 : vector<2x128xf32> to vector<1x2x128xf32>
    tpu.vector_store %arg17[%c1_102, %c0_103, %c0_104], %218 {strides = array<i32>} : memref<8x2x128xf32, #tpu.memory_space<vmem>>, vector<1x2x128xf32>,
    %219 = vector.extract_strided_slice %4 {offsets = [0, 6, 0], sizes = [2, 1, 5], strides = [1, 1, 1]} : vector<2x8x5xf32> to vector<2x1x5xf32>
    %220 = vector.shape_cast %219 : vector<2x1x5xf32> to vector<2x5xf32>
    %cst_105 = arith.constant dense<0.000000e+00> : vector<2x32xf32>
    %221 = tpu.matmul %220, %5, %cst_105 {dimension_numbers = #tpu.dot_dimension_numbers<[1], [0], [0], [1], [0, 0, 1, 1], [], []>} : vector<2x5xf32>, vector<5x32xf32>, vector<2x32xf32> -> vector<2x32xf32>
    %222 = vector.broadcast %6 : vector<1x32xf32> to vector<2x32xf32>
    %223 = arith.addf %221, %222 : vector<2x32xf32>
    %cst_106 = arith.constant 0.000000e+00 : f32
    %224 = vector.broadcast %cst_106 : f32 to vector<2x32xf32>
    %225 = arith.maximumf %223, %224 : vector<2x32xf32>
    %cst_107 = arith.constant dense<0.000000e+00> : vector<2x32xf32>
    %226 = tpu.matmul %225, %7, %cst_107 {dimension_numbers = #tpu.dot_dimension_numbers<[1], [0], [0], [1], [0, 0, 1, 1], [], []>} : vector<2x32xf32>, vector<32x32xf32>, vector<2x32xf32> -> vector<2x32xf32>
    %227 = vector.broadcast %8 : vector<1x32xf32> to vector<2x32xf32>
    %228 = arith.addf %226, %227 : vector<2x32xf32>
    %cst_108 = arith.constant 0.000000e+00 : f32
    %229 = vector.broadcast %cst_108 : f32 to vector<2x32xf32>
    %230 = arith.maximumf %228, %229 : vector<2x32xf32>
    %cst_109 = arith.constant dense<0.000000e+00> : vector<2x32xf32>
    %231 = tpu.matmul %230, %9, %cst_109 {dimension_numbers = #tpu.dot_dimension_numbers<[1], [0], [0], [1], [0, 0, 1, 1], [], []>} : vector<2x32xf32>, vector<32x32xf32>, vector<2x32xf32> -> vector<2x32xf32>
    %232 = vector.broadcast %10 : vector<1x32xf32> to vector<2x32xf32>
    %233 = arith.addf %231, %232 : vector<2x32xf32>
    %cst_110 = arith.constant 0.000000e+00 : f32
    %234 = vector.broadcast %cst_110 : f32 to vector<2x32xf32>
    %235 = arith.maximumf %233, %234 : vector<2x32xf32>
    %cst_111 = arith.constant dense<0.000000e+00> : vector<2x32xf32>
    %236 = tpu.matmul %235, %11, %cst_111 {dimension_numbers = #tpu.dot_dimension_numbers<[1], [0], [0], [1], [0, 0, 1, 1], [], []>} : vector<2x32xf32>, vector<32x32xf32>, vector<2x32xf32> -> vector<2x32xf32>
    %237 = vector.broadcast %12 : vector<1x32xf32> to vector<2x32xf32>
    %238 = arith.addf %236, %237 : vector<2x32xf32>
    %cst_112 = arith.constant 0.000000e+00 : f32
    %239 = vector.broadcast %cst_112 : f32 to vector<2x32xf32>
    %240 = arith.maximumf %238, %239 : vector<2x32xf32>
    %cst_113 = arith.constant dense<0.000000e+00> : vector<2x32xf32>
    %241 = tpu.matmul %240, %13, %cst_113 {dimension_numbers = #tpu.dot_dimension_numbers<[1], [0], [0], [1], [0, 0, 1, 1], [], []>} : vector<2x32xf32>, vector<32x32xf32>, vector<2x32xf32> -> vector<2x32xf32>
    %242 = vector.broadcast %14 : vector<1x32xf32> to vector<2x32xf32>
    %243 = arith.addf %241, %242 : vector<2x32xf32>
    %cst_114 = arith.constant 0.000000e+00 : f32
    %244 = vector.broadcast %cst_114 : f32 to vector<2x32xf32>
    %245 = arith.maximumf %243, %244 : vector<2x32xf32>
    %cst_115 = arith.constant dense<0.000000e+00> : vector<2x384xf32>
    %246 = tpu.matmul %245, %18, %cst_115 {dimension_numbers = #tpu.dot_dimension_numbers<[1], [0], [0], [1], [0, 0, 1, 1], [], []>} : vector<2x32xf32>, vector<32x384xf32>, vector<2x384xf32> -> vector<2x384xf32>
    %247 = vector.broadcast %26 : vector<1x384xf32> to vector<2x384xf32>
    %248 = arith.addf %246, %247 : vector<2x384xf32>
    %cst_116 = arith.constant dense<0.000000e+00> : vector<2x384xf32>
    %249 = tpu.matmul %153, %22, %cst_116 {dimension_numbers = #tpu.dot_dimension_numbers<[1], [0], [0], [1], [0, 0, 1, 1], [], []>} : vector<2x128xf32>, vector<128x384xf32>, vector<2x384xf32> -> vector<2x384xf32>
    %250 = vector.broadcast %30 : vector<1x384xf32> to vector<2x384xf32>
    %251 = arith.addf %249, %250 : vector<2x384xf32>
    %252 = vector.extract_strided_slice %248 {offsets = [0, 0], sizes = [2, 128], strides = [1, 1]} : vector<2x384xf32> to vector<2x128xf32>
    %253 = vector.extract_strided_slice %251 {offsets = [0, 0], sizes = [2, 128], strides = [1, 1]} : vector<2x384xf32> to vector<2x128xf32>
    %254 = arith.addf %252, %253 : vector<2x128xf32>
    %255 = arith.negf %254 : vector<2x128xf32>
    %256 = math.exp %255 : vector<2x128xf32>
    %cst_117 = arith.constant 1.000000e+00 : f32
    %257 = vector.broadcast %cst_117 : f32 to vector<2x128xf32>
    %258 = arith.addf %257, %256 : vector<2x128xf32>
    %259 = arith.divf %257, %258 : vector<2x128xf32>
    %260 = vector.extract_strided_slice %248 {offsets = [0, 128], sizes = [2, 128], strides = [1, 1]} : vector<2x384xf32> to vector<2x128xf32>
    %261 = vector.extract_strided_slice %251 {offsets = [0, 128], sizes = [2, 128], strides = [1, 1]} : vector<2x384xf32> to vector<2x128xf32>
    %262 = arith.addf %260, %261 : vector<2x128xf32>
    %263 = arith.negf %262 : vector<2x128xf32>
    %264 = math.exp %263 : vector<2x128xf32>
    %cst_118 = arith.constant 1.000000e+00 : f32
    %265 = vector.broadcast %cst_118 : f32 to vector<2x128xf32>
    %266 = arith.addf %265, %264 : vector<2x128xf32>
    %267 = arith.divf %265, %266 : vector<2x128xf32>
    %268 = vector.extract_strided_slice %248 {offsets = [0, 256], sizes = [2, 128], strides = [1, 1]} : vector<2x384xf32> to vector<2x128xf32>
    %269 = vector.extract_strided_slice %251 {offsets = [0, 256], sizes = [2, 128], strides = [1, 1]} : vector<2x384xf32> to vector<2x128xf32>
    %270 = arith.mulf %259, %269 : vector<2x128xf32>
    %271 = arith.addf %268, %270 : vector<2x128xf32>
    %272 = math.tanh %271 : vector<2x128xf32>
    %cst_119 = arith.constant 1.000000e+00 : f32
    %273 = vector.broadcast %cst_119 : f32 to vector<2x128xf32>
    %274 = arith.subf %273, %267 : vector<2x128xf32>
    %275 = arith.mulf %274, %272 : vector<2x128xf32>
    %276 = arith.mulf %267, %153 : vector<2x128xf32>
    %277 = arith.addf %275, %276 : vector<2x128xf32>
    %c6 = arith.constant 6 : index
    %c0_120 = arith.constant 0 : index
    %c0_121 = arith.constant 0 : index
    %278 = vector.load %arg18[%c6, %c0_120, %c0_121] : memref<8x2x128xf32, #tpu.memory_space<vmem>>, vector<1x2x128xf32>
    %279 = vector.shape_cast %278 : vector<1x2x128xf32> to vector<2x128xf32>
    %280 = vector.shape_cast %277 : vector<2x128xf32> to vector<1x2x128xf32>
    tpu.vector_store %arg18[%c6, %c0_120, %c0_121], %280 {strides = array<i32>} : memref<8x2x128xf32, #tpu.memory_space<vmem>>, vector<1x2x128xf32>,
    %281 = vector.extract_strided_slice %3 {offsets = [0, 2, 0], sizes = [2, 1, 5], strides = [1, 1, 1]} : vector<2x8x5xf32> to vector<2x1x5xf32>
    %282 = vector.shape_cast %281 : vector<2x1x5xf32> to vector<2x5xf32>
    %cst_122 = arith.constant dense<0.000000e+00> : vector<2x32xf32>
    %283 = tpu.matmul %282, %5, %cst_122 {dimension_numbers = #tpu.dot_dimension_numbers<[1], [0], [0], [1], [0, 0, 1, 1], [], []>} : vector<2x5xf32>, vector<5x32xf32>, vector<2x32xf32> -> vector<2x32xf32>
    %284 = vector.broadcast %6 : vector<1x32xf32> to vector<2x32xf32>
    %285 = arith.addf %283, %284 : vector<2x32xf32>
    %cst_123 = arith.constant 0.000000e+00 : f32
    %286 = vector.broadcast %cst_123 : f32 to vector<2x32xf32>
    %287 = arith.maximumf %285, %286 : vector<2x32xf32>
    %cst_124 = arith.constant dense<0.000000e+00> : vector<2x32xf32>
    %288 = tpu.matmul %287, %7, %cst_124 {dimension_numbers = #tpu.dot_dimension_numbers<[1], [0], [0], [1], [0, 0, 1, 1], [], []>} : vector<2x32xf32>, vector<32x32xf32>, vector<2x32xf32> -> vector<2x32xf32>
    %289 = vector.broadcast %8 : vector<1x32xf32> to vector<2x32xf32>
    %290 = arith.addf %288, %289 : vector<2x32xf32>
    %cst_125 = arith.constant 0.000000e+00 : f32
    %291 = vector.broadcast %cst_125 : f32 to vector<2x32xf32>
    %292 = arith.maximumf %290, %291 : vector<2x32xf32>
    %cst_126 = arith.constant dense<0.000000e+00> : vector<2x32xf32>
    %293 = tpu.matmul %292, %9, %cst_126 {dimension_numbers = #tpu.dot_dimension_numbers<[1], [0], [0], [1], [0, 0, 1, 1], [], []>} : vector<2x32xf32>, vector<32x32xf32>, vector<2x32xf32> -> vector<2x32xf32>
    %294 = vector.broadcast %10 : vector<1x32xf32> to vector<2x32xf32>
    %295 = arith.addf %293, %294 : vector<2x32xf32>
    %cst_127 = arith.constant 0.000000e+00 : f32
    %296 = vector.broadcast %cst_127 : f32 to vector<2x32xf32>
    %297 = arith.maximumf %295, %296 : vector<2x32xf32>
    %cst_128 = arith.constant dense<0.000000e+00> : vector<2x32xf32>
    %298 = tpu.matmul %297, %11, %cst_128 {dimension_numbers = #tpu.dot_dimension_numbers<[1], [0], [0], [1], [0, 0, 1, 1], [], []>} : vector<2x32xf32>, vector<32x32xf32>, vector<2x32xf32> -> vector<2x32xf32>
    %299 = vector.broadcast %12 : vector<1x32xf32> to vector<2x32xf32>
    %300 = arith.addf %298, %299 : vector<2x32xf32>
    %cst_129 = arith.constant 0.000000e+00 : f32
    %301 = vector.broadcast %cst_129 : f32 to vector<2x32xf32>
    %302 = arith.maximumf %300, %301 : vector<2x32xf32>
    %cst_130 = arith.constant dense<0.000000e+00> : vector<2x32xf32>
    %303 = tpu.matmul %302, %13, %cst_130 {dimension_numbers = #tpu.dot_dimension_numbers<[1], [0], [0], [1], [0, 0, 1, 1], [], []>} : vector<2x32xf32>, vector<32x32xf32>, vector<2x32xf32> -> vector<2x32xf32>
    %304 = vector.broadcast %14 : vector<1x32xf32> to vector<2x32xf32>
    %305 = arith.addf %303, %304 : vector<2x32xf32>
    %cst_131 = arith.constant 0.000000e+00 : f32
    %306 = vector.broadcast %cst_131 : f32 to vector<2x32xf32>
    %307 = arith.maximumf %305, %306 : vector<2x32xf32>
    %cst_132 = arith.constant dense<0.000000e+00> : vector<2x384xf32>
    %308 = tpu.matmul %307, %16, %cst_132 {dimension_numbers = #tpu.dot_dimension_numbers<[1], [0], [0], [1], [0, 0, 1, 1], [], []>} : vector<2x32xf32>, vector<32x384xf32>, vector<2x384xf32> -> vector<2x384xf32>
    %309 = vector.broadcast %24 : vector<1x384xf32> to vector<2x384xf32>
    %310 = arith.addf %308, %309 : vector<2x384xf32>
    %cst_133 = arith.constant dense<0.000000e+00> : vector<2x384xf32>
    %311 = tpu.matmul %215, %20, %cst_133 {dimension_numbers = #tpu.dot_dimension_numbers<[1], [0], [0], [1], [0, 0, 1, 1], [], []>} : vector<2x128xf32>, vector<128x384xf32>, vector<2x384xf32> -> vector<2x384xf32>
    %312 = vector.broadcast %28 : vector<1x384xf32> to vector<2x384xf32>
    %313 = arith.addf %311, %312 : vector<2x384xf32>
    %314 = vector.extract_strided_slice %310 {offsets = [0, 0], sizes = [2, 128], strides = [1, 1]} : vector<2x384xf32> to vector<2x128xf32>
    %315 = vector.extract_strided_slice %313 {offsets = [0, 0], sizes = [2, 128], strides = [1, 1]} : vector<2x384xf32> to vector<2x128xf32>
    %316 = arith.addf %314, %315 : vector<2x128xf32>
    %317 = arith.negf %316 : vector<2x128xf32>
    %318 = math.exp %317 : vector<2x128xf32>
    %cst_134 = arith.constant 1.000000e+00 : f32
    %319 = vector.broadcast %cst_134 : f32 to vector<2x128xf32>
    %320 = arith.addf %319, %318 : vector<2x128xf32>
    %321 = arith.divf %319, %320 : vector<2x128xf32>
    %322 = vector.extract_strided_slice %310 {offsets = [0, 128], sizes = [2, 128], strides = [1, 1]} : vector<2x384xf32> to vector<2x128xf32>
    %323 = vector.extract_strided_slice %313 {offsets = [0, 128], sizes = [2, 128], strides = [1, 1]} : vector<2x384xf32> to vector<2x128xf32>
    %324 = arith.addf %322, %323 : vector<2x128xf32>
    %325 = arith.negf %324 : vector<2x128xf32>
    %326 = math.exp %325 : vector<2x128xf32>
    %cst_135 = arith.constant 1.000000e+00 : f32
    %327 = vector.broadcast %cst_135 : f32 to vector<2x128xf32>
    %328 = arith.addf %327, %326 : vector<2x128xf32>
    %329 = arith.divf %327, %328 : vector<2x128xf32>
    %330 = vector.extract_strided_slice %310 {offsets = [0, 256], sizes = [2, 128], strides = [1, 1]} : vector<2x384xf32> to vector<2x128xf32>
    %331 = vector.extract_strided_slice %313 {offsets = [0, 256], sizes = [2, 128], strides = [1, 1]} : vector<2x384xf32> to vector<2x128xf32>
    %332 = arith.mulf %321, %331 : vector<2x128xf32>
    %333 = arith.addf %330, %332 : vector<2x128xf32>
    %334 = math.tanh %333 : vector<2x128xf32>
    %cst_136 = arith.constant 1.000000e+00 : f32
    %335 = vector.broadcast %cst_136 : f32 to vector<2x128xf32>
    %336 = arith.subf %335, %329 : vector<2x128xf32>
    %337 = arith.mulf %336, %334 : vector<2x128xf32>
    %338 = arith.mulf %329, %215 : vector<2x128xf32>
    %339 = arith.addf %337, %338 : vector<2x128xf32>
    %c2 = arith.constant 2 : index
    %c0_137 = arith.constant 0 : index
    %c0_138 = arith.constant 0 : index
    %340 = vector.load %arg17[%c2, %c0_137, %c0_138] : memref<8x2x128xf32, #tpu.memory_space<vmem>>, vector<1x2x128xf32>
    %341 = vector.shape_cast %340 : vector<1x2x128xf32> to vector<2x128xf32>
    %342 = vector.shape_cast %339 : vector<2x128xf32> to vector<1x2x128xf32>
    tpu.vector_store %arg17[%c2, %c0_137, %c0_138], %342 {strides = array<i32>} : memref<8x2x128xf32, #tpu.memory_space<vmem>>, vector<1x2x128xf32>,
    %343 = vector.extract_strided_slice %4 {offsets = [0, 5, 0], sizes = [2, 1, 5], strides = [1, 1, 1]} : vector<2x8x5xf32> to vector<2x1x5xf32>
    %344 = vector.shape_cast %343 : vector<2x1x5xf32> to vector<2x5xf32>
    %cst_139 = arith.constant dense<0.000000e+00> : vector<2x32xf32>
    %345 = tpu.matmul %344, %5, %cst_139 {dimension_numbers = #tpu.dot_dimension_numbers<[1], [0], [0], [1], [0, 0, 1, 1], [], []>} : vector<2x5xf32>, vector<5x32xf32>, vector<2x32xf32> -> vector<2x32xf32>
    %346 = vector.broadcast %6 : vector<1x32xf32> to vector<2x32xf32>
    %347 = arith.addf %345, %346 : vector<2x32xf32>
    %cst_140 = arith.constant 0.000000e+00 : f32
    %348 = vector.broadcast %cst_140 : f32 to vector<2x32xf32>
    %349 = arith.maximumf %347, %348 : vector<2x32xf32>
    %cst_141 = arith.constant dense<0.000000e+00> : vector<2x32xf32>
    %350 = tpu.matmul %349, %7, %cst_141 {dimension_numbers = #tpu.dot_dimension_numbers<[1], [0], [0], [1], [0, 0, 1, 1], [], []>} : vector<2x32xf32>, vector<32x32xf32>, vector<2x32xf32> -> vector<2x32xf32>
    %351 = vector.broadcast %8 : vector<1x32xf32> to vector<2x32xf32>
    %352 = arith.addf %350, %351 : vector<2x32xf32>
    %cst_142 = arith.constant 0.000000e+00 : f32
    %353 = vector.broadcast %cst_142 : f32 to vector<2x32xf32>
    %354 = arith.maximumf %352, %353 : vector<2x32xf32>
    %cst_143 = arith.constant dense<0.000000e+00> : vector<2x32xf32>
    %355 = tpu.matmul %354, %9, %cst_143 {dimension_numbers = #tpu.dot_dimension_numbers<[1], [0], [0], [1], [0, 0, 1, 1], [], []>} : vector<2x32xf32>, vector<32x32xf32>, vector<2x32xf32> -> vector<2x32xf32>
    %356 = vector.broadcast %10 : vector<1x32xf32> to vector<2x32xf32>
    %357 = arith.addf %355, %356 : vector<2x32xf32>
    %cst_144 = arith.constant 0.000000e+00 : f32
    %358 = vector.broadcast %cst_144 : f32 to vector<2x32xf32>
    %359 = arith.maximumf %357, %358 : vector<2x32xf32>
    %cst_145 = arith.constant dense<0.000000e+00> : vector<2x32xf32>
    %360 = tpu.matmul %359, %11, %cst_145 {dimension_numbers = #tpu.dot_dimension_numbers<[1], [0], [0], [1], [0, 0, 1, 1], [], []>} : vector<2x32xf32>, vector<32x32xf32>, vector<2x32xf32> -> vector<2x32xf32>
    %361 = vector.broadcast %12 : vector<1x32xf32> to vector<2x32xf32>
    %362 = arith.addf %360, %361 : vector<2x32xf32>
    %cst_146 = arith.constant 0.000000e+00 : f32
    %363 = vector.broadcast %cst_146 : f32 to vector<2x32xf32>
    %364 = arith.maximumf %362, %363 : vector<2x32xf32>
    %cst_147 = arith.constant dense<0.000000e+00> : vector<2x32xf32>
    %365 = tpu.matmul %364, %13, %cst_147 {dimension_numbers = #tpu.dot_dimension_numbers<[1], [0], [0], [1], [0, 0, 1, 1], [], []>} : vector<2x32xf32>, vector<32x32xf32>, vector<2x32xf32> -> vector<2x32xf32>
    %366 = vector.broadcast %14 : vector<1x32xf32> to vector<2x32xf32>
    %367 = arith.addf %365, %366 : vector<2x32xf32>
    %cst_148 = arith.constant 0.000000e+00 : f32
    %368 = vector.broadcast %cst_148 : f32 to vector<2x32xf32>
    %369 = arith.maximumf %367, %368 : vector<2x32xf32>
    %cst_149 = arith.constant dense<0.000000e+00> : vector<2x384xf32>
    %370 = tpu.matmul %369, %18, %cst_149 {dimension_numbers = #tpu.dot_dimension_numbers<[1], [0], [0], [1], [0, 0, 1, 1], [], []>} : vector<2x32xf32>, vector<32x384xf32>, vector<2x384xf32> -> vector<2x384xf32>
    %371 = vector.broadcast %26 : vector<1x384xf32> to vector<2x384xf32>
    %372 = arith.addf %370, %371 : vector<2x384xf32>
    %cst_150 = arith.constant dense<0.000000e+00> : vector<2x384xf32>
    %373 = tpu.matmul %277, %22, %cst_150 {dimension_numbers = #tpu.dot_dimension_numbers<[1], [0], [0], [1], [0, 0, 1, 1], [], []>} : vector<2x128xf32>, vector<128x384xf32>, vector<2x384xf32> -> vector<2x384xf32>
    %374 = vector.broadcast %30 : vector<1x384xf32> to vector<2x384xf32>
    %375 = arith.addf %373, %374 : vector<2x384xf32>
    %376 = vector.extract_strided_slice %372 {offsets = [0, 0], sizes = [2, 128], strides = [1, 1]} : vector<2x384xf32> to vector<2x128xf32>
    %377 = vector.extract_strided_slice %375 {offsets = [0, 0], sizes = [2, 128], strides = [1, 1]} : vector<2x384xf32> to vector<2x128xf32>
    %378 = arith.addf %376, %377 : vector<2x128xf32>
    %379 = arith.negf %378 : vector<2x128xf32>
    %380 = math.exp %379 : vector<2x128xf32>
    %cst_151 = arith.constant 1.000000e+00 : f32
    %381 = vector.broadcast %cst_151 : f32 to vector<2x128xf32>
    %382 = arith.addf %381, %380 : vector<2x128xf32>
    %383 = arith.divf %381, %382 : vector<2x128xf32>
    %384 = vector.extract_strided_slice %372 {offsets = [0, 128], sizes = [2, 128], strides = [1, 1]} : vector<2x384xf32> to vector<2x128xf32>
    %385 = vector.extract_strided_slice %375 {offsets = [0, 128], sizes = [2, 128], strides = [1, 1]} : vector<2x384xf32> to vector<2x128xf32>
    %386 = arith.addf %384, %385 : vector<2x128xf32>
    %387 = arith.negf %386 : vector<2x128xf32>
    %388 = math.exp %387 : vector<2x128xf32>
    %cst_152 = arith.constant 1.000000e+00 : f32
    %389 = vector.broadcast %cst_152 : f32 to vector<2x128xf32>
    %390 = arith.addf %389, %388 : vector<2x128xf32>
    %391 = arith.divf %389, %390 : vector<2x128xf32>
    %392 = vector.extract_strided_slice %372 {offsets = [0, 256], sizes = [2, 128], strides = [1, 1]} : vector<2x384xf32> to vector<2x128xf32>
    %393 = vector.extract_strided_slice %375 {offsets = [0, 256], sizes = [2, 128], strides = [1, 1]} : vector<2x384xf32> to vector<2x128xf32>
    %394 = arith.mulf %383, %393 : vector<2x128xf32>
    %395 = arith.addf %392, %394 : vector<2x128xf32>
    %396 = math.tanh %395 : vector<2x128xf32>
    %cst_153 = arith.constant 1.000000e+00 : f32
    %397 = vector.broadcast %cst_153 : f32 to vector<2x128xf32>
    %398 = arith.subf %397, %391 : vector<2x128xf32>
    %399 = arith.mulf %398, %396 : vector<2x128xf32>
    %400 = arith.mulf %391, %277 : vector<2x128xf32>
    %401 = arith.addf %399, %400 : vector<2x128xf32>
    %c5 = arith.constant 5 : index
    %c0_154 = arith.constant 0 : index
    %c0_155 = arith.constant 0 : index
    %402 = vector.load %arg18[%c5, %c0_154, %c0_155] : memref<8x2x128xf32, #tpu.memory_space<vmem>>, vector<1x2x128xf32>
    %403 = vector.shape_cast %402 : vector<1x2x128xf32> to vector<2x128xf32>
    %404 = vector.shape_cast %401 : vector<2x128xf32> to vector<1x2x128xf32>
    tpu.vector_store %arg18[%c5, %c0_154, %c0_155], %404 {strides = array<i32>} : memref<8x2x128xf32, #tpu.memory_space<vmem>>, vector<1x2x128xf32>,
    %405 = vector.extract_strided_slice %3 {offsets = [0, 3, 0], sizes = [2, 1, 5], strides = [1, 1, 1]} : vector<2x8x5xf32> to vector<2x1x5xf32>
    %406 = vector.shape_cast %405 : vector<2x1x5xf32> to vector<2x5xf32>
    %cst_156 = arith.constant dense<0.000000e+00> : vector<2x32xf32>
    %407 = tpu.matmul %406, %5, %cst_156 {dimension_numbers = #tpu.dot_dimension_numbers<[1], [0], [0], [1], [0, 0, 1, 1], [], []>} : vector<2x5xf32>, vector<5x32xf32>, vector<2x32xf32> -> vector<2x32xf32>
    %408 = vector.broadcast %6 : vector<1x32xf32> to vector<2x32xf32>
    %409 = arith.addf %407, %408 : vector<2x32xf32>
    %cst_157 = arith.constant 0.000000e+00 : f32
    %410 = vector.broadcast %cst_157 : f32 to vector<2x32xf32>
    %411 = arith.maximumf %409, %410 : vector<2x32xf32>
    %cst_158 = arith.constant dense<0.000000e+00> : vector<2x32xf32>
    %412 = tpu.matmul %411, %7, %cst_158 {dimension_numbers = #tpu.dot_dimension_numbers<[1], [0], [0], [1], [0, 0, 1, 1], [], []>} : vector<2x32xf32>, vector<32x32xf32>, vector<2x32xf32> -> vector<2x32xf32>
    %413 = vector.broadcast %8 : vector<1x32xf32> to vector<2x32xf32>
    %414 = arith.addf %412, %413 : vector<2x32xf32>
    %cst_159 = arith.constant 0.000000e+00 : f32
    %415 = vector.broadcast %cst_159 : f32 to vector<2x32xf32>
    %416 = arith.maximumf %414, %415 : vector<2x32xf32>
    %cst_160 = arith.constant dense<0.000000e+00> : vector<2x32xf32>
    %417 = tpu.matmul %416, %9, %cst_160 {dimension_numbers = #tpu.dot_dimension_numbers<[1], [0], [0], [1], [0, 0, 1, 1], [], []>} : vector<2x32xf32>, vector<32x32xf32>, vector<2x32xf32> -> vector<2x32xf32>
    %418 = vector.broadcast %10 : vector<1x32xf32> to vector<2x32xf32>
    %419 = arith.addf %417, %418 : vector<2x32xf32>
    %cst_161 = arith.constant 0.000000e+00 : f32
    %420 = vector.broadcast %cst_161 : f32 to vector<2x32xf32>
    %421 = arith.maximumf %419, %420 : vector<2x32xf32>
    %cst_162 = arith.constant dense<0.000000e+00> : vector<2x32xf32>
    %422 = tpu.matmul %421, %11, %cst_162 {dimension_numbers = #tpu.dot_dimension_numbers<[1], [0], [0], [1], [0, 0, 1, 1], [], []>} : vector<2x32xf32>, vector<32x32xf32>, vector<2x32xf32> -> vector<2x32xf32>
    %423 = vector.broadcast %12 : vector<1x32xf32> to vector<2x32xf32>
    %424 = arith.addf %422, %423 : vector<2x32xf32>
    %cst_163 = arith.constant 0.000000e+00 : f32
    %425 = vector.broadcast %cst_163 : f32 to vector<2x32xf32>
    %426 = arith.maximumf %424, %425 : vector<2x32xf32>
    %cst_164 = arith.constant dense<0.000000e+00> : vector<2x32xf32>
    %427 = tpu.matmul %426, %13, %cst_164 {dimension_numbers = #tpu.dot_dimension_numbers<[1], [0], [0], [1], [0, 0, 1, 1], [], []>} : vector<2x32xf32>, vector<32x32xf32>, vector<2x32xf32> -> vector<2x32xf32>
    %428 = vector.broadcast %14 : vector<1x32xf32> to vector<2x32xf32>
    %429 = arith.addf %427, %428 : vector<2x32xf32>
    %cst_165 = arith.constant 0.000000e+00 : f32
    %430 = vector.broadcast %cst_165 : f32 to vector<2x32xf32>
    %431 = arith.maximumf %429, %430 : vector<2x32xf32>
    %cst_166 = arith.constant dense<0.000000e+00> : vector<2x384xf32>
    %432 = tpu.matmul %431, %16, %cst_166 {dimension_numbers = #tpu.dot_dimension_numbers<[1], [0], [0], [1], [0, 0, 1, 1], [], []>} : vector<2x32xf32>, vector<32x384xf32>, vector<2x384xf32> -> vector<2x384xf32>
    %433 = vector.broadcast %24 : vector<1x384xf32> to vector<2x384xf32>
    %434 = arith.addf %432, %433 : vector<2x384xf32>
    %cst_167 = arith.constant dense<0.000000e+00> : vector<2x384xf32>
    %435 = tpu.matmul %339, %20, %cst_167 {dimension_numbers = #tpu.dot_dimension_numbers<[1], [0], [0], [1], [0, 0, 1, 1], [], []>} : vector<2x128xf32>, vector<128x384xf32>, vector<2x384xf32> -> vector<2x384xf32>
    %436 = vector.broadcast %28 : vector<1x384xf32> to vector<2x384xf32>
    %437 = arith.addf %435, %436 : vector<2x384xf32>
    %438 = vector.extract_strided_slice %434 {offsets = [0, 0], sizes = [2, 128], strides = [1, 1]} : vector<2x384xf32> to vector<2x128xf32>
    %439 = vector.extract_strided_slice %437 {offsets = [0, 0], sizes = [2, 128], strides = [1, 1]} : vector<2x384xf32> to vector<2x128xf32>
    %440 = arith.addf %438, %439 : vector<2x128xf32>
    %441 = arith.negf %440 : vector<2x128xf32>
    %442 = math.exp %441 : vector<2x128xf32>
    %cst_168 = arith.constant 1.000000e+00 : f32
    %443 = vector.broadcast %cst_168 : f32 to vector<2x128xf32>
    %444 = arith.addf %443, %442 : vector<2x128xf32>
    %445 = arith.divf %443, %444 : vector<2x128xf32>
    %446 = vector.extract_strided_slice %434 {offsets = [0, 128], sizes = [2, 128], strides = [1, 1]} : vector<2x384xf32> to vector<2x128xf32>
    %447 = vector.extract_strided_slice %437 {offsets = [0, 128], sizes = [2, 128], strides = [1, 1]} : vector<2x384xf32> to vector<2x128xf32>
    %448 = arith.addf %446, %447 : vector<2x128xf32>
    %449 = arith.negf %448 : vector<2x128xf32>
    %450 = math.exp %449 : vector<2x128xf32>
    %cst_169 = arith.constant 1.000000e+00 : f32
    %451 = vector.broadcast %cst_169 : f32 to vector<2x128xf32>
    %452 = arith.addf %451, %450 : vector<2x128xf32>
    %453 = arith.divf %451, %452 : vector<2x128xf32>
    %454 = vector.extract_strided_slice %434 {offsets = [0, 256], sizes = [2, 128], strides = [1, 1]} : vector<2x384xf32> to vector<2x128xf32>
    %455 = vector.extract_strided_slice %437 {offsets = [0, 256], sizes = [2, 128], strides = [1, 1]} : vector<2x384xf32> to vector<2x128xf32>
    %456 = arith.mulf %445, %455 : vector<2x128xf32>
    %457 = arith.addf %454, %456 : vector<2x128xf32>
    %458 = math.tanh %457 : vector<2x128xf32>
    %cst_170 = arith.constant 1.000000e+00 : f32
    %459 = vector.broadcast %cst_170 : f32 to vector<2x128xf32>
    %460 = arith.subf %459, %453 : vector<2x128xf32>
    %461 = arith.mulf %460, %458 : vector<2x128xf32>
    %462 = arith.mulf %453, %339 : vector<2x128xf32>
    %463 = arith.addf %461, %462 : vector<2x128xf32>
    %c3 = arith.constant 3 : index
    %c0_171 = arith.constant 0 : index
    %c0_172 = arith.constant 0 : index
    %464 = vector.load %arg17[%c3, %c0_171, %c0_172] : memref<8x2x128xf32, #tpu.memory_space<vmem>>, vector<1x2x128xf32>
    %465 = vector.shape_cast %464 : vector<1x2x128xf32> to vector<2x128xf32>
    %466 = vector.shape_cast %463 : vector<2x128xf32> to vector<1x2x128xf32>
    tpu.vector_store %arg17[%c3, %c0_171, %c0_172], %466 {strides = array<i32>} : memref<8x2x128xf32, #tpu.memory_space<vmem>>, vector<1x2x128xf32>,
    %467 = vector.extract_strided_slice %4 {offsets = [0, 4, 0], sizes = [2, 1, 5], strides = [1, 1, 1]} : vector<2x8x5xf32> to vector<2x1x5xf32>
    %468 = vector.shape_cast %467 : vector<2x1x5xf32> to vector<2x5xf32>
    %cst_173 = arith.constant dense<0.000000e+00> : vector<2x32xf32>
    %469 = tpu.matmul %468, %5, %cst_173 {dimension_numbers = #tpu.dot_dimension_numbers<[1], [0], [0], [1], [0, 0, 1, 1], [], []>} : vector<2x5xf32>, vector<5x32xf32>, vector<2x32xf32> -> vector<2x32xf32>
    %470 = vector.broadcast %6 : vector<1x32xf32> to vector<2x32xf32>
    %471 = arith.addf %469, %470 : vector<2x32xf32>
    %cst_174 = arith.constant 0.000000e+00 : f32
    %472 = vector.broadcast %cst_174 : f32 to vector<2x32xf32>
    %473 = arith.maximumf %471, %472 : vector<2x32xf32>
    %cst_175 = arith.constant dense<0.000000e+00> : vector<2x32xf32>
    %474 = tpu.matmul %473, %7, %cst_175 {dimension_numbers = #tpu.dot_dimension_numbers<[1], [0], [0], [1], [0, 0, 1, 1], [], []>} : vector<2x32xf32>, vector<32x32xf32>, vector<2x32xf32> -> vector<2x32xf32>
    %475 = vector.broadcast %8 : vector<1x32xf32> to vector<2x32xf32>
    %476 = arith.addf %474, %475 : vector<2x32xf32>
    %cst_176 = arith.constant 0.000000e+00 : f32
    %477 = vector.broadcast %cst_176 : f32 to vector<2x32xf32>
    %478 = arith.maximumf %476, %477 : vector<2x32xf32>
    %cst_177 = arith.constant dense<0.000000e+00> : vector<2x32xf32>
    %479 = tpu.matmul %478, %9, %cst_177 {dimension_numbers = #tpu.dot_dimension_numbers<[1], [0], [0], [1], [0, 0, 1, 1], [], []>} : vector<2x32xf32>, vector<32x32xf32>, vector<2x32xf32> -> vector<2x32xf32>
    %480 = vector.broadcast %10 : vector<1x32xf32> to vector<2x32xf32>
    %481 = arith.addf %479, %480 : vector<2x32xf32>
    %cst_178 = arith.constant 0.000000e+00 : f32
    %482 = vector.broadcast %cst_178 : f32 to vector<2x32xf32>
    %483 = arith.maximumf %481, %482 : vector<2x32xf32>
    %cst_179 = arith.constant dense<0.000000e+00> : vector<2x32xf32>
    %484 = tpu.matmul %483, %11, %cst_179 {dimension_numbers = #tpu.dot_dimension_numbers<[1], [0], [0], [1], [0, 0, 1, 1], [], []>} : vector<2x32xf32>, vector<32x32xf32>, vector<2x32xf32> -> vector<2x32xf32>
    %485 = vector.broadcast %12 : vector<1x32xf32> to vector<2x32xf32>
    %486 = arith.addf %484, %485 : vector<2x32xf32>
    %cst_180 = arith.constant 0.000000e+00 : f32
    %487 = vector.broadcast %cst_180 : f32 to vector<2x32xf32>
    %488 = arith.maximumf %486, %487 : vector<2x32xf32>
    %cst_181 = arith.constant dense<0.000000e+00> : vector<2x32xf32>
    %489 = tpu.matmul %488, %13, %cst_181 {dimension_numbers = #tpu.dot_dimension_numbers<[1], [0], [0], [1], [0, 0, 1, 1], [], []>} : vector<2x32xf32>, vector<32x32xf32>, vector<2x32xf32> -> vector<2x32xf32>
    %490 = vector.broadcast %14 : vector<1x32xf32> to vector<2x32xf32>
    %491 = arith.addf %489, %490 : vector<2x32xf32>
    %cst_182 = arith.constant 0.000000e+00 : f32
    %492 = vector.broadcast %cst_182 : f32 to vector<2x32xf32>
    %493 = arith.maximumf %491, %492 : vector<2x32xf32>
    %cst_183 = arith.constant dense<0.000000e+00> : vector<2x384xf32>
    %494 = tpu.matmul %493, %18, %cst_183 {dimension_numbers = #tpu.dot_dimension_numbers<[1], [0], [0], [1], [0, 0, 1, 1], [], []>} : vector<2x32xf32>, vector<32x384xf32>, vector<2x384xf32> -> vector<2x384xf32>
    %495 = vector.broadcast %26 : vector<1x384xf32> to vector<2x384xf32>
    %496 = arith.addf %494, %495 : vector<2x384xf32>
    %cst_184 = arith.constant dense<0.000000e+00> : vector<2x384xf32>
    %497 = tpu.matmul %401, %22, %cst_184 {dimension_numbers = #tpu.dot_dimension_numbers<[1], [0], [0], [1], [0, 0, 1, 1], [], []>} : vector<2x128xf32>, vector<128x384xf32>, vector<2x384xf32> -> vector<2x384xf32>
    %498 = vector.broadcast %30 : vector<1x384xf32> to vector<2x384xf32>
    %499 = arith.addf %497, %498 : vector<2x384xf32>
    %500 = vector.extract_strided_slice %496 {offsets = [0, 0], sizes = [2, 128], strides = [1, 1]} : vector<2x384xf32> to vector<2x128xf32>
    %501 = vector.extract_strided_slice %499 {offsets = [0, 0], sizes = [2, 128], strides = [1, 1]} : vector<2x384xf32> to vector<2x128xf32>
    %502 = arith.addf %500, %501 : vector<2x128xf32>
    %503 = arith.negf %502 : vector<2x128xf32>
    %504 = math.exp %503 : vector<2x128xf32>
    %cst_185 = arith.constant 1.000000e+00 : f32
    %505 = vector.broadcast %cst_185 : f32 to vector<2x128xf32>
    %506 = arith.addf %505, %504 : vector<2x128xf32>
    %507 = arith.divf %505, %506 : vector<2x128xf32>
    %508 = vector.extract_strided_slice %496 {offsets = [0, 128], sizes = [2, 128], strides = [1, 1]} : vector<2x384xf32> to vector<2x128xf32>
    %509 = vector.extract_strided_slice %499 {offsets = [0, 128], sizes = [2, 128], strides = [1, 1]} : vector<2x384xf32> to vector<2x128xf32>
    %510 = arith.addf %508, %509 : vector<2x128xf32>
    %511 = arith.negf %510 : vector<2x128xf32>
    %512 = math.exp %511 : vector<2x128xf32>
    %cst_186 = arith.constant 1.000000e+00 : f32
    %513 = vector.broadcast %cst_186 : f32 to vector<2x128xf32>
    %514 = arith.addf %513, %512 : vector<2x128xf32>
    %515 = arith.divf %513, %514 : vector<2x128xf32>
    %516 = vector.extract_strided_slice %496 {offsets = [0, 256], sizes = [2, 128], strides = [1, 1]} : vector<2x384xf32> to vector<2x128xf32>
    %517 = vector.extract_strided_slice %499 {offsets = [0, 256], sizes = [2, 128], strides = [1, 1]} : vector<2x384xf32> to vector<2x128xf32>
    %518 = arith.mulf %507, %517 : vector<2x128xf32>
    %519 = arith.addf %516, %518 : vector<2x128xf32>
    %520 = math.tanh %519 : vector<2x128xf32>
    %cst_187 = arith.constant 1.000000e+00 : f32
    %521 = vector.broadcast %cst_187 : f32 to vector<2x128xf32>
    %522 = arith.subf %521, %515 : vector<2x128xf32>
    %523 = arith.mulf %522, %520 : vector<2x128xf32>
    %524 = arith.mulf %515, %401 : vector<2x128xf32>
    %525 = arith.addf %523, %524 : vector<2x128xf32>
    %c4 = arith.constant 4 : index
    %c0_188 = arith.constant 0 : index
    %c0_189 = arith.constant 0 : index
    %526 = vector.load %arg18[%c4, %c0_188, %c0_189] : memref<8x2x128xf32, #tpu.memory_space<vmem>>, vector<1x2x128xf32>
    %527 = vector.shape_cast %526 : vector<1x2x128xf32> to vector<2x128xf32>
    %528 = vector.shape_cast %525 : vector<2x128xf32> to vector<1x2x128xf32>
    tpu.vector_store %arg18[%c4, %c0_188, %c0_189], %528 {strides = array<i32>} : memref<8x2x128xf32, #tpu.memory_space<vmem>>, vector<1x2x128xf32>,
    %529 = vector.extract_strided_slice %3 {offsets = [0, 4, 0], sizes = [2, 1, 5], strides = [1, 1, 1]} : vector<2x8x5xf32> to vector<2x1x5xf32>
    %530 = vector.shape_cast %529 : vector<2x1x5xf32> to vector<2x5xf32>
    %cst_190 = arith.constant dense<0.000000e+00> : vector<2x32xf32>
    %531 = tpu.matmul %530, %5, %cst_190 {dimension_numbers = #tpu.dot_dimension_numbers<[1], [0], [0], [1], [0, 0, 1, 1], [], []>} : vector<2x5xf32>, vector<5x32xf32>, vector<2x32xf32> -> vector<2x32xf32>
    %532 = vector.broadcast %6 : vector<1x32xf32> to vector<2x32xf32>
    %533 = arith.addf %531, %532 : vector<2x32xf32>
    %cst_191 = arith.constant 0.000000e+00 : f32
    %534 = vector.broadcast %cst_191 : f32 to vector<2x32xf32>
    %535 = arith.maximumf %533, %534 : vector<2x32xf32>
    %cst_192 = arith.constant dense<0.000000e+00> : vector<2x32xf32>
    %536 = tpu.matmul %535, %7, %cst_192 {dimension_numbers = #tpu.dot_dimension_numbers<[1], [0], [0], [1], [0, 0, 1, 1], [], []>} : vector<2x32xf32>, vector<32x32xf32>, vector<2x32xf32> -> vector<2x32xf32>
    %537 = vector.broadcast %8 : vector<1x32xf32> to vector<2x32xf32>
    %538 = arith.addf %536, %537 : vector<2x32xf32>
    %cst_193 = arith.constant 0.000000e+00 : f32
    %539 = vector.broadcast %cst_193 : f32 to vector<2x32xf32>
    %540 = arith.maximumf %538, %539 : vector<2x32xf32>
    %cst_194 = arith.constant dense<0.000000e+00> : vector<2x32xf32>
    %541 = tpu.matmul %540, %9, %cst_194 {dimension_numbers = #tpu.dot_dimension_numbers<[1], [0], [0], [1], [0, 0, 1, 1], [], []>} : vector<2x32xf32>, vector<32x32xf32>, vector<2x32xf32> -> vector<2x32xf32>
    %542 = vector.broadcast %10 : vector<1x32xf32> to vector<2x32xf32>
    %543 = arith.addf %541, %542 : vector<2x32xf32>
    %cst_195 = arith.constant 0.000000e+00 : f32
    %544 = vector.broadcast %cst_195 : f32 to vector<2x32xf32>
    %545 = arith.maximumf %543, %544 : vector<2x32xf32>
    %cst_196 = arith.constant dense<0.000000e+00> : vector<2x32xf32>
    %546 = tpu.matmul %545, %11, %cst_196 {dimension_numbers = #tpu.dot_dimension_numbers<[1], [0], [0], [1], [0, 0, 1, 1], [], []>} : vector<2x32xf32>, vector<32x32xf32>, vector<2x32xf32> -> vector<2x32xf32>
    %547 = vector.broadcast %12 : vector<1x32xf32> to vector<2x32xf32>
    %548 = arith.addf %546, %547 : vector<2x32xf32>
    %cst_197 = arith.constant 0.000000e+00 : f32
    %549 = vector.broadcast %cst_197 : f32 to vector<2x32xf32>
    %550 = arith.maximumf %548, %549 : vector<2x32xf32>
    %cst_198 = arith.constant dense<0.000000e+00> : vector<2x32xf32>
    %551 = tpu.matmul %550, %13, %cst_198 {dimension_numbers = #tpu.dot_dimension_numbers<[1], [0], [0], [1], [0, 0, 1, 1], [], []>} : vector<2x32xf32>, vector<32x32xf32>, vector<2x32xf32> -> vector<2x32xf32>
    %552 = vector.broadcast %14 : vector<1x32xf32> to vector<2x32xf32>
    %553 = arith.addf %551, %552 : vector<2x32xf32>
    %cst_199 = arith.constant 0.000000e+00 : f32
    %554 = vector.broadcast %cst_199 : f32 to vector<2x32xf32>
    %555 = arith.maximumf %553, %554 : vector<2x32xf32>
    %cst_200 = arith.constant dense<0.000000e+00> : vector<2x384xf32>
    %556 = tpu.matmul %555, %16, %cst_200 {dimension_numbers = #tpu.dot_dimension_numbers<[1], [0], [0], [1], [0, 0, 1, 1], [], []>} : vector<2x32xf32>, vector<32x384xf32>, vector<2x384xf32> -> vector<2x384xf32>
    %557 = vector.broadcast %24 : vector<1x384xf32> to vector<2x384xf32>
    %558 = arith.addf %556, %557 : vector<2x384xf32>
    %cst_201 = arith.constant dense<0.000000e+00> : vector<2x384xf32>
    %559 = tpu.matmul %463, %20, %cst_201 {dimension_numbers = #tpu.dot_dimension_numbers<[1], [0], [0], [1], [0, 0, 1, 1], [], []>} : vector<2x128xf32>, vector<128x384xf32>, vector<2x384xf32> -> vector<2x384xf32>
    %560 = vector.broadcast %28 : vector<1x384xf32> to vector<2x384xf32>
    %561 = arith.addf %559, %560 : vector<2x384xf32>
    %562 = vector.extract_strided_slice %558 {offsets = [0, 0], sizes = [2, 128], strides = [1, 1]} : vector<2x384xf32> to vector<2x128xf32>
    %563 = vector.extract_strided_slice %561 {offsets = [0, 0], sizes = [2, 128], strides = [1, 1]} : vector<2x384xf32> to vector<2x128xf32>
    %564 = arith.addf %562, %563 : vector<2x128xf32>
    %565 = arith.negf %564 : vector<2x128xf32>
    %566 = math.exp %565 : vector<2x128xf32>
    %cst_202 = arith.constant 1.000000e+00 : f32
    %567 = vector.broadcast %cst_202 : f32 to vector<2x128xf32>
    %568 = arith.addf %567, %566 : vector<2x128xf32>
    %569 = arith.divf %567, %568 : vector<2x128xf32>
    %570 = vector.extract_strided_slice %558 {offsets = [0, 128], sizes = [2, 128], strides = [1, 1]} : vector<2x384xf32> to vector<2x128xf32>
    %571 = vector.extract_strided_slice %561 {offsets = [0, 128], sizes = [2, 128], strides = [1, 1]} : vector<2x384xf32> to vector<2x128xf32>
    %572 = arith.addf %570, %571 : vector<2x128xf32>
    %573 = arith.negf %572 : vector<2x128xf32>
    %574 = math.exp %573 : vector<2x128xf32>
    %cst_203 = arith.constant 1.000000e+00 : f32
    %575 = vector.broadcast %cst_203 : f32 to vector<2x128xf32>
    %576 = arith.addf %575, %574 : vector<2x128xf32>
    %577 = arith.divf %575, %576 : vector<2x128xf32>
    %578 = vector.extract_strided_slice %558 {offsets = [0, 256], sizes = [2, 128], strides = [1, 1]} : vector<2x384xf32> to vector<2x128xf32>
    %579 = vector.extract_strided_slice %561 {offsets = [0, 256], sizes = [2, 128], strides = [1, 1]} : vector<2x384xf32> to vector<2x128xf32>
    %580 = arith.mulf %569, %579 : vector<2x128xf32>
    %581 = arith.addf %578, %580 : vector<2x128xf32>
    %582 = math.tanh %581 : vector<2x128xf32>
    %cst_204 = arith.constant 1.000000e+00 : f32
    %583 = vector.broadcast %cst_204 : f32 to vector<2x128xf32>
    %584 = arith.subf %583, %577 : vector<2x128xf32>
    %585 = arith.mulf %584, %582 : vector<2x128xf32>
    %586 = arith.mulf %577, %463 : vector<2x128xf32>
    %587 = arith.addf %585, %586 : vector<2x128xf32>
    %c4_205 = arith.constant 4 : index
    %c0_206 = arith.constant 0 : index
    %c0_207 = arith.constant 0 : index
    %588 = vector.load %arg17[%c4_205, %c0_206, %c0_207] : memref<8x2x128xf32, #tpu.memory_space<vmem>>, vector<1x2x128xf32>
    %589 = vector.shape_cast %588 : vector<1x2x128xf32> to vector<2x128xf32>
    %590 = vector.shape_cast %587 : vector<2x128xf32> to vector<1x2x128xf32>
    tpu.vector_store %arg17[%c4_205, %c0_206, %c0_207], %590 {strides = array<i32>} : memref<8x2x128xf32, #tpu.memory_space<vmem>>, vector<1x2x128xf32>,
    %591 = vector.extract_strided_slice %4 {offsets = [0, 3, 0], sizes = [2, 1, 5], strides = [1, 1, 1]} : vector<2x8x5xf32> to vector<2x1x5xf32>
    %592 = vector.shape_cast %591 : vector<2x1x5xf32> to vector<2x5xf32>
    %cst_208 = arith.constant dense<0.000000e+00> : vector<2x32xf32>
    %593 = tpu.matmul %592, %5, %cst_208 {dimension_numbers = #tpu.dot_dimension_numbers<[1], [0], [0], [1], [0, 0, 1, 1], [], []>} : vector<2x5xf32>, vector<5x32xf32>, vector<2x32xf32> -> vector<2x32xf32>
    %594 = vector.broadcast %6 : vector<1x32xf32> to vector<2x32xf32>
    %595 = arith.addf %593, %594 : vector<2x32xf32>
    %cst_209 = arith.constant 0.000000e+00 : f32
    %596 = vector.broadcast %cst_209 : f32 to vector<2x32xf32>
    %597 = arith.maximumf %595, %596 : vector<2x32xf32>
    %cst_210 = arith.constant dense<0.000000e+00> : vector<2x32xf32>
    %598 = tpu.matmul %597, %7, %cst_210 {dimension_numbers = #tpu.dot_dimension_numbers<[1], [0], [0], [1], [0, 0, 1, 1], [], []>} : vector<2x32xf32>, vector<32x32xf32>, vector<2x32xf32> -> vector<2x32xf32>
    %599 = vector.broadcast %8 : vector<1x32xf32> to vector<2x32xf32>
    %600 = arith.addf %598, %599 : vector<2x32xf32>
    %cst_211 = arith.constant 0.000000e+00 : f32
    %601 = vector.broadcast %cst_211 : f32 to vector<2x32xf32>
    %602 = arith.maximumf %600, %601 : vector<2x32xf32>
    %cst_212 = arith.constant dense<0.000000e+00> : vector<2x32xf32>
    %603 = tpu.matmul %602, %9, %cst_212 {dimension_numbers = #tpu.dot_dimension_numbers<[1], [0], [0], [1], [0, 0, 1, 1], [], []>} : vector<2x32xf32>, vector<32x32xf32>, vector<2x32xf32> -> vector<2x32xf32>
    %604 = vector.broadcast %10 : vector<1x32xf32> to vector<2x32xf32>
    %605 = arith.addf %603, %604 : vector<2x32xf32>
    %cst_213 = arith.constant 0.000000e+00 : f32
    %606 = vector.broadcast %cst_213 : f32 to vector<2x32xf32>
    %607 = arith.maximumf %605, %606 : vector<2x32xf32>
    %cst_214 = arith.constant dense<0.000000e+00> : vector<2x32xf32>
    %608 = tpu.matmul %607, %11, %cst_214 {dimension_numbers = #tpu.dot_dimension_numbers<[1], [0], [0], [1], [0, 0, 1, 1], [], []>} : vector<2x32xf32>, vector<32x32xf32>, vector<2x32xf32> -> vector<2x32xf32>
    %609 = vector.broadcast %12 : vector<1x32xf32> to vector<2x32xf32>
    %610 = arith.addf %608, %609 : vector<2x32xf32>
    %cst_215 = arith.constant 0.000000e+00 : f32
    %611 = vector.broadcast %cst_215 : f32 to vector<2x32xf32>
    %612 = arith.maximumf %610, %611 : vector<2x32xf32>
    %cst_216 = arith.constant dense<0.000000e+00> : vector<2x32xf32>
    %613 = tpu.matmul %612, %13, %cst_216 {dimension_numbers = #tpu.dot_dimension_numbers<[1], [0], [0], [1], [0, 0, 1, 1], [], []>} : vector<2x32xf32>, vector<32x32xf32>, vector<2x32xf32> -> vector<2x32xf32>
    %614 = vector.broadcast %14 : vector<1x32xf32> to vector<2x32xf32>
    %615 = arith.addf %613, %614 : vector<2x32xf32>
    %cst_217 = arith.constant 0.000000e+00 : f32
    %616 = vector.broadcast %cst_217 : f32 to vector<2x32xf32>
    %617 = arith.maximumf %615, %616 : vector<2x32xf32>
    %cst_218 = arith.constant dense<0.000000e+00> : vector<2x384xf32>
    %618 = tpu.matmul %617, %18, %cst_218 {dimension_numbers = #tpu.dot_dimension_numbers<[1], [0], [0], [1], [0, 0, 1, 1], [], []>} : vector<2x32xf32>, vector<32x384xf32>, vector<2x384xf32> -> vector<2x384xf32>
    %619 = vector.broadcast %26 : vector<1x384xf32> to vector<2x384xf32>
    %620 = arith.addf %618, %619 : vector<2x384xf32>
    %cst_219 = arith.constant dense<0.000000e+00> : vector<2x384xf32>
    %621 = tpu.matmul %525, %22, %cst_219 {dimension_numbers = #tpu.dot_dimension_numbers<[1], [0], [0], [1], [0, 0, 1, 1], [], []>} : vector<2x128xf32>, vector<128x384xf32>, vector<2x384xf32> -> vector<2x384xf32>
    %622 = vector.broadcast %30 : vector<1x384xf32> to vector<2x384xf32>
    %623 = arith.addf %621, %622 : vector<2x384xf32>
    %624 = vector.extract_strided_slice %620 {offsets = [0, 0], sizes = [2, 128], strides = [1, 1]} : vector<2x384xf32> to vector<2x128xf32>
    %625 = vector.extract_strided_slice %623 {offsets = [0, 0], sizes = [2, 128], strides = [1, 1]} : vector<2x384xf32> to vector<2x128xf32>
    %626 = arith.addf %624, %625 : vector<2x128xf32>
    %627 = arith.negf %626 : vector<2x128xf32>
    %628 = math.exp %627 : vector<2x128xf32>
    %cst_220 = arith.constant 1.000000e+00 : f32
    %629 = vector.broadcast %cst_220 : f32 to vector<2x128xf32>
    %630 = arith.addf %629, %628 : vector<2x128xf32>
    %631 = arith.divf %629, %630 : vector<2x128xf32>
    %632 = vector.extract_strided_slice %620 {offsets = [0, 128], sizes = [2, 128], strides = [1, 1]} : vector<2x384xf32> to vector<2x128xf32>
    %633 = vector.extract_strided_slice %623 {offsets = [0, 128], sizes = [2, 128], strides = [1, 1]} : vector<2x384xf32> to vector<2x128xf32>
    %634 = arith.addf %632, %633 : vector<2x128xf32>
    %635 = arith.negf %634 : vector<2x128xf32>
    %636 = math.exp %635 : vector<2x128xf32>
    %cst_221 = arith.constant 1.000000e+00 : f32
    %637 = vector.broadcast %cst_221 : f32 to vector<2x128xf32>
    %638 = arith.addf %637, %636 : vector<2x128xf32>
    %639 = arith.divf %637, %638 : vector<2x128xf32>
    %640 = vector.extract_strided_slice %620 {offsets = [0, 256], sizes = [2, 128], strides = [1, 1]} : vector<2x384xf32> to vector<2x128xf32>
    %641 = vector.extract_strided_slice %623 {offsets = [0, 256], sizes = [2, 128], strides = [1, 1]} : vector<2x384xf32> to vector<2x128xf32>
    %642 = arith.mulf %631, %641 : vector<2x128xf32>
    %643 = arith.addf %640, %642 : vector<2x128xf32>
    %644 = math.tanh %643 : vector<2x128xf32>
    %cst_222 = arith.constant 1.000000e+00 : f32
    %645 = vector.broadcast %cst_222 : f32 to vector<2x128xf32>
    %646 = arith.subf %645, %639 : vector<2x128xf32>
    %647 = arith.mulf %646, %644 : vector<2x128xf32>
    %648 = arith.mulf %639, %525 : vector<2x128xf32>
    %649 = arith.addf %647, %648 : vector<2x128xf32>
    %c3_223 = arith.constant 3 : index
    %c0_224 = arith.constant 0 : index
    %c0_225 = arith.constant 0 : index
    %650 = vector.load %arg18[%c3_223, %c0_224, %c0_225] : memref<8x2x128xf32, #tpu.memory_space<vmem>>, vector<1x2x128xf32>
    %651 = vector.shape_cast %650 : vector<1x2x128xf32> to vector<2x128xf32>
    %652 = vector.shape_cast %649 : vector<2x128xf32> to vector<1x2x128xf32>
    tpu.vector_store %arg18[%c3_223, %c0_224, %c0_225], %652 {strides = array<i32>} : memref<8x2x128xf32, #tpu.memory_space<vmem>>, vector<1x2x128xf32>,
    %653 = vector.extract_strided_slice %3 {offsets = [0, 5, 0], sizes = [2, 1, 5], strides = [1, 1, 1]} : vector<2x8x5xf32> to vector<2x1x5xf32>
    %654 = vector.shape_cast %653 : vector<2x1x5xf32> to vector<2x5xf32>
    %cst_226 = arith.constant dense<0.000000e+00> : vector<2x32xf32>
    %655 = tpu.matmul %654, %5, %cst_226 {dimension_numbers = #tpu.dot_dimension_numbers<[1], [0], [0], [1], [0, 0, 1, 1], [], []>} : vector<2x5xf32>, vector<5x32xf32>, vector<2x32xf32> -> vector<2x32xf32>
    %656 = vector.broadcast %6 : vector<1x32xf32> to vector<2x32xf32>
    %657 = arith.addf %655, %656 : vector<2x32xf32>
    %cst_227 = arith.constant 0.000000e+00 : f32
    %658 = vector.broadcast %cst_227 : f32 to vector<2x32xf32>
    %659 = arith.maximumf %657, %658 : vector<2x32xf32>
    %cst_228 = arith.constant dense<0.000000e+00> : vector<2x32xf32>
    %660 = tpu.matmul %659, %7, %cst_228 {dimension_numbers = #tpu.dot_dimension_numbers<[1], [0], [0], [1], [0, 0, 1, 1], [], []>} : vector<2x32xf32>, vector<32x32xf32>, vector<2x32xf32> -> vector<2x32xf32>
    %661 = vector.broadcast %8 : vector<1x32xf32> to vector<2x32xf32>
    %662 = arith.addf %660, %661 : vector<2x32xf32>
    %cst_229 = arith.constant 0.000000e+00 : f32
    %663 = vector.broadcast %cst_229 : f32 to vector<2x32xf32>
    %664 = arith.maximumf %662, %663 : vector<2x32xf32>
    %cst_230 = arith.constant dense<0.000000e+00> : vector<2x32xf32>
    %665 = tpu.matmul %664, %9, %cst_230 {dimension_numbers = #tpu.dot_dimension_numbers<[1], [0], [0], [1], [0, 0, 1, 1], [], []>} : vector<2x32xf32>, vector<32x32xf32>, vector<2x32xf32> -> vector<2x32xf32>
    %666 = vector.broadcast %10 : vector<1x32xf32> to vector<2x32xf32>
    %667 = arith.addf %665, %666 : vector<2x32xf32>
    %cst_231 = arith.constant 0.000000e+00 : f32
    %668 = vector.broadcast %cst_231 : f32 to vector<2x32xf32>
    %669 = arith.maximumf %667, %668 : vector<2x32xf32>
    %cst_232 = arith.constant dense<0.000000e+00> : vector<2x32xf32>
    %670 = tpu.matmul %669, %11, %cst_232 {dimension_numbers = #tpu.dot_dimension_numbers<[1], [0], [0], [1], [0, 0, 1, 1], [], []>} : vector<2x32xf32>, vector<32x32xf32>, vector<2x32xf32> -> vector<2x32xf32>
    %671 = vector.broadcast %12 : vector<1x32xf32> to vector<2x32xf32>
    %672 = arith.addf %670, %671 : vector<2x32xf32>
    %cst_233 = arith.constant 0.000000e+00 : f32
    %673 = vector.broadcast %cst_233 : f32 to vector<2x32xf32>
    %674 = arith.maximumf %672, %673 : vector<2x32xf32>
    %cst_234 = arith.constant dense<0.000000e+00> : vector<2x32xf32>
    %675 = tpu.matmul %674, %13, %cst_234 {dimension_numbers = #tpu.dot_dimension_numbers<[1], [0], [0], [1], [0, 0, 1, 1], [], []>} : vector<2x32xf32>, vector<32x32xf32>, vector<2x32xf32> -> vector<2x32xf32>
    %676 = vector.broadcast %14 : vector<1x32xf32> to vector<2x32xf32>
    %677 = arith.addf %675, %676 : vector<2x32xf32>
    %cst_235 = arith.constant 0.000000e+00 : f32
    %678 = vector.broadcast %cst_235 : f32 to vector<2x32xf32>
    %679 = arith.maximumf %677, %678 : vector<2x32xf32>
    %cst_236 = arith.constant dense<0.000000e+00> : vector<2x384xf32>
    %680 = tpu.matmul %679, %16, %cst_236 {dimension_numbers = #tpu.dot_dimension_numbers<[1], [0], [0], [1], [0, 0, 1, 1], [], []>} : vector<2x32xf32>, vector<32x384xf32>, vector<2x384xf32> -> vector<2x384xf32>
    %681 = vector.broadcast %24 : vector<1x384xf32> to vector<2x384xf32>
    %682 = arith.addf %680, %681 : vector<2x384xf32>
    %cst_237 = arith.constant dense<0.000000e+00> : vector<2x384xf32>
    %683 = tpu.matmul %587, %20, %cst_237 {dimension_numbers = #tpu.dot_dimension_numbers<[1], [0], [0], [1], [0, 0, 1, 1], [], []>} : vector<2x128xf32>, vector<128x384xf32>, vector<2x384xf32> -> vector<2x384xf32>
    %684 = vector.broadcast %28 : vector<1x384xf32> to vector<2x384xf32>
    %685 = arith.addf %683, %684 : vector<2x384xf32>
    %686 = vector.extract_strided_slice %682 {offsets = [0, 0], sizes = [2, 128], strides = [1, 1]} : vector<2x384xf32> to vector<2x128xf32>
    %687 = vector.extract_strided_slice %685 {offsets = [0, 0], sizes = [2, 128], strides = [1, 1]} : vector<2x384xf32> to vector<2x128xf32>
    %688 = arith.addf %686, %687 : vector<2x128xf32>
    %689 = arith.negf %688 : vector<2x128xf32>
    %690 = math.exp %689 : vector<2x128xf32>
    %cst_238 = arith.constant 1.000000e+00 : f32
    %691 = vector.broadcast %cst_238 : f32 to vector<2x128xf32>
    %692 = arith.addf %691, %690 : vector<2x128xf32>
    %693 = arith.divf %691, %692 : vector<2x128xf32>
    %694 = vector.extract_strided_slice %682 {offsets = [0, 128], sizes = [2, 128], strides = [1, 1]} : vector<2x384xf32> to vector<2x128xf32>
    %695 = vector.extract_strided_slice %685 {offsets = [0, 128], sizes = [2, 128], strides = [1, 1]} : vector<2x384xf32> to vector<2x128xf32>
    %696 = arith.addf %694, %695 : vector<2x128xf32>
    %697 = arith.negf %696 : vector<2x128xf32>
    %698 = math.exp %697 : vector<2x128xf32>
    %cst_239 = arith.constant 1.000000e+00 : f32
    %699 = vector.broadcast %cst_239 : f32 to vector<2x128xf32>
    %700 = arith.addf %699, %698 : vector<2x128xf32>
    %701 = arith.divf %699, %700 : vector<2x128xf32>
    %702 = vector.extract_strided_slice %682 {offsets = [0, 256], sizes = [2, 128], strides = [1, 1]} : vector<2x384xf32> to vector<2x128xf32>
    %703 = vector.extract_strided_slice %685 {offsets = [0, 256], sizes = [2, 128], strides = [1, 1]} : vector<2x384xf32> to vector<2x128xf32>
    %704 = arith.mulf %693, %703 : vector<2x128xf32>
    %705 = arith.addf %702, %704 : vector<2x128xf32>
    %706 = math.tanh %705 : vector<2x128xf32>
    %cst_240 = arith.constant 1.000000e+00 : f32
    %707 = vector.broadcast %cst_240 : f32 to vector<2x128xf32>
    %708 = arith.subf %707, %701 : vector<2x128xf32>
    %709 = arith.mulf %708, %706 : vector<2x128xf32>
    %710 = arith.mulf %701, %587 : vector<2x128xf32>
    %711 = arith.addf %709, %710 : vector<2x128xf32>
    %c5_241 = arith.constant 5 : index
    %c0_242 = arith.constant 0 : index
    %c0_243 = arith.constant 0 : index
    %712 = vector.load %arg17[%c5_241, %c0_242, %c0_243] : memref<8x2x128xf32, #tpu.memory_space<vmem>>, vector<1x2x128xf32>
    %713 = vector.shape_cast %712 : vector<1x2x128xf32> to vector<2x128xf32>
    %714 = vector.shape_cast %711 : vector<2x128xf32> to vector<1x2x128xf32>
    tpu.vector_store %arg17[%c5_241, %c0_242, %c0_243], %714 {strides = array<i32>} : memref<8x2x128xf32, #tpu.memory_space<vmem>>, vector<1x2x128xf32>,
    %715 = vector.extract_strided_slice %4 {offsets = [0, 2, 0], sizes = [2, 1, 5], strides = [1, 1, 1]} : vector<2x8x5xf32> to vector<2x1x5xf32>
    %716 = vector.shape_cast %715 : vector<2x1x5xf32> to vector<2x5xf32>
    %cst_244 = arith.constant dense<0.000000e+00> : vector<2x32xf32>
    %717 = tpu.matmul %716, %5, %cst_244 {dimension_numbers = #tpu.dot_dimension_numbers<[1], [0], [0], [1], [0, 0, 1, 1], [], []>} : vector<2x5xf32>, vector<5x32xf32>, vector<2x32xf32> -> vector<2x32xf32>
    %718 = vector.broadcast %6 : vector<1x32xf32> to vector<2x32xf32>
    %719 = arith.addf %717, %718 : vector<2x32xf32>
    %cst_245 = arith.constant 0.000000e+00 : f32
    %720 = vector.broadcast %cst_245 : f32 to vector<2x32xf32>
    %721 = arith.maximumf %719, %720 : vector<2x32xf32>
    %cst_246 = arith.constant dense<0.000000e+00> : vector<2x32xf32>
    %722 = tpu.matmul %721, %7, %cst_246 {dimension_numbers = #tpu.dot_dimension_numbers<[1], [0], [0], [1], [0, 0, 1, 1], [], []>} : vector<2x32xf32>, vector<32x32xf32>, vector<2x32xf32> -> vector<2x32xf32>
    %723 = vector.broadcast %8 : vector<1x32xf32> to vector<2x32xf32>
    %724 = arith.addf %722, %723 : vector<2x32xf32>
    %cst_247 = arith.constant 0.000000e+00 : f32
    %725 = vector.broadcast %cst_247 : f32 to vector<2x32xf32>
    %726 = arith.maximumf %724, %725 : vector<2x32xf32>
    %cst_248 = arith.constant dense<0.000000e+00> : vector<2x32xf32>
    %727 = tpu.matmul %726, %9, %cst_248 {dimension_numbers = #tpu.dot_dimension_numbers<[1], [0], [0], [1], [0, 0, 1, 1], [], []>} : vector<2x32xf32>, vector<32x32xf32>, vector<2x32xf32> -> vector<2x32xf32>
    %728 = vector.broadcast %10 : vector<1x32xf32> to vector<2x32xf32>
    %729 = arith.addf %727, %728 : vector<2x32xf32>
    %cst_249 = arith.constant 0.000000e+00 : f32
    %730 = vector.broadcast %cst_249 : f32 to vector<2x32xf32>
    %731 = arith.maximumf %729, %730 : vector<2x32xf32>
    %cst_250 = arith.constant dense<0.000000e+00> : vector<2x32xf32>
    %732 = tpu.matmul %731, %11, %cst_250 {dimension_numbers = #tpu.dot_dimension_numbers<[1], [0], [0], [1], [0, 0, 1, 1], [], []>} : vector<2x32xf32>, vector<32x32xf32>, vector<2x32xf32> -> vector<2x32xf32>
    %733 = vector.broadcast %12 : vector<1x32xf32> to vector<2x32xf32>
    %734 = arith.addf %732, %733 : vector<2x32xf32>
    %cst_251 = arith.constant 0.000000e+00 : f32
    %735 = vector.broadcast %cst_251 : f32 to vector<2x32xf32>
    %736 = arith.maximumf %734, %735 : vector<2x32xf32>
    %cst_252 = arith.constant dense<0.000000e+00> : vector<2x32xf32>
    %737 = tpu.matmul %736, %13, %cst_252 {dimension_numbers = #tpu.dot_dimension_numbers<[1], [0], [0], [1], [0, 0, 1, 1], [], []>} : vector<2x32xf32>, vector<32x32xf32>, vector<2x32xf32> -> vector<2x32xf32>
    %738 = vector.broadcast %14 : vector<1x32xf32> to vector<2x32xf32>
    %739 = arith.addf %737, %738 : vector<2x32xf32>
    %cst_253 = arith.constant 0.000000e+00 : f32
    %740 = vector.broadcast %cst_253 : f32 to vector<2x32xf32>
    %741 = arith.maximumf %739, %740 : vector<2x32xf32>
    %cst_254 = arith.constant dense<0.000000e+00> : vector<2x384xf32>
    %742 = tpu.matmul %741, %18, %cst_254 {dimension_numbers = #tpu.dot_dimension_numbers<[1], [0], [0], [1], [0, 0, 1, 1], [], []>} : vector<2x32xf32>, vector<32x384xf32>, vector<2x384xf32> -> vector<2x384xf32>
    %743 = vector.broadcast %26 : vector<1x384xf32> to vector<2x384xf32>
    %744 = arith.addf %742, %743 : vector<2x384xf32>
    %cst_255 = arith.constant dense<0.000000e+00> : vector<2x384xf32>
    %745 = tpu.matmul %649, %22, %cst_255 {dimension_numbers = #tpu.dot_dimension_numbers<[1], [0], [0], [1], [0, 0, 1, 1], [], []>} : vector<2x128xf32>, vector<128x384xf32>, vector<2x384xf32> -> vector<2x384xf32>
    %746 = vector.broadcast %30 : vector<1x384xf32> to vector<2x384xf32>
    %747 = arith.addf %745, %746 : vector<2x384xf32>
    %748 = vector.extract_strided_slice %744 {offsets = [0, 0], sizes = [2, 128], strides = [1, 1]} : vector<2x384xf32> to vector<2x128xf32>
    %749 = vector.extract_strided_slice %747 {offsets = [0, 0], sizes = [2, 128], strides = [1, 1]} : vector<2x384xf32> to vector<2x128xf32>
    %750 = arith.addf %748, %749 : vector<2x128xf32>
    %751 = arith.negf %750 : vector<2x128xf32>
    %752 = math.exp %751 : vector<2x128xf32>
    %cst_256 = arith.constant 1.000000e+00 : f32
    %753 = vector.broadcast %cst_256 : f32 to vector<2x128xf32>
    %754 = arith.addf %753, %752 : vector<2x128xf32>
    %755 = arith.divf %753, %754 : vector<2x128xf32>
    %756 = vector.extract_strided_slice %744 {offsets = [0, 128], sizes = [2, 128], strides = [1, 1]} : vector<2x384xf32> to vector<2x128xf32>
    %757 = vector.extract_strided_slice %747 {offsets = [0, 128], sizes = [2, 128], strides = [1, 1]} : vector<2x384xf32> to vector<2x128xf32>
    %758 = arith.addf %756, %757 : vector<2x128xf32>
    %759 = arith.negf %758 : vector<2x128xf32>
    %760 = math.exp %759 : vector<2x128xf32>
    %cst_257 = arith.constant 1.000000e+00 : f32
    %761 = vector.broadcast %cst_257 : f32 to vector<2x128xf32>
    %762 = arith.addf %761, %760 : vector<2x128xf32>
    %763 = arith.divf %761, %762 : vector<2x128xf32>
    %764 = vector.extract_strided_slice %744 {offsets = [0, 256], sizes = [2, 128], strides = [1, 1]} : vector<2x384xf32> to vector<2x128xf32>
    %765 = vector.extract_strided_slice %747 {offsets = [0, 256], sizes = [2, 128], strides = [1, 1]} : vector<2x384xf32> to vector<2x128xf32>
    %766 = arith.mulf %755, %765 : vector<2x128xf32>
    %767 = arith.addf %764, %766 : vector<2x128xf32>
    %768 = math.tanh %767 : vector<2x128xf32>
    %cst_258 = arith.constant 1.000000e+00 : f32
    %769 = vector.broadcast %cst_258 : f32 to vector<2x128xf32>
    %770 = arith.subf %769, %763 : vector<2x128xf32>
    %771 = arith.mulf %770, %768 : vector<2x128xf32>
    %772 = arith.mulf %763, %649 : vector<2x128xf32>
    %773 = arith.addf %771, %772 : vector<2x128xf32>
    %c2_259 = arith.constant 2 : index
    %c0_260 = arith.constant 0 : index
    %c0_261 = arith.constant 0 : index
    %774 = vector.load %arg18[%c2_259, %c0_260, %c0_261] : memref<8x2x128xf32, #tpu.memory_space<vmem>>, vector<1x2x128xf32>
    %775 = vector.shape_cast %774 : vector<1x2x128xf32> to vector<2x128xf32>
    %776 = vector.shape_cast %773 : vector<2x128xf32> to vector<1x2x128xf32>
    tpu.vector_store %arg18[%c2_259, %c0_260, %c0_261], %776 {strides = array<i32>} : memref<8x2x128xf32, #tpu.memory_space<vmem>>, vector<1x2x128xf32>,
    %777 = vector.extract_strided_slice %3 {offsets = [0, 6, 0], sizes = [2, 1, 5], strides = [1, 1, 1]} : vector<2x8x5xf32> to vector<2x1x5xf32>
    %778 = vector.shape_cast %777 : vector<2x1x5xf32> to vector<2x5xf32>
    %cst_262 = arith.constant dense<0.000000e+00> : vector<2x32xf32>
    %779 = tpu.matmul %778, %5, %cst_262 {dimension_numbers = #tpu.dot_dimension_numbers<[1], [0], [0], [1], [0, 0, 1, 1], [], []>} : vector<2x5xf32>, vector<5x32xf32>, vector<2x32xf32> -> vector<2x32xf32>
    %780 = vector.broadcast %6 : vector<1x32xf32> to vector<2x32xf32>
    %781 = arith.addf %779, %780 : vector<2x32xf32>
    %cst_263 = arith.constant 0.000000e+00 : f32
    %782 = vector.broadcast %cst_263 : f32 to vector<2x32xf32>
    %783 = arith.maximumf %781, %782 : vector<2x32xf32>
    %cst_264 = arith.constant dense<0.000000e+00> : vector<2x32xf32>
    %784 = tpu.matmul %783, %7, %cst_264 {dimension_numbers = #tpu.dot_dimension_numbers<[1], [0], [0], [1], [0, 0, 1, 1], [], []>} : vector<2x32xf32>, vector<32x32xf32>, vector<2x32xf32> -> vector<2x32xf32>
    %785 = vector.broadcast %8 : vector<1x32xf32> to vector<2x32xf32>
    %786 = arith.addf %784, %785 : vector<2x32xf32>
    %cst_265 = arith.constant 0.000000e+00 : f32
    %787 = vector.broadcast %cst_265 : f32 to vector<2x32xf32>
    %788 = arith.maximumf %786, %787 : vector<2x32xf32>
    %cst_266 = arith.constant dense<0.000000e+00> : vector<2x32xf32>
    %789 = tpu.matmul %788, %9, %cst_266 {dimension_numbers = #tpu.dot_dimension_numbers<[1], [0], [0], [1], [0, 0, 1, 1], [], []>} : vector<2x32xf32>, vector<32x32xf32>, vector<2x32xf32> -> vector<2x32xf32>
    %790 = vector.broadcast %10 : vector<1x32xf32> to vector<2x32xf32>
    %791 = arith.addf %789, %790 : vector<2x32xf32>
    %cst_267 = arith.constant 0.000000e+00 : f32
    %792 = vector.broadcast %cst_267 : f32 to vector<2x32xf32>
    %793 = arith.maximumf %791, %792 : vector<2x32xf32>
    %cst_268 = arith.constant dense<0.000000e+00> : vector<2x32xf32>
    %794 = tpu.matmul %793, %11, %cst_268 {dimension_numbers = #tpu.dot_dimension_numbers<[1], [0], [0], [1], [0, 0, 1, 1], [], []>} : vector<2x32xf32>, vector<32x32xf32>, vector<2x32xf32> -> vector<2x32xf32>
    %795 = vector.broadcast %12 : vector<1x32xf32> to vector<2x32xf32>
    %796 = arith.addf %794, %795 : vector<2x32xf32>
    %cst_269 = arith.constant 0.000000e+00 : f32
    %797 = vector.broadcast %cst_269 : f32 to vector<2x32xf32>
    %798 = arith.maximumf %796, %797 : vector<2x32xf32>
    %cst_270 = arith.constant dense<0.000000e+00> : vector<2x32xf32>
    %799 = tpu.matmul %798, %13, %cst_270 {dimension_numbers = #tpu.dot_dimension_numbers<[1], [0], [0], [1], [0, 0, 1, 1], [], []>} : vector<2x32xf32>, vector<32x32xf32>, vector<2x32xf32> -> vector<2x32xf32>
    %800 = vector.broadcast %14 : vector<1x32xf32> to vector<2x32xf32>
    %801 = arith.addf %799, %800 : vector<2x32xf32>
    %cst_271 = arith.constant 0.000000e+00 : f32
    %802 = vector.broadcast %cst_271 : f32 to vector<2x32xf32>
    %803 = arith.maximumf %801, %802 : vector<2x32xf32>
    %cst_272 = arith.constant dense<0.000000e+00> : vector<2x384xf32>
    %804 = tpu.matmul %803, %16, %cst_272 {dimension_numbers = #tpu.dot_dimension_numbers<[1], [0], [0], [1], [0, 0, 1, 1], [], []>} : vector<2x32xf32>, vector<32x384xf32>, vector<2x384xf32> -> vector<2x384xf32>
    %805 = vector.broadcast %24 : vector<1x384xf32> to vector<2x384xf32>
    %806 = arith.addf %804, %805 : vector<2x384xf32>
    %cst_273 = arith.constant dense<0.000000e+00> : vector<2x384xf32>
    %807 = tpu.matmul %711, %20, %cst_273 {dimension_numbers = #tpu.dot_dimension_numbers<[1], [0], [0], [1], [0, 0, 1, 1], [], []>} : vector<2x128xf32>, vector<128x384xf32>, vector<2x384xf32> -> vector<2x384xf32>
    %808 = vector.broadcast %28 : vector<1x384xf32> to vector<2x384xf32>
    %809 = arith.addf %807, %808 : vector<2x384xf32>
    %810 = vector.extract_strided_slice %806 {offsets = [0, 0], sizes = [2, 128], strides = [1, 1]} : vector<2x384xf32> to vector<2x128xf32>
    %811 = vector.extract_strided_slice %809 {offsets = [0, 0], sizes = [2, 128], strides = [1, 1]} : vector<2x384xf32> to vector<2x128xf32>
    %812 = arith.addf %810, %811 : vector<2x128xf32>
    %813 = arith.negf %812 : vector<2x128xf32>
    %814 = math.exp %813 : vector<2x128xf32>
    %cst_274 = arith.constant 1.000000e+00 : f32
    %815 = vector.broadcast %cst_274 : f32 to vector<2x128xf32>
    %816 = arith.addf %815, %814 : vector<2x128xf32>
    %817 = arith.divf %815, %816 : vector<2x128xf32>
    %818 = vector.extract_strided_slice %806 {offsets = [0, 128], sizes = [2, 128], strides = [1, 1]} : vector<2x384xf32> to vector<2x128xf32>
    %819 = vector.extract_strided_slice %809 {offsets = [0, 128], sizes = [2, 128], strides = [1, 1]} : vector<2x384xf32> to vector<2x128xf32>
    %820 = arith.addf %818, %819 : vector<2x128xf32>
    %821 = arith.negf %820 : vector<2x128xf32>
    %822 = math.exp %821 : vector<2x128xf32>
    %cst_275 = arith.constant 1.000000e+00 : f32
    %823 = vector.broadcast %cst_275 : f32 to vector<2x128xf32>
    %824 = arith.addf %823, %822 : vector<2x128xf32>
    %825 = arith.divf %823, %824 : vector<2x128xf32>
    %826 = vector.extract_strided_slice %806 {offsets = [0, 256], sizes = [2, 128], strides = [1, 1]} : vector<2x384xf32> to vector<2x128xf32>
    %827 = vector.extract_strided_slice %809 {offsets = [0, 256], sizes = [2, 128], strides = [1, 1]} : vector<2x384xf32> to vector<2x128xf32>
    %828 = arith.mulf %817, %827 : vector<2x128xf32>
    %829 = arith.addf %826, %828 : vector<2x128xf32>
    %830 = math.tanh %829 : vector<2x128xf32>
    %cst_276 = arith.constant 1.000000e+00 : f32
    %831 = vector.broadcast %cst_276 : f32 to vector<2x128xf32>
    %832 = arith.subf %831, %825 : vector<2x128xf32>
    %833 = arith.mulf %832, %830 : vector<2x128xf32>
    %834 = arith.mulf %825, %711 : vector<2x128xf32>
    %835 = arith.addf %833, %834 : vector<2x128xf32>
    %c6_277 = arith.constant 6 : index
    %c0_278 = arith.constant 0 : index
    %c0_279 = arith.constant 0 : index
    %836 = vector.load %arg17[%c6_277, %c0_278, %c0_279] : memref<8x2x128xf32, #tpu.memory_space<vmem>>, vector<1x2x128xf32>
    %837 = vector.shape_cast %836 : vector<1x2x128xf32> to vector<2x128xf32>
    %838 = vector.shape_cast %835 : vector<2x128xf32> to vector<1x2x128xf32>
    tpu.vector_store %arg17[%c6_277, %c0_278, %c0_279], %838 {strides = array<i32>} : memref<8x2x128xf32, #tpu.memory_space<vmem>>, vector<1x2x128xf32>,
    %839 = vector.extract_strided_slice %4 {offsets = [0, 1, 0], sizes = [2, 1, 5], strides = [1, 1, 1]} : vector<2x8x5xf32> to vector<2x1x5xf32>
    %840 = vector.shape_cast %839 : vector<2x1x5xf32> to vector<2x5xf32>
    %cst_280 = arith.constant dense<0.000000e+00> : vector<2x32xf32>
    %841 = tpu.matmul %840, %5, %cst_280 {dimension_numbers = #tpu.dot_dimension_numbers<[1], [0], [0], [1], [0, 0, 1, 1], [], []>} : vector<2x5xf32>, vector<5x32xf32>, vector<2x32xf32> -> vector<2x32xf32>
    %842 = vector.broadcast %6 : vector<1x32xf32> to vector<2x32xf32>
    %843 = arith.addf %841, %842 : vector<2x32xf32>
    %cst_281 = arith.constant 0.000000e+00 : f32
    %844 = vector.broadcast %cst_281 : f32 to vector<2x32xf32>
    %845 = arith.maximumf %843, %844 : vector<2x32xf32>
    %cst_282 = arith.constant dense<0.000000e+00> : vector<2x32xf32>
    %846 = tpu.matmul %845, %7, %cst_282 {dimension_numbers = #tpu.dot_dimension_numbers<[1], [0], [0], [1], [0, 0, 1, 1], [], []>} : vector<2x32xf32>, vector<32x32xf32>, vector<2x32xf32> -> vector<2x32xf32>
    %847 = vector.broadcast %8 : vector<1x32xf32> to vector<2x32xf32>
    %848 = arith.addf %846, %847 : vector<2x32xf32>
    %cst_283 = arith.constant 0.000000e+00 : f32
    %849 = vector.broadcast %cst_283 : f32 to vector<2x32xf32>
    %850 = arith.maximumf %848, %849 : vector<2x32xf32>
    %cst_284 = arith.constant dense<0.000000e+00> : vector<2x32xf32>
    %851 = tpu.matmul %850, %9, %cst_284 {dimension_numbers = #tpu.dot_dimension_numbers<[1], [0], [0], [1], [0, 0, 1, 1], [], []>} : vector<2x32xf32>, vector<32x32xf32>, vector<2x32xf32> -> vector<2x32xf32>
    %852 = vector.broadcast %10 : vector<1x32xf32> to vector<2x32xf32>
    %853 = arith.addf %851, %852 : vector<2x32xf32>
    %cst_285 = arith.constant 0.000000e+00 : f32
    %854 = vector.broadcast %cst_285 : f32 to vector<2x32xf32>
    %855 = arith.maximumf %853, %854 : vector<2x32xf32>
    %cst_286 = arith.constant dense<0.000000e+00> : vector<2x32xf32>
    %856 = tpu.matmul %855, %11, %cst_286 {dimension_numbers = #tpu.dot_dimension_numbers<[1], [0], [0], [1], [0, 0, 1, 1], [], []>} : vector<2x32xf32>, vector<32x32xf32>, vector<2x32xf32> -> vector<2x32xf32>
    %857 = vector.broadcast %12 : vector<1x32xf32> to vector<2x32xf32>
    %858 = arith.addf %856, %857 : vector<2x32xf32>
    %cst_287 = arith.constant 0.000000e+00 : f32
    %859 = vector.broadcast %cst_287 : f32 to vector<2x32xf32>
    %860 = arith.maximumf %858, %859 : vector<2x32xf32>
    %cst_288 = arith.constant dense<0.000000e+00> : vector<2x32xf32>
    %861 = tpu.matmul %860, %13, %cst_288 {dimension_numbers = #tpu.dot_dimension_numbers<[1], [0], [0], [1], [0, 0, 1, 1], [], []>} : vector<2x32xf32>, vector<32x32xf32>, vector<2x32xf32> -> vector<2x32xf32>
    %862 = vector.broadcast %14 : vector<1x32xf32> to vector<2x32xf32>
    %863 = arith.addf %861, %862 : vector<2x32xf32>
    %cst_289 = arith.constant 0.000000e+00 : f32
    %864 = vector.broadcast %cst_289 : f32 to vector<2x32xf32>
    %865 = arith.maximumf %863, %864 : vector<2x32xf32>
    %cst_290 = arith.constant dense<0.000000e+00> : vector<2x384xf32>
    %866 = tpu.matmul %865, %18, %cst_290 {dimension_numbers = #tpu.dot_dimension_numbers<[1], [0], [0], [1], [0, 0, 1, 1], [], []>} : vector<2x32xf32>, vector<32x384xf32>, vector<2x384xf32> -> vector<2x384xf32>
    %867 = vector.broadcast %26 : vector<1x384xf32> to vector<2x384xf32>
    %868 = arith.addf %866, %867 : vector<2x384xf32>
    %cst_291 = arith.constant dense<0.000000e+00> : vector<2x384xf32>
    %869 = tpu.matmul %773, %22, %cst_291 {dimension_numbers = #tpu.dot_dimension_numbers<[1], [0], [0], [1], [0, 0, 1, 1], [], []>} : vector<2x128xf32>, vector<128x384xf32>, vector<2x384xf32> -> vector<2x384xf32>
    %870 = vector.broadcast %30 : vector<1x384xf32> to vector<2x384xf32>
    %871 = arith.addf %869, %870 : vector<2x384xf32>
    %872 = vector.extract_strided_slice %868 {offsets = [0, 0], sizes = [2, 128], strides = [1, 1]} : vector<2x384xf32> to vector<2x128xf32>
    %873 = vector.extract_strided_slice %871 {offsets = [0, 0], sizes = [2, 128], strides = [1, 1]} : vector<2x384xf32> to vector<2x128xf32>
    %874 = arith.addf %872, %873 : vector<2x128xf32>
    %875 = arith.negf %874 : vector<2x128xf32>
    %876 = math.exp %875 : vector<2x128xf32>
    %cst_292 = arith.constant 1.000000e+00 : f32
    %877 = vector.broadcast %cst_292 : f32 to vector<2x128xf32>
    %878 = arith.addf %877, %876 : vector<2x128xf32>
    %879 = arith.divf %877, %878 : vector<2x128xf32>
    %880 = vector.extract_strided_slice %868 {offsets = [0, 128], sizes = [2, 128], strides = [1, 1]} : vector<2x384xf32> to vector<2x128xf32>
    %881 = vector.extract_strided_slice %871 {offsets = [0, 128], sizes = [2, 128], strides = [1, 1]} : vector<2x384xf32> to vector<2x128xf32>
    %882 = arith.addf %880, %881 : vector<2x128xf32>
    %883 = arith.negf %882 : vector<2x128xf32>
    %884 = math.exp %883 : vector<2x128xf32>
    %cst_293 = arith.constant 1.000000e+00 : f32
    %885 = vector.broadcast %cst_293 : f32 to vector<2x128xf32>
    %886 = arith.addf %885, %884 : vector<2x128xf32>
    %887 = arith.divf %885, %886 : vector<2x128xf32>
    %888 = vector.extract_strided_slice %868 {offsets = [0, 256], sizes = [2, 128], strides = [1, 1]} : vector<2x384xf32> to vector<2x128xf32>
    %889 = vector.extract_strided_slice %871 {offsets = [0, 256], sizes = [2, 128], strides = [1, 1]} : vector<2x384xf32> to vector<2x128xf32>
    %890 = arith.mulf %879, %889 : vector<2x128xf32>
    %891 = arith.addf %888, %890 : vector<2x128xf32>
    %892 = math.tanh %891 : vector<2x128xf32>
    %cst_294 = arith.constant 1.000000e+00 : f32
    %893 = vector.broadcast %cst_294 : f32 to vector<2x128xf32>
    %894 = arith.subf %893, %887 : vector<2x128xf32>
    %895 = arith.mulf %894, %892 : vector<2x128xf32>
    %896 = arith.mulf %887, %773 : vector<2x128xf32>
    %897 = arith.addf %895, %896 : vector<2x128xf32>
    %c1_295 = arith.constant 1 : index
    %c0_296 = arith.constant 0 : index
    %c0_297 = arith.constant 0 : index
    %898 = vector.load %arg18[%c1_295, %c0_296, %c0_297] : memref<8x2x128xf32, #tpu.memory_space<vmem>>, vector<1x2x128xf32>
    %899 = vector.shape_cast %898 : vector<1x2x128xf32> to vector<2x128xf32>
    %900 = vector.shape_cast %897 : vector<2x128xf32> to vector<1x2x128xf32>
    tpu.vector_store %arg18[%c1_295, %c0_296, %c0_297], %900 {strides = array<i32>} : memref<8x2x128xf32, #tpu.memory_space<vmem>>, vector<1x2x128xf32>,
    %901 = vector.extract_strided_slice %3 {offsets = [0, 7, 0], sizes = [2, 1, 5], strides = [1, 1, 1]} : vector<2x8x5xf32> to vector<2x1x5xf32>
    %902 = vector.shape_cast %901 : vector<2x1x5xf32> to vector<2x5xf32>
    %cst_298 = arith.constant dense<0.000000e+00> : vector<2x32xf32>
    %903 = tpu.matmul %902, %5, %cst_298 {dimension_numbers = #tpu.dot_dimension_numbers<[1], [0], [0], [1], [0, 0, 1, 1], [], []>} : vector<2x5xf32>, vector<5x32xf32>, vector<2x32xf32> -> vector<2x32xf32>
    %904 = vector.broadcast %6 : vector<1x32xf32> to vector<2x32xf32>
    %905 = arith.addf %903, %904 : vector<2x32xf32>
    %cst_299 = arith.constant 0.000000e+00 : f32
    %906 = vector.broadcast %cst_299 : f32 to vector<2x32xf32>
    %907 = arith.maximumf %905, %906 : vector<2x32xf32>
    %cst_300 = arith.constant dense<0.000000e+00> : vector<2x32xf32>
    %908 = tpu.matmul %907, %7, %cst_300 {dimension_numbers = #tpu.dot_dimension_numbers<[1], [0], [0], [1], [0, 0, 1, 1], [], []>} : vector<2x32xf32>, vector<32x32xf32>, vector<2x32xf32> -> vector<2x32xf32>
    %909 = vector.broadcast %8 : vector<1x32xf32> to vector<2x32xf32>
    %910 = arith.addf %908, %909 : vector<2x32xf32>
    %cst_301 = arith.constant 0.000000e+00 : f32
    %911 = vector.broadcast %cst_301 : f32 to vector<2x32xf32>
    %912 = arith.maximumf %910, %911 : vector<2x32xf32>
    %cst_302 = arith.constant dense<0.000000e+00> : vector<2x32xf32>
    %913 = tpu.matmul %912, %9, %cst_302 {dimension_numbers = #tpu.dot_dimension_numbers<[1], [0], [0], [1], [0, 0, 1, 1], [], []>} : vector<2x32xf32>, vector<32x32xf32>, vector<2x32xf32> -> vector<2x32xf32>
    %914 = vector.broadcast %10 : vector<1x32xf32> to vector<2x32xf32>
    %915 = arith.addf %913, %914 : vector<2x32xf32>
    %cst_303 = arith.constant 0.000000e+00 : f32
    %916 = vector.broadcast %cst_303 : f32 to vector<2x32xf32>
    %917 = arith.maximumf %915, %916 : vector<2x32xf32>
    %cst_304 = arith.constant dense<0.000000e+00> : vector<2x32xf32>
    %918 = tpu.matmul %917, %11, %cst_304 {dimension_numbers = #tpu.dot_dimension_numbers<[1], [0], [0], [1], [0, 0, 1, 1], [], []>} : vector<2x32xf32>, vector<32x32xf32>, vector<2x32xf32> -> vector<2x32xf32>
    %919 = vector.broadcast %12 : vector<1x32xf32> to vector<2x32xf32>
    %920 = arith.addf %918, %919 : vector<2x32xf32>
    %cst_305 = arith.constant 0.000000e+00 : f32
    %921 = vector.broadcast %cst_305 : f32 to vector<2x32xf32>
    %922 = arith.maximumf %920, %921 : vector<2x32xf32>
    %cst_306 = arith.constant dense<0.000000e+00> : vector<2x32xf32>
    %923 = tpu.matmul %922, %13, %cst_306 {dimension_numbers = #tpu.dot_dimension_numbers<[1], [0], [0], [1], [0, 0, 1, 1], [], []>} : vector<2x32xf32>, vector<32x32xf32>, vector<2x32xf32> -> vector<2x32xf32>
    %924 = vector.broadcast %14 : vector<1x32xf32> to vector<2x32xf32>
    %925 = arith.addf %923, %924 : vector<2x32xf32>
    %cst_307 = arith.constant 0.000000e+00 : f32
    %926 = vector.broadcast %cst_307 : f32 to vector<2x32xf32>
    %927 = arith.maximumf %925, %926 : vector<2x32xf32>
    %cst_308 = arith.constant dense<0.000000e+00> : vector<2x384xf32>
    %928 = tpu.matmul %927, %16, %cst_308 {dimension_numbers = #tpu.dot_dimension_numbers<[1], [0], [0], [1], [0, 0, 1, 1], [], []>} : vector<2x32xf32>, vector<32x384xf32>, vector<2x384xf32> -> vector<2x384xf32>
    %929 = vector.broadcast %24 : vector<1x384xf32> to vector<2x384xf32>
    %930 = arith.addf %928, %929 : vector<2x384xf32>
    %cst_309 = arith.constant dense<0.000000e+00> : vector<2x384xf32>
    %931 = tpu.matmul %835, %20, %cst_309 {dimension_numbers = #tpu.dot_dimension_numbers<[1], [0], [0], [1], [0, 0, 1, 1], [], []>} : vector<2x128xf32>, vector<128x384xf32>, vector<2x384xf32> -> vector<2x384xf32>
    %932 = vector.broadcast %28 : vector<1x384xf32> to vector<2x384xf32>
    %933 = arith.addf %931, %932 : vector<2x384xf32>
    %934 = vector.extract_strided_slice %930 {offsets = [0, 0], sizes = [2, 128], strides = [1, 1]} : vector<2x384xf32> to vector<2x128xf32>
    %935 = vector.extract_strided_slice %933 {offsets = [0, 0], sizes = [2, 128], strides = [1, 1]} : vector<2x384xf32> to vector<2x128xf32>
    %936 = arith.addf %934, %935 : vector<2x128xf32>
    %937 = arith.negf %936 : vector<2x128xf32>
    %938 = math.exp %937 : vector<2x128xf32>
    %cst_310 = arith.constant 1.000000e+00 : f32
    %939 = vector.broadcast %cst_310 : f32 to vector<2x128xf32>
    %940 = arith.addf %939, %938 : vector<2x128xf32>
    %941 = arith.divf %939, %940 : vector<2x128xf32>
    %942 = vector.extract_strided_slice %930 {offsets = [0, 128], sizes = [2, 128], strides = [1, 1]} : vector<2x384xf32> to vector<2x128xf32>
    %943 = vector.extract_strided_slice %933 {offsets = [0, 128], sizes = [2, 128], strides = [1, 1]} : vector<2x384xf32> to vector<2x128xf32>
    %944 = arith.addf %942, %943 : vector<2x128xf32>
    %945 = arith.negf %944 : vector<2x128xf32>
    %946 = math.exp %945 : vector<2x128xf32>
    %cst_311 = arith.constant 1.000000e+00 : f32
    %947 = vector.broadcast %cst_311 : f32 to vector<2x128xf32>
    %948 = arith.addf %947, %946 : vector<2x128xf32>
    %949 = arith.divf %947, %948 : vector<2x128xf32>
    %950 = vector.extract_strided_slice %930 {offsets = [0, 256], sizes = [2, 128], strides = [1, 1]} : vector<2x384xf32> to vector<2x128xf32>
    %951 = vector.extract_strided_slice %933 {offsets = [0, 256], sizes = [2, 128], strides = [1, 1]} : vector<2x384xf32> to vector<2x128xf32>
    %952 = arith.mulf %941, %951 : vector<2x128xf32>
    %953 = arith.addf %950, %952 : vector<2x128xf32>
    %954 = math.tanh %953 : vector<2x128xf32>
    %cst_312 = arith.constant 1.000000e+00 : f32
    %955 = vector.broadcast %cst_312 : f32 to vector<2x128xf32>
    %956 = arith.subf %955, %949 : vector<2x128xf32>
    %957 = arith.mulf %956, %954 : vector<2x128xf32>
    %958 = arith.mulf %949, %835 : vector<2x128xf32>
    %959 = arith.addf %957, %958 : vector<2x128xf32>
    %c7_313 = arith.constant 7 : index
    %c0_314 = arith.constant 0 : index
    %c0_315 = arith.constant 0 : index
    %960 = vector.load %arg17[%c7_313, %c0_314, %c0_315] : memref<8x2x128xf32, #tpu.memory_space<vmem>>, vector<1x2x128xf32>
    %961 = vector.shape_cast %960 : vector<1x2x128xf32> to vector<2x128xf32>
    %962 = vector.shape_cast %959 : vector<2x128xf32> to vector<1x2x128xf32>
    tpu.vector_store %arg17[%c7_313, %c0_314, %c0_315], %962 {strides = array<i32>} : memref<8x2x128xf32, #tpu.memory_space<vmem>>, vector<1x2x128xf32>,
    %963 = vector.extract_strided_slice %4 {offsets = [0, 0, 0], sizes = [2, 1, 5], strides = [1, 1, 1]} : vector<2x8x5xf32> to vector<2x1x5xf32>
    %964 = vector.shape_cast %963 : vector<2x1x5xf32> to vector<2x5xf32>
    %cst_316 = arith.constant dense<0.000000e+00> : vector<2x32xf32>
    %965 = tpu.matmul %964, %5, %cst_316 {dimension_numbers = #tpu.dot_dimension_numbers<[1], [0], [0], [1], [0, 0, 1, 1], [], []>} : vector<2x5xf32>, vector<5x32xf32>, vector<2x32xf32> -> vector<2x32xf32>
    %966 = vector.broadcast %6 : vector<1x32xf32> to vector<2x32xf32>
    %967 = arith.addf %965, %966 : vector<2x32xf32>
    %cst_317 = arith.constant 0.000000e+00 : f32
    %968 = vector.broadcast %cst_317 : f32 to vector<2x32xf32>
    %969 = arith.maximumf %967, %968 : vector<2x32xf32>
    %cst_318 = arith.constant dense<0.000000e+00> : vector<2x32xf32>
    %970 = tpu.matmul %969, %7, %cst_318 {dimension_numbers = #tpu.dot_dimension_numbers<[1], [0], [0], [1], [0, 0, 1, 1], [], []>} : vector<2x32xf32>, vector<32x32xf32>, vector<2x32xf32> -> vector<2x32xf32>
    %971 = vector.broadcast %8 : vector<1x32xf32> to vector<2x32xf32>
    %972 = arith.addf %970, %971 : vector<2x32xf32>
    %cst_319 = arith.constant 0.000000e+00 : f32
    %973 = vector.broadcast %cst_319 : f32 to vector<2x32xf32>
    %974 = arith.maximumf %972, %973 : vector<2x32xf32>
    %cst_320 = arith.constant dense<0.000000e+00> : vector<2x32xf32>
    %975 = tpu.matmul %974, %9, %cst_320 {dimension_numbers = #tpu.dot_dimension_numbers<[1], [0], [0], [1], [0, 0, 1, 1], [], []>} : vector<2x32xf32>, vector<32x32xf32>, vector<2x32xf32> -> vector<2x32xf32>
    %976 = vector.broadcast %10 : vector<1x32xf32> to vector<2x32xf32>
    %977 = arith.addf %975, %976 : vector<2x32xf32>
    %cst_321 = arith.constant 0.000000e+00 : f32
    %978 = vector.broadcast %cst_321 : f32 to vector<2x32xf32>
    %979 = arith.maximumf %977, %978 : vector<2x32xf32>
    %cst_322 = arith.constant dense<0.000000e+00> : vector<2x32xf32>
    %980 = tpu.matmul %979, %11, %cst_322 {dimension_numbers = #tpu.dot_dimension_numbers<[1], [0], [0], [1], [0, 0, 1, 1], [], []>} : vector<2x32xf32>, vector<32x32xf32>, vector<2x32xf32> -> vector<2x32xf32>
    %981 = vector.broadcast %12 : vector<1x32xf32> to vector<2x32xf32>
    %982 = arith.addf %980, %981 : vector<2x32xf32>
    %cst_323 = arith.constant 0.000000e+00 : f32
    %983 = vector.broadcast %cst_323 : f32 to vector<2x32xf32>
    %984 = arith.maximumf %982, %983 : vector<2x32xf32>
    %cst_324 = arith.constant dense<0.000000e+00> : vector<2x32xf32>
    %985 = tpu.matmul %984, %13, %cst_324 {dimension_numbers = #tpu.dot_dimension_numbers<[1], [0], [0], [1], [0, 0, 1, 1], [], []>} : vector<2x32xf32>, vector<32x32xf32>, vector<2x32xf32> -> vector<2x32xf32>
    %986 = vector.broadcast %14 : vector<1x32xf32> to vector<2x32xf32>
    %987 = arith.addf %985, %986 : vector<2x32xf32>
    %cst_325 = arith.constant 0.000000e+00 : f32
    %988 = vector.broadcast %cst_325 : f32 to vector<2x32xf32>
    %989 = arith.maximumf %987, %988 : vector<2x32xf32>
    %cst_326 = arith.constant dense<0.000000e+00> : vector<2x384xf32>
    %990 = tpu.matmul %989, %18, %cst_326 {dimension_numbers = #tpu.dot_dimension_numbers<[1], [0], [0], [1], [0, 0, 1, 1], [], []>} : vector<2x32xf32>, vector<32x384xf32>, vector<2x384xf32> -> vector<2x384xf32>
    %991 = vector.broadcast %26 : vector<1x384xf32> to vector<2x384xf32>
    %992 = arith.addf %990, %991 : vector<2x384xf32>
    %cst_327 = arith.constant dense<0.000000e+00> : vector<2x384xf32>
    %993 = tpu.matmul %897, %22, %cst_327 {dimension_numbers = #tpu.dot_dimension_numbers<[1], [0], [0], [1], [0, 0, 1, 1], [], []>} : vector<2x128xf32>, vector<128x384xf32>, vector<2x384xf32> -> vector<2x384xf32>
    %994 = vector.broadcast %30 : vector<1x384xf32> to vector<2x384xf32>
    %995 = arith.addf %993, %994 : vector<2x384xf32>
    %996 = vector.extract_strided_slice %992 {offsets = [0, 0], sizes = [2, 128], strides = [1, 1]} : vector<2x384xf32> to vector<2x128xf32>
    %997 = vector.extract_strided_slice %995 {offsets = [0, 0], sizes = [2, 128], strides = [1, 1]} : vector<2x384xf32> to vector<2x128xf32>
    %998 = arith.addf %996, %997 : vector<2x128xf32>
    %999 = arith.negf %998 : vector<2x128xf32>
    %1000 = math.exp %999 : vector<2x128xf32>
    %cst_328 = arith.constant 1.000000e+00 : f32
    %1001 = vector.broadcast %cst_328 : f32 to vector<2x128xf32>
    %1002 = arith.addf %1001, %1000 : vector<2x128xf32>
    %1003 = arith.divf %1001, %1002 : vector<2x128xf32>
    %1004 = vector.extract_strided_slice %992 {offsets = [0, 128], sizes = [2, 128], strides = [1, 1]} : vector<2x384xf32> to vector<2x128xf32>
    %1005 = vector.extract_strided_slice %995 {offsets = [0, 128], sizes = [2, 128], strides = [1, 1]} : vector<2x384xf32> to vector<2x128xf32>
    %1006 = arith.addf %1004, %1005 : vector<2x128xf32>
    %1007 = arith.negf %1006 : vector<2x128xf32>
    %1008 = math.exp %1007 : vector<2x128xf32>
    %cst_329 = arith.constant 1.000000e+00 : f32
    %1009 = vector.broadcast %cst_329 : f32 to vector<2x128xf32>
    %1010 = arith.addf %1009, %1008 : vector<2x128xf32>
    %1011 = arith.divf %1009, %1010 : vector<2x128xf32>
    %1012 = vector.extract_strided_slice %992 {offsets = [0, 256], sizes = [2, 128], strides = [1, 1]} : vector<2x384xf32> to vector<2x128xf32>
    %1013 = vector.extract_strided_slice %995 {offsets = [0, 256], sizes = [2, 128], strides = [1, 1]} : vector<2x384xf32> to vector<2x128xf32>
    %1014 = arith.mulf %1003, %1013 : vector<2x128xf32>
    %1015 = arith.addf %1012, %1014 : vector<2x128xf32>
    %1016 = math.tanh %1015 : vector<2x128xf32>
    %cst_330 = arith.constant 1.000000e+00 : f32
    %1017 = vector.broadcast %cst_330 : f32 to vector<2x128xf32>
    %1018 = arith.subf %1017, %1011 : vector<2x128xf32>
    %1019 = arith.mulf %1018, %1016 : vector<2x128xf32>
    %1020 = arith.mulf %1011, %897 : vector<2x128xf32>
    %1021 = arith.addf %1019, %1020 : vector<2x128xf32>
    %c0_331 = arith.constant 0 : index
    %c0_332 = arith.constant 0 : index
    %c0_333 = arith.constant 0 : index
    %1022 = vector.load %arg18[%c0_331, %c0_332, %c0_333] : memref<8x2x128xf32, #tpu.memory_space<vmem>>, vector<1x2x128xf32>
    %1023 = vector.shape_cast %1022 : vector<1x2x128xf32> to vector<2x128xf32>
    %1024 = vector.shape_cast %1021 : vector<2x128xf32> to vector<1x2x128xf32>
    tpu.vector_store %arg18[%c0_331, %c0_332, %c0_333], %1024 {strides = array<i32>} : memref<8x2x128xf32, #tpu.memory_space<vmem>>, vector<1x2x128xf32>,
    %c0_334 = arith.constant 0 : index
    %c0_335 = arith.constant 0 : index
    %1025 = vector.load %arg19[%c0_334, %c0_335] : memref<2x128xf32, #tpu.memory_space<vmem>>, vector<2x128xf32>
    tpu.vector_store %arg19[%c0_334, %c0_335], %959 {strides = array<i32>} : memref<2x128xf32, #tpu.memory_space<vmem>>, vector<2x128xf32>,
    %c0_336 = arith.constant 0 : index
    %c0_337 = arith.constant 0 : index
    %1026 = vector.load %arg20[%c0_336, %c0_337] : memref<2x128xf32, #tpu.memory_space<vmem>>, vector<2x128xf32>
    tpu.vector_store %arg20[%c0_336, %c0_337], %1021 {strides = array<i32>} : memref<2x128xf32, #tpu.memory_space<vmem>>, vector<2x128xf32>,
    return
  }
  func.func @transform_0(%arg0: i32) -> (i32, i32, i32) {
    %c0_i32 = arith.constant 0 : i32
    %c0_i32_0 = arith.constant 0 : i32
    %c0_i32_1 = arith.constant 0 : i32
    return %c0_i32, %arg0, %c0_i32_0 : i32, i32, i32
  }
  func.func @transform_1(%arg0: i32) -> (i32, i32, i32) {
    %c0_i32 = arith.constant 0 : i32
    %0 = arith.subi %c0_i32, %arg0 : i32
    %c0_i32_0 = arith.constant 0 : i32
    %c0_i32_1 = arith.constant 0 : i32
    %c0_i32_2 = arith.constant 0 : i32
    return %c0_i32_0, %0, %c0_i32_1 : i32, i32, i32
  }
  func.func @transform_2(%arg0: i32) -> (i32, i32) {
    %c0_i32 = arith.constant 0 : i32
    %c0_i32_0 = arith.constant 0 : i32
    %c0_i32_1 = arith.constant 0 : i32
    return %c0_i32, %c0_i32_0 : i32, i32
  }
  func.func @transform_3(%arg0: i32) -> (i32, i32) {
    %c0_i32 = arith.constant 0 : i32
    %c0_i32_0 = arith.constant 0 : i32
    %c0_i32_1 = arith.constant 0 : i32
    return %c0_i32, %c0_i32_0 : i32, i32
  }
  func.func @transform_4(%arg0: i32) -> (i32, i32) {
    %c0_i32 = arith.constant 0 : i32
    %c0_i32_0 = arith.constant 0 : i32
    %c0_i32_1 = arith.constant 0 : i32
    return %c0_i32, %c0_i32_0 : i32, i32
  }
  func.func @transform_5(%arg0: i32) -> (i32, i32) {
    %c0_i32 = arith.constant 0 : i32
    %c0_i32_0 = arith.constant 0 : i32
    %c0_i32_1 = arith.constant 0 : i32
    return %c0_i32, %c0_i32_0 : i32, i32
  }
  func.func @transform_6(%arg0: i32) -> (i32, i32) {
    %c0_i32 = arith.constant 0 : i32
    %c0_i32_0 = arith.constant 0 : i32
    %c0_i32_1 = arith.constant 0 : i32
    return %c0_i32, %c0_i32_0 : i32, i32
  }
  func.func @transform_7(%arg0: i32) -> (i32, i32) {
    %c0_i32 = arith.constant 0 : i32
    %c0_i32_0 = arith.constant 0 : i32
    %c0_i32_1 = arith.constant 0 : i32
    return %c0_i32, %c0_i32_0 : i32, i32
  }
  func.func @transform_8(%arg0: i32) -> (i32, i32) {
    %c0_i32 = arith.constant 0 : i32
    %c0_i32_0 = arith.constant 0 : i32
    %c0_i32_1 = arith.constant 0 : i32
    return %c0_i32, %c0_i32_0 : i32, i32
  }
  func.func @transform_9(%arg0: i32) -> (i32, i32) {
    %c0_i32 = arith.constant 0 : i32
    %c0_i32_0 = arith.constant 0 : i32
    %c0_i32_1 = arith.constant 0 : i32
    return %c0_i32, %c0_i32_0 : i32, i32
  }
  func.func @transform_10(%arg0: i32) -> (i32, i32) {
    %c0_i32 = arith.constant 0 : i32
    %c0_i32_0 = arith.constant 0 : i32
    %c0_i32_1 = arith.constant 0 : i32
    return %c0_i32, %c0_i32_0 : i32, i32
  }
  func.func @transform_11(%arg0: i32) -> (i32, i32) {
    %c0_i32 = arith.constant 0 : i32
    %c0_i32_0 = arith.constant 0 : i32
    %c0_i32_1 = arith.constant 0 : i32
    return %c0_i32, %c0_i32_0 : i32, i32
  }
  func.func @transform_12(%arg0: i32) -> (i32, i32, i32) {
    %c0_i32 = arith.constant 0 : i32
    %c0_i32_0 = arith.constant 0 : i32
    %c0_i32_1 = arith.constant 0 : i32
    %c0_i32_2 = arith.constant 0 : i32
    return %c0_i32, %c0_i32_0, %c0_i32_1 : i32, i32, i32
  }
  func.func @transform_13(%arg0: i32) -> (i32, i32, i32) {
    %c0_i32 = arith.constant 0 : i32
    %c0_i32_0 = arith.constant 0 : i32
    %c0_i32_1 = arith.constant 0 : i32
    %c0_i32_2 = arith.constant 0 : i32
    return %c0_i32, %c0_i32_0, %c0_i32_1 : i32, i32, i32
  }
  func.func @transform_14(%arg0: i32) -> (i32, i32, i32) {
    %c0_i32 = arith.constant 0 : i32
    %c0_i32_0 = arith.constant 0 : i32
    %c0_i32_1 = arith.constant 0 : i32
    %c0_i32_2 = arith.constant 0 : i32
    return %c0_i32, %c0_i32_0, %c0_i32_1 : i32, i32, i32
  }
  func.func @transform_15(%arg0: i32) -> (i32, i32, i32) {
    %c0_i32 = arith.constant 0 : i32
    %c0_i32_0 = arith.constant 0 : i32
    %c0_i32_1 = arith.constant 0 : i32
    %c0_i32_2 = arith.constant 0 : i32
    return %c0_i32, %c0_i32_0, %c0_i32_1 : i32, i32, i32
  }
  func.func @transform_16(%arg0: i32) -> (i32, i32, i32) {
    %c0_i32 = arith.constant 0 : i32
    %c0_i32_0 = arith.constant 0 : i32
    %c0_i32_1 = arith.constant 0 : i32
    return %arg0, %c0_i32, %c0_i32_0 : i32, i32, i32
  }
  func.func @transform_17(%arg0: i32) -> (i32, i32, i32) {
    %c0_i32 = arith.constant 0 : i32
    %0 = arith.subi %c0_i32, %arg0 : i32
    %c0_i32_0 = arith.constant 0 : i32
    %c0_i32_1 = arith.constant 0 : i32
    %c0_i32_2 = arith.constant 0 : i32
    return %0, %c0_i32_0, %c0_i32_1 : i32, i32, i32
  }
}

</mosaic_0001>

<bundles_post_ra>
// kernel: tpu_custom_call.1
= control target key start
LH: loop header
LB: loop body
LE: loop exit
PB: predicated region body
PF: predicated region fallthrough
CT: control target
= control target key end

     0   :  { %s17985_s0 = inlined_call_operand.vmem [shape: f32[2,8,5], index: 0, kind: input, shape index: {}]   ;;  %s17986_s1 = inlined_call_operand.vmem [shape: f32[2,8,5], index: 1, kind: input, shape index: {}]   ;;  %s17987_s2 = inlined_call_operand.hbm [shape: f32[5,32], index: 2, kind: input, shape index: {}]   ;;  %s17988_s3 = inlined_call_operand.hbm [shape: f32[1,32], index: 3, kind: input, shape index: {}]   ;;  %s17989_s4 = inlined_call_operand.vmem [shape: f32[32,32], index: 4, kind: input, shape index: {}]   ;;  %s17990_s5 = inlined_call_operand.hbm [shape: f32[1,32], index: 5, kind: input, shape index: {}]   ;;  %s17991_s6 = inlined_call_operand.vmem [shape: f32[32,32], index: 6, kind: input, shape index: {}]   ;;  %s17992_s7 = inlined_call_operand.vmem [shape: f32[1,32], index: 7, kind: input, shape index: {}]   ;;  %s17993_s8 = inlined_call_operand.hbm [shape: f32[32,32], index: 8, kind: input, shape index: {}]   ;;  %s17994_s9 = inlined_call_operand.vmem [shape: f32[1,32], index: 9, kind: input, shape index: {}]   ;;  %s17995_s10 = inlined_call_operand.hbm [shape: f32[32,32], index: 10, kind: input, shape index: {}]   ;;  %s17996_s11 = inlined_call_operand.vmem [shape: f32[1,32], index: 11, kind: input, shape index: {}]   ;;  %s17997_s12 = inlined_call_operand.hbm [shape: f32[2,32,384], index: 12, kind: input, shape index: {}]   ;;  %s17998_s13 = inlined_call_operand.hbm [shape: f32[2,128,384], index: 13, kind: input, shape index: {}]   ;;  %s17999_s14 = inlined_call_operand.vmem [shape: f32[2,1,384], index: 14, kind: input, shape index: {}]   ;;  %s18000_s15 = inlined_call_operand.vmem [shape: f32[2,1,384], index: 15, kind: input, shape index: {}]   ;;  %s18001_s16 = inlined_call_operand.hbm [shape: f32[8,2,128], index: 16, kind: output, shape index: {0}]   ;;  %s18002_s17 = inlined_call_operand.hbm [shape: f32[8,2,128], index: 17, kind: output, shape index: {1}]  }
   0x1   :  { %18123 = sst [smem:[#allocation71_spill]] %s17985_s0 }
   0x2   :  { %18124 = sst [smem:[#allocation72_spill]] %s17986_s1 }
   0x3   :  { %23 = vsyncpa [#allocation5], 0 }
   0x4   :  { %24 = vsyncpa [#allocation8], 0 }
   0x5   :  { %25 = vsyncpa [#allocation11], 0 }
   0x6   :  { %26 = vsyncpa [#allocation14], 0 }
   0x7   :  { %27 = vsyncpa [#allocation6], 0 }
   0x8   :  { %28 = vsyncpa [#allocation18], 0  ;;  %s15771_s24 = smov [#allocation7]   ;;  %s15772_s26 = smov [#allocation10]  }
   0x9   :  { %s55_s25 = sshll.u32 %s15771_s24, 4  ;;  %s80_s27 = sshll.u32 %s15772_s26, 4  ;;  %s56_s25 = int_to_ptr.vmem [resolvable:$true] %s55_s25  ;;  %s15879_s27 = int_to_ptr.vmem [resolvable:$true] %s80_s27 }
   0xa   :  { %s15561_s0 = scalar_lea.hbm %s17988_s3, 16 }
   0xb   :  { %p15562_p0 = scmp.ne.s32.totalorder %s17988_s3, %s15561_s0  ;;  %p15565_p1 = scmp.lt.u32.totalorder %s15561_s0, %s17988_s3 }
   0xd   :  { %p15567_p2 = pnand %p15565_p1, %p15562_p0 }
   0xf   :  { %15570 = shalt.err (!%p15567_p2)
}
  0x10   :  { %s15571_s20 = scalar_lea.vmem %s56_s25, 16  ;;  %s15575_s21 = scalar_lea.vmem %s56_s25, 32 }
  0x11   :  { %p15572_p3 = scmp.ne.s32.totalorder %s56_s25, %s15571_s20  ;;  %p15576_p4 = scmp.lt.s32.totalorder %s56_s25, %s56_s25 }
  0x12   :  { %p15577_p5 = scmp.lt.s32.totalorder %s15575_s21, %s15571_s20 }
  0x14   :  { %p15578_p6 = por %p15577_p5, %p15576_p4 }
  0x16   :  { %p15579_p7 = pnand %p15578_p6, %p15572_p3 }
  0x18   :  { %15582 = shalt.err (!%p15579_p7)
}
  0x19   :  { %58 = dma.hbm_to_vmem [thread:$0]  %s17988_s3, 16, %s56_s25, [#allocation8]  }
  0x1a   :  { %s15583_s28 = scalar_lea.hbm %s17993_s8, 512 }
  0x1b   :  { %p15584_p8 = scmp.ne.s32.totalorder %s17993_s8, %s15583_s28  ;;  %p15587_p9 = scmp.lt.u32.totalorder %s15583_s28, %s17993_s8 }
  0x1d   :  { %p15589_p10 = pnand %p15587_p9, %p15584_p8 }
  0x1f   :  { %15592 = shalt.err (!%p15589_p10)
}
  0x20   :  { %s15593_s19 = scalar_lea.vmem %s15879_s27, 512  ;;  %p15598_p12 = scmp.lt.s32.totalorder %s15879_s27, %s15879_s27 }
  0x21   :  { %p15594_p11 = scmp.ne.s32.totalorder %s15879_s27, %s15593_s19  ;;  %p15599_p13 = scmp.lt.s32.totalorder %s15593_s19, %s15593_s19 }
  0x23   :  { %p15600_p0 = por %p15599_p13, %p15598_p12 }
  0x25   :  { %p15601_p1 = pnand %p15600_p0, %p15594_p11 }
  0x27   :  { %15604 = shalt.err (!%p15601_p1)
}
  0x28   :  { %s18005_s3 = smov 128   ;;  %s15774_s25 = smov 8  }
  0x29   :  { %86 = dma.hbm_to_vmem [thread:$0]  %s17993_s8, 512, %s15879_s27, [#allocation11], %s18005_s3, %s18005_s3, %s15774_s25  }
  0x2a   :  { %s15775_s21 = smov [#allocation13]   ;;  %s15605_s26 = scalar_lea.hbm %s17997_s12, 3072 }
  0x2b   :  { %s108_s22 = sshll.u32 %s15775_s21, 4  ;;  %p15606_p2 = scmp.ne.s32.totalorder %s17997_s12, %s15605_s26  ;;  %s109_s22 = int_to_ptr.vmem [resolvable:$true] %s108_s22 }
  0x2c   :  { %p15609_p3 = scmp.lt.u32.totalorder %s15605_s26, %s17997_s12 }
  0x2e   :  { %p15611_p4 = pnand %p15609_p3, %p15606_p2 }
  0x30   :  { %15614 = shalt.err (!%p15611_p4)
}
  0x31   :  { %s15615_s18 = scalar_lea.vmem %s109_s22, 3072  ;;  %p15620_p6 = scmp.lt.s32.totalorder %s109_s22, %s109_s22 }
  0x32   :  { %p15616_p5 = scmp.ne.s32.totalorder %s109_s22, %s15615_s18  ;;  %p15621_p7 = scmp.lt.s32.totalorder %s15615_s18, %s15615_s18 }
  0x34   :  { %p15622_p8 = por %p15621_p7, %p15620_p6 }
  0x36   :  { %p15623_p9 = pnand %p15622_p8, %p15616_p5 }
  0x38   :  { %15626 = shalt.err (!%p15623_p9)
}
  0x39   :  { %s15776_s8 = smov 384   ;;  %s15777_s27 = smov 24  }
  0x3a   :  { %114 = dma.hbm_to_vmem [thread:$0]  %s17997_s12, 3072, %s109_s22, [#allocation14], %s15776_s8, %s15776_s8, %s15777_s27  }
  0x3b   :  { %s15778_s20 = smov [#allocation4]   ;;  %s15779_s23 = smov [#allocation9]  }
  0x3c   :  { %s45_s21 = sshll.u32 %s15778_s20, 4  ;;  %s67_s24 = sshll.u32 %s15779_s23, 4  ;;  %s46_s21 = int_to_ptr.vmem [resolvable:$true] %s45_s21  ;;  %s68_s24 = int_to_ptr.vmem [resolvable:$true] %s67_s24 }
  0x3d   :  { %s15627_s29 = scalar_lea.hbm %s17987_s2, 128 }
  0x3e   :  { %p15628_p10 = scmp.ne.s32.totalorder %s17987_s2, %s15627_s29  ;;  %p15631_p11 = scmp.lt.u32.totalorder %s15627_s29, %s17987_s2 }
  0x40   :  { %p15633_p12 = pnand %p15631_p11, %p15628_p10 }
  0x42   :  { %15636 = shalt.err (!%p15633_p12)
}
  0x43   :  { %s15637_s12 = scalar_lea.vmem %s46_s21, 128  ;;  %p15642_p0 = scmp.lt.s32.totalorder %s46_s21, %s46_s21 }
  0x44   :  { %p15638_p13 = scmp.ne.s32.totalorder %s46_s21, %s15637_s12  ;;  %p15643_p1 = scmp.lt.s32.totalorder %s15637_s12, %s15637_s12 }
  0x46   :  { %p15644_p2 = por %p15643_p1, %p15642_p0 }
  0x48   :  { %p15645_p3 = pnand %p15644_p2, %p15638_p13 }
  0x4a   :  { %15648 = shalt.err (!%p15645_p3)
}
  0x4b   :  { %48 = dma.hbm_to_vmem [thread:$0]  %s17987_s2, 128, %s46_s21, [#allocation5]  }
  0x4c   :  { %s15649_s23 = scalar_lea.hbm %s17990_s5, 16 }
  0x4d   :  { %p15650_p4 = scmp.ne.s32.totalorder %s17990_s5, %s15649_s23  ;;  %p15653_p5 = scmp.lt.u32.totalorder %s15649_s23, %s17990_s5 }
  0x4f   :  { %p15655_p6 = pnand %p15653_p5, %p15650_p4 }
  0x51   :  { %15658 = shalt.err (!%p15655_p6)
}
  0x52   :  { %s15659_s0 = scalar_lea.vmem %s68_s24, 16  ;;  %s15663_s30 = scalar_lea.vmem %s68_s24, 32 }
  0x53   :  { %p15660_p7 = scmp.ne.s32.totalorder %s68_s24, %s15659_s0  ;;  %p15664_p8 = scmp.lt.s32.totalorder %s68_s24, %s68_s24 }
  0x54   :  { %p15665_p9 = scmp.lt.s32.totalorder %s15663_s30, %s15659_s0 }
  0x56   :  { %p15666_p10 = por %p15665_p9, %p15664_p8 }
  0x58   :  { %p15667_p11 = pnand %p15666_p10, %p15660_p7 }
  0x5a   :  { %15670 = shalt.err (!%p15667_p11)
}
  0x5b   :  { %70 = dma.hbm_to_vmem [thread:$0]  %s17990_s5, 16, %s68_s24, [#allocation8]  }
  0x5c   :  { %s15780_s18 = smov [#allocation12]   ;;  %s15781_s22 = smov [#allocation15]  }
  0x5d   :  { %s94_s12 = sshll.u32 %s15780_s18, 4  ;;  %s120_s19 = sshll.u32 %s15781_s22, 4  ;;  %s95_s12 = int_to_ptr.vmem [resolvable:$true] %s94_s12  ;;  %s121_s19 = int_to_ptr.vmem [resolvable:$true] %s120_s19 }
  0x5e   :  { %s15671_s23 = scalar_lea.hbm %s17995_s10, 512 }
  0x5f   :  { %p15672_p12 = scmp.ne.s32.totalorder %s17995_s10, %s15671_s23  ;;  %p15675_p13 = scmp.lt.u32.totalorder %s15671_s23, %s17995_s10 }
  0x61   :  { %p15677_p0 = pnand %p15675_p13, %p15672_p12 }
  0x63   :  { %15680 = shalt.err (!%p15677_p0)
}
  0x64   :  { %s15681_s5 = scalar_lea.vmem %s95_s12, 512  ;;  %p15686_p2 = scmp.lt.s32.totalorder %s95_s12, %s95_s12 }
  0x65   :  { %p15682_p1 = scmp.ne.s32.totalorder %s95_s12, %s15681_s5  ;;  %p15687_p3 = scmp.lt.s32.totalorder %s15681_s5, %s15681_s5 }
  0x67   :  { %p15688_p4 = por %p15687_p3, %p15686_p2 }
  0x69   :  { %p15689_p5 = pnand %p15688_p4, %p15682_p1 }
  0x6b   :  { %15692 = shalt.err (!%p15689_p5)
}
  0x6c   :  { %s18125_s24 = smov 128   ;;  %s15693_s18 = scalar_lea.hbm %s17998_s13, 12288 }
  0x6d   :  { %100 = dma.hbm_to_vmem [thread:$0]  %s17995_s10, 512, %s95_s12, [#allocation11], %s18125_s24, %s18125_s24, %s15774_s25  }
  0x6e   :  { %p15694_p6 = scmp.ne.s32.totalorder %s17998_s13, %s15693_s18  ;;  %p15697_p7 = scmp.lt.u32.totalorder %s15693_s18, %s17998_s13 }
  0x70   :  { %p15699_p8 = pnand %p15697_p7, %p15694_p6 }
  0x72   :  { %15702 = shalt.err (!%p15699_p8)
}
  0x73   :  { %s15703_s3 = scalar_lea.vmem %s121_s19, 12288  ;;  %p15708_p10 = scmp.lt.s32.totalorder %s121_s19, %s121_s19 }
  0x74   :  { %p15704_p9 = scmp.ne.s32.totalorder %s121_s19, %s15703_s3  ;;  %p15709_p11 = scmp.lt.s32.totalorder %s15703_s3, %s15703_s3 }
  0x76   :  { %p15710_p12 = por %p15709_p11, %p15708_p10 }
  0x78   :  { %p15711_p13 = pnand %p15710_p12, %p15704_p9 }
  0x7a   :  { %15714 = shalt.err (!%p15711_p13)
}
  0x7b   :  { %126 = dma.hbm_to_vmem [thread:$0]  %s17998_s13, 12288, %s121_s19, [#allocation14], %s15776_s8, %s15776_s8, %s15777_s27  }
  0x7c   :  { %15759 = dma.done.wait [#allocation5], 128  }
  0x7d   :  { %15760 = vsyncadd [#allocation5], 4294967168 }
  0x7e   :  { %15761 = dma.done.wait [#allocation8], 32  }
  0x7f   :  { %15762 = vsyncadd [#allocation8], 4294967264 }
  0x80   :  { %15763 = dma.done.wait [#allocation11], 1024  }
  0x81   :  { %15764 = vsyncadd [#allocation11], 4294966272 }
  0x82   :  { %15765 = dma.done.wait [#allocation14], 15360  }
  0x83   :  { %15766 = vsyncadd [#allocation14], 4294951936  ;;  %v18008_v0 = vmov 0.0   ;;  %vm15783_vm0 = vmmov 0   ;;  %v18006_v1 = vmov 0.0|0.0   ;;  %vm341_vm1 = vcmask 1044480  }
  0x84   :  { %12227 = vmatprep.subr.mxu0 %v18008_v0  ;;  %169 = vst [vmem:[#allocation2] sm:$0x3] %v18008_v0  ;;  %170 = vst [vmem:[#allocation3] sm:$0x3] %v18008_v0  ;;  %12229 = vmatprep.mubr.msk.f32.mxu0 %vm15783_vm0, %v18008_v0  ;;  %v15990_v2 = vld [vmem:[#allocation4] sm:$0x1f] }
  0x85   :  { %13747 = vmatprep.subr.bf16.mxu1 %v18006_v1  ;;  %12240 = vmatprep.mubr.msk.f32.mxu1 %vm15783_vm0, %v18008_v0  ;;  %s18126_s27 = sld [smem:[#allocation71_spill]]  ;;  %vm336_vm2 = vcmask 1041409   ;;  %vm338_vm3 = vcmask 39936   ;;  %v177_v6 = vld [vmem:[%s17989_s4] sm:$0xff]  ;;  %v178_v7 = vld [vmem:[%s17989_s4 + $0x8] sm:$0xff]  ;;  %v179_v10 = vld [vmem:[%s17989_s4 + $0x10] sm:$0xff] }
  0x86   :  { %12228 = vmatpush3.msk.msra.mxu0 %vm341_vm1, %v15990_v2  ;;  %v16011_v8 = vpack.c.bf16 %v178_v7, %v177_v6  ;;  %v180_v11 = vld [vmem:[%s17989_s4 + $0x18] sm:$0xff]  ;;  %v182_v13 = vld [vmem:[%s17991_s6] sm:$0xff]  ;;  %v183_v14 = vld [vmem:[%s17991_s6 + $0x8] sm:$0xff]  ;;  %vm422_vm4 = vcmask 261120   ;;  %s18135_s28 = sld [smem:[#allocation72_spill]] }
  0x87   :  { %13753 = vmatprep.subr.bf16.mxu0 %v18006_v1  ;;  %v16027_v12 = vpack.c.bf16 %v180_v11, %v179_v10  ;;  %v16037_v15 = vpack.c.bf16 %v183_v14, %v182_v13  ;;  %v16041_v16 = vld [vmem:[#allocation7] ss:$0 sm:$0xff]  ;;  %v184_v21 = vld [vmem:[%s17991_s6 + $0x10] sm:$0xff]  ;;  %v187_v24 = vld [vmem:[#allocation10] sm:$0xff] }
  0x88   :  { %13749 = vmatpush3.bf16.msra.mxu1 %v16011_v8  ;;  %v185_v22 = vld [vmem:[%s17991_s6 + $0x18] sm:$0xff]  ;;  %v188_v25 = vld [vmem:[#allocation10 + $0x8] sm:$0xff]  ;;  %v189_v32 = vld [vmem:[#allocation10 + $0x10] sm:$0xff] }
  0x89   :  { %13750 = vmatprep.subr.bf16.mxu1 %v18006_v1  ;;  %v16053_v23 = vpack.c.bf16 %v185_v22, %v184_v21  ;;  %v16057_v26 = vpack.c.bf16 %v188_v25, %v187_v24  ;;  %v16061_v27 = vld [vmem:[#allocation9] ss:$0 sm:$0xff]  ;;  %v192_v35 = vld [vmem:[#allocation12] sm:$0xff]  ;;  %v193_v36 = vld [vmem:[#allocation12 + $0x8] sm:$0xff] }
  0x8a   :  { %v190_v33 = vld [vmem:[#allocation10 + $0x18] sm:$0xff]  ;;  %v16070_v37 = vpack.c.bf16 %v193_v36, %v192_v35  ;;  %v16077_v38 = vld [vmem:[%s17992_s7] ss:$0 sm:$0xff]  ;;  %v194_v43 = vld [vmem:[#allocation12 + $0x10] sm:$0xff] }
  0x8b   :  { %v15995_v3 = vld [vmem:[%s18126_s27] sm:$0xff]  ;;  %v16000_v4 = vld [vmem:[%s18126_s27 + $0x8] sm:$0xff]  ;;  %v16067_v34 = vpack.c.bf16 %v190_v33, %v189_v32  ;;  %v195_v44 = vld [vmem:[#allocation12 + $0x18] sm:$0xff] }
  0x8c   :  { %v335_v5 = vrot.slane %v16000_v4, 7  ;;  %13752 = vmatpush3.bf16.msra.mxu1 %v16027_v12  ;;  %v16082_v45 = vpack.c.bf16 %v195_v44, %v194_v43  ;;  %v198_v46 = vld [vmem:[#allocation13 + $0x8] sm:$0xff]  ;;  %v201_v47 = vld [vmem:[#allocation13 + $0x20] sm:$0xff]  ;;  %v200_v50 = vld [vmem:[#allocation13 + $0x18] sm:$0xff] }
  0x8d   :  { %13759 = vmatprep.subr.bf16.mxu1 %v18006_v1  ;;  %v197_v48 = vld [vmem:[#allocation13] sm:$0xff]  ;;  %v16086_v49 = vpack.c.bf16 %v201_v47, %v198_v46  ;;  %v199_v53 = vld [vmem:[#allocation13 + $0x10] sm:$0xff]  ;;  %v202_v54 = vld [vmem:[#allocation13 + $0x28] sm:$0xff] }
  0x8e   :  { %v337_v9 = vsel %vm336_vm2, %v335_v5, %v15995_v3  ;;  %v16088_v51 = vpack.c.bf16 %v200_v50, %v197_v48  ;;  %v16095_v52 = vld [vmem:[%s17994_s9] ss:$0 sm:$0xff]  ;;  %v16098_v58 = vpack.c.bf16 %v202_v54, %v199_v53  ;;  %v204_v60 = vld [vmem:[#allocation13 + $0x38] sm:$0xff]  ;;  %v207_v61 = vld [vmem:[#allocation13 + $0x50] sm:$0xff] }
  0x8f   :  { %12230 = vmatmul.mubr.msk.f32.vlgmr.msra.gmra.mrb[0].mxu0 %vm338_vm3, %v337_v9  ;;  %18127 = vst [vmem:[#allocation25_spill] sm:$0xff] %v16086_v49  ;;  %v16105_v62 = vpack.c.bf16 %v207_v61, %v204_v60  ;;  %v203_v63 = vld [vmem:[#allocation13 + $0x30] sm:$0xff]  ;;  %v206_v5 = vld [vmem:[#allocation13 + $0x48] sm:$0xff]  ;;  %v205_v7 = vld [vmem:[#allocation13 + $0x40] sm:$0xff] }
  0x90   :  { %12251 = vmatprep.mubr.msk.f32.mxu0 %vm15783_vm0, %v18008_v0  ;;  %13755 = vmatpush3.bf16.msra.mxu0 %v16037_v15  ;;  %v16107_v6 = vpack.c.bf16 %v206_v5, %v203_v63  ;;  %v208_v9 = vld [vmem:[#allocation13 + $0x58] sm:$0xff]  ;;  %v223_v11 = vld [vmem:[#allocation15 + $0x8] sm:$0xff]  ;;  %v226_v13 = vld [vmem:[#allocation15 + $0x20] sm:$0xff] }
  0x91   :  { %13756 = vmatprep.subr.bf16.mxu0 %v18006_v1  ;;  %v16110_v10 = vpack.c.bf16 %v208_v9, %v205_v7  ;;  %v16114_v14 = vpack.c.bf16 %v226_v13, %v223_v11  ;;  %v227_v21 = vld [vmem:[#allocation15 + $0x28] sm:$0xff]  ;;  %v229_v24 = vld [vmem:[#allocation15 + $0x38] sm:$0xff]  ;;  %v232_v25 = vld [vmem:[#allocation15 + $0x50] sm:$0xff] }
  0x92   :  { %v16128_v35 = vpack.c.bf16 %v232_v25, %v229_v24  ;;  %v231_v36 = vld [vmem:[#allocation15 + $0x48] sm:$0xff]  ;;  %v234_v44 = vld [vmem:[#allocation15 + $0x60] sm:$0xff]  ;;  %v237_v48 = vld [vmem:[#allocation15 + $0x78] sm:$0xff] }
  0x93   :  { %v236_v50 = vld [vmem:[#allocation15 + $0x70] sm:$0xff]  ;;  %v239_v53 = vld [vmem:[#allocation15 + $0x88] sm:$0xff]  ;;  %v241_v54 = vld [vmem:[#allocation15 + $0x98] sm:$0xff] }
  0x94   :  { %13758 = vmatpush3.bf16.msra.mxu0 %v16053_v23  ;;  %v243_v61 = vld [vmem:[#allocation15 + $0xa8] sm:$0xff]  ;;  %v242_v63 = vld [vmem:[#allocation15 + $0xa0] sm:$0xff]  ;;  %v245_v5 = vld [vmem:[#allocation15 + $0xb8] sm:$0xff] }
  0x95   :  { %13765 = vmatprep.subr.bf16.mxu0 %v18006_v1  ;;  %v247_v7 = vld [vmem:[#allocation15 + $0xc8] sm:$0xff]  ;;  %v250_v9 = vld [vmem:[#allocation15 + $0xe0] sm:$0xff]  ;;  %v253_v24 = vld [vmem:[#allocation15 + $0xf8] sm:$0xff] }
  0x96   :  { %v246_v13 = vld [vmem:[#allocation15 + $0xc0] sm:$0xff]  ;;  %v256_v25 = vld [vmem:[#allocation15 + $0x110] sm:$0xff] }
 0x162   :  { %v411_v17 = vpop.f32.mrb[0].mxu0 }
 0x163   :  { %v412_v18 = vadd.f32 %v16041_v16, %v411_v17  ;;  %v12231_v19 = vpop.f32.mrb[1].mxu0  ;;  %v16121_v17 = vld [vmem:[%s17996_s11] ss:$0 sm:$0xff] }
 0x164   :  { %v225_v19 = vld [vmem:[#allocation15 + $0x18] sm:$0xff] }
 0x165   :  { %v415_v20 = vmax.f32 %v412_v18, 0.0  ;;  %v222_v18 = vld [vmem:[#allocation15] sm:$0xff] }
 0x167   :  { %12241 = vmatmul.mubr.msk.f32.vlgmr.msra.gmra.mrb[0].mxu1 %vm422_vm4, %v415_v20  ;;  %v224_v20 = vld [vmem:[#allocation15 + $0x10] sm:$0xff] }
 0x168   :  { %12262 = vmatprep.mubr.msk.f32.mxu1 %vm15783_vm0, %v18008_v0  ;;  %13761 = vmatpush3.bf16.msra.mxu1 %v16057_v26  ;;  %v16126_v32 = vpack.c.bf16 %v227_v21, %v224_v20  ;;  %v249_v20 = vld [vmem:[#allocation15 + $0xd8] sm:$0xff]  ;;  %v248_v21 = vld [vmem:[#allocation15 + $0xd0] sm:$0xff] }
 0x169   :  { %13762 = vmatprep.subr.bf16.mxu1 %v18006_v1 }
 0x16c   :  { %13764 = vmatpush3.bf16.msra.mxu1 %v16067_v34 }
 0x16d   :  { %13772 = vmatprep.subr.bf16.mxu1 %v16086_v49 }
 0x23a   :  { %v492_v28 = vpop.f32.mrb[0].mxu1 }
 0x23b   :  { %v493_v29 = vadd.f32 %v16061_v27, %v492_v28  ;;  %v12242_v30 = vpop.f32.mrb[1].mxu1 }
 0x23c   :  { %v16124_v30 = vpack.c.bf16 %v225_v19, %v222_v18  ;;  %v16159_v18 = vpack.c.bf16 %v245_v5, %v242_v63  ;;  %v16162_v19 = vpack.c.bf16 %v250_v9, %v247_v7  ;;  %v268_v63 = vld [vmem:[#allocation15 + $0x170] sm:$0xff] }
 0x23d   :  { %v496_v31 = vmax.f32 %v493_v29, 0.0  ;;  %v264_v7 = vld [vmem:[#allocation15 + $0x150] sm:$0xff] }
 0x23f   :  { %12252 = vmatmul.mubr.msk.f32.vlgmr.msra.gmra.mrb[2].mxu0 %vm422_vm4, %v496_v31  ;;  %v228_v31 = vld [vmem:[#allocation15 + $0x30] sm:$0xff] }
 0x240   :  { %12273 = vmatprep.mubr.msk.f32.mxu0 %vm15783_vm0, %v18008_v0  ;;  %13767 = vmatpush3.bf16.msra.mxu0 %v16070_v37  ;;  %v16133_v43 = vpack.c.bf16 %v231_v36, %v228_v31  ;;  %v255_v36 = vld [vmem:[#allocation15 + $0x108] sm:$0xff] }
 0x241   :  { %13768 = vmatprep.subr.bf16.mxu0 %v18006_v1 }
 0x244   :  { %13770 = vmatpush3.bf16.msra.mxu0 %v16082_v45 }
 0x245   :  { %13779 = vmatprep.subr.bf16.mxu0 %v18006_v1 }
 0x312   :  { %v572_v39 = vpop.f32.mrb[2].mxu0 }
 0x313   :  { %v573_v40 = vadd.f32 %v16077_v38, %v572_v39  ;;  %v12253_v41 = vpop.f32.mrb[3].mxu0  ;;  %v230_v39 = vld [vmem:[#allocation15 + $0x40] sm:$0xff] }
 0x314   :  { %v235_v41 = vld [vmem:[#allocation15 + $0x68] sm:$0xff] }
 0x315   :  { %v576_v42 = vmax.f32 %v573_v40, 0.0  ;;  %v233_v40 = vld [vmem:[#allocation15 + $0x58] sm:$0xff] }
 0x316   :  { %v16136_v46 = vpack.c.bf16 %v233_v40, %v230_v39  ;;  %v254_v39 = vld [vmem:[#allocation15 + $0x100] sm:$0xff]  ;;  %v257_v40 = vld [vmem:[#allocation15 + $0x118] sm:$0xff] }
 0x317   :  { %12263 = vmatmul.mubr.msk.f32.vlgmr.msra.gmra.mrb[2].mxu1 %vm422_vm4, %v576_v42  ;;  %v238_v42 = vld [vmem:[#allocation15 + $0x80] sm:$0xff] }
 0x318   :  { %820 = vmatprep.mubr.f32.mxu1 %v18008_v0  ;;  %13774 = vmatpush1.bf16.msra.mxu1 %v16088_v51  ;;  %v16139_v47 = vpack.c.bf16 %v238_v42, %v235_v41  ;;  %v259_v41 = vld [vmem:[#allocation15 + $0x128] sm:$0xff]  ;;  %v262_v42 = vld [vmem:[#allocation15 + $0x140] sm:$0xff] }
 0x319   :  { %13776 = vmatprep.subr.bf16.mxu1 %v16105_v62 }
 0x31c   :  { %13778 = vmatpush1.bf16.msra.mxu1 %v16107_v6 }
 0x31d   :  { %13786 = vmatprep.subr.bf16.mxu1 %v16114_v14 }
 0x3ea   :  { %v652_v55 = vpop.f32.mrb[2].mxu1 }
 0x3eb   :  { %v653_v56 = vadd.f32 %v16095_v52, %v652_v55  ;;  %v12264_v57 = vpop.f32.mrb[3].mxu1  ;;  %v244_v55 = vld [vmem:[#allocation15 + $0xb0] sm:$0xff] }
 0x3ec   :  { %v240_v57 = vld [vmem:[#allocation15 + $0x90] sm:$0xff]  ;;  %v16152_v60 = vpack.c.bf16 %v244_v55, %v241_v54  ;;  %v261_v54 = vld [vmem:[#allocation15 + $0x138] sm:$0xff] }
 0x3ed   :  { %v656_v59 = vmax.f32 %v653_v56, 0.0  ;;  %v16146_v56 = vpack.c.bf16 %v237_v48, %v234_v44  ;;  %v16156_v11 = vpack.c.bf16 %v243_v61, %v240_v57  ;;  %v258_v48 = vld [vmem:[#allocation15 + $0x120] sm:$0xff]  ;;  %v260_v55 = vld [vmem:[#allocation15 + $0x130] sm:$0xff]  ;;  %v263_v57 = vld [vmem:[#allocation15 + $0x148] sm:$0xff] }
 0x3ee   :  { %v265_v61 = vld [vmem:[#allocation15 + $0x158] sm:$0xff]  ;;  %v16186_v5 = vpack.c.bf16 %v261_v54, %v258_v48  ;;  %v16189_v9 = vpack.c.bf16 %v263_v57, %v260_v55  ;;  %v738_v55 = vlaneseq }
 0x3ef   :  { %12274 = vmatmul.mubr.msk.f32.vlgmr.msra.gmra.mrb[4].mxu0 %vm422_vm4, %v656_v59  ;;  %v16149_v59 = vpack.c.bf16 %v239_v53, %v236_v50  ;;  %v16179_v50 = vpack.c.bf16 %v257_v40, %v254_v39  ;;  %v16182_v53 = vpack.c.bf16 %v262_v42, %v259_v41  ;;  %v16214_v39 = vld [vmem:[#allocation2] sm:$0x3] }
 0x3f0   :  { %13781 = vmatpush3.bf16.msra.mxu0 %v16098_v58  ;;  %12284 = vmatprep.mubr.msk.f32.mxu0 %vm15783_vm0, %v18008_v0  ;;  %18130 = vst [vmem:[#allocation28_spill] sm:$0xff] %v16186_v5  ;;  %18131 = vst [vmem:[#allocation29_spill] sm:$0xff] %v16189_v9  ;;  %v739_v57 = vshrl.u32 %v738_v55, 7 }
 0x3f1   :  { %13782 = vmatprep.subr.bf16.mxu0 %v18006_v1  ;;  %18128 = vst [vmem:[#allocation26_spill] sm:$0xff] %v16179_v50  ;;  %18129 = vst [vmem:[#allocation27_spill] sm:$0xff] %v16182_v53 }
 0x3f4   :  { %13784 = vmatpush3.bf16.msra.mxu0 %v16110_v10 }
 0x3f5   :  { %13817 = vmatprep.subr.bf16.mxu0 %v18006_v1 }
 0x4c2   :  { %v732_v22 = vpop.f32.mrb[4].mxu0 }
 0x4c3   :  { %v733_v28 = vadd.f32 %v16121_v17, %v732_v22  ;;  %v12275_v29 = vpop.f32.mrb[5].mxu0  ;;  %v251_v22 = vld [vmem:[#allocation15 + $0xe8] sm:$0xff] }
 0x4c4   :  { %v252_v29 = vld [vmem:[#allocation15 + $0xf0] sm:$0xff]  ;;  %v16169_v31 = vpack.c.bf16 %v251_v22, %v248_v21  ;;  %v266_v21 = vld [vmem:[#allocation15 + $0x160] sm:$0xff]  ;;  %v269_v22 = vld [vmem:[#allocation15 + $0x178] sm:$0xff] }
 0x4c5   :  { %v736_v33 = vmax.f32 %v733_v28, 0.0  ;;  %v16166_v28 = vpack.c.bf16 %v249_v20, %v246_v13  ;;  %v16176_v44 = vpack.c.bf16 %v255_v36, %v252_v29  ;;  %v16192_v13 = vpack.c.bf16 %v268_v63, %v265_v61  ;;  %v267_v20 = vld [vmem:[#allocation15 + $0x168] sm:$0xff]  ;;  %v16205_v29 = vld [vmem:[%s18135_s28] sm:$0xff] }
 0x4c6   :  { %18136 = vst [vmem:[#allocation33_spill] sm:$0xff] %v16205_v29  ;;  %v16210_v36 = vld [vmem:[%s18135_s28 + $0x8] sm:$0xff]  ;;  %v1078_v40 = vrot.slane %v16205_v29, 7  ;;  %v16242_v61 = vsub.s32 0, %v739_v57  ;;  %v322_v63 = vld [vmem:[%s18000_s15] sm:$0x7] }
 0x4c7   :  { %11369 = vmatmul.mubr.msk.f32.vlgmr.msra.gmra.mrb[4].mxu1 %vm422_vm4, %v736_v33  ;;  %12285 = vmatmul.mubr.msk.f32.vlgmr.msra.gmra.mrb[6].mxu0 %vm422_vm4, %v736_v33  ;;  %v16172_v33 = vpack.c.bf16 %v256_v25, %v253_v24  ;;  %18132 = vst [vmem:[#allocation30_spill] sm:$0xff] %v16192_v13  ;;  %v16196_v24 = vpack.c.bf16 %v267_v20, %v264_v7  ;;  %18137 = vst [vmem:[#allocation34_spill] sm:$0xff] %v16210_v36  ;;  %v1079_v41 = vrot.slane %v16210_v36, 6  ;;  %v319_v7 = vld [vmem:[%s17999_s14] sm:$0x7] }
 0x4c8   :  { %13788 = vmatpush1.bf16.msra.mxu1 %v16124_v30  ;;  %13819 = vmatpush3.bf16.msra.mxu0 %v16126_v32  ;;  %v16199_v25 = vpack.c.bf16 %v269_v22, %v266_v21  ;;  %v16250_v20 = vsub.s32 1, %v739_v57  ;;  %v741_v21 = vrot.slane %v319_v7, %v16242_v61  ;;  %v901_v22 = vrot.slane %v322_v63, %v16242_v61 }
 0x4c9   :  { %13790 = vmatprep.subr.bf16.mxu1 %v16128_v35  ;;  %13820 = vmatprep.subr.bf16.mxu0 %v18006_v1  ;;  %18133 = vst [vmem:[#allocation31_spill] sm:$0xff] %v16196_v24  ;;  %v1080_v42 = vsel %vm336_vm2, %v1079_v41, %v1078_v40 }
 0x4ca   :  { %977 = vmatprep.mubr.f32.mxu1 %v18008_v0  ;;  %12319 = vmatprep.mubr.msk.f32.mxu0 %vm15783_vm0, %v18008_v0  ;;  %18134 = vst [vmem:[#allocation32_spill] sm:$0xff] %v16199_v25  ;;  %v745_v40 = vrot.slane %v319_v7, %v16250_v20  ;;  %v905_v41 = vrot.slane %v322_v63, %v16250_v20 }
 0x4cc   :  { %13792 = vmatpush1.bf16.msra.mxu1 %v16133_v43  ;;  %13822 = vmatpush3.bf16.msra.mxu0 %v16136_v46  ;;  %v16258_v55 = vadd.f32 %v905_v41, %v745_v40 }
 0x4cd   :  { %13794 = vmatprep.subr.bf16.mxu1 %v16139_v47  ;;  %13823 = vmatprep.subr.bf16.mxu0 %v18006_v1 }
 0x4ce   :  { %18139 = vst [vmem:[#allocation36_spill] sm:$0xff] %v16258_v55 }
 0x4d0   :  { %13796 = vmatpush1.bf16.msra.mxu1 %v16146_v56  ;;  %13825 = vmatpush3.bf16.msra.mxu0 %v16149_v59 }
 0x4d1   :  { %13798 = vmatprep.subr.bf16.mxu1 %v16152_v60  ;;  %13826 = vmatprep.subr.bf16.mxu0 %v18006_v1 }
 0x4d4   :  { %13800 = vmatpush1.bf16.msra.mxu1 %v16156_v11  ;;  %13828 = vmatpush3.bf16.msra.mxu0 %v16159_v18 }
 0x4d5   :  { %13802 = vmatprep.subr.bf16.mxu1 %v16162_v19  ;;  %13829 = vmatprep.subr.bf16.mxu0 %v18006_v1 }
 0x4d8   :  { %13804 = vmatpush1.bf16.msra.mxu1 %v16166_v28  ;;  %13831 = vmatpush3.bf16.msra.mxu0 %v16169_v31 }
 0x4d9   :  { %13806 = vmatprep.subr.bf16.mxu1 %v16172_v33  ;;  %13832 = vmatprep.subr.bf16.mxu0 %v18006_v1 }
 0x4dc   :  { %13808 = vmatpush1.bf16.msra.mxu1 %v16176_v44  ;;  %13834 = vmatpush3.bf16.msra.mxu0 %v16179_v50 }
 0x4dd   :  { %13810 = vmatprep.subr.bf16.mxu1 %v16182_v53  ;;  %13835 = vmatprep.subr.bf16.mxu0 %v18006_v1 }
 0x4e0   :  { %13812 = vmatpush1.bf16.msra.mxu1 %v16186_v5  ;;  %13837 = vmatpush3.bf16.msra.mxu0 %v16189_v9 }
 0x4e1   :  { %13814 = vmatprep.subr.bf16.mxu1 %v16192_v13  ;;  %13838 = vmatprep.subr.bf16.mxu0 %v18006_v1 }
 0x4e4   :  { %13816 = vmatpush1.bf16.msra.mxu1 %v16196_v24  ;;  %13840 = vmatpush3.bf16.msra.mxu0 %v16199_v25 }
 0x4e5   :  { %12322 = vmatprep.subr.mxu1 %v18008_v0  ;;  %13841 = vmatprep.subr.bf16.mxu0 %v18006_v1 }
 0x4e7   :  { %978 = vmatmul.mubr.f32.vlgmr.msra.gmra.mrb[4].mxu1 %v16214_v39  ;;  %12320 = vmatmul.mubr.f32.vlgmr.msra.gmra.mrb[8].mxu0 %v16214_v39 }
 0x4e8   :  { %12323 = vmatpush3.msk.msra.mxu1 %vm341_vm1, %v15990_v2  ;;  %12324 = vmatprep.mubr.msk.f32.mxu1 %vm15783_vm0, %v18008_v0 }
 0x4e9   :  { %13843 = vmatpush3.bf16.msra.mxu0 %v16011_v8  ;;  %12335 = vmatprep.mubr.msk.f32.mxu0 %vm15783_vm0, %v18008_v0 }
 0x4ea   :  { %13844 = vmatprep.subr.bf16.mxu0 %v18006_v1  ;;  %13847 = vmatprep.subr.bf16.mxu1 %v18006_v1 }
 0x4eb   :  { %12325 = vmatmul.mubr.msk.f32.vlgmr.msra.gmra.mrb[6].mxu1 %vm338_vm3, %v1080_v42  ;;  %v16256_v42 = vadd.f32 %v901_v22, %v741_v21  ;;  %v18140_v21 = vmov 0.0   ;;  %v18141_v22 = vmov 0.0|0.0  }
 0x4ec   :  { %13849 = vmatpush3.bf16.msra.mxu1 %v16037_v15  ;;  %12346 = vmatprep.mubr.msk.f32.mxu1 %vm15783_vm0, %v18008_v0 }
 0x4ed   :  { %13846 = vmatpush3.bf16.msra.mxu0 %v16027_v12  ;;  %13850 = vmatprep.subr.bf16.mxu1 %v18006_v1  ;;  %18138 = vst [vmem:[#allocation35_spill] sm:$0xff] %v16256_v42 }
 0x4ee   :  { %13853 = vmatprep.subr.bf16.mxu0 %v18006_v1 }
 0x4f0   :  { %13852 = vmatpush3.bf16.msra.mxu1 %v16053_v23 }
 0x4f1   :  { %13859 = vmatprep.subr.bf16.mxu1 %v18006_v1 }
 0x59a   :  { %v893_v48 = vpop.f32.mrb[6].mxu0 }
 0x59b   :  { %v12286_v54 = vpop.f32.mrb[7].mxu0 }
 0x5ba   :  { %v979_v54 = vpop.f32.mrb[4].mxu1  ;;  %v1050_v1 = vpop.f32.mrb[8].mxu0 }
 0x5bb   :  { %v15252_v0 = vadd.f32 %v16256_v42, %v979_v54  ;;  %v981_v36 = vpop.f32.mrb[5].mxu1  ;;  %v12321_v29 = vpop.f32.mrb[9].mxu0  ;;  %v287_v42 = vld [vmem:[#allocation15 + $0x200] sm:$0xff] }
 0x5bc   :  { %v15254_v24 = vadd.f32 %v16258_v55, %v981_v36 }
 0x5bd   :  { %v11371_v25 = vmul.f32 -1.442695, %v15252_v0 }
 0x5be   :  { %v1149_v13 = vpop.f32.mrb[6].mxu1  ;;  %v11372_v50 = vmul.f32 -1.442695, %v15254_v24 }
 0x5bf   :  { %15365 = vpow2.f32 %v11371_v25  ;;  %v1150_v9 = vadd.f32 %v16041_v16, %v1149_v13  ;;  %v12326_v5 = vpop.f32.mrb[7].mxu1  ;;  %v16269_v25 = vsub.s32 2, %v739_v57 }
 0x5c0   :  { %15367 = vpow2.f32 %v11372_v50 }
 0x5c1   :  { %v1153_v53 = vmax.f32 %v1150_v9, 0.0  ;;  %v16272_v5 = vrot.slane %v322_v63, %v16269_v25 }
 0x5c3   :  { %12336 = vmatmul.mubr.msk.f32.vlgmr.msra.gmra.mrb[10].mxu0 %vm422_vm4, %v1153_v53  ;;  %18142 = vst [vmem:[#allocation37_spill] sm:$0xff] %v16272_v5  ;;  %v16275_v53 = vrot.slane %v319_v7, %v16269_v25  ;;  %v1051_v24 = vadd.f32 %v1050_v1, %v16272_v5 }
 0x5c4   :  { %13855 = vmatpush3.bf16.msra.mxu0 %v16057_v26  ;;  %12357 = vmatprep.mubr.msk.f32.mxu0 %vm15783_vm0, %v18140_v21 }
 0x5c5   :  { %13856 = vmatprep.subr.bf16.mxu0 %v18141_v22  ;;  %18143 = vst [vmem:[#allocation38_spill] sm:$0xff] %v16275_v53  ;;  %v894_v50 = vadd.f32 %v893_v48, %v16275_v53  ;;  %v282_v53 = vld [vmem:[#allocation15 + $0x1d8] sm:$0xff] }
 0x5c8   :  { %13858 = vmatpush3.bf16.msra.mxu0 %v16067_v34 }
 0x5c9   :  { %v15366_v0 = vpop.eup %15365 }
 0x5ca   :  { %v1058_v29 = vadd.f32 1.0, %v15366_v0  ;;  %v15368_v9 = vpop.eup %15367 }
 0x5cb   :  { %v1065_v13 = vadd.f32 1.0, %v15368_v9 }
 0x5cc   :  { %15369 = vrcp.f32 %v1058_v29 }
 0x5cd   :  { %15371 = vrcp.f32 %v1065_v13 }
 0x5d6   :  { %v15370_v36 = vpop.eup %15369 }
 0x5d7   :  { %v1068_v40 = vmul.f32 %v15370_v36, %v1051_v24  ;;  %v15372_v54 = vpop.eup %15371  ;;  %v214_v36 = vld [vmem:[#allocation13 + $0x80] sm:$0xff] }
 0x5d8   :  { %v1071_v57 = vsub.f32 1.0, %v15372_v54  ;;  %v1073_v63 = vmul.f32 %v15372_v54, %v16214_v39 }
 0x5d9   :  { %v1069_v41 = vadd.f32 %v1068_v40, %v894_v50  ;;  %v210_v50 = vld [vmem:[#allocation13 + $0x60] sm:$0xff] }
 0x5db   :  { %15373 = vtanh.f32 %v1069_v41  ;;  %v213_v41 = vld [vmem:[#allocation13 + $0x78] sm:$0xff] }
 0x5dc   :  { %v16296_v54 = vpack.c.bf16 %v213_v41, %v210_v50  ;;  %v218_v50 = vld [vmem:[#allocation13 + $0xa0] sm:$0xff]  ;;  %v221_v41 = vld [vmem:[#allocation13 + $0xb8] sm:$0xff] }
 0x5de   :  { %18145 = vst [vmem:[#allocation40_spill] sm:$0xff] %v16296_v54 }
 0x5e5   :  { %v15374_v0 = vpop.eup %15373 }
 0x5e6   :  { %v1072_v29 = vmul.f32 %v15374_v0, %v1071_v57  ;;  %v212_v57 = vld [vmem:[#allocation13 + $0x70] sm:$0xff]  ;;  %v215_v0 = vld [vmem:[#allocation13 + $0x88] sm:$0xff] }
 0x5e8   :  { %v16280_v55 = vadd.f32 %v1073_v63, %v1072_v29 }
 0x5ea   :  { %1075 = vst [vmem:[#allocation16] sm:$0x3] %v16280_v55 }
 0x696   :  { %v1223_v7 = vpop.f32.mrb[10].mxu0 }
 0x697   :  { %v1224_v1 = vadd.f32 %v16061_v27, %v1223_v7  ;;  %v12337_v9 = vpop.f32.mrb[11].mxu0 }
 0x699   :  { %v1227_v5 = vmax.f32 %v1224_v1, 0.0  ;;  %v16301_v1 = vpack.c.bf16 %v215_v0, %v212_v57  ;;  %v16313_v57 = vpack.c.bf16 %v221_v41, %v218_v50  ;;  %v272_v0 = vld [vmem:[#allocation15 + $0x188] sm:$0xff]  ;;  %v281_v50 = vld [vmem:[#allocation15 + $0x1d0] sm:$0xff] }
 0x69b   :  { %12347 = vmatmul.mubr.msk.f32.vlgmr.msra.gmra.mrb[8].mxu1 %vm422_vm4, %v1227_v5  ;;  %v211_v5 = vld [vmem:[#allocation13 + $0x68] sm:$0xff]  ;;  %18146 = vst [vmem:[#allocation41_spill] sm:$0xff] %v16301_v1  ;;  %18149 = vst [vmem:[#allocation44_spill] sm:$0xff] %v16313_v57 }
 0x69c   :  { %13861 = vmatpush3.bf16.msra.mxu1 %v16070_v37  ;;  %12368 = vmatprep.mubr.msk.f32.mxu1 %vm15783_vm0, %v18140_v21  ;;  %v16294_v40 = vpack.c.bf16 %v214_v36, %v211_v5  ;;  %v219_v5 = vld [vmem:[#allocation13 + $0xa8] sm:$0xff] }
 0x69d   :  { %13862 = vmatprep.subr.bf16.mxu1 %v18141_v22 }
 0x69e   :  { %18144 = vst [vmem:[#allocation39_spill] sm:$0xff] %v16294_v40  ;;  %13866 = vmatprep.subr.bf16.mxu0 %v16294_v40  ;;  %v284_v40 = vld [vmem:[#allocation15 + $0x1e8] sm:$0xff] }
 0x6a0   :  { %13864 = vmatpush3.bf16.msra.mxu1 %v16082_v45 }
 0x6a1   :  { %13873 = vmatprep.subr.bf16.mxu1 %v18141_v22 }
 0x76e   :  { %v1297_v39 = vpop.f32.mrb[8].mxu1 }
 0x76f   :  { %v1298_v48 = vadd.f32 %v16077_v38, %v1297_v39  ;;  %v12348_v13 = vpop.f32.mrb[9].mxu1  ;;  %v217_v39 = vld [vmem:[#allocation13 + $0x98] sm:$0xff] }
 0x771   :  { %v1301_v24 = vmax.f32 %v1298_v48, 0.0  ;;  %v220_v48 = vld [vmem:[#allocation13 + $0xb0] sm:$0xff] }
 0x772   :  { %v16308_v13 = vpack.c.bf16 %v220_v48, %v217_v39  ;;  %v273_v39 = vld [vmem:[#allocation15 + $0x190] sm:$0xff]  ;;  %v276_v48 = vld [vmem:[#allocation15 + $0x1a8] sm:$0xff] }
 0x773   :  { %12358 = vmatmul.mubr.msk.f32.vlgmr.msra.gmra.mrb[12].mxu0 %vm422_vm4, %v1301_v24  ;;  %v216_v24 = vld [vmem:[#allocation13 + $0x90] sm:$0xff] }
 0x774   :  { %1533 = vmatprep.mubr.f32.mxu0 %v18140_v21  ;;  %13868 = vmatpush1.bf16.msra.mxu0 %v16296_v54  ;;  %18147 = vst [vmem:[#allocation42_spill] sm:$0xff] %v16308_v13  ;;  %v16310_v36 = vpack.c.bf16 %v219_v5, %v216_v24  ;;  %v278_v5 = vld [vmem:[#allocation15 + $0x1b8] sm:$0xff]  ;;  %v280_v54 = vld [vmem:[#allocation15 + $0x1c8] sm:$0xff] }
 0x775   :  { %13870 = vmatprep.subr.bf16.mxu0 %v16308_v13  ;;  %v277_v13 = vld [vmem:[#allocation15 + $0x1b0] sm:$0xff] }
 0x776   :  { %18148 = vst [vmem:[#allocation43_spill] sm:$0xff] %v16310_v36 }
 0x778   :  { %13872 = vmatpush1.bf16.msra.mxu0 %v16310_v36 }
 0x846   :  { %v1371_v29 = vpop.f32.mrb[12].mxu0 }
 0x847   :  { %v1372_v63 = vadd.f32 %v16095_v52, %v1371_v29  ;;  %v12359_v7 = vpop.f32.mrb[13].mxu0  ;;  %v275_v29 = vld [vmem:[#allocation15 + $0x1a0] sm:$0xff] }
 0x848   :  { %v271_v7 = vld [vmem:[#allocation15 + $0x180] sm:$0xff] }
 0x849   :  { %v1375_v9 = vmax.f32 %v1372_v63, 0.0  ;;  %v16317_v63 = vpack.c.bf16 %v275_v29, %v272_v0  ;;  %v16326_v29 = vpack.c.bf16 %v281_v50, %v278_v5  ;;  %v288_v5 = vld [vmem:[#allocation15 + $0x208] sm:$0xff]  ;;  %v290_v50 = vld [vmem:[#allocation15 + $0x218] sm:$0xff] }
 0x84b   :  { %12369 = vmatmul.mubr.msk.f32.vlgmr.msra.gmra.mrb[10].mxu1 %vm422_vm4, %v1375_v9  ;;  %18150 = vst [vmem:[#allocation45_spill] sm:$0xff] %v16317_v63  ;;  %13880 = vmatprep.subr.bf16.mxu0 %v16317_v63  ;;  %v274_v9 = vld [vmem:[#allocation15 + $0x198] sm:$0xff]  ;;  %18153 = vst [vmem:[#allocation48_spill] sm:$0xff] %v16326_v29  ;;  %v279_v63 = vld [vmem:[#allocation15 + $0x1c0] sm:$0xff] }
 0x84c   :  { %13875 = vmatpush3.bf16.msra.mxu1 %v16301_v1  ;;  %12379 = vmatprep.mubr.msk.f32.mxu1 %vm15783_vm0, %v18140_v21  ;;  %v16322_v36 = vpack.c.bf16 %v274_v9, %v271_v7  ;;  %v283_v7 = vld [vmem:[#allocation15 + $0x1e0] sm:$0xff]  ;;  %v16334_v9 = vpack.c.bf16 %v282_v53, %v279_v63 }
 0x84d   :  { %13876 = vmatprep.subr.bf16.mxu1 %v18141_v22  ;;  %v291_v63 = vld [vmem:[#allocation15 + $0x220] sm:$0xff] }
 0x84e   :  { %18151 = vst [vmem:[#allocation46_spill] sm:$0xff] %v16322_v36  ;;  %18155 = vst [vmem:[#allocation50_spill] sm:$0xff] %v16334_v9 }
 0x850   :  { %13878 = vmatpush3.bf16.msra.mxu1 %v16313_v57  ;;  %v16324_v57 = vpack.c.bf16 %v276_v48, %v273_v39  ;;  %v16337_v39 = vpack.c.bf16 %v287_v42, %v284_v40  ;;  %v286_v48 = vld [vmem:[#allocation15 + $0x1f8] sm:$0xff] }
 0x851   :  { %13911 = vmatprep.subr.bf16.mxu1 %v18141_v22  ;;  %v16344_v53 = vpack.c.bf16 %v286_v48, %v283_v7  ;;  %v295_v48 = vld [vmem:[#allocation15 + $0x240] sm:$0xff] }
 0x852   :  { %18152 = vst [vmem:[#allocation47_spill] sm:$0xff] %v16324_v57  ;;  %18156 = vst [vmem:[#allocation51_spill] sm:$0xff] %v16337_v39 }
 0x853   :  { %18157 = vst [vmem:[#allocation52_spill] sm:$0xff] %v16344_v53 }
 0x91e   :  { %v1445_v24 = vpop.f32.mrb[10].mxu1 }
 0x91f   :  { %v1446_v41 = vadd.f32 %v16121_v17, %v1445_v24  ;;  %v12370_v1 = vpop.f32.mrb[11].mxu1  ;;  %v285_v24 = vld [vmem:[#allocation15 + $0x1f0] sm:$0xff] }
 0x920   :  { %v16331_v1 = vpack.c.bf16 %v280_v54, %v277_v13  ;;  %v289_v54 = vld [vmem:[#allocation15 + $0x210] sm:$0xff]  ;;  %v16347_v42 = vpack.c.bf16 %v288_v5, %v285_v24  ;;  %v292_v13 = vld [vmem:[#allocation15 + $0x228] sm:$0xff] }
 0x921   :  { %v1449_v0 = vmax.f32 %v1446_v41, 0.0  ;;  %v293_v41 = vld [vmem:[#allocation15 + $0x230] sm:$0xff]  ;;  %v16354_v7 = vpack.c.bf16 %v292_v13, %v289_v54 }
 0x922   :  { %18154 = vst [vmem:[#allocation49_spill] sm:$0xff] %v16331_v1  ;;  %18158 = vst [vmem:[#allocation53_spill] sm:$0xff] %v16347_v42  ;;  %v16350_v40 = vpack.c.bf16 %v293_v41, %v290_v50  ;;  %v298_v50 = vld [vmem:[#allocation15 + $0x258] sm:$0xff]  ;;  %v297_v41 = vld [vmem:[#allocation15 + $0x250] sm:$0xff] }
 0x923   :  { %11379 = vmatmul.mubr.msk.f32.vlgmr.msra.gmra.mrb[14].mxu0 %vm422_vm4, %v1449_v0  ;;  %12380 = vmatmul.mubr.msk.f32.vlgmr.msra.gmra.mrb[12].mxu1 %vm422_vm4, %v1449_v0  ;;  %v294_v0 = vld [vmem:[#allocation15 + $0x238] sm:$0xff]  ;;  %18160 = vst [vmem:[#allocation55_spill] sm:$0xff] %v16354_v7  ;;  %v16364_v54 = vpack.c.bf16 %v298_v50, %v295_v48  ;;  %v301_v13 = vld [vmem:[#allocation15 + $0x270] sm:$0xff]  ;;  %v307_v50 = vld [vmem:[#allocation15 + $0x2a0] sm:$0xff] }
 0x924   :  { %13882 = vmatpush1.bf16.msra.mxu0 %v16322_v36  ;;  %13913 = vmatpush3.bf16.msra.mxu1 %v16324_v57  ;;  %18159 = vst [vmem:[#allocation54_spill] sm:$0xff] %v16350_v40  ;;  %v299_v57 = vld [vmem:[#allocation15 + $0x260] sm:$0xff]  ;;  %v16357_v24 = vpack.c.bf16 %v294_v0, %v291_v63 }
 0x925   :  { %13884 = vmatprep.subr.bf16.mxu0 %v16326_v29  ;;  %13914 = vmatprep.subr.bf16.mxu1 %v18141_v22  ;;  %v296_v29 = vld [vmem:[#allocation15 + $0x248] sm:$0xff]  ;;  %18163 = vst [vmem:[#allocation58_spill] sm:$0xff] %v16364_v54  ;;  %v303_v0 = vld [vmem:[#allocation15 + $0x280] sm:$0xff] }
 0x926   :  { %1690 = vmatprep.mubr.f32.mxu0 %v18140_v21  ;;  %12414 = vmatprep.mubr.msk.f32.mxu1 %vm15783_vm0, %v18140_v21  ;;  %18161 = vst [vmem:[#allocation56_spill] sm:$0xff] %v16357_v24  ;;  %v16360_v5 = vpack.c.bf16 %v299_v57, %v296_v29  ;;  %v304_v29 = vld [vmem:[#allocation15 + $0x288] sm:$0xff] }
 0x927   :  { %v16374_v48 = vpack.c.bf16 %v304_v29, %v301_v13  ;;  %v313_v29 = vld [vmem:[#allocation15 + $0x2d0] sm:$0xff] }
 0x928   :  { %13886 = vmatpush1.bf16.msra.mxu0 %v16331_v1  ;;  %13916 = vmatpush3.bf16.msra.mxu1 %v16334_v9  ;;  %18162 = vst [vmem:[#allocation57_spill] sm:$0xff] %v16360_v5  ;;  %v302_v9 = vld [vmem:[#allocation15 + $0x278] sm:$0xff]  ;;  %v305_v1 = vld [vmem:[#allocation15 + $0x290] sm:$0xff] }
 0x929   :  { %13888 = vmatprep.subr.bf16.mxu0 %v16337_v39  ;;  %13917 = vmatprep.subr.bf16.mxu1 %v18141_v22  ;;  %v300_v39 = vld [vmem:[#allocation15 + $0x268] sm:$0xff]  ;;  %v16370_v57 = vpack.c.bf16 %v305_v1, %v302_v9  ;;  %18166 = vst [vmem:[#allocation61_spill] sm:$0xff] %v16374_v48  ;;  %v310_v9 = vld [vmem:[#allocation15 + $0x2b8] sm:$0xff] }
 0x92a   :  { %v16367_v63 = vpack.c.bf16 %v300_v39, %v297_v41  ;;  %v309_v41 = vld [vmem:[#allocation15 + $0x2b0] sm:$0xff]  ;;  %v16384_v13 = vpack.c.bf16 %v310_v9, %v307_v50 }
 0x92b   :  { %18165 = vst [vmem:[#allocation60_spill] sm:$0xff] %v16370_v57 }
 0x92c   :  { %13890 = vmatpush1.bf16.msra.mxu0 %v16344_v53  ;;  %13919 = vmatpush3.bf16.msra.mxu1 %v16347_v42  ;;  %18164 = vst [vmem:[#allocation59_spill] sm:$0xff] %v16367_v63  ;;  %v308_v42 = vld [vmem:[#allocation15 + $0x2a8] sm:$0xff]  ;;  %v311_v53 = vld [vmem:[#allocation15 + $0x2c0] sm:$0xff]  ;;  %18169 = vst [vmem:[#allocation64_spill] sm:$0xff] %v16384_v13 }
 0x92d   :  { %13892 = vmatprep.subr.bf16.mxu0 %v16350_v40  ;;  %13920 = vmatprep.subr.bf16.mxu1 %v18141_v22  ;;  %v306_v40 = vld [vmem:[#allocation15 + $0x298] sm:$0xff]  ;;  %v16380_v1 = vpack.c.bf16 %v311_v53, %v308_v42  ;;  %v316_v42 = vld [vmem:[#allocation15 + $0x2e8] sm:$0xff] }
 0x92e   :  { %v16377_v39 = vpack.c.bf16 %v306_v40, %v303_v0  ;;  %v315_v0 = vld [vmem:[#allocation15 + $0x2e0] sm:$0xff] }
 0x92f   :  { %18168 = vst [vmem:[#allocation63_spill] sm:$0xff] %v16380_v1 }
 0x930   :  { %13894 = vmatpush1.bf16.msra.mxu0 %v16354_v7  ;;  %13922 = vmatpush3.bf16.msra.mxu1 %v16357_v24  ;;  %18167 = vst [vmem:[#allocation62_spill] sm:$0xff] %v16377_v39  ;;  %v314_v24 = vld [vmem:[#allocation15 + $0x2d8] sm:$0xff]  ;;  %v317_v7 = vld [vmem:[#allocation15 + $0x2f0] sm:$0xff] }
 0x931   :  { %13896 = vmatprep.subr.bf16.mxu0 %v16360_v5  ;;  %13923 = vmatprep.subr.bf16.mxu1 %v18141_v22  ;;  %v312_v5 = vld [vmem:[#allocation15 + $0x2c8] sm:$0xff]  ;;  %v16390_v53 = vpack.c.bf16 %v317_v7, %v314_v24  ;;  %v16402_v7 = vld [vmem:[#allocation3] sm:$0x3]  ;;  %v1790_v24 = vrot.slane %v15995_v3, 1 }
 0x932   :  { %v16387_v40 = vpack.c.bf16 %v312_v5, %v309_v41 }
 0x933   :  { %18171 = vst [vmem:[#allocation66_spill] sm:$0xff] %v16390_v53  ;;  %v1791_v5 = vsel %vm336_vm2, %v16000_v4, %v1790_v24  ;;  %v11357_v4 = vld [vmem:[%s18000_s15 + $0x3] sm:$0x7] }
 0x934   :  { %13898 = vmatpush1.bf16.msra.mxu0 %v16364_v54  ;;  %13925 = vmatpush3.bf16.msra.mxu1 %v16367_v63  ;;  %18170 = vst [vmem:[#allocation65_spill] sm:$0xff] %v16387_v40  ;;  %v16394_v63 = vpack.c.bf16 %v316_v42, %v313_v29  ;;  %v1614_v41 = vrot.slane %v11357_v4, %v16242_v61 }
 0x935   :  { %13900 = vmatprep.subr.bf16.mxu0 %v16370_v57  ;;  %13926 = vmatprep.subr.bf16.mxu1 %v18141_v22  ;;  %v318_v57 = vld [vmem:[#allocation15 + $0x2f8] sm:$0xff]  ;;  %v1618_v42 = vrot.slane %v11357_v4, %v16250_v20 }
 0x936   :  { %18172 = vst [vmem:[#allocation67_spill] sm:$0xff] %v16394_v63  ;;  %v16397_v50 = vpack.c.bf16 %v318_v57, %v315_v0  ;;  %v11356_v57 = vld [vmem:[%s17999_s14 + $0x3] sm:$0x7] }
 0x937   :  { %v1454_v9 = vrot.slane %v11356_v57, %v16242_v61  ;;  %v1458_v29 = vrot.slane %v11356_v57, %v16250_v20 }
 0x938   :  { %13902 = vmatpush1.bf16.msra.mxu0 %v16374_v48  ;;  %13928 = vmatpush3.bf16.msra.mxu1 %v16377_v39  ;;  %18173 = vst [vmem:[#allocation68_spill] sm:$0xff] %v16397_v50 }
 0x939   :  { %13904 = vmatprep.subr.bf16.mxu0 %v16380_v1  ;;  %13929 = vmatprep.subr.bf16.mxu1 %v18141_v22  ;;  %v16440_v0 = vadd.f32 %v1614_v41, %v1454_v9 }
 0x93b   :  { %18174 = vst [vmem:[#allocation69_spill] sm:$0xff] %v16440_v0 }
 0x93c   :  { %13906 = vmatpush1.bf16.msra.mxu0 %v16384_v13  ;;  %13931 = vmatpush3.bf16.msra.mxu1 %v16387_v40 }
 0x93d   :  { %13908 = vmatprep.subr.bf16.mxu0 %v16390_v53  ;;  %13932 = vmatprep.subr.bf16.mxu1 %v18141_v22 }
 0x940   :  { %13910 = vmatpush1.bf16.msra.mxu0 %v16394_v63  ;;  %13934 = vmatpush3.bf16.msra.mxu1 %v16397_v50 }
 0x941   :  { %12417 = vmatprep.subr.mxu0 %v18140_v21  ;;  %13935 = vmatprep.subr.bf16.mxu1 %v18141_v22 }
 0x943   :  { %1691 = vmatmul.mubr.f32.vlgmr.msra.gmra.mrb[14].mxu0 %v16402_v7  ;;  %12415 = vmatmul.mubr.f32.vlgmr.msra.gmra.mrb[14].mxu1 %v16402_v7 }
 0x944   :  { %12418 = vmatpush3.msk.msra.mxu0 %vm341_vm1, %v15990_v2  ;;  %12419 = vmatprep.mubr.msk.f32.mxu0 %vm15783_vm0, %v18140_v21 }
 0x945   :  { %13937 = vmatpush3.bf16.msra.mxu1 %v16011_v8  ;;  %12430 = vmatprep.mubr.msk.f32.mxu1 %vm15783_vm0, %v18140_v21 }
 0x946   :  { %13938 = vmatprep.subr.bf16.mxu1 %v18141_v22  ;;  %13941 = vmatprep.subr.bf16.mxu0 %v18141_v22 }
 0x947   :  { %12420 = vmatmul.mubr.msk.f32.vlgmr.msra.gmra.mrb[16].mxu0 %vm338_vm3, %v1791_v5  ;;  %v16442_v5 = vadd.f32 %v1618_v42, %v1458_v29 }
 0x948   :  { %13943 = vmatpush3.bf16.msra.mxu0 %v16037_v15  ;;  %12441 = vmatprep.mubr.msk.f32.mxu0 %vm15783_vm0, %v18140_v21 }
 0x949   :  { %13940 = vmatpush3.bf16.msra.mxu1 %v16027_v12  ;;  %13944 = vmatprep.subr.bf16.mxu0 %v18141_v22  ;;  %18175 = vst [vmem:[#allocation70_spill] sm:$0xff] %v16442_v5 }
 0x94a   :  { %13947 = vmatprep.subr.bf16.mxu1 %v18141_v22 }
 0x94c   :  { %13946 = vmatpush3.bf16.msra.mxu0 %v16053_v23 }
 0x94d   :  { %13953 = vmatprep.subr.bf16.mxu0 %v18141_v22 }
 0x9f6   :  { %v1606_v2 = vpop.f32.mrb[12].mxu1 }
 0x9f7   :  { %v12381_v3 = vpop.f32.mrb[13].mxu1 }
 0xa16   :  { %v1692_v24 = vpop.f32.mrb[14].mxu0  ;;  %v1763_v3 = vpop.f32.mrb[14].mxu1 }
 0xa17   :  { %v15256_v50 = vadd.f32 %v16440_v0, %v1692_v24  ;;  %v1694_v63 = vpop.f32.mrb[15].mxu0  ;;  %v12416_v53 = vpop.f32.mrb[15].mxu1 }
 0xa18   :  { %v15258_v13 = vadd.f32 %v16442_v5, %v1694_v63 }
 0xa19   :  { %v11381_v40 = vmul.f32 -1.442695, %v15256_v50 }
 0xa1a   :  { %v1860_v1 = vpop.f32.mrb[16].mxu0  ;;  %v11382_v20 = vmul.f32 -1.442695, %v15258_v13 }
 0xa1b   :  { %15375 = vpow2.f32 %v11381_v40  ;;  %v1861_v61 = vadd.f32 %v16041_v16, %v1860_v1  ;;  %v12421_v39 = vpop.f32.mrb[17].mxu0  ;;  %v16455_v16 = vrot.slane %v11357_v4, %v16269_v25 }
 0xa1c   :  { %15377 = vpow2.f32 %v11382_v20 }
 0xa1d   :  { %v1864_v48 = vmax.f32 %v1861_v61, 0.0  ;;  %v1764_v13 = vadd.f32 %v1763_v3, %v16455_v16 }
 0xa1f   :  { %12431 = vmatmul.mubr.msk.f32.vlgmr.msra.gmra.mrb[16].mxu1 %vm422_vm4, %v1864_v48  ;;  %v16458_v48 = vrot.slane %v11356_v57, %v16269_v25 }
 0xa20   :  { %13949 = vmatpush3.bf16.msra.mxu1 %v16057_v26  ;;  %12452 = vmatprep.mubr.msk.f32.mxu1 %vm15783_vm0, %v18140_v21 }
 0xa21   :  { %13950 = vmatprep.subr.bf16.mxu1 %v18141_v22  ;;  %v1607_v50 = vadd.f32 %v1606_v2, %v16458_v48 }
 0xa24   :  { %13952 = vmatpush3.bf16.msra.mxu1 %v16067_v34 }
 0xa25   :  { %v15376_v63 = vpop.eup %15375  ;;  %13960 = vmatprep.subr.bf16.mxu1 %v16086_v49 }
 0xa26   :  { %v1771_v40 = vadd.f32 1.0, %v15376_v63  ;;  %v15378_v39 = vpop.eup %15377 }
 0xa27   :  { %v1778_v1 = vadd.f32 1.0, %v15378_v39 }
 0xa28   :  { %15379 = vrcp.f32 %v1771_v40 }
 0xa29   :  { %15381 = vrcp.f32 %v1778_v1 }
 0xa32   :  { %v15380_v53 = vpop.eup %15379 }
 0xa33   :  { %v1781_v9 = vmul.f32 %v15380_v53, %v1764_v13  ;;  %v15382_v29 = vpop.eup %15381 }
 0xa34   :  { %v1784_v42 = vsub.f32 1.0, %v15382_v29  ;;  %v1786_v4 = vmul.f32 %v15382_v29, %v16402_v7  ;;  %v18178_v29 = vld [vmem:[#allocation28_spill] sm:$0xff] }
 0xa35   :  { %v1782_v41 = vadd.f32 %v1781_v9, %v1607_v50 }
 0xa37   :  { %15383 = vtanh.f32 %v1782_v41  ;;  %v18177_v41 = vld [vmem:[#allocation27_spill] sm:$0xff] }
 0xa41   :  { %v15384_v24 = vpop.eup %15383 }
 0xa42   :  { %v1785_v61 = vmul.f32 %v15384_v24, %v1784_v42  ;;  %v18179_v42 = vld [vmem:[#allocation29_spill] sm:$0xff]  ;;  %v18180_v24 = vld [vmem:[#allocation30_spill] sm:$0xff] }
 0xa44   :  { %v16463_v20 = vadd.f32 %v1786_v4, %v1785_v61  ;;  %v18181_v61 = vld [vmem:[#allocation31_spill] sm:$0xff]  ;;  %v18182_v4 = vld [vmem:[#allocation32_spill] sm:$0xff] }
 0xa46   :  { %1789 = vst [vmem:[#allocation17 + $0xe] sm:$0x3] %v16463_v20 }
 0xaf2   :  { %v1934_v25 = vpop.f32.mrb[16].mxu1 }
 0xaf3   :  { %v1935_v57 = vadd.f32 %v16061_v27, %v1934_v25  ;;  %v12432_v3 = vpop.f32.mrb[17].mxu1  ;;  %v18183_v25 = vld [vmem:[#allocation33_spill] sm:$0xff] }
 0xaf4   :  { %v18184_v3 = vld [vmem:[#allocation34_spill] sm:$0xff] }
 0xaf5   :  { %v1938_v63 = vmax.f32 %v1935_v57, 0.0  ;;  %v2469_v57 = vrot.slane %v18183_v25, 6 }
 0xaf7   :  { %12442 = vmatmul.mubr.msk.f32.vlgmr.msra.gmra.mrb[18].mxu0 %vm422_vm4, %v1938_v63  ;;  %v2470_v63 = vrot.slane %v18184_v3, 5  ;;  %v16554_v3 = vld [vmem:[#allocation7] ss:$0 sm:$0xff] }
 0xaf8   :  { %13955 = vmatpush3.bf16.msra.mxu0 %v16070_v37  ;;  %12463 = vmatprep.mubr.msk.f32.mxu0 %vm15783_vm0, %v18140_v21 }
 0xaf9   :  { %13956 = vmatprep.subr.bf16.mxu0 %v18141_v22 }
 0xafc   :  { %13958 = vmatpush3.bf16.msra.mxu0 %v16082_v45 }
 0xafd   :  { %13967 = vmatprep.subr.bf16.mxu0 %v18141_v22 }
 0xbca   :  { %v2008_v7 = vpop.f32.mrb[18].mxu0 }
 0xbcb   :  { %v2009_v2 = vadd.f32 %v16077_v38, %v2008_v7  ;;  %v12443_v40 = vpop.f32.mrb[19].mxu0  ;;  %v16531_v7 = vld [vmem:[#allocation4] sm:$0x1f] }
 0xbcd   :  { %v2012_v27 = vmax.f32 %v2009_v2, 0.0  ;;  %v2471_v2 = vsel %vm336_vm2, %v2470_v63, %v2469_v57 }
 0xbcf   :  { %12453 = vmatmul.mubr.msk.f32.vlgmr.msra.gmra.mrb[18].mxu1 %vm422_vm4, %v2012_v27 }
 0xbd0   :  { %13962 = vmatpush1.bf16.msra.mxu1 %v16088_v51  ;;  %2228 = vmatprep.mubr.f32.mxu1 %v18140_v21 }
 0xbd1   :  { %13964 = vmatprep.subr.bf16.mxu1 %v16105_v62 }
 0xbd4   :  { %13966 = vmatpush1.bf16.msra.mxu1 %v16107_v6 }
 0xbd5   :  { %13974 = vmatprep.subr.bf16.mxu1 %v16114_v14 }
 0xca2   :  { %v2082_v39 = vpop.f32.mrb[18].mxu1 }
 0xca3   :  { %v2083_v1 = vadd.f32 %v16095_v52, %v2082_v39  ;;  %v12454_v13 = vpop.f32.mrb[19].mxu1 }
 0xca4   :  { %v18185_v13 = vld [vmem:[#allocation35_spill] sm:$0xff] }
 0xca5   :  { %v2086_v53 = vmax.f32 %v2083_v1, 0.0 }
 0xca7   :  { %12464 = vmatmul.mubr.msk.f32.vlgmr.msra.gmra.mrb[20].mxu0 %vm422_vm4, %v2086_v53 }
 0xca8   :  { %13969 = vmatpush3.bf16.msra.mxu0 %v16098_v58  ;;  %12474 = vmatprep.mubr.msk.f32.mxu0 %vm15783_vm0, %v18140_v21 }
 0xca9   :  { %13970 = vmatprep.subr.bf16.mxu0 %v18141_v22 }
 0xcac   :  { %13972 = vmatpush3.bf16.msra.mxu0 %v16110_v10 }
 0xcad   :  { %14005 = vmatprep.subr.bf16.mxu0 %v18141_v22 }
 0xd7a   :  { %v2156_v38 = vpop.f32.mrb[20].mxu0 }
 0xd7b   :  { %v2157_v50 = vadd.f32 %v16121_v17, %v2156_v38  ;;  %v12465_v9 = vpop.f32.mrb[21].mxu0  ;;  %v18176_v17 = vld [vmem:[#allocation26_spill] sm:$0xff] }
 0xd7d   :  { %v2160_v52 = vmax.f32 %v2157_v50, 0.0 }
 0xd7f   :  { %11389 = vmatmul.mubr.msk.f32.vlgmr.msra.gmra.mrb[20].mxu1 %vm422_vm4, %v2160_v52  ;;  %12475 = vmatmul.mubr.msk.f32.vlgmr.msra.gmra.mrb[22].mxu0 %vm422_vm4, %v2160_v52  ;;  %v18186_v52 = vld [vmem:[#allocation36_spill] sm:$0xff] }
 0xd80   :  { %13976 = vmatpush1.bf16.msra.mxu1 %v16124_v30  ;;  %14007 = vmatpush3.bf16.msra.mxu0 %v16126_v32 }
 0xd81   :  { %13978 = vmatprep.subr.bf16.mxu1 %v16128_v35  ;;  %14008 = vmatprep.subr.bf16.mxu0 %v18141_v22 }
 0xd82   :  { %2369 = vmatprep.mubr.f32.mxu1 %v18140_v21  ;;  %12509 = vmatprep.mubr.msk.f32.mxu0 %vm15783_vm0, %v18140_v21 }
 0xd84   :  { %13980 = vmatpush1.bf16.msra.mxu1 %v16133_v43  ;;  %14010 = vmatpush3.bf16.msra.mxu0 %v16136_v46 }
 0xd85   :  { %13982 = vmatprep.subr.bf16.mxu1 %v16139_v47  ;;  %14011 = vmatprep.subr.bf16.mxu0 %v18141_v22 }
 0xd88   :  { %13984 = vmatpush1.bf16.msra.mxu1 %v16146_v56  ;;  %14013 = vmatpush3.bf16.msra.mxu0 %v16149_v59 }
 0xd89   :  { %13986 = vmatprep.subr.bf16.mxu1 %v16152_v60  ;;  %14014 = vmatprep.subr.bf16.mxu0 %v18141_v22 }
 0xd8c   :  { %13988 = vmatpush1.bf16.msra.mxu1 %v16156_v11  ;;  %14016 = vmatpush3.bf16.msra.mxu0 %v16159_v18 }
 0xd8d   :  { %13990 = vmatprep.subr.bf16.mxu1 %v16162_v19  ;;  %14017 = vmatprep.subr.bf16.mxu0 %v18141_v22 }
 0xd90   :  { %13992 = vmatpush1.bf16.msra.mxu1 %v16166_v28  ;;  %14019 = vmatpush3.bf16.msra.mxu0 %v16169_v31 }
 0xd91   :  { %13994 = vmatprep.subr.bf16.mxu1 %v16172_v33  ;;  %14020 = vmatprep.subr.bf16.mxu0 %v18141_v22 }
 0xd94   :  { %13996 = vmatpush1.bf16.msra.mxu1 %v16176_v44  ;;  %14022 = vmatpush3.bf16.msra.mxu0 %v18176_v17 }
 0xd95   :  { %13998 = vmatprep.subr.bf16.mxu1 %v18177_v41  ;;  %14023 = vmatprep.subr.bf16.mxu0 %v18141_v22 }
 0xd98   :  { %14000 = vmatpush1.bf16.msra.mxu1 %v18178_v29  ;;  %14025 = vmatpush3.bf16.msra.mxu0 %v18179_v42 }
 0xd99   :  { %14002 = vmatprep.subr.bf16.mxu1 %v18180_v24  ;;  %14026 = vmatprep.subr.bf16.mxu0 %v18141_v22 }
 0xd9c   :  { %14004 = vmatpush1.bf16.msra.mxu1 %v18181_v61  ;;  %14028 = vmatpush3.bf16.msra.mxu0 %v18182_v4 }
 0xd9d   :  { %12512 = vmatprep.subr.mxu1 %v18140_v21  ;;  %14029 = vmatprep.subr.bf16.mxu0 %v18141_v22 }
 0xd9f   :  { %2370 = vmatmul.mubr.f32.vlgmr.msra.gmra.mrb[20].mxu1 %v16280_v55  ;;  %12510 = vmatmul.mubr.f32.vlgmr.msra.gmra.mrb[24].mxu0 %v16280_v55 }
 0xda0   :  { %12513 = vmatpush3.msk.msra.mxu1 %vm341_vm1, %v16531_v7  ;;  %12514 = vmatprep.mubr.msk.f32.mxu1 %vm15783_vm0, %v18140_v21 }
 0xda1   :  { %14031 = vmatpush3.bf16.msra.mxu0 %v16011_v8  ;;  %12525 = vmatprep.mubr.msk.f32.mxu0 %vm15783_vm0, %v18140_v21 }
 0xda2   :  { %14032 = vmatprep.subr.bf16.mxu0 %v18141_v22  ;;  %14035 = vmatprep.subr.bf16.mxu1 %v18141_v22 }
 0xda3   :  { %12515 = vmatmul.mubr.msk.f32.vlgmr.msra.gmra.mrb[22].mxu1 %vm338_vm3, %v2471_v2 }
 0xda4   :  { %14037 = vmatpush3.bf16.msra.mxu1 %v16037_v15  ;;  %12536 = vmatprep.mubr.msk.f32.mxu1 %vm15783_vm0, %v18140_v21 }
 0xda5   :  { %14034 = vmatpush3.bf16.msra.mxu0 %v16027_v12  ;;  %14038 = vmatprep.subr.bf16.mxu1 %v18141_v22 }
 0xda6   :  { %14041 = vmatprep.subr.bf16.mxu0 %v18141_v22 }
 0xda8   :  { %14040 = vmatpush3.bf16.msra.mxu1 %v16053_v23 }
 0xda9   :  { %14047 = vmatprep.subr.bf16.mxu1 %v18141_v22 }
 0xe52   :  { %v2301_v40 = vpop.f32.mrb[22].mxu0 }
 0xe53   :  { %v12476_v27 = vpop.f32.mrb[23].mxu0 }
 0xe72   :  { %v2371_v39 = vpop.f32.mrb[20].mxu1  ;;  %v2442_v1 = vpop.f32.mrb[24].mxu0 }
 0xe73   :  { %v15260_v53 = vadd.f32 %v18185_v13, %v2371_v39  ;;  %v2373_v38 = vpop.f32.mrb[21].mxu1  ;;  %v12511_v50 = vpop.f32.mrb[25].mxu0  ;;  %v18187_v39 = vld [vmem:[#allocation39_spill] sm:$0xff] }
 0xe74   :  { %v15262_v25 = vadd.f32 %v18186_v52, %v2373_v38 }
 0xe75   :  { %v11391_v9 = vmul.f32 -1.442695, %v15260_v53 }
 0xe76   :  { %v2540_v57 = vpop.f32.mrb[22].mxu1  ;;  %v11392_v61 = vmul.f32 -1.442695, %v15262_v25 }
 0xe77   :  { %15385 = vpow2.f32 %v11391_v9  ;;  %v2541_v63 = vadd.f32 %v16554_v3, %v2540_v57  ;;  %v12516_v2 = vpop.f32.mrb[23].mxu1  ;;  %v18188_v9 = vld [vmem:[#allocation37_spill] sm:$0xff]  ;;  %v18189_v57 = vld [vmem:[#allocation38_spill] sm:$0xff] }
 0xe78   :  { %15387 = vpow2.f32 %v11392_v61  ;;  %v2443_v25 = vadd.f32 %v2442_v1, %v18188_v9 }
 0xe79   :  { %v2544_v4 = vmax.f32 %v2541_v63, 0.0  ;;  %v2302_v63 = vadd.f32 %v2301_v40, %v18189_v57 }
 0xe7b   :  { %12526 = vmatmul.mubr.msk.f32.vlgmr.msra.gmra.mrb[26].mxu0 %vm422_vm4, %v2544_v4 }
 0xe7c   :  { %14043 = vmatpush3.bf16.msra.mxu0 %v16057_v26  ;;  %12547 = vmatprep.mubr.msk.f32.mxu0 %vm15783_vm0, %v18140_v21 }
 0xe7d   :  { %14044 = vmatprep.subr.bf16.mxu0 %v18141_v22 }
 0xe80   :  { %14046 = vmatpush3.bf16.msra.mxu0 %v16067_v34 }
 0xe81   :  { %v15386_v27 = vpop.eup %15385  ;;  %14054 = vmatprep.subr.bf16.mxu0 %v18187_v39 }
 0xe82   :  { %v2450_v53 = vadd.f32 1.0, %v15386_v27  ;;  %v15388_v38 = vpop.eup %15387 }
 0xe83   :  { %v2457_v50 = vadd.f32 1.0, %v15388_v38 }
 0xe84   :  { %15389 = vrcp.f32 %v2450_v53  ;;  %v16570_v53 = vld [vmem:[#allocation9] ss:$0 sm:$0xff] }
 0xe85   :  { %15391 = vrcp.f32 %v2457_v50  ;;  %v18191_v50 = vld [vmem:[#allocation42_spill] sm:$0xff] }
 0xe8e   :  { %v15390_v4 = vpop.eup %15389 }
 0xe8f   :  { %v2460_v2 = vmul.f32 %v15390_v4, %v2443_v25  ;;  %v15392_v13 = vpop.eup %15391  ;;  %v18192_v25 = vld [vmem:[#allocation43_spill] sm:$0xff]  ;;  %v18193_v4 = vld [vmem:[#allocation45_spill] sm:$0xff] }
 0xe90   :  { %v2463_v61 = vsub.f32 1.0, %v15392_v13  ;;  %v2465_v29 = vmul.f32 %v15392_v13, %v16280_v55 }
 0xe91   :  { %v2461_v52 = vadd.f32 %v2460_v2, %v2302_v63  ;;  %v16595_v2 = vld [vmem:[%s17994_s9] ss:$0 sm:$0xff] }
 0xe93   :  { %15393 = vtanh.f32 %v2461_v52  ;;  %v18190_v52 = vld [vmem:[#allocation40_spill] sm:$0xff] }
 0xe9d   :  { %v15394_v24 = vpop.eup %15393 }
 0xe9e   :  { %v2464_v42 = vmul.f32 %v15394_v24, %v2463_v61 }
 0xea0   :  { %v16567_v39 = vadd.f32 %v2465_v29, %v2464_v42  ;;  %v16583_v29 = vld [vmem:[%s17992_s7] ss:$0 sm:$0xff] }
 0xea2   :  { %2468 = vst [vmem:[#allocation16 + $0x2] sm:$0x3] %v16567_v39 }
 0xf4e   :  { %v2614_v27 = vpop.f32.mrb[26].mxu0 }
 0xf4f   :  { %v2615_v1 = vadd.f32 %v16570_v53, %v2614_v27  ;;  %v12527_v40 = vpop.f32.mrb[27].mxu0 }
 0xf50   :  { %v18194_v40 = vld [vmem:[#allocation41_spill] sm:$0xff] }
 0xf51   :  { %v2618_v38 = vmax.f32 %v2615_v1, 0.0 }
 0xf53   :  { %12537 = vmatmul.mubr.msk.f32.vlgmr.msra.gmra.mrb[24].mxu1 %vm422_vm4, %v2618_v38  ;;  %v18195_v38 = vld [vmem:[#allocation44_spill] sm:$0xff] }
 0xf54   :  { %14049 = vmatpush3.bf16.msra.mxu1 %v16070_v37  ;;  %12558 = vmatprep.mubr.msk.f32.mxu1 %vm15783_vm0, %v18140_v21 }
 0xf55   :  { %14050 = vmatprep.subr.bf16.mxu1 %v18141_v22 }
 0xf58   :  { %14052 = vmatpush3.bf16.msra.mxu1 %v16082_v45 }
 0xf59   :  { %14061 = vmatprep.subr.bf16.mxu1 %v18141_v22 }
0x1026   :  { %v2688_v55 = vpop.f32.mrb[24].mxu1 }
0x1027   :  { %v2689_v42 = vadd.f32 %v16583_v29, %v2688_v55  ;;  %v12538_v24 = vpop.f32.mrb[25].mxu1 }
0x1029   :  { %v2692_v13 = vmax.f32 %v2689_v42, 0.0  ;;  %v16608_v42 = vld [vmem:[%s17996_s11] ss:$0 sm:$0xff] }
0x102b   :  { %12548 = vmatmul.mubr.msk.f32.vlgmr.msra.gmra.mrb[28].mxu0 %vm422_vm4, %v2692_v13 }
0x102c   :  { %14056 = vmatpush1.bf16.msra.mxu0 %v18190_v52  ;;  %2908 = vmatprep.mubr.f32.mxu0 %v18140_v21 }
0x102d   :  { %14058 = vmatprep.subr.bf16.mxu0 %v18191_v50 }
0x1030   :  { %14060 = vmatpush1.bf16.msra.mxu0 %v18192_v25 }
0x1031   :  { %14068 = vmatprep.subr.bf16.mxu0 %v18193_v4 }
0x10fe   :  { %v2762_v63 = vpop.f32.mrb[28].mxu0 }
0x10ff   :  { %v2763_v61 = vadd.f32 %v16595_v2, %v2762_v63  ;;  %v12549_v27 = vpop.f32.mrb[29].mxu0 }
0x1100   :  { %v18197_v27 = vld [vmem:[#allocation48_spill] sm:$0xff] }
0x1101   :  { %v2766_v1 = vmax.f32 %v2763_v61, 0.0  ;;  %v18196_v61 = vld [vmem:[#allocation47_spill] sm:$0xff] }
0x1103   :  { %12559 = vmatmul.mubr.msk.f32.vlgmr.msra.gmra.mrb[26].mxu1 %vm422_vm4, %v2766_v1  ;;  %v18198_v1 = vld [vmem:[#allocation49_spill] sm:$0xff] }
0x1104   :  { %14063 = vmatpush3.bf16.msra.mxu1 %v18194_v40  ;;  %12569 = vmatprep.mubr.msk.f32.mxu1 %vm15783_vm0, %v18140_v21 }
0x1105   :  { %14064 = vmatprep.subr.bf16.mxu1 %v18141_v22 }
0x1108   :  { %14066 = vmatpush3.bf16.msra.mxu1 %v18195_v38  ;;  %v18206_v38 = vld [vmem:[#allocation57_spill] sm:$0xff] }
0x1109   :  { %14099 = vmatprep.subr.bf16.mxu1 %v18141_v22 }
0x11d6   :  { %v2836_v55 = vpop.f32.mrb[26].mxu1 }
0x11d7   :  { %v2837_v24 = vadd.f32 %v16608_v42, %v2836_v55  ;;  %v12560_v13 = vpop.f32.mrb[27].mxu1  ;;  %v18199_v55 = vld [vmem:[#allocation50_spill] sm:$0xff] }
0x11d8   :  { %v18201_v13 = vld [vmem:[#allocation52_spill] sm:$0xff] }
0x11d9   :  { %v2840_v63 = vmax.f32 %v2837_v24, 0.0  ;;  %v18200_v24 = vld [vmem:[#allocation51_spill] sm:$0xff] }
0x11db   :  { %11399 = vmatmul.mubr.msk.f32.vlgmr.msra.gmra.mrb[30].mxu0 %vm422_vm4, %v2840_v63  ;;  %12570 = vmatmul.mubr.msk.f32.vlgmr.msra.gmra.mrb[28].mxu1 %vm422_vm4, %v2840_v63  ;;  %v18202_v63 = vld [vmem:[#allocation53_spill] sm:$0xff] }
0x11dc   :  { %14070 = vmatpush1.bf16.msra.mxu0 %v16322_v36  ;;  %14101 = vmatpush3.bf16.msra.mxu1 %v18196_v61  ;;  %v18204_v61 = vld [vmem:[#allocation55_spill] sm:$0xff]  ;;  %v18205_v36 = vld [vmem:[#allocation56_spill] sm:$0xff] }
0x11dd   :  { %14072 = vmatprep.subr.bf16.mxu0 %v18197_v27  ;;  %14102 = vmatprep.subr.bf16.mxu1 %v18141_v22  ;;  %v18203_v27 = vld [vmem:[#allocation54_spill] sm:$0xff] }
0x11de   :  { %3049 = vmatprep.mubr.f32.mxu0 %v18140_v21  ;;  %12604 = vmatprep.mubr.msk.f32.mxu1 %vm15783_vm0, %v18140_v21 }
0x11e0   :  { %14074 = vmatpush1.bf16.msra.mxu0 %v18198_v1  ;;  %14104 = vmatpush3.bf16.msra.mxu1 %v18199_v55  ;;  %v18208_v55 = vld [vmem:[#allocation60_spill] sm:$0xff] }
0x11e1   :  { %14076 = vmatprep.subr.bf16.mxu0 %v18200_v24  ;;  %14105 = vmatprep.subr.bf16.mxu1 %v18141_v22  ;;  %v18207_v24 = vld [vmem:[#allocation59_spill] sm:$0xff] }
0x11e4   :  { %14078 = vmatpush1.bf16.msra.mxu0 %v18201_v13  ;;  %14107 = vmatpush3.bf16.msra.mxu1 %v18202_v63  ;;  %v18209_v63 = vld [vmem:[#allocation61_spill] sm:$0xff]  ;;  %v18211_v13 = vld [vmem:[#allocation63_spill] sm:$0xff] }
0x11e5   :  { %14080 = vmatprep.subr.bf16.mxu0 %v18203_v27  ;;  %14108 = vmatprep.subr.bf16.mxu1 %v18141_v22  ;;  %v18210_v27 = vld [vmem:[#allocation62_spill] sm:$0xff] }
0x11e8   :  { %14082 = vmatpush1.bf16.msra.mxu0 %v18204_v61  ;;  %14110 = vmatpush3.bf16.msra.mxu1 %v18205_v36  ;;  %v18212_v36 = vld [vmem:[#allocation64_spill] sm:$0xff]  ;;  %v18214_v61 = vld [vmem:[#allocation66_spill] sm:$0xff] }
0x11e9   :  { %14084 = vmatprep.subr.bf16.mxu0 %v18206_v38  ;;  %14111 = vmatprep.subr.bf16.mxu1 %v18141_v22  ;;  %v18213_v38 = vld [vmem:[#allocation65_spill] sm:$0xff] }
0x11ec   :  { %14086 = vmatpush1.bf16.msra.mxu0 %v16364_v54  ;;  %14113 = vmatpush3.bf16.msra.mxu1 %v18207_v24  ;;  %v18215_v24 = vld [vmem:[#allocation67_spill] sm:$0xff] }
0x11ed   :  { %14088 = vmatprep.subr.bf16.mxu0 %v18208_v55  ;;  %14114 = vmatprep.subr.bf16.mxu1 %v18141_v22  ;;  %v18216_v55 = vld [vmem:[#allocation68_spill] sm:$0xff] }
0x11f0   :  { %14090 = vmatpush1.bf16.msra.mxu0 %v18209_v63  ;;  %14116 = vmatpush3.bf16.msra.mxu1 %v18210_v27  ;;  %v16649_v27 = vld [vmem:[%s18126_s27] sm:$0xff] }
0x11f1   :  { %14092 = vmatprep.subr.bf16.mxu0 %v18211_v13  ;;  %14117 = vmatprep.subr.bf16.mxu1 %v18141_v22  ;;  %18217 = vst [vmem:[#allocation26_spill] sm:$0xff] %v16649_v27  ;;  %v3149_v13 = vrot.slane %v16649_v27, 2 }
0x11f4   :  { %14094 = vmatpush1.bf16.msra.mxu0 %v18212_v36  ;;  %14119 = vmatpush3.bf16.msra.mxu1 %v18213_v38  ;;  %v16655_v36 = vld [vmem:[%s18126_s27 + $0x8] sm:$0xff] }
0x11f5   :  { %14096 = vmatprep.subr.bf16.mxu0 %v18214_v61  ;;  %14120 = vmatprep.subr.bf16.mxu1 %v18141_v22  ;;  %18218 = vst [vmem:[#allocation27_spill] sm:$0xff] %v16655_v36  ;;  %v3150_v61 = vrot.slane %v16655_v36, 1 }
0x11f7   :  { %v3151_v27 = vsel %vm336_vm2, %v3150_v61, %v3149_v13 }
0x11f8   :  { %14098 = vmatpush1.bf16.msra.mxu0 %v18215_v24  ;;  %14122 = vmatpush3.bf16.msra.mxu1 %v18216_v55 }
0x11f9   :  { %12607 = vmatprep.subr.mxu0 %v18140_v21  ;;  %14123 = vmatprep.subr.bf16.mxu1 %v18141_v22 }
0x11fb   :  { %3050 = vmatmul.mubr.f32.vlgmr.msra.gmra.mrb[30].mxu0 %v16463_v20  ;;  %12605 = vmatmul.mubr.f32.vlgmr.msra.gmra.mrb[30].mxu1 %v16463_v20 }
0x11fc   :  { %12608 = vmatpush3.msk.msra.mxu0 %vm341_vm1, %v16531_v7  ;;  %12609 = vmatprep.mubr.msk.f32.mxu0 %vm15783_vm0, %v18140_v21 }
0x11fd   :  { %14125 = vmatpush3.bf16.msra.mxu1 %v16011_v8  ;;  %12620 = vmatprep.mubr.msk.f32.mxu1 %vm15783_vm0, %v18140_v21 }
0x11fe   :  { %14126 = vmatprep.subr.bf16.mxu1 %v18141_v22  ;;  %14129 = vmatprep.subr.bf16.mxu0 %v18141_v22 }
0x11ff   :  { %12610 = vmatmul.mubr.msk.f32.vlgmr.msra.gmra.mrb[32].mxu0 %vm338_vm3, %v3151_v27 }
0x1200   :  { %14131 = vmatpush3.bf16.msra.mxu0 %v16037_v15  ;;  %12631 = vmatprep.mubr.msk.f32.mxu0 %vm15783_vm0, %v18140_v21 }
0x1201   :  { %14128 = vmatpush3.bf16.msra.mxu1 %v16027_v12  ;;  %14132 = vmatprep.subr.bf16.mxu0 %v18141_v22 }
0x1202   :  { %14135 = vmatprep.subr.bf16.mxu1 %v18141_v22 }
0x1204   :  { %14134 = vmatpush3.bf16.msra.mxu0 %v16053_v23 }
0x1205   :  { %14141 = vmatprep.subr.bf16.mxu0 %v18141_v22 }
0x12ae   :  { %v2981_v61 = vpop.f32.mrb[28].mxu1 }
0x12af   :  { %v12571_v13 = vpop.f32.mrb[29].mxu1 }
0x12ce   :  { %v3051_v36 = vpop.f32.mrb[30].mxu0  ;;  %v3122_v55 = vpop.f32.mrb[30].mxu1 }
0x12cf   :  { %v15264_v27 = vadd.f32 %v16440_v0, %v3051_v36  ;;  %v3053_v24 = vpop.f32.mrb[31].mxu0  ;;  %v12606_v38 = vpop.f32.mrb[31].mxu1 }
0x12d0   :  { %v15266_v54 = vadd.f32 %v16442_v5, %v3053_v24 }
0x12d1   :  { %v11401_v63 = vmul.f32 -1.442695, %v15264_v27 }
0x12d2   :  { %v3220_v1 = vpop.f32.mrb[32].mxu0  ;;  %v11402_v50 = vmul.f32 -1.442695, %v15266_v54  ;;  %v3123_v54 = vadd.f32 %v3122_v55, %v16455_v16 }
0x12d3   :  { %15395 = vpow2.f32 %v11401_v63  ;;  %v3221_v40 = vadd.f32 %v16554_v3, %v3220_v1  ;;  %v12611_v4 = vpop.f32.mrb[33].mxu0  ;;  %v2982_v1 = vadd.f32 %v2981_v61, %v16458_v48 }
0x12d4   :  { %15397 = vpow2.f32 %v11402_v50 }
0x12d5   :  { %v3224_v25 = vmax.f32 %v3221_v40, 0.0 }
0x12d7   :  { %12621 = vmatmul.mubr.msk.f32.vlgmr.msra.gmra.mrb[32].mxu1 %vm422_vm4, %v3224_v25 }
0x12d8   :  { %14137 = vmatpush3.bf16.msra.mxu1 %v16057_v26  ;;  %12642 = vmatprep.mubr.msk.f32.mxu1 %vm15783_vm0, %v18140_v21 }
0x12d9   :  { %14138 = vmatprep.subr.bf16.mxu1 %v18141_v22 }
0x12dc   :  { %14140 = vmatpush3.bf16.msra.mxu1 %v16067_v34 }
0x12dd   :  { %v15396_v36 = vpop.eup %15395  ;;  %14148 = vmatprep.subr.bf16.mxu1 %v16086_v49 }
0x12de   :  { %v3130_v38 = vadd.f32 1.0, %v15396_v36  ;;  %v15398_v4 = vpop.eup %15397 }
0x12df   :  { %v3137_v40 = vadd.f32 1.0, %v15398_v4 }
0x12e0   :  { %15399 = vrcp.f32 %v3130_v38 }
0x12e1   :  { %15401 = vrcp.f32 %v3137_v40 }
0x12ea   :  { %v15400_v25 = vpop.eup %15399 }
0x12eb   :  { %v3140_v24 = vmul.f32 %v15400_v25, %v3123_v54  ;;  %v15402_v13 = vpop.eup %15401 }
0x12ec   :  { %v3143_v50 = vsub.f32 1.0, %v15402_v13  ;;  %v3145_v0 = vmul.f32 %v15402_v13, %v16463_v20 }
0x12ed   :  { %v3141_v63 = vadd.f32 %v3140_v24, %v2982_v1 }
0x12ef   :  { %15403 = vtanh.f32 %v3141_v63 }
0x12f9   :  { %v15404_v27 = vpop.eup %15403 }
0x12fa   :  { %v3144_v5 = vmul.f32 %v15404_v27, %v3143_v50  ;;  %v18219_v27 = vld [vmem:[#allocation28_spill] sm:$0xff] }
0x12fc   :  { %v16694_v49 = vadd.f32 %v3145_v0, %v3144_v5 }
0x12fe   :  { %3148 = vst [vmem:[#allocation17 + $0xc] sm:$0x3] %v16694_v49 }
0x13aa   :  { %v3294_v36 = vpop.f32.mrb[32].mxu1 }
0x13ab   :  { %v3295_v55 = vadd.f32 %v16570_v53, %v3294_v36  ;;  %v12622_v38 = vpop.f32.mrb[33].mxu1  ;;  %v18220_v36 = vld [vmem:[#allocation29_spill] sm:$0xff] }
0x13ac   :  { %v18222_v38 = vld [vmem:[#allocation31_spill] sm:$0xff] }
0x13ad   :  { %v3298_v4 = vmax.f32 %v3295_v55, 0.0  ;;  %v18221_v55 = vld [vmem:[#allocation30_spill] sm:$0xff] }
0x13af   :  { %12632 = vmatmul.mubr.msk.f32.vlgmr.msra.gmra.mrb[34].mxu0 %vm422_vm4, %v3298_v4  ;;  %v18223_v4 = vld [vmem:[#allocation32_spill] sm:$0xff] }
0x13b0   :  { %14143 = vmatpush3.bf16.msra.mxu0 %v16070_v37  ;;  %12653 = vmatprep.mubr.msk.f32.mxu0 %vm15783_vm0, %v18140_v21 }
0x13b1   :  { %14144 = vmatprep.subr.bf16.mxu0 %v18141_v22 }
0x13b4   :  { %14146 = vmatpush3.bf16.msra.mxu0 %v16082_v45 }
0x13b5   :  { %14155 = vmatprep.subr.bf16.mxu0 %v18141_v22 }
0x1482   :  { %v3368_v0 = vpop.f32.mrb[34].mxu0 }
0x1483   :  { %v3369_v5 = vadd.f32 %v16583_v29, %v3368_v0  ;;  %v12633_v20 = vpop.f32.mrb[35].mxu0  ;;  %v16759_v0 = vld [vmem:[%s18135_s28] sm:$0xff] }
0x1484   :  { %18224 = vst [vmem:[#allocation33_spill] sm:$0xff] %v16759_v0  ;;  %v16765_v20 = vld [vmem:[%s18135_s28 + $0x8] sm:$0xff] }
0x1485   :  { %v3372_v61 = vmax.f32 %v3369_v5, 0.0  ;;  %v3829_v5 = vrot.slane %v16759_v0, 5  ;;  %18225 = vst [vmem:[#allocation34_spill] sm:$0xff] %v16765_v20 }
0x1487   :  { %12643 = vmatmul.mubr.msk.f32.vlgmr.msra.gmra.mrb[34].mxu1 %vm422_vm4, %v3372_v61  ;;  %v3830_v61 = vrot.slane %v16765_v20, 4 }
0x1488   :  { %14150 = vmatpush1.bf16.msra.mxu1 %v16088_v51  ;;  %3588 = vmatprep.mubr.f32.mxu1 %v18140_v21 }
0x1489   :  { %14152 = vmatprep.subr.bf16.mxu1 %v16105_v62 }
0x148c   :  { %14154 = vmatpush1.bf16.msra.mxu1 %v16107_v6 }
0x148d   :  { %14162 = vmatprep.subr.bf16.mxu1 %v16114_v14 }
0x155a   :  { %v3442_v40 = vpop.f32.mrb[34].mxu1 }
0x155b   :  { %v3443_v54 = vadd.f32 %v16595_v2, %v3442_v40  ;;  %v12644_v25 = vpop.f32.mrb[35].mxu1  ;;  %v3831_v40 = vsel %vm336_vm2, %v3830_v61, %v3829_v5 }
0x155d   :  { %v3446_v1 = vmax.f32 %v3443_v54, 0.0 }
0x155f   :  { %12654 = vmatmul.mubr.msk.f32.vlgmr.msra.gmra.mrb[36].mxu0 %vm422_vm4, %v3446_v1 }
0x1560   :  { %14157 = vmatpush3.bf16.msra.mxu0 %v16098_v58  ;;  %12664 = vmatprep.mubr.msk.f32.mxu0 %vm15783_vm0, %v18140_v21 }
0x1561   :  { %14158 = vmatprep.subr.bf16.mxu0 %v18141_v22 }
0x1564   :  { %14160 = vmatpush3.bf16.msra.mxu0 %v16110_v10 }
0x1565   :  { %14193 = vmatprep.subr.bf16.mxu0 %v18141_v22 }
0x1632   :  { %v3516_v24 = vpop.f32.mrb[36].mxu0 }
0x1633   :  { %v3517_v63 = vadd.f32 %v16608_v42, %v3516_v24  ;;  %v12655_v13 = vpop.f32.mrb[37].mxu0 }
0x1635   :  { %v3520_v50 = vmax.f32 %v3517_v63, 0.0  ;;  %v18226_v63 = vld [vmem:[#allocation35_spill] sm:$0xff] }
0x1637   :  { %11409 = vmatmul.mubr.msk.f32.vlgmr.msra.gmra.mrb[36].mxu1 %vm422_vm4, %v3520_v50  ;;  %12665 = vmatmul.mubr.msk.f32.vlgmr.msra.gmra.mrb[38].mxu0 %vm422_vm4, %v3520_v50 }
0x1638   :  { %14164 = vmatpush1.bf16.msra.mxu1 %v16124_v30  ;;  %14195 = vmatpush3.bf16.msra.mxu0 %v16126_v32 }
0x1639   :  { %14166 = vmatprep.subr.bf16.mxu1 %v16128_v35  ;;  %14196 = vmatprep.subr.bf16.mxu0 %v18141_v22 }
0x163a   :  { %3729 = vmatprep.mubr.f32.mxu1 %v18140_v21  ;;  %12699 = vmatprep.mubr.msk.f32.mxu0 %vm15783_vm0, %v18140_v21 }
0x163c   :  { %14168 = vmatpush1.bf16.msra.mxu1 %v16133_v43  ;;  %14198 = vmatpush3.bf16.msra.mxu0 %v16136_v46 }
0x163d   :  { %14170 = vmatprep.subr.bf16.mxu1 %v16139_v47  ;;  %14199 = vmatprep.subr.bf16.mxu0 %v18141_v22 }
0x1640   :  { %14172 = vmatpush1.bf16.msra.mxu1 %v16146_v56  ;;  %14201 = vmatpush3.bf16.msra.mxu0 %v16149_v59 }
0x1641   :  { %14174 = vmatprep.subr.bf16.mxu1 %v16152_v60  ;;  %14202 = vmatprep.subr.bf16.mxu0 %v18141_v22 }
0x1644   :  { %14176 = vmatpush1.bf16.msra.mxu1 %v16156_v11  ;;  %14204 = vmatpush3.bf16.msra.mxu0 %v16159_v18 }
0x1645   :  { %14178 = vmatprep.subr.bf16.mxu1 %v16162_v19  ;;  %14205 = vmatprep.subr.bf16.mxu0 %v18141_v22 }
0x1648   :  { %14180 = vmatpush1.bf16.msra.mxu1 %v16166_v28  ;;  %14207 = vmatpush3.bf16.msra.mxu0 %v16169_v31 }
0x1649   :  { %14182 = vmatprep.subr.bf16.mxu1 %v16172_v33  ;;  %14208 = vmatprep.subr.bf16.mxu0 %v18141_v22 }
0x164c   :  { %14184 = vmatpush1.bf16.msra.mxu1 %v16176_v44  ;;  %14210 = vmatpush3.bf16.msra.mxu0 %v18176_v17 }
0x164d   :  { %14186 = vmatprep.subr.bf16.mxu1 %v18177_v41  ;;  %14211 = vmatprep.subr.bf16.mxu0 %v18141_v22 }
0x1650   :  { %14188 = vmatpush1.bf16.msra.mxu1 %v18219_v27  ;;  %14213 = vmatpush3.bf16.msra.mxu0 %v18220_v36 }
0x1651   :  { %14190 = vmatprep.subr.bf16.mxu1 %v18221_v55  ;;  %14214 = vmatprep.subr.bf16.mxu0 %v18141_v22 }
0x1654   :  { %14192 = vmatpush1.bf16.msra.mxu1 %v18222_v38  ;;  %14216 = vmatpush3.bf16.msra.mxu0 %v18223_v4 }
0x1655   :  { %12702 = vmatprep.subr.mxu1 %v18140_v21  ;;  %14217 = vmatprep.subr.bf16.mxu0 %v18141_v22 }
0x1657   :  { %3730 = vmatmul.mubr.f32.vlgmr.msra.gmra.mrb[36].mxu1 %v16567_v39  ;;  %12700 = vmatmul.mubr.f32.vlgmr.msra.gmra.mrb[40].mxu0 %v16567_v39 }
0x1658   :  { %12703 = vmatpush3.msk.msra.mxu1 %vm341_vm1, %v16531_v7  ;;  %12704 = vmatprep.mubr.msk.f32.mxu1 %vm15783_vm0, %v18140_v21 }
0x1659   :  { %14219 = vmatpush3.bf16.msra.mxu0 %v16011_v8  ;;  %12715 = vmatprep.mubr.msk.f32.mxu0 %vm15783_vm0, %v18140_v21 }
0x165a   :  { %14220 = vmatprep.subr.bf16.mxu0 %v18141_v22  ;;  %14223 = vmatprep.subr.bf16.mxu1 %v18141_v22 }
0x165b   :  { %12705 = vmatmul.mubr.msk.f32.vlgmr.msra.gmra.mrb[38].mxu1 %vm338_vm3, %v3831_v40  ;;  %v18227_v40 = vld [vmem:[#allocation36_spill] sm:$0xff] }
0x165c   :  { %14225 = vmatpush3.bf16.msra.mxu1 %v16037_v15  ;;  %12726 = vmatprep.mubr.msk.f32.mxu1 %vm15783_vm0, %v18140_v21 }
0x165d   :  { %14222 = vmatpush3.bf16.msra.mxu0 %v16027_v12  ;;  %14226 = vmatprep.subr.bf16.mxu1 %v18141_v22 }
0x165e   :  { %14229 = vmatprep.subr.bf16.mxu0 %v18141_v22 }
0x1660   :  { %14228 = vmatpush3.bf16.msra.mxu1 %v16053_v23 }
0x1661   :  { %14235 = vmatprep.subr.bf16.mxu1 %v18141_v22 }
0x170a   :  { %v3661_v54 = vpop.f32.mrb[38].mxu0 }
0x170b   :  { %v12666_v25 = vpop.f32.mrb[39].mxu0 }
0x172a   :  { %v3731_v1 = vpop.f32.mrb[36].mxu1  ;;  %v3802_v24 = vpop.f32.mrb[40].mxu0 }
0x172b   :  { %v15268_v13 = vadd.f32 %v18226_v63, %v3731_v1  ;;  %v3733_v50 = vpop.f32.mrb[37].mxu1  ;;  %v12701_v5 = vpop.f32.mrb[41].mxu0  ;;  %v18228_v1 = vld [vmem:[#allocation39_spill] sm:$0xff] }
0x172c   :  { %v15270_v20 = vadd.f32 %v18227_v40, %v3733_v50 }
0x172d   :  { %v11411_v61 = vmul.f32 -1.442695, %v15268_v13 }
0x172e   :  { %v3900_v0 = vpop.f32.mrb[38].mxu1  ;;  %v11412_v36 = vmul.f32 -1.442695, %v15270_v20  ;;  %v3662_v20 = vadd.f32 %v3661_v54, %v18189_v57 }
0x172f   :  { %15405 = vpow2.f32 %v11411_v61  ;;  %v3901_v4 = vadd.f32 %v16554_v3, %v3900_v0  ;;  %v12706_v38 = vpop.f32.mrb[39].mxu1  ;;  %v3803_v0 = vadd.f32 %v3802_v24, %v18188_v9 }
0x1730   :  { %15407 = vpow2.f32 %v11412_v36 }
0x1731   :  { %v3904_v55 = vmax.f32 %v3901_v4, 0.0 }
0x1733   :  { %12716 = vmatmul.mubr.msk.f32.vlgmr.msra.gmra.mrb[42].mxu0 %vm422_vm4, %v3904_v55 }
0x1734   :  { %14231 = vmatpush3.bf16.msra.mxu0 %v16057_v26  ;;  %12737 = vmatprep.mubr.msk.f32.mxu0 %vm15783_vm0, %v18140_v21 }
0x1735   :  { %14232 = vmatprep.subr.bf16.mxu0 %v18141_v22 }
0x1738   :  { %14234 = vmatpush3.bf16.msra.mxu0 %v16067_v34 }
0x1739   :  { %v15406_v25 = vpop.eup %15405  ;;  %14242 = vmatprep.subr.bf16.mxu0 %v18228_v1 }
0x173a   :  { %v3810_v13 = vadd.f32 1.0, %v15406_v25  ;;  %v15408_v38 = vpop.eup %15407 }
0x173b   :  { %v3817_v4 = vadd.f32 1.0, %v15408_v38 }
0x173c   :  { %15409 = vrcp.f32 %v3810_v13 }
0x173d   :  { %15411 = vrcp.f32 %v3817_v4  ;;  %v18230_v4 = vld [vmem:[#allocation43_spill] sm:$0xff] }
0x1746   :  { %v15410_v55 = vpop.eup %15409 }
0x1747   :  { %v3820_v50 = vmul.f32 %v15410_v55, %v3803_v0  ;;  %v15412_v61 = vpop.eup %15411  ;;  %v18231_v0 = vld [vmem:[#allocation45_spill] sm:$0xff] }
0x1748   :  { %v3823_v36 = vsub.f32 1.0, %v15412_v61  ;;  %v3825_v27 = vmul.f32 %v15412_v61, %v16567_v39  ;;  %v18232_v61 = vld [vmem:[#allocation41_spill] sm:$0xff] }
0x1749   :  { %v3821_v5 = vadd.f32 %v3820_v50, %v3662_v20 }
0x174b   :  { %15413 = vtanh.f32 %v3821_v5 }
0x1755   :  { %v15414_v40 = vpop.eup %15413 }
0x1756   :  { %v3824_v63 = vmul.f32 %v15414_v40, %v3823_v36  ;;  %v18229_v40 = vld [vmem:[#allocation42_spill] sm:$0xff]  ;;  %v18233_v36 = vld [vmem:[#allocation44_spill] sm:$0xff] }
0x1758   :  { %v16804_v1 = vadd.f32 %v3825_v27, %v3824_v63 }
0x175a   :  { %3828 = vst [vmem:[#allocation16 + $0x4] sm:$0x3] %v16804_v1 }
0x1806   :  { %v3974_v25 = vpop.f32.mrb[42].mxu0 }
0x1807   :  { %v3975_v24 = vadd.f32 %v16570_v53, %v3974_v25  ;;  %v12717_v13 = vpop.f32.mrb[43].mxu0 }
0x1809   :  { %v3978_v38 = vmax.f32 %v3975_v24, 0.0 }
0x180b   :  { %12727 = vmatmul.mubr.msk.f32.vlgmr.msra.gmra.mrb[40].mxu1 %vm422_vm4, %v3978_v38 }
0x180c   :  { %14237 = vmatpush3.bf16.msra.mxu1 %v16070_v37  ;;  %12748 = vmatprep.mubr.msk.f32.mxu1 %vm15783_vm0, %v18140_v21 }
0x180d   :  { %14238 = vmatprep.subr.bf16.mxu1 %v18141_v22 }
0x1810   :  { %14240 = vmatpush3.bf16.msra.mxu1 %v16082_v45 }
0x1811   :  { %14249 = vmatprep.subr.bf16.mxu1 %v18141_v22 }
0x18de   :  { %v4048_v39 = vpop.f32.mrb[40].mxu1 }
0x18df   :  { %v4049_v27 = vadd.f32 %v16583_v29, %v4048_v39  ;;  %v12728_v54 = vpop.f32.mrb[41].mxu1  ;;  %v18234_v39 = vld [vmem:[#allocation46_spill] sm:$0xff] }
0x18e0   :  { %v18236_v54 = vld [vmem:[#allocation48_spill] sm:$0xff] }
0x18e1   :  { %v4052_v63 = vmax.f32 %v4049_v27, 0.0  ;;  %v18235_v27 = vld [vmem:[#allocation47_spill] sm:$0xff] }
0x18e3   :  { %12738 = vmatmul.mubr.msk.f32.vlgmr.msra.gmra.mrb[44].mxu0 %vm422_vm4, %v4052_v63  ;;  %v18237_v63 = vld [vmem:[#allocation49_spill] sm:$0xff] }
0x18e4   :  { %14244 = vmatpush1.bf16.msra.mxu0 %v18190_v52  ;;  %4268 = vmatprep.mubr.f32.mxu0 %v18140_v21 }
0x18e5   :  { %14246 = vmatprep.subr.bf16.mxu0 %v18229_v40 }
0x18e8   :  { %14248 = vmatpush1.bf16.msra.mxu0 %v18230_v4 }
0x18e9   :  { %14256 = vmatprep.subr.bf16.mxu0 %v18231_v0 }
0x19b6   :  { %v4122_v55 = vpop.f32.mrb[44].mxu0 }
0x19b7   :  { %v4123_v20 = vadd.f32 %v16595_v2, %v4122_v55  ;;  %v12739_v50 = vpop.f32.mrb[45].mxu0  ;;  %v18238_v55 = vld [vmem:[#allocation50_spill] sm:$0xff] }
0x19b8   :  { %v18240_v50 = vld [vmem:[#allocation52_spill] sm:$0xff] }
0x19b9   :  { %v4126_v5 = vmax.f32 %v4123_v20, 0.0  ;;  %v18239_v20 = vld [vmem:[#allocation51_spill] sm:$0xff] }
0x19bb   :  { %12749 = vmatmul.mubr.msk.f32.vlgmr.msra.gmra.mrb[42].mxu1 %vm422_vm4, %v4126_v5  ;;  %v18241_v5 = vld [vmem:[#allocation53_spill] sm:$0xff] }
0x19bc   :  { %14251 = vmatpush3.bf16.msra.mxu1 %v18232_v61  ;;  %12759 = vmatprep.mubr.msk.f32.mxu1 %vm15783_vm0, %v18140_v21 }
0x19bd   :  { %14252 = vmatprep.subr.bf16.mxu1 %v18141_v22 }
0x19c0   :  { %14254 = vmatpush3.bf16.msra.mxu1 %v18233_v36 }
0x19c1   :  { %14287 = vmatprep.subr.bf16.mxu1 %v18141_v22 }
0x1a8e   :  { %v4196_v25 = vpop.f32.mrb[42].mxu1 }
0x1a8f   :  { %v4197_v24 = vadd.f32 %v16608_v42, %v4196_v25  ;;  %v12750_v13 = vpop.f32.mrb[43].mxu1  ;;  %v18242_v25 = vld [vmem:[#allocation54_spill] sm:$0xff] }
0x1a90   :  { %v18244_v13 = vld [vmem:[#allocation56_spill] sm:$0xff] }
0x1a91   :  { %v4200_v38 = vmax.f32 %v4197_v24, 0.0  ;;  %v18243_v24 = vld [vmem:[#allocation55_spill] sm:$0xff] }
0x1a93   :  { %11419 = vmatmul.mubr.msk.f32.vlgmr.msra.gmra.mrb[46].mxu0 %vm422_vm4, %v4200_v38  ;;  %12760 = vmatmul.mubr.msk.f32.vlgmr.msra.gmra.mrb[44].mxu1 %vm422_vm4, %v4200_v38  ;;  %v18245_v38 = vld [vmem:[#allocation57_spill] sm:$0xff] }
0x1a94   :  { %14258 = vmatpush1.bf16.msra.mxu0 %v18234_v39  ;;  %14289 = vmatpush3.bf16.msra.mxu1 %v18235_v27 }
0x1a95   :  { %14260 = vmatprep.subr.bf16.mxu0 %v18236_v54  ;;  %14290 = vmatprep.subr.bf16.mxu1 %v18141_v22  ;;  %v18258_v54 = vld [vmem:[#allocation27_spill] sm:$0xff] }
0x1a96   :  { %4409 = vmatprep.mubr.f32.mxu0 %v18140_v21  ;;  %12794 = vmatprep.mubr.msk.f32.mxu1 %vm15783_vm0, %v18140_v21 }
0x1a98   :  { %14262 = vmatpush1.bf16.msra.mxu0 %v18237_v63  ;;  %14292 = vmatpush3.bf16.msra.mxu1 %v18238_v55  ;;  %v18246_v55 = vld [vmem:[#allocation58_spill] sm:$0xff]  ;;  %v18248_v63 = vld [vmem:[#allocation60_spill] sm:$0xff] }
0x1a99   :  { %14264 = vmatprep.subr.bf16.mxu0 %v18239_v20  ;;  %14293 = vmatprep.subr.bf16.mxu1 %v18141_v22  ;;  %v18247_v20 = vld [vmem:[#allocation59_spill] sm:$0xff] }
0x1a9c   :  { %14266 = vmatpush1.bf16.msra.mxu0 %v18240_v50  ;;  %14295 = vmatpush3.bf16.msra.mxu1 %v18241_v5  ;;  %v18249_v5 = vld [vmem:[#allocation61_spill] sm:$0xff]  ;;  %v18251_v50 = vld [vmem:[#allocation63_spill] sm:$0xff] }
0x1a9d   :  { %14268 = vmatprep.subr.bf16.mxu0 %v18242_v25  ;;  %14296 = vmatprep.subr.bf16.mxu1 %v18141_v22  ;;  %v18250_v25 = vld [vmem:[#allocation62_spill] sm:$0xff] }
0x1aa0   :  { %14270 = vmatpush1.bf16.msra.mxu0 %v18243_v24  ;;  %14298 = vmatpush3.bf16.msra.mxu1 %v18244_v13  ;;  %v18252_v13 = vld [vmem:[#allocation64_spill] sm:$0xff]  ;;  %v18254_v24 = vld [vmem:[#allocation66_spill] sm:$0xff] }
0x1aa1   :  { %14272 = vmatprep.subr.bf16.mxu0 %v18245_v38  ;;  %14299 = vmatprep.subr.bf16.mxu1 %v18141_v22  ;;  %v18253_v38 = vld [vmem:[#allocation65_spill] sm:$0xff] }
0x1aa4   :  { %14274 = vmatpush1.bf16.msra.mxu0 %v18246_v55  ;;  %14301 = vmatpush3.bf16.msra.mxu1 %v18247_v20  ;;  %v18255_v20 = vld [vmem:[#allocation67_spill] sm:$0xff]  ;;  %v18257_v55 = vld [vmem:[#allocation26_spill] sm:$0xff] }
0x1aa5   :  { %14276 = vmatprep.subr.bf16.mxu0 %v18248_v63  ;;  %14302 = vmatprep.subr.bf16.mxu1 %v18141_v22  ;;  %v18256_v63 = vld [vmem:[#allocation68_spill] sm:$0xff] }
0x1aa8   :  { %14278 = vmatpush1.bf16.msra.mxu0 %v18249_v5  ;;  %14304 = vmatpush3.bf16.msra.mxu1 %v18250_v25  ;;  %v4509_v5 = vrot.slane %v18257_v55, 3  ;;  %v4510_v25 = vrot.slane %v18258_v54, 2 }
0x1aa9   :  { %14280 = vmatprep.subr.bf16.mxu0 %v18251_v50  ;;  %14305 = vmatprep.subr.bf16.mxu1 %v18141_v22 }
0x1aac   :  { %14282 = vmatpush1.bf16.msra.mxu0 %v18252_v13  ;;  %14307 = vmatpush3.bf16.msra.mxu1 %v18253_v38  ;;  %v18260_v13 = vld [vmem:[#allocation70_spill] sm:$0xff] }
0x1aad   :  { %14284 = vmatprep.subr.bf16.mxu0 %v18254_v24  ;;  %14308 = vmatprep.subr.bf16.mxu1 %v18141_v22 }
0x1ab0   :  { %14286 = vmatpush1.bf16.msra.mxu0 %v18255_v20  ;;  %14310 = vmatpush3.bf16.msra.mxu1 %v18256_v63  ;;  %v4511_v63 = vsel %vm336_vm2, %v4510_v25, %v4509_v5 }
0x1ab1   :  { %12797 = vmatprep.subr.mxu0 %v18140_v21  ;;  %14311 = vmatprep.subr.bf16.mxu1 %v18141_v22 }
0x1ab3   :  { %4410 = vmatmul.mubr.f32.vlgmr.msra.gmra.mrb[46].mxu0 %v16694_v49  ;;  %12795 = vmatmul.mubr.f32.vlgmr.msra.gmra.mrb[46].mxu1 %v16694_v49 }
0x1ab4   :  { %12798 = vmatpush3.msk.msra.mxu0 %vm341_vm1, %v16531_v7  ;;  %12799 = vmatprep.mubr.msk.f32.mxu0 %vm15783_vm0, %v18140_v21 }
0x1ab5   :  { %14313 = vmatpush3.bf16.msra.mxu1 %v16011_v8  ;;  %12810 = vmatprep.mubr.msk.f32.mxu1 %vm15783_vm0, %v18140_v21 }
0x1ab6   :  { %14314 = vmatprep.subr.bf16.mxu1 %v18141_v22  ;;  %14317 = vmatprep.subr.bf16.mxu0 %v18141_v22 }
0x1ab7   :  { %12800 = vmatmul.mubr.msk.f32.vlgmr.msra.gmra.mrb[48].mxu0 %vm338_vm3, %v4511_v63  ;;  %v18259_v63 = vld [vmem:[#allocation69_spill] sm:$0xff] }
0x1ab8   :  { %14319 = vmatpush3.bf16.msra.mxu0 %v16037_v15  ;;  %12821 = vmatprep.mubr.msk.f32.mxu0 %vm15783_vm0, %v18140_v21 }
0x1ab9   :  { %14316 = vmatpush3.bf16.msra.mxu1 %v16027_v12  ;;  %14320 = vmatprep.subr.bf16.mxu0 %v18141_v22 }
0x1aba   :  { %14323 = vmatprep.subr.bf16.mxu1 %v18141_v22 }
0x1abc   :  { %14322 = vmatpush3.bf16.msra.mxu0 %v16053_v23 }
0x1abd   :  { %14329 = vmatprep.subr.bf16.mxu0 %v18141_v22 }
0x1b66   :  { %v4341_v7 = vpop.f32.mrb[44].mxu1 }
0x1b67   :  { %v12761_v54 = vpop.f32.mrb[45].mxu1 }
0x1b86   :  { %v4411_v55 = vpop.f32.mrb[46].mxu0  ;;  %v4482_v5 = vpop.f32.mrb[46].mxu1 }
0x1b87   :  { %v15272_v25 = vadd.f32 %v18259_v63, %v4411_v55  ;;  %v4413_v20 = vpop.f32.mrb[47].mxu0  ;;  %v12796_v24 = vpop.f32.mrb[47].mxu1 }
0x1b88   :  { %v15274_v50 = vadd.f32 %v18260_v13, %v4413_v20  ;;  %v18261_v24 = vld [vmem:[#allocation25_spill] sm:$0xff] }
0x1b89   :  { %v11421_v38 = vmul.f32 -1.442695, %v15272_v25 }
0x1b8a   :  { %v4580_v27 = vpop.f32.mrb[48].mxu0  ;;  %v11422_v0 = vmul.f32 -1.442695, %v15274_v50 }
0x1b8b   :  { %15415 = vpow2.f32 %v11421_v38  ;;  %v4581_v39 = vadd.f32 %v16554_v3, %v4580_v27  ;;  %v12801_v36 = vpop.f32.mrb[49].mxu0  ;;  %v4342_v27 = vadd.f32 %v4341_v7, %v16458_v48 }
0x1b8c   :  { %15417 = vpow2.f32 %v11422_v0 }
0x1b8d   :  { %v4584_v61 = vmax.f32 %v4581_v39, 0.0  ;;  %v4483_v39 = vadd.f32 %v4482_v5, %v16455_v16 }
0x1b8f   :  { %12811 = vmatmul.mubr.msk.f32.vlgmr.msra.gmra.mrb[48].mxu1 %vm422_vm4, %v4584_v61 }
0x1b90   :  { %14325 = vmatpush3.bf16.msra.mxu1 %v16057_v26  ;;  %12832 = vmatprep.mubr.msk.f32.mxu1 %vm15783_vm0, %v18140_v21 }
0x1b91   :  { %14326 = vmatprep.subr.bf16.mxu1 %v18141_v22 }
0x1b94   :  { %14328 = vmatpush3.bf16.msra.mxu1 %v16067_v34 }
0x1b95   :  { %v15416_v20 = vpop.eup %15415  ;;  %14336 = vmatprep.subr.bf16.mxu1 %v18261_v24 }
0x1b96   :  { %v4490_v38 = vadd.f32 1.0, %v15416_v20  ;;  %v15418_v3 = vpop.eup %15417 }
0x1b97   :  { %v4497_v36 = vadd.f32 1.0, %v15418_v3 }
0x1b98   :  { %15419 = vrcp.f32 %v4490_v38 }
0x1b99   :  { %15421 = vrcp.f32 %v4497_v36 }
0x1ba2   :  { %v15420_v61 = vpop.eup %15419 }
0x1ba3   :  { %v4500_v50 = vmul.f32 %v15420_v61, %v4483_v39  ;;  %v15422_v55 = vpop.eup %15421 }
0x1ba4   :  { %v4503_v0 = vsub.f32 1.0, %v15422_v55  ;;  %v4505_v63 = vmul.f32 %v15422_v55, %v16694_v49  ;;  %v18264_v55 = vld [vmem:[#allocation30_spill] sm:$0xff] }
0x1ba5   :  { %v4501_v54 = vadd.f32 %v4500_v50, %v4342_v27 }
0x1ba7   :  { %15423 = vtanh.f32 %v4501_v54  ;;  %v18263_v54 = vld [vmem:[#allocation29_spill] sm:$0xff] }
0x1bb1   :  { %v15424_v25 = vpop.eup %15423 }
0x1bb2   :  { %v4504_v13 = vmul.f32 %v15424_v25, %v4503_v0  ;;  %v18265_v0 = vld [vmem:[#allocation31_spill] sm:$0xff]  ;;  %v18266_v25 = vld [vmem:[#allocation32_spill] sm:$0xff] }
0x1bb4   :  { %v16904_v24 = vadd.f32 %v4505_v63, %v4504_v13 }
0x1bb6   :  { %4508 = vst [vmem:[#allocation17 + $0xa] sm:$0x3] %v16904_v24 }
0x1c62   :  { %v4654_v20 = vpop.f32.mrb[48].mxu1 }
0x1c63   :  { %v4655_v5 = vadd.f32 %v16570_v53, %v4654_v20  ;;  %v12812_v38 = vpop.f32.mrb[49].mxu1  ;;  %v18267_v20 = vld [vmem:[#allocation33_spill] sm:$0xff] }
0x1c64   :  { %v18268_v38 = vld [vmem:[#allocation34_spill] sm:$0xff] }
0x1c65   :  { %v4658_v3 = vmax.f32 %v4655_v5, 0.0  ;;  %v5189_v5 = vrot.slane %v18267_v20, 4 }
0x1c67   :  { %12822 = vmatmul.mubr.msk.f32.vlgmr.msra.gmra.mrb[50].mxu0 %vm422_vm4, %v4658_v3  ;;  %v5190_v3 = vrot.slane %v18268_v38, 3  ;;  %v16995_v38 = vld [vmem:[#allocation7] ss:$0 sm:$0xff] }
0x1c68   :  { %14331 = vmatpush3.bf16.msra.mxu0 %v16070_v37  ;;  %12843 = vmatprep.mubr.msk.f32.mxu0 %vm15783_vm0, %v18140_v21 }
0x1c69   :  { %14332 = vmatprep.subr.bf16.mxu0 %v18141_v22 }
0x1c6c   :  { %14334 = vmatpush3.bf16.msra.mxu0 %v16082_v45 }
0x1c6d   :  { %14343 = vmatprep.subr.bf16.mxu0 %v18141_v22 }
0x1d3a   :  { %v4728_v49 = vpop.f32.mrb[50].mxu0 }
0x1d3b   :  { %v4729_v13 = vadd.f32 %v16583_v29, %v4728_v49  ;;  %v12823_v7 = vpop.f32.mrb[51].mxu0  ;;  %v16972_v49 = vld [vmem:[#allocation4] sm:$0x1f] }
0x1d3d   :  { %v4732_v53 = vmax.f32 %v4729_v13, 0.0  ;;  %v5191_v13 = vsel %vm336_vm2, %v5190_v3, %v5189_v5 }
0x1d3f   :  { %12833 = vmatmul.mubr.msk.f32.vlgmr.msra.gmra.mrb[50].mxu1 %vm422_vm4, %v4732_v53 }
0x1d40   :  { %14338 = vmatpush1.bf16.msra.mxu1 %v16088_v51  ;;  %4948 = vmatprep.mubr.f32.mxu1 %v18140_v21 }
0x1d41   :  { %14340 = vmatprep.subr.bf16.mxu1 %v16105_v62 }
0x1d44   :  { %14342 = vmatpush1.bf16.msra.mxu1 %v16107_v6 }
0x1d45   :  { %14350 = vmatprep.subr.bf16.mxu1 %v16114_v14 }
0x1e12   :  { %v4802_v63 = vpop.f32.mrb[50].mxu1 }
0x1e13   :  { %v4803_v36 = vadd.f32 %v16595_v2, %v4802_v63  ;;  %v12834_v39 = vpop.f32.mrb[51].mxu1 }
0x1e14   :  { %v18269_v39 = vld [vmem:[#allocation35_spill] sm:$0xff] }
0x1e15   :  { %v4806_v61 = vmax.f32 %v4803_v36, 0.0 }
0x1e17   :  { %12844 = vmatmul.mubr.msk.f32.vlgmr.msra.gmra.mrb[52].mxu0 %vm422_vm4, %v4806_v61 }
0x1e18   :  { %14345 = vmatpush3.bf16.msra.mxu0 %v16098_v58  ;;  %12854 = vmatprep.mubr.msk.f32.mxu0 %vm15783_vm0, %v18140_v21 }
0x1e19   :  { %14346 = vmatprep.subr.bf16.mxu0 %v18141_v22 }
0x1e1c   :  { %14348 = vmatpush3.bf16.msra.mxu0 %v16110_v10 }
0x1e1d   :  { %14381 = vmatprep.subr.bf16.mxu0 %v18141_v22 }
0x1eea   :  { %v4876_v29 = vpop.f32.mrb[52].mxu0 }
0x1eeb   :  { %v4877_v27 = vadd.f32 %v16608_v42, %v4876_v29  ;;  %v12845_v50 = vpop.f32.mrb[53].mxu0  ;;  %v18262_v42 = vld [vmem:[#allocation28_spill] sm:$0xff] }
0x1eed   :  { %v4880_v2 = vmax.f32 %v4877_v27, 0.0 }
0x1eef   :  { %11429 = vmatmul.mubr.msk.f32.vlgmr.msra.gmra.mrb[52].mxu1 %vm422_vm4, %v4880_v2  ;;  %12855 = vmatmul.mubr.msk.f32.vlgmr.msra.gmra.mrb[54].mxu0 %vm422_vm4, %v4880_v2  ;;  %v18270_v2 = vld [vmem:[#allocation36_spill] sm:$0xff] }
0x1ef0   :  { %14352 = vmatpush1.bf16.msra.mxu1 %v16124_v30  ;;  %14383 = vmatpush3.bf16.msra.mxu0 %v16126_v32 }
0x1ef1   :  { %14354 = vmatprep.subr.bf16.mxu1 %v16128_v35  ;;  %14384 = vmatprep.subr.bf16.mxu0 %v18141_v22 }
0x1ef2   :  { %5089 = vmatprep.mubr.f32.mxu1 %v18140_v21  ;;  %12889 = vmatprep.mubr.msk.f32.mxu0 %vm15783_vm0, %v18140_v21 }
0x1ef4   :  { %14356 = vmatpush1.bf16.msra.mxu1 %v16133_v43  ;;  %14386 = vmatpush3.bf16.msra.mxu0 %v16136_v46 }
0x1ef5   :  { %14358 = vmatprep.subr.bf16.mxu1 %v16139_v47  ;;  %14387 = vmatprep.subr.bf16.mxu0 %v18141_v22 }
0x1ef8   :  { %14360 = vmatpush1.bf16.msra.mxu1 %v16146_v56  ;;  %14389 = vmatpush3.bf16.msra.mxu0 %v16149_v59 }
0x1ef9   :  { %14362 = vmatprep.subr.bf16.mxu1 %v16152_v60  ;;  %14390 = vmatprep.subr.bf16.mxu0 %v18141_v22 }
0x1efc   :  { %14364 = vmatpush1.bf16.msra.mxu1 %v16156_v11  ;;  %14392 = vmatpush3.bf16.msra.mxu0 %v16159_v18 }
0x1efd   :  { %14366 = vmatprep.subr.bf16.mxu1 %v16162_v19  ;;  %14393 = vmatprep.subr.bf16.mxu0 %v18141_v22 }
0x1f00   :  { %14368 = vmatpush1.bf16.msra.mxu1 %v16166_v28  ;;  %14395 = vmatpush3.bf16.msra.mxu0 %v16169_v31 }
0x1f01   :  { %14370 = vmatprep.subr.bf16.mxu1 %v16172_v33  ;;  %14396 = vmatprep.subr.bf16.mxu0 %v18141_v22 }
0x1f04   :  { %14372 = vmatpush1.bf16.msra.mxu1 %v16176_v44  ;;  %14398 = vmatpush3.bf16.msra.mxu0 %v18176_v17 }
0x1f05   :  { %14374 = vmatprep.subr.bf16.mxu1 %v18177_v41  ;;  %14399 = vmatprep.subr.bf16.mxu0 %v18141_v22 }
0x1f08   :  { %14376 = vmatpush1.bf16.msra.mxu1 %v18262_v42  ;;  %14401 = vmatpush3.bf16.msra.mxu0 %v18263_v54 }
0x1f09   :  { %14378 = vmatprep.subr.bf16.mxu1 %v18264_v55  ;;  %14402 = vmatprep.subr.bf16.mxu0 %v18141_v22 }
0x1f0c   :  { %14380 = vmatpush1.bf16.msra.mxu1 %v18265_v0  ;;  %14404 = vmatpush3.bf16.msra.mxu0 %v18266_v25 }
0x1f0d   :  { %12892 = vmatprep.subr.mxu1 %v18140_v21  ;;  %14405 = vmatprep.subr.bf16.mxu0 %v18141_v22 }
0x1f0f   :  { %5090 = vmatmul.mubr.f32.vlgmr.msra.gmra.mrb[52].mxu1 %v16804_v1  ;;  %12890 = vmatmul.mubr.f32.vlgmr.msra.gmra.mrb[56].mxu0 %v16804_v1 }
0x1f10   :  { %12893 = vmatpush3.msk.msra.mxu1 %vm341_vm1, %v16972_v49  ;;  %12894 = vmatprep.mubr.msk.f32.mxu1 %vm15783_vm0, %v18140_v21 }
0x1f11   :  { %14407 = vmatpush3.bf16.msra.mxu0 %v16011_v8  ;;  %12905 = vmatprep.mubr.msk.f32.mxu0 %vm15783_vm0, %v18140_v21 }
0x1f12   :  { %14408 = vmatprep.subr.bf16.mxu0 %v18141_v22  ;;  %14411 = vmatprep.subr.bf16.mxu1 %v18141_v22 }
0x1f13   :  { %12895 = vmatmul.mubr.msk.f32.vlgmr.msra.gmra.mrb[54].mxu1 %vm338_vm3, %v5191_v13 }
0x1f14   :  { %14413 = vmatpush3.bf16.msra.mxu1 %v16037_v15  ;;  %12916 = vmatprep.mubr.msk.f32.mxu1 %vm15783_vm0, %v18140_v21 }
0x1f15   :  { %14410 = vmatpush3.bf16.msra.mxu0 %v16027_v12  ;;  %14414 = vmatprep.subr.bf16.mxu1 %v18141_v22 }
0x1f16   :  { %14417 = vmatprep.subr.bf16.mxu0 %v18141_v22 }
0x1f18   :  { %14416 = vmatpush3.bf16.msra.mxu1 %v16053_v23 }
0x1f19   :  { %14423 = vmatprep.subr.bf16.mxu1 %v18141_v22 }
0x1fc2   :  { %v5021_v7 = vpop.f32.mrb[54].mxu0 }
0x1fc3   :  { %v12856_v53 = vpop.f32.mrb[55].mxu0 }
0x1fe2   :  { %v5091_v63 = vpop.f32.mrb[52].mxu1  ;;  %v5162_v36 = vpop.f32.mrb[56].mxu0 }
0x1fe3   :  { %v15276_v61 = vadd.f32 %v18269_v39, %v5091_v63  ;;  %v5093_v29 = vpop.f32.mrb[53].mxu1  ;;  %v12891_v27 = vpop.f32.mrb[57].mxu0  ;;  %v18271_v63 = vld [vmem:[#allocation39_spill] sm:$0xff] }
0x1fe4   :  { %v15278_v20 = vadd.f32 %v18270_v2, %v5093_v29 }
0x1fe5   :  { %v11431_v50 = vmul.f32 -1.442695, %v15276_v61 }
0x1fe6   :  { %v5260_v5 = vpop.f32.mrb[54].mxu1  ;;  %v11432_v0 = vmul.f32 -1.442695, %v15278_v20  ;;  %v5022_v20 = vadd.f32 %v5021_v7, %v18189_v57 }
0x1fe7   :  { %15425 = vpow2.f32 %v11431_v50  ;;  %v5261_v3 = vadd.f32 %v16995_v38, %v5260_v5  ;;  %v12896_v13 = vpop.f32.mrb[55].mxu1  ;;  %v5163_v50 = vadd.f32 %v5162_v36, %v18188_v9 }
0x1fe8   :  { %15427 = vpow2.f32 %v11432_v0 }
0x1fe9   :  { %v5264_v25 = vmax.f32 %v5261_v3, 0.0 }
0x1feb   :  { %12906 = vmatmul.mubr.msk.f32.vlgmr.msra.gmra.mrb[58].mxu0 %vm422_vm4, %v5264_v25 }
0x1fec   :  { %14419 = vmatpush3.bf16.msra.mxu0 %v16057_v26  ;;  %12927 = vmatprep.mubr.msk.f32.mxu0 %vm15783_vm0, %v18140_v21 }
0x1fed   :  { %14420 = vmatprep.subr.bf16.mxu0 %v18141_v22 }
0x1ff0   :  { %14422 = vmatpush3.bf16.msra.mxu0 %v16067_v34 }
0x1ff1   :  { %v15426_v53 = vpop.eup %15425  ;;  %14430 = vmatprep.subr.bf16.mxu0 %v18271_v63 }
0x1ff2   :  { %v5170_v61 = vadd.f32 1.0, %v15426_v53  ;;  %v15428_v29 = vpop.eup %15427 }
0x1ff3   :  { %v5177_v27 = vadd.f32 1.0, %v15428_v29 }
0x1ff4   :  { %15429 = vrcp.f32 %v5170_v61  ;;  %v17011_v61 = vld [vmem:[#allocation9] ss:$0 sm:$0xff] }
0x1ff5   :  { %15431 = vrcp.f32 %v5177_v27 }
0x1ffe   :  { %v15430_v25 = vpop.eup %15429 }
0x1fff   :  { %v5180_v5 = vmul.f32 %v15430_v25, %v5163_v50  ;;  %v15432_v13 = vpop.eup %15431  ;;  %v18272_v50 = vld [vmem:[#allocation45_spill] sm:$0xff] }
0x2000   :  { %v5183_v0 = vsub.f32 1.0, %v15432_v13  ;;  %v5185_v55 = vmul.f32 %v15432_v13, %v16804_v1 }
0x2001   :  { %v5181_v3 = vadd.f32 %v5180_v5, %v5022_v20  ;;  %v17036_v20 = vld [vmem:[%s17994_s9] ss:$0 sm:$0xff] }
0x2003   :  { %15433 = vtanh.f32 %v5181_v3 }
0x200d   :  { %v15434_v2 = vpop.eup %15433 }
0x200e   :  { %v5184_v39 = vmul.f32 %v15434_v2, %v5183_v0  ;;  %v18273_v0 = vld [vmem:[#allocation41_spill] sm:$0xff] }
0x2010   :  { %v17008_v63 = vadd.f32 %v5185_v55, %v5184_v39  ;;  %v17024_v55 = vld [vmem:[%s17992_s7] ss:$0 sm:$0xff] }
0x2012   :  { %5188 = vst [vmem:[#allocation16 + $0x6] sm:$0x3] %v17008_v63 }
0x20be   :  { %v5334_v53 = vpop.f32.mrb[58].mxu0 }
0x20bf   :  { %v5335_v36 = vadd.f32 %v17011_v61, %v5334_v53  ;;  %v12907_v7 = vpop.f32.mrb[59].mxu0  ;;  %v18274_v53 = vld [vmem:[#allocation44_spill] sm:$0xff] }
0x20c0   :  { %v17049_v7 = vld [vmem:[%s17996_s11] ss:$0 sm:$0xff] }
0x20c1   :  { %v5338_v29 = vmax.f32 %v5335_v36, 0.0 }
0x20c3   :  { %12917 = vmatmul.mubr.msk.f32.vlgmr.msra.gmra.mrb[56].mxu1 %vm422_vm4, %v5338_v29 }
0x20c4   :  { %14425 = vmatpush3.bf16.msra.mxu1 %v16070_v37  ;;  %12938 = vmatprep.mubr.msk.f32.mxu1 %vm15783_vm0, %v18140_v21 }
0x20c5   :  { %14426 = vmatprep.subr.bf16.mxu1 %v18141_v22 }
0x20c8   :  { %14428 = vmatpush3.bf16.msra.mxu1 %v16082_v45 }
0x20c9   :  { %14437 = vmatprep.subr.bf16.mxu1 %v18141_v22 }
0x2196   :  { %v5408_v1 = vpop.f32.mrb[56].mxu1 }
0x2197   :  { %v5409_v39 = vadd.f32 %v17024_v55, %v5408_v1  ;;  %v12918_v2 = vpop.f32.mrb[57].mxu1 }
0x2198   :  { %v18275_v2 = vld [vmem:[#allocation46_spill] sm:$0xff] }
0x2199   :  { %v5412_v27 = vmax.f32 %v5409_v39, 0.0 }
0x219b   :  { %12928 = vmatmul.mubr.msk.f32.vlgmr.msra.gmra.mrb[60].mxu0 %vm422_vm4, %v5412_v27  ;;  %v18276_v27 = vld [vmem:[#allocation47_spill] sm:$0xff] }
0x219c   :  { %14432 = vmatpush1.bf16.msra.mxu0 %v18190_v52  ;;  %5628 = vmatprep.mubr.f32.mxu0 %v18140_v21 }
0x219d   :  { %14434 = vmatprep.subr.bf16.mxu0 %v18229_v40 }
0x21a0   :  { %14436 = vmatpush1.bf16.msra.mxu0 %v18230_v4 }
0x21a1   :  { %14444 = vmatprep.subr.bf16.mxu0 %v18272_v50 }
0x226e   :  { %v5482_v25 = vpop.f32.mrb[60].mxu0 }
0x226f   :  { %v5483_v5 = vadd.f32 %v17036_v20, %v5482_v25  ;;  %v12929_v3 = vpop.f32.mrb[61].mxu0  ;;  %v18277_v25 = vld [vmem:[#allocation48_spill] sm:$0xff] }
0x2270   :  { %v18279_v3 = vld [vmem:[#allocation50_spill] sm:$0xff] }
0x2271   :  { %v5486_v13 = vmax.f32 %v5483_v5, 0.0  ;;  %v18278_v5 = vld [vmem:[#allocation49_spill] sm:$0xff] }
0x2273   :  { %12939 = vmatmul.mubr.msk.f32.vlgmr.msra.gmra.mrb[58].mxu1 %vm422_vm4, %v5486_v13  ;;  %v18280_v13 = vld [vmem:[#allocation51_spill] sm:$0xff] }
0x2274   :  { %14439 = vmatpush3.bf16.msra.mxu1 %v18273_v0  ;;  %12949 = vmatprep.mubr.msk.f32.mxu1 %vm15783_vm0, %v18140_v21 }
0x2275   :  { %14440 = vmatprep.subr.bf16.mxu1 %v18141_v22 }
0x2278   :  { %14442 = vmatpush3.bf16.msra.mxu1 %v18274_v53 }
0x2279   :  { %14475 = vmatprep.subr.bf16.mxu1 %v18141_v22 }
0x2346   :  { %v5556_v36 = vpop.f32.mrb[58].mxu1 }
0x2347   :  { %v5557_v29 = vadd.f32 %v17049_v7, %v5556_v36  ;;  %v12940_v1 = vpop.f32.mrb[59].mxu1  ;;  %v18281_v36 = vld [vmem:[#allocation52_spill] sm:$0xff] }
0x2348   :  { %v18283_v1 = vld [vmem:[#allocation54_spill] sm:$0xff] }
0x2349   :  { %v5560_v39 = vmax.f32 %v5557_v29, 0.0  ;;  %v18282_v29 = vld [vmem:[#allocation53_spill] sm:$0xff] }
0x234b   :  { %11439 = vmatmul.mubr.msk.f32.vlgmr.msra.gmra.mrb[62].mxu0 %vm422_vm4, %v5560_v39  ;;  %12950 = vmatmul.mubr.msk.f32.vlgmr.msra.gmra.mrb[60].mxu1 %vm422_vm4, %v5560_v39  ;;  %v18284_v39 = vld [vmem:[#allocation55_spill] sm:$0xff] }
0x234c   :  { %14446 = vmatpush1.bf16.msra.mxu0 %v18275_v2  ;;  %14477 = vmatpush3.bf16.msra.mxu1 %v18276_v27  ;;  %v18286_v27 = vld [vmem:[#allocation57_spill] sm:$0xff]  ;;  %v18301_v2 = vld [vmem:[#allocation70_spill] sm:$0xff] }
0x234d   :  { %14448 = vmatprep.subr.bf16.mxu0 %v18277_v25  ;;  %14478 = vmatprep.subr.bf16.mxu1 %v18141_v22  ;;  %v18285_v25 = vld [vmem:[#allocation56_spill] sm:$0xff] }
0x234e   :  { %5769 = vmatprep.mubr.f32.mxu0 %v18140_v21  ;;  %12984 = vmatprep.mubr.msk.f32.mxu1 %vm15783_vm0, %v18140_v21 }
0x2350   :  { %14450 = vmatpush1.bf16.msra.mxu0 %v18278_v5  ;;  %14480 = vmatpush3.bf16.msra.mxu1 %v18279_v3  ;;  %v18287_v3 = vld [vmem:[#allocation58_spill] sm:$0xff]  ;;  %v18289_v5 = vld [vmem:[#allocation60_spill] sm:$0xff] }
0x2351   :  { %14452 = vmatprep.subr.bf16.mxu0 %v18280_v13  ;;  %14481 = vmatprep.subr.bf16.mxu1 %v18141_v22  ;;  %v18288_v13 = vld [vmem:[#allocation59_spill] sm:$0xff] }
0x2354   :  { %14454 = vmatpush1.bf16.msra.mxu0 %v18281_v36  ;;  %14483 = vmatpush3.bf16.msra.mxu1 %v18282_v29  ;;  %v18290_v29 = vld [vmem:[#allocation61_spill] sm:$0xff]  ;;  %v18292_v36 = vld [vmem:[#allocation63_spill] sm:$0xff] }
0x2355   :  { %14456 = vmatprep.subr.bf16.mxu0 %v18283_v1  ;;  %14484 = vmatprep.subr.bf16.mxu1 %v18141_v22  ;;  %v18291_v1 = vld [vmem:[#allocation62_spill] sm:$0xff] }
0x2358   :  { %14458 = vmatpush1.bf16.msra.mxu0 %v18284_v39  ;;  %14486 = vmatpush3.bf16.msra.mxu1 %v18285_v25  ;;  %v18293_v25 = vld [vmem:[#allocation64_spill] sm:$0xff]  ;;  %v18295_v39 = vld [vmem:[#allocation66_spill] sm:$0xff] }
0x2359   :  { %14460 = vmatprep.subr.bf16.mxu0 %v18286_v27  ;;  %14487 = vmatprep.subr.bf16.mxu1 %v18141_v22  ;;  %v18294_v27 = vld [vmem:[#allocation65_spill] sm:$0xff] }
0x235c   :  { %14462 = vmatpush1.bf16.msra.mxu0 %v18287_v3  ;;  %14489 = vmatpush3.bf16.msra.mxu1 %v18288_v13  ;;  %v18296_v13 = vld [vmem:[#allocation67_spill] sm:$0xff] }
0x235d   :  { %14464 = vmatprep.subr.bf16.mxu0 %v18289_v5  ;;  %14490 = vmatprep.subr.bf16.mxu1 %v18141_v22  ;;  %v18297_v5 = vld [vmem:[#allocation68_spill] sm:$0xff] }
0x2360   :  { %14466 = vmatpush1.bf16.msra.mxu0 %v18290_v29  ;;  %14492 = vmatpush3.bf16.msra.mxu1 %v18291_v1  ;;  %v17090_v1 = vld [vmem:[%s18126_s27] sm:$0xff] }
0x2361   :  { %14468 = vmatprep.subr.bf16.mxu0 %v18292_v36  ;;  %14493 = vmatprep.subr.bf16.mxu1 %v18141_v22  ;;  %18298 = vst [vmem:[#allocation26_spill] sm:$0xff] %v17090_v1  ;;  %v5869_v36 = vrot.slane %v17090_v1, 4 }
0x2364   :  { %14470 = vmatpush1.bf16.msra.mxu0 %v18293_v25  ;;  %14495 = vmatpush3.bf16.msra.mxu1 %v18294_v27  ;;  %v17096_v25 = vld [vmem:[%s18126_s27 + $0x8] sm:$0xff] }
0x2365   :  { %14472 = vmatprep.subr.bf16.mxu0 %v18295_v39  ;;  %14496 = vmatprep.subr.bf16.mxu1 %v18141_v22  ;;  %18299 = vst [vmem:[#allocation27_spill] sm:$0xff] %v17096_v25  ;;  %v5870_v39 = vrot.slane %v17096_v25, 3 }
0x2367   :  { %v5871_v1 = vsel %vm336_vm2, %v5870_v39, %v5869_v36 }
0x2368   :  { %14474 = vmatpush1.bf16.msra.mxu0 %v18296_v13  ;;  %14498 = vmatpush3.bf16.msra.mxu1 %v18297_v5 }
0x2369   :  { %12987 = vmatprep.subr.mxu0 %v18140_v21  ;;  %14499 = vmatprep.subr.bf16.mxu1 %v18141_v22 }
0x236b   :  { %5770 = vmatmul.mubr.f32.vlgmr.msra.gmra.mrb[62].mxu0 %v16904_v24  ;;  %12985 = vmatmul.mubr.f32.vlgmr.msra.gmra.mrb[62].mxu1 %v16904_v24 }
0x236c   :  { %12988 = vmatpush3.msk.msra.mxu0 %vm341_vm1, %v16972_v49  ;;  %12989 = vmatprep.mubr.msk.f32.mxu0 %vm15783_vm0, %v18140_v21 }
0x236d   :  { %14501 = vmatpush3.bf16.msra.mxu1 %v16011_v8  ;;  %13000 = vmatprep.mubr.msk.f32.mxu1 %vm15783_vm0, %v18140_v21 }
0x236e   :  { %14502 = vmatprep.subr.bf16.mxu1 %v18141_v22  ;;  %14505 = vmatprep.subr.bf16.mxu0 %v18141_v22 }
0x236f   :  { %12990 = vmatmul.mubr.msk.f32.vlgmr.msra.gmra.mrb[64].mxu0 %vm338_vm3, %v5871_v1  ;;  %v18300_v1 = vld [vmem:[#allocation69_spill] sm:$0xff] }
0x2370   :  { %14507 = vmatpush3.bf16.msra.mxu0 %v16037_v15  ;;  %13011 = vmatprep.mubr.msk.f32.mxu0 %vm15783_vm0, %v18140_v21 }
0x2371   :  { %14504 = vmatpush3.bf16.msra.mxu1 %v16027_v12  ;;  %14508 = vmatprep.subr.bf16.mxu0 %v18141_v22 }
0x2372   :  { %14511 = vmatprep.subr.bf16.mxu1 %v18141_v22 }
0x2374   :  { %14510 = vmatpush3.bf16.msra.mxu0 %v16053_v23 }
0x2375   :  { %14517 = vmatprep.subr.bf16.mxu0 %v18141_v22 }
0x241e   :  { %v5701_v36 = vpop.f32.mrb[60].mxu1 }
0x241f   :  { %v12951_v39 = vpop.f32.mrb[61].mxu1 }
0x243e   :  { %v5771_v25 = vpop.f32.mrb[62].mxu0  ;;  %v5842_v5 = vpop.f32.mrb[62].mxu1 }
0x243f   :  { %v15280_v13 = vadd.f32 %v18300_v1, %v5771_v25  ;;  %v5773_v27 = vpop.f32.mrb[63].mxu0  ;;  %v12986_v29 = vpop.f32.mrb[63].mxu1  ;;  %v18302_v25 = vld [vmem:[#allocation25_spill] sm:$0xff] }
0x2440   :  { %v15282_v53 = vadd.f32 %v18301_v2, %v5773_v27 }
0x2441   :  { %v11441_v3 = vmul.f32 -1.442695, %v15280_v13 }
0x2442   :  { %v5940_v0 = vpop.f32.mrb[64].mxu0  ;;  %v11442_v52 = vmul.f32 -1.442695, %v15282_v53  ;;  %v5702_v53 = vadd.f32 %v5701_v36, %v16458_v48 }
0x2443   :  { %15435 = vpow2.f32 %v11441_v3  ;;  %v5941_v50 = vadd.f32 %v16995_v38, %v5940_v0  ;;  %v12991_v4 = vpop.f32.mrb[65].mxu0  ;;  %v5843_v0 = vadd.f32 %v5842_v5, %v16455_v16 }
0x2444   :  { %15437 = vpow2.f32 %v11442_v52 }
0x2445   :  { %v5944_v40 = vmax.f32 %v5941_v50, 0.0 }
0x2447   :  { %13001 = vmatmul.mubr.msk.f32.vlgmr.msra.gmra.mrb[64].mxu1 %vm422_vm4, %v5944_v40 }
0x2448   :  { %14513 = vmatpush3.bf16.msra.mxu1 %v16057_v26  ;;  %13022 = vmatprep.mubr.msk.f32.mxu1 %vm15783_vm0, %v18140_v21 }
0x2449   :  { %14514 = vmatprep.subr.bf16.mxu1 %v18141_v22 }
0x244c   :  { %14516 = vmatpush3.bf16.msra.mxu1 %v16067_v34 }
0x244d   :  { %v15436_v27 = vpop.eup %15435  ;;  %14524 = vmatprep.subr.bf16.mxu1 %v18302_v25 }
0x244e   :  { %v5850_v3 = vadd.f32 1.0, %v15436_v27  ;;  %v15438_v4 = vpop.eup %15437 }
0x244f   :  { %v5857_v50 = vadd.f32 1.0, %v15438_v4 }
0x2450   :  { %15439 = vrcp.f32 %v5850_v3 }
0x2451   :  { %15441 = vrcp.f32 %v5857_v50 }
0x245a   :  { %v15440_v40 = vpop.eup %15439 }
0x245b   :  { %v5860_v13 = vmul.f32 %v15440_v40, %v5843_v0  ;;  %v15442_v39 = vpop.eup %15441 }
0x245c   :  { %v5863_v52 = vsub.f32 1.0, %v15442_v39  ;;  %v5865_v57 = vmul.f32 %v15442_v39, %v16904_v24 }
0x245d   :  { %v5861_v29 = vadd.f32 %v5860_v13, %v5702_v53 }
0x245f   :  { %15443 = vtanh.f32 %v5861_v29 }
0x2469   :  { %v15444_v2 = vpop.eup %15443 }
0x246a   :  { %v5864_v1 = vmul.f32 %v15444_v2, %v5863_v52  ;;  %v18303_v52 = vld [vmem:[#allocation30_spill] sm:$0xff] }
0x246c   :  { %v17135_v25 = vadd.f32 %v5865_v57, %v5864_v1 }
0x246e   :  { %5868 = vst [vmem:[#allocation17 + $0x8] sm:$0x3] %v17135_v25 }
0x251a   :  { %v6014_v27 = vpop.f32.mrb[64].mxu1 }
0x251b   :  { %v6015_v5 = vadd.f32 %v17011_v61, %v6014_v27  ;;  %v13002_v3 = vpop.f32.mrb[65].mxu1  ;;  %v18304_v27 = vld [vmem:[#allocation31_spill] sm:$0xff] }
0x251c   :  { %v17200_v3 = vld [vmem:[%s18135_s28] sm:$0xff] }
0x251d   :  { %v6018_v4 = vmax.f32 %v6015_v5, 0.0  ;;  %v18305_v5 = vld [vmem:[#allocation32_spill] sm:$0xff]  ;;  %18306 = vst [vmem:[#allocation28_spill] sm:$0xff] %v17200_v3 }
0x251f   :  { %13012 = vmatmul.mubr.msk.f32.vlgmr.msra.gmra.mrb[66].mxu0 %vm422_vm4, %v6018_v4  ;;  %v6549_v4 = vrot.slane %v17200_v3, 3 }
0x2520   :  { %14519 = vmatpush3.bf16.msra.mxu0 %v16070_v37  ;;  %13033 = vmatprep.mubr.msk.f32.mxu0 %vm15783_vm0, %v18140_v21 }
0x2521   :  { %14520 = vmatprep.subr.bf16.mxu0 %v18141_v22 }
0x2524   :  { %14522 = vmatpush3.bf16.msra.mxu0 %v16082_v45 }
0x2525   :  { %14531 = vmatprep.subr.bf16.mxu0 %v18141_v22 }
0x25f2   :  { %v6088_v57 = vpop.f32.mrb[66].mxu0 }
0x25f3   :  { %v6089_v24 = vadd.f32 %v17024_v55, %v6088_v57  ;;  %v13013_v2 = vpop.f32.mrb[67].mxu0  ;;  %v17206_v57 = vld [vmem:[%s18135_s28 + $0x8] sm:$0xff] }
0x25f4   :  { %18307 = vst [vmem:[#allocation33_spill] sm:$0xff] %v17206_v57 }
0x25f5   :  { %v6092_v36 = vmax.f32 %v6089_v24, 0.0  ;;  %v6550_v24 = vrot.slane %v17206_v57, 2 }
0x25f7   :  { %13023 = vmatmul.mubr.msk.f32.vlgmr.msra.gmra.mrb[66].mxu1 %vm422_vm4, %v6092_v36  ;;  %v6551_v2 = vsel %vm336_vm2, %v6550_v24, %v6549_v4  ;;  %v18309_v4 = vld [vmem:[#allocation36_spill] sm:$0xff] }
0x25f8   :  { %14526 = vmatpush1.bf16.msra.mxu1 %v16088_v51  ;;  %6308 = vmatprep.mubr.f32.mxu1 %v18140_v21 }
0x25f9   :  { %14528 = vmatprep.subr.bf16.mxu1 %v16105_v62 }
0x25fc   :  { %14530 = vmatpush1.bf16.msra.mxu1 %v16107_v6 }
0x25fd   :  { %14538 = vmatprep.subr.bf16.mxu1 %v16114_v14 }
0x26ca   :  { %v6162_v1 = vpop.f32.mrb[66].mxu1 }
0x26cb   :  { %v6163_v50 = vadd.f32 %v17036_v20, %v6162_v1  ;;  %v13024_v0 = vpop.f32.mrb[67].mxu1 }
0x26cd   :  { %v6166_v40 = vmax.f32 %v6163_v50, 0.0 }
0x26cf   :  { %13034 = vmatmul.mubr.msk.f32.vlgmr.msra.gmra.mrb[68].mxu0 %vm422_vm4, %v6166_v40  ;;  %v18308_v40 = vld [vmem:[#allocation35_spill] sm:$0xff] }
0x26d0   :  { %14533 = vmatpush3.bf16.msra.mxu0 %v16098_v58  ;;  %13044 = vmatprep.mubr.msk.f32.mxu0 %vm15783_vm0, %v18140_v21 }
0x26d1   :  { %14534 = vmatprep.subr.bf16.mxu0 %v18141_v22 }
0x26d4   :  { %14536 = vmatpush3.bf16.msra.mxu0 %v16110_v10 }
0x26d5   :  { %14569 = vmatprep.subr.bf16.mxu0 %v18141_v22 }
0x27a2   :  { %v6236_v53 = vpop.f32.mrb[68].mxu0 }
0x27a3   :  { %v6237_v13 = vadd.f32 %v17049_v7, %v6236_v53  ;;  %v13035_v29 = vpop.f32.mrb[69].mxu0 }
0x27a5   :  { %v6240_v39 = vmax.f32 %v6237_v13, 0.0 }
0x27a7   :  { %11449 = vmatmul.mubr.msk.f32.vlgmr.msra.gmra.mrb[68].mxu1 %vm422_vm4, %v6240_v39  ;;  %13045 = vmatmul.mubr.msk.f32.vlgmr.msra.gmra.mrb[70].mxu0 %vm422_vm4, %v6240_v39 }
0x27a8   :  { %14540 = vmatpush1.bf16.msra.mxu1 %v16124_v30  ;;  %14571 = vmatpush3.bf16.msra.mxu0 %v16126_v32 }
0x27a9   :  { %14542 = vmatprep.subr.bf16.mxu1 %v16128_v35  ;;  %14572 = vmatprep.subr.bf16.mxu0 %v18141_v22 }
0x27aa   :  { %6449 = vmatprep.mubr.f32.mxu1 %v18140_v21  ;;  %13079 = vmatprep.mubr.msk.f32.mxu0 %vm15783_vm0, %v18140_v21 }
0x27ac   :  { %14544 = vmatpush1.bf16.msra.mxu1 %v16133_v43  ;;  %14574 = vmatpush3.bf16.msra.mxu0 %v16136_v46 }
0x27ad   :  { %14546 = vmatprep.subr.bf16.mxu1 %v16139_v47  ;;  %14575 = vmatprep.subr.bf16.mxu0 %v18141_v22 }
0x27b0   :  { %14548 = vmatpush1.bf16.msra.mxu1 %v16146_v56  ;;  %14577 = vmatpush3.bf16.msra.mxu0 %v16149_v59 }
0x27b1   :  { %14550 = vmatprep.subr.bf16.mxu1 %v16152_v60  ;;  %14578 = vmatprep.subr.bf16.mxu0 %v18141_v22 }
0x27b4   :  { %14552 = vmatpush1.bf16.msra.mxu1 %v16156_v11  ;;  %14580 = vmatpush3.bf16.msra.mxu0 %v16159_v18 }
0x27b5   :  { %14554 = vmatprep.subr.bf16.mxu1 %v16162_v19  ;;  %14581 = vmatprep.subr.bf16.mxu0 %v18141_v22 }
0x27b8   :  { %14556 = vmatpush1.bf16.msra.mxu1 %v16166_v28  ;;  %14583 = vmatpush3.bf16.msra.mxu0 %v16169_v31 }
0x27b9   :  { %14558 = vmatprep.subr.bf16.mxu1 %v16172_v33  ;;  %14584 = vmatprep.subr.bf16.mxu0 %v18141_v22 }
0x27bc   :  { %14560 = vmatpush1.bf16.msra.mxu1 %v16176_v44  ;;  %14586 = vmatpush3.bf16.msra.mxu0 %v18176_v17 }
0x27bd   :  { %14562 = vmatprep.subr.bf16.mxu1 %v18177_v41  ;;  %14587 = vmatprep.subr.bf16.mxu0 %v18141_v22 }
0x27c0   :  { %14564 = vmatpush1.bf16.msra.mxu1 %v18262_v42  ;;  %14589 = vmatpush3.bf16.msra.mxu0 %v18263_v54 }
0x27c1   :  { %14566 = vmatprep.subr.bf16.mxu1 %v18303_v52  ;;  %14590 = vmatprep.subr.bf16.mxu0 %v18141_v22 }
0x27c4   :  { %14568 = vmatpush1.bf16.msra.mxu1 %v18304_v27  ;;  %14592 = vmatpush3.bf16.msra.mxu0 %v18305_v5 }
0x27c5   :  { %13082 = vmatprep.subr.mxu1 %v18140_v21  ;;  %14593 = vmatprep.subr.bf16.mxu0 %v18141_v22 }
0x27c7   :  { %6450 = vmatmul.mubr.f32.vlgmr.msra.gmra.mrb[68].mxu1 %v17008_v63  ;;  %13080 = vmatmul.mubr.f32.vlgmr.msra.gmra.mrb[72].mxu0 %v17008_v63 }
0x27c8   :  { %13083 = vmatpush3.msk.msra.mxu1 %vm341_vm1, %v16972_v49  ;;  %13084 = vmatprep.mubr.msk.f32.mxu1 %vm15783_vm0, %v18140_v21 }
0x27c9   :  { %14595 = vmatpush3.bf16.msra.mxu0 %v16011_v8  ;;  %13095 = vmatprep.mubr.msk.f32.mxu0 %vm15783_vm0, %v18140_v21 }
0x27ca   :  { %14596 = vmatprep.subr.bf16.mxu0 %v18141_v22  ;;  %14599 = vmatprep.subr.bf16.mxu1 %v18141_v22 }
0x27cb   :  { %13085 = vmatmul.mubr.msk.f32.vlgmr.msra.gmra.mrb[70].mxu1 %vm338_vm3, %v6551_v2 }
0x27cc   :  { %14601 = vmatpush3.bf16.msra.mxu1 %v16037_v15  ;;  %13106 = vmatprep.mubr.msk.f32.mxu1 %vm15783_vm0, %v18140_v21 }
0x27cd   :  { %14598 = vmatpush3.bf16.msra.mxu0 %v16027_v12  ;;  %14602 = vmatprep.subr.bf16.mxu1 %v18141_v22 }
0x27ce   :  { %14605 = vmatprep.subr.bf16.mxu0 %v18141_v22 }
0x27d0   :  { %14604 = vmatpush3.bf16.msra.mxu1 %v16053_v23 }
0x27d1   :  { %14611 = vmatprep.subr.bf16.mxu1 %v18141_v22 }
0x287a   :  { %v6381_v36 = vpop.f32.mrb[70].mxu0 }
0x287b   :  { %v13046_v1 = vpop.f32.mrb[71].mxu0 }
0x289a   :  { %v6451_v50 = vpop.f32.mrb[68].mxu1  ;;  %v6522_v0 = vpop.f32.mrb[72].mxu0 }
0x289b   :  { %v15284_v53 = vadd.f32 %v18308_v40, %v6451_v50  ;;  %v6453_v13 = vpop.f32.mrb[69].mxu1  ;;  %v13081_v29 = vpop.f32.mrb[73].mxu0  ;;  %v18310_v50 = vld [vmem:[#allocation39_spill] sm:$0xff] }
0x289c   :  { %v15286_v24 = vadd.f32 %v18309_v4, %v6453_v13  ;;  %v6523_v13 = vadd.f32 %v6522_v0, %v18188_v9  ;;  %v18311_v29 = vld [vmem:[#allocation38_spill] sm:$0xff] }
0x289d   :  { %v11451_v39 = vmul.f32 -1.442695, %v15284_v53 }
0x289e   :  { %v6620_v2 = vpop.f32.mrb[70].mxu1  ;;  %v11452_v27 = vmul.f32 -1.442695, %v15286_v24 }
0x289f   :  { %15445 = vpow2.f32 %v11451_v39  ;;  %v6621_v57 = vadd.f32 %v16995_v38, %v6620_v2  ;;  %v13086_v3 = vpop.f32.mrb[71].mxu1  ;;  %v6382_v39 = vadd.f32 %v6381_v36, %v18311_v29 }
0x28a0   :  { %15447 = vpow2.f32 %v11452_v27 }
0x28a1   :  { %v6624_v5 = vmax.f32 %v6621_v57, 0.0 }
0x28a3   :  { %13096 = vmatmul.mubr.msk.f32.vlgmr.msra.gmra.mrb[74].mxu0 %vm422_vm4, %v6624_v5 }
0x28a4   :  { %14607 = vmatpush3.bf16.msra.mxu0 %v16057_v26  ;;  %13117 = vmatprep.mubr.msk.f32.mxu0 %vm15783_vm0, %v18140_v21 }
0x28a5   :  { %14608 = vmatprep.subr.bf16.mxu0 %v18141_v22 }
0x28a8   :  { %14610 = vmatpush3.bf16.msra.mxu0 %v16067_v34 }
0x28a9   :  { %v15446_v1 = vpop.eup %15445  ;;  %14618 = vmatprep.subr.bf16.mxu0 %v18310_v50 }
0x28aa   :  { %v6530_v53 = vadd.f32 1.0, %v15446_v1  ;;  %v15448_v3 = vpop.eup %15447 }
0x28ab   :  { %v6537_v57 = vadd.f32 1.0, %v15448_v3 }
0x28ac   :  { %15449 = vrcp.f32 %v6530_v53 }
0x28ad   :  { %15451 = vrcp.f32 %v6537_v57  ;;  %v18314_v57 = vld [vmem:[#allocation43_spill] sm:$0xff] }
0x28b6   :  { %v15450_v5 = vpop.eup %15449 }
0x28b7   :  { %v6540_v24 = vmul.f32 %v15450_v5, %v6523_v13  ;;  %v15452_v4 = vpop.eup %15451  ;;  %v18315_v13 = vld [vmem:[#allocation45_spill] sm:$0xff] }
0x28b8   :  { %v6543_v27 = vsub.f32 1.0, %v15452_v4  ;;  %v6545_v54 = vmul.f32 %v15452_v4, %v17008_v63  ;;  %v18313_v4 = vld [vmem:[#allocation42_spill] sm:$0xff] }
0x28b9   :  { %v6541_v2 = vadd.f32 %v6540_v24, %v6382_v39 }
0x28bb   :  { %15453 = vtanh.f32 %v6541_v2 }
0x28c5   :  { %v15454_v40 = vpop.eup %15453 }
0x28c6   :  { %v6544_v52 = vmul.f32 %v15454_v40, %v6543_v27  ;;  %v18312_v40 = vld [vmem:[#allocation40_spill] sm:$0xff]  ;;  %v18316_v27 = vld [vmem:[#allocation41_spill] sm:$0xff] }
0x28c8   :  { %v17245_v50 = vadd.f32 %v6545_v54, %v6544_v52 }
0x28ca   :  { %6548 = vst [vmem:[#allocation16 + $0x8] sm:$0x3] %v17245_v50 }
0x2976   :  { %v6694_v1 = vpop.f32.mrb[74].mxu0 }
0x2977   :  { %v6695_v0 = vadd.f32 %v17011_v61, %v6694_v1  ;;  %v13097_v53 = vpop.f32.mrb[75].mxu0  ;;  %v18317_v1 = vld [vmem:[#allocation44_spill] sm:$0xff] }
0x2979   :  { %v6698_v3 = vmax.f32 %v6695_v0, 0.0 }
0x297b   :  { %13107 = vmatmul.mubr.msk.f32.vlgmr.msra.gmra.mrb[72].mxu1 %vm422_vm4, %v6698_v3 }
0x297c   :  { %14613 = vmatpush3.bf16.msra.mxu1 %v16070_v37  ;;  %13128 = vmatprep.mubr.msk.f32.mxu1 %vm15783_vm0, %v18140_v21 }
0x297d   :  { %14614 = vmatprep.subr.bf16.mxu1 %v18141_v22 }
0x2980   :  { %14616 = vmatpush3.bf16.msra.mxu1 %v16082_v45 }
0x2981   :  { %14625 = vmatprep.subr.bf16.mxu1 %v18141_v22 }
0x2a4e   :  { %v6768_v54 = vpop.f32.mrb[72].mxu1 }
0x2a4f   :  { %v6769_v63 = vadd.f32 %v17024_v55, %v6768_v54  ;;  %v13108_v52 = vpop.f32.mrb[73].mxu1 }
0x2a50   :  { %v18319_v52 = vld [vmem:[#allocation47_spill] sm:$0xff] }
0x2a51   :  { %v6772_v36 = vmax.f32 %v6769_v63, 0.0  ;;  %v18318_v63 = vld [vmem:[#allocation46_spill] sm:$0xff] }
0x2a53   :  { %13118 = vmatmul.mubr.msk.f32.vlgmr.msra.gmra.mrb[76].mxu0 %vm422_vm4, %v6772_v36  ;;  %v18320_v36 = vld [vmem:[#allocation48_spill] sm:$0xff] }
0x2a54   :  { %14620 = vmatpush1.bf16.msra.mxu0 %v18312_v40  ;;  %6988 = vmatprep.mubr.f32.mxu0 %v18140_v21 }
0x2a55   :  { %14622 = vmatprep.subr.bf16.mxu0 %v18313_v4 }
0x2a58   :  { %14624 = vmatpush1.bf16.msra.mxu0 %v18314_v57 }
0x2a59   :  { %14632 = vmatprep.subr.bf16.mxu0 %v18315_v13 }
0x2b26   :  { %v6842_v5 = vpop.f32.mrb[76].mxu0 }
0x2b27   :  { %v6843_v39 = vadd.f32 %v17036_v20, %v6842_v5  ;;  %v13119_v24 = vpop.f32.mrb[77].mxu0  ;;  %v18321_v5 = vld [vmem:[#allocation49_spill] sm:$0xff] }
0x2b28   :  { %v18323_v24 = vld [vmem:[#allocation51_spill] sm:$0xff] }
0x2b29   :  { %v6846_v2 = vmax.f32 %v6843_v39, 0.0  ;;  %v18322_v39 = vld [vmem:[#allocation50_spill] sm:$0xff] }
0x2b2b   :  { %13129 = vmatmul.mubr.msk.f32.vlgmr.msra.gmra.mrb[74].mxu1 %vm422_vm4, %v6846_v2  ;;  %v18324_v2 = vld [vmem:[#allocation52_spill] sm:$0xff] }
0x2b2c   :  { %14627 = vmatpush3.bf16.msra.mxu1 %v18316_v27  ;;  %13139 = vmatprep.mubr.msk.f32.mxu1 %vm15783_vm0, %v18140_v21 }
0x2b2d   :  { %14628 = vmatprep.subr.bf16.mxu1 %v18141_v22 }
0x2b30   :  { %14630 = vmatpush3.bf16.msra.mxu1 %v18317_v1 }
0x2b31   :  { %14663 = vmatprep.subr.bf16.mxu1 %v18141_v22 }
0x2bfe   :  { %v6916_v0 = vpop.f32.mrb[74].mxu1 }
0x2bff   :  { %v6917_v53 = vadd.f32 %v17049_v7, %v6916_v0  ;;  %v13130_v3 = vpop.f32.mrb[75].mxu1  ;;  %v18325_v0 = vld [vmem:[#allocation53_spill] sm:$0xff] }
0x2c00   :  { %v18327_v3 = vld [vmem:[#allocation55_spill] sm:$0xff] }
0x2c01   :  { %v6920_v54 = vmax.f32 %v6917_v53, 0.0  ;;  %v18326_v53 = vld [vmem:[#allocation54_spill] sm:$0xff] }
0x2c03   :  { %11459 = vmatmul.mubr.msk.f32.vlgmr.msra.gmra.mrb[78].mxu0 %vm422_vm4, %v6920_v54  ;;  %13140 = vmatmul.mubr.msk.f32.vlgmr.msra.gmra.mrb[76].mxu1 %vm422_vm4, %v6920_v54  ;;  %v18328_v54 = vld [vmem:[#allocation56_spill] sm:$0xff] }
0x2c04   :  { %14634 = vmatpush1.bf16.msra.mxu0 %v18318_v63  ;;  %14665 = vmatpush3.bf16.msra.mxu1 %v18319_v52  ;;  %v18342_v52 = vld [vmem:[#allocation27_spill] sm:$0xff] }
0x2c05   :  { %14636 = vmatprep.subr.bf16.mxu0 %v18320_v36  ;;  %14666 = vmatprep.subr.bf16.mxu1 %v18141_v22  ;;  %v18329_v36 = vld [vmem:[#allocation57_spill] sm:$0xff] }
0x2c06   :  { %7129 = vmatprep.mubr.f32.mxu0 %v18140_v21  ;;  %13174 = vmatprep.mubr.msk.f32.mxu1 %vm15783_vm0, %v18140_v21 }
0x2c08   :  { %14638 = vmatpush1.bf16.msra.mxu0 %v18321_v5  ;;  %14668 = vmatpush3.bf16.msra.mxu1 %v18322_v39  ;;  %v18330_v39 = vld [vmem:[#allocation58_spill] sm:$0xff]  ;;  %v18332_v5 = vld [vmem:[#allocation60_spill] sm:$0xff] }
0x2c09   :  { %14640 = vmatprep.subr.bf16.mxu0 %v18323_v24  ;;  %14669 = vmatprep.subr.bf16.mxu1 %v18141_v22  ;;  %v18331_v24 = vld [vmem:[#allocation59_spill] sm:$0xff] }
0x2c0c   :  { %14642 = vmatpush1.bf16.msra.mxu0 %v18324_v2  ;;  %14671 = vmatpush3.bf16.msra.mxu1 %v18325_v0  ;;  %v18333_v0 = vld [vmem:[#allocation61_spill] sm:$0xff]  ;;  %v18335_v2 = vld [vmem:[#allocation63_spill] sm:$0xff] }
0x2c0d   :  { %14644 = vmatprep.subr.bf16.mxu0 %v18326_v53  ;;  %14672 = vmatprep.subr.bf16.mxu1 %v18141_v22  ;;  %v18334_v53 = vld [vmem:[#allocation62_spill] sm:$0xff] }
0x2c10   :  { %14646 = vmatpush1.bf16.msra.mxu0 %v18327_v3  ;;  %14674 = vmatpush3.bf16.msra.mxu1 %v18328_v54  ;;  %v18336_v54 = vld [vmem:[#allocation64_spill] sm:$0xff]  ;;  %v18338_v3 = vld [vmem:[#allocation66_spill] sm:$0xff] }
0x2c11   :  { %14648 = vmatprep.subr.bf16.mxu0 %v18329_v36  ;;  %14675 = vmatprep.subr.bf16.mxu1 %v18141_v22  ;;  %v18337_v36 = vld [vmem:[#allocation65_spill] sm:$0xff] }
0x2c14   :  { %14650 = vmatpush1.bf16.msra.mxu0 %v18330_v39  ;;  %14677 = vmatpush3.bf16.msra.mxu1 %v18331_v24  ;;  %v18339_v24 = vld [vmem:[#allocation67_spill] sm:$0xff]  ;;  %v18341_v39 = vld [vmem:[#allocation26_spill] sm:$0xff] }
0x2c15   :  { %14652 = vmatprep.subr.bf16.mxu0 %v18332_v5  ;;  %14678 = vmatprep.subr.bf16.mxu1 %v18141_v22  ;;  %v18340_v5 = vld [vmem:[#allocation68_spill] sm:$0xff] }
0x2c18   :  { %14654 = vmatpush1.bf16.msra.mxu0 %v18333_v0  ;;  %14680 = vmatpush3.bf16.msra.mxu1 %v18334_v53  ;;  %v7229_v0 = vrot.slane %v18341_v39, 5  ;;  %v7230_v53 = vrot.slane %v18342_v52, 4 }
0x2c19   :  { %14656 = vmatprep.subr.bf16.mxu0 %v18335_v2  ;;  %14681 = vmatprep.subr.bf16.mxu1 %v18141_v22 }
0x2c1c   :  { %14658 = vmatpush1.bf16.msra.mxu0 %v18336_v54  ;;  %14683 = vmatpush3.bf16.msra.mxu1 %v18337_v36  ;;  %v18344_v54 = vld [vmem:[#allocation70_spill] sm:$0xff] }
0x2c1d   :  { %14660 = vmatprep.subr.bf16.mxu0 %v18338_v3  ;;  %14684 = vmatprep.subr.bf16.mxu1 %v18141_v22 }
0x2c20   :  { %14662 = vmatpush1.bf16.msra.mxu0 %v18339_v24  ;;  %14686 = vmatpush3.bf16.msra.mxu1 %v18340_v5  ;;  %v7231_v5 = vsel %vm336_vm2, %v7230_v53, %v7229_v0 }
0x2c21   :  { %13177 = vmatprep.subr.mxu0 %v18140_v21  ;;  %14687 = vmatprep.subr.bf16.mxu1 %v18141_v22 }
0x2c23   :  { %7130 = vmatmul.mubr.f32.vlgmr.msra.gmra.mrb[78].mxu0 %v17135_v25  ;;  %13175 = vmatmul.mubr.f32.vlgmr.msra.gmra.mrb[78].mxu1 %v17135_v25 }
0x2c24   :  { %13178 = vmatpush3.msk.msra.mxu0 %vm341_vm1, %v16972_v49  ;;  %13179 = vmatprep.mubr.msk.f32.mxu0 %vm15783_vm0, %v18140_v21 }
0x2c25   :  { %14689 = vmatpush3.bf16.msra.mxu1 %v16011_v8  ;;  %13190 = vmatprep.mubr.msk.f32.mxu1 %vm15783_vm0, %v18140_v21 }
0x2c26   :  { %14690 = vmatprep.subr.bf16.mxu1 %v18141_v22  ;;  %14693 = vmatprep.subr.bf16.mxu0 %v18141_v22 }
0x2c27   :  { %13180 = vmatmul.mubr.msk.f32.vlgmr.msra.gmra.mrb[80].mxu0 %vm338_vm3, %v7231_v5  ;;  %v18343_v5 = vld [vmem:[#allocation69_spill] sm:$0xff] }
0x2c28   :  { %14695 = vmatpush3.bf16.msra.mxu0 %v16037_v15  ;;  %13201 = vmatprep.mubr.msk.f32.mxu0 %vm15783_vm0, %v18140_v21 }
0x2c29   :  { %14692 = vmatpush3.bf16.msra.mxu1 %v16027_v12  ;;  %14696 = vmatprep.subr.bf16.mxu0 %v18141_v22 }
0x2c2a   :  { %14699 = vmatprep.subr.bf16.mxu1 %v18141_v22 }
0x2c2c   :  { %14698 = vmatpush3.bf16.msra.mxu0 %v16053_v23 }
0x2c2d   :  { %14705 = vmatprep.subr.bf16.mxu0 %v18141_v22 }
0x2cd6   :  { %v7061_v49 = vpop.f32.mrb[76].mxu1 }
0x2cd7   :  { %v13141_v52 = vpop.f32.mrb[77].mxu1 }
0x2cf6   :  { %v7131_v39 = vpop.f32.mrb[78].mxu0  ;;  %v7202_v0 = vpop.f32.mrb[78].mxu1 }
0x2cf7   :  { %v15288_v53 = vadd.f32 %v18343_v5, %v7131_v39  ;;  %v7133_v24 = vpop.f32.mrb[79].mxu0  ;;  %v13176_v3 = vpop.f32.mrb[79].mxu1 }
0x2cf8   :  { %v15290_v2 = vadd.f32 %v18344_v54, %v7133_v24  ;;  %v18345_v3 = vld [vmem:[#allocation25_spill] sm:$0xff] }
0x2cf9   :  { %v11461_v36 = vmul.f32 -1.442695, %v15288_v53 }
0x2cfa   :  { %v7300_v63 = vpop.f32.mrb[80].mxu0  ;;  %v11462_v57 = vmul.f32 -1.442695, %v15290_v2 }
0x2cfb   :  { %15455 = vpow2.f32 %v11461_v36  ;;  %v7301_v1 = vadd.f32 %v16995_v38, %v7300_v63  ;;  %v13181_v27 = vpop.f32.mrb[81].mxu0  ;;  %v7062_v63 = vadd.f32 %v7061_v49, %v16458_v48 }
0x2cfc   :  { %15457 = vpow2.f32 %v11462_v57 }
0x2cfd   :  { %v7304_v13 = vmax.f32 %v7301_v1, 0.0  ;;  %v7203_v1 = vadd.f32 %v7202_v0, %v16455_v16 }
0x2cff   :  { %13191 = vmatmul.mubr.msk.f32.vlgmr.msra.gmra.mrb[80].mxu1 %vm422_vm4, %v7304_v13 }
0x2d00   :  { %14701 = vmatpush3.bf16.msra.mxu1 %v16057_v26  ;;  %13212 = vmatprep.mubr.msk.f32.mxu1 %vm15783_vm0, %v18140_v21 }
0x2d01   :  { %14702 = vmatprep.subr.bf16.mxu1 %v18141_v22 }
0x2d04   :  { %14704 = vmatpush3.bf16.msra.mxu1 %v16067_v34 }
0x2d05   :  { %v15456_v24 = vpop.eup %15455  ;;  %14712 = vmatprep.subr.bf16.mxu1 %v18345_v3 }
0x2d06   :  { %v7210_v36 = vadd.f32 1.0, %v15456_v24  ;;  %v15458_v38 = vpop.eup %15457 }
0x2d07   :  { %v7217_v27 = vadd.f32 1.0, %v15458_v38 }
0x2d08   :  { %15459 = vrcp.f32 %v7210_v36 }
0x2d09   :  { %15461 = vrcp.f32 %v7217_v27 }
0x2d12   :  { %v15460_v13 = vpop.eup %15459 }
0x2d13   :  { %v7220_v2 = vmul.f32 %v15460_v13, %v7203_v1  ;;  %v15462_v39 = vpop.eup %15461 }
0x2d14   :  { %v7223_v57 = vsub.f32 1.0, %v15462_v39  ;;  %v7225_v5 = vmul.f32 %v15462_v39, %v17135_v25  ;;  %v18348_v39 = vld [vmem:[#allocation31_spill] sm:$0xff] }
0x2d15   :  { %v7221_v52 = vadd.f32 %v7220_v2, %v7062_v63 }
0x2d17   :  { %15463 = vtanh.f32 %v7221_v52  ;;  %v18347_v52 = vld [vmem:[#allocation30_spill] sm:$0xff] }
0x2d21   :  { %v15464_v53 = vpop.eup %15463 }
0x2d22   :  { %v7224_v54 = vmul.f32 %v15464_v53, %v7223_v57  ;;  %v18349_v57 = vld [vmem:[#allocation32_spill] sm:$0xff] }
0x2d23   :  { %v18350_v53 = vld [vmem:[#allocation28_spill] sm:$0xff] }
0x2d24   :  { %v17345_v3 = vadd.f32 %v7225_v5, %v7224_v54 }
0x2d26   :  { %7228 = vst [vmem:[#allocation17 + $0x6] sm:$0x3] %v17345_v3 }
0x2dd2   :  { %v7374_v24 = vpop.f32.mrb[80].mxu1 }
0x2dd3   :  { %v7375_v0 = vadd.f32 %v17011_v61, %v7374_v24  ;;  %v13192_v36 = vpop.f32.mrb[81].mxu1  ;;  %v7909_v24 = vrot.slane %v18350_v53, 2 }
0x2dd5   :  { %v7378_v38 = vmax.f32 %v7375_v0, 0.0  ;;  %v18351_v0 = vld [vmem:[#allocation33_spill] sm:$0xff] }
0x2dd6   :  { %v7910_v36 = vrot.slane %v18351_v0, 1 }
0x2dd7   :  { %13202 = vmatmul.mubr.msk.f32.vlgmr.msra.gmra.mrb[82].mxu0 %vm422_vm4, %v7378_v38  ;;  %v17413_v38 = vld [vmem:[#allocation4] sm:$0x1f] }
0x2dd8   :  { %14707 = vmatpush3.bf16.msra.mxu0 %v16070_v37  ;;  %13223 = vmatprep.mubr.msk.f32.mxu0 %vm15783_vm0, %v18140_v21 }
0x2dd9   :  { %14708 = vmatprep.subr.bf16.mxu0 %v18141_v22 }
0x2ddc   :  { %14710 = vmatpush3.bf16.msra.mxu0 %v16082_v45 }
0x2ddd   :  { %14719 = vmatprep.subr.bf16.mxu0 %v18141_v22 }
0x2eaa   :  { %v7448_v25 = vpop.f32.mrb[82].mxu0 }
0x2eab   :  { %v7449_v54 = vadd.f32 %v17024_v55, %v7448_v25  ;;  %v13203_v49 = vpop.f32.mrb[83].mxu0  ;;  %v7911_v25 = vsel %vm336_vm2, %v7910_v36, %v7909_v24  ;;  %v17436_v24 = vld [vmem:[#allocation7] ss:$0 sm:$0xff] }
0x2ead   :  { %v7452_v61 = vmax.f32 %v7449_v54, 0.0 }
0x2eaf   :  { %13213 = vmatmul.mubr.msk.f32.vlgmr.msra.gmra.mrb[82].mxu1 %vm422_vm4, %v7452_v61 }
0x2eb0   :  { %14714 = vmatpush1.bf16.msra.mxu1 %v16088_v51  ;;  %7668 = vmatprep.mubr.f32.mxu1 %v18140_v21 }
0x2eb1   :  { %14716 = vmatprep.subr.bf16.mxu1 %v16105_v62 }
0x2eb4   :  { %14718 = vmatpush1.bf16.msra.mxu1 %v16107_v6 }
0x2eb5   :  { %14726 = vmatprep.subr.bf16.mxu1 %v16114_v14 }
0x2f82   :  { %v7522_v5 = vpop.f32.mrb[82].mxu1 }
0x2f83   :  { %v7523_v27 = vadd.f32 %v17036_v20, %v7522_v5  ;;  %v13214_v1 = vpop.f32.mrb[83].mxu1 }
0x2f85   :  { %v7526_v13 = vmax.f32 %v7523_v27, 0.0  ;;  %v18352_v27 = vld [vmem:[#allocation35_spill] sm:$0xff] }
0x2f87   :  { %13224 = vmatmul.mubr.msk.f32.vlgmr.msra.gmra.mrb[84].mxu0 %vm422_vm4, %v7526_v13 }
0x2f88   :  { %14721 = vmatpush3.bf16.msra.mxu0 %v16098_v58  ;;  %13234 = vmatprep.mubr.msk.f32.mxu0 %vm15783_vm0, %v18140_v21 }
0x2f89   :  { %14722 = vmatprep.subr.bf16.mxu0 %v18141_v22 }
0x2f8c   :  { %14724 = vmatpush3.bf16.msra.mxu0 %v16110_v10 }
0x2f8d   :  { %14757 = vmatprep.subr.bf16.mxu0 %v18141_v22 }
0x305a   :  { %v7596_v55 = vpop.f32.mrb[84].mxu0 }
0x305b   :  { %v7597_v63 = vadd.f32 %v17049_v7, %v7596_v55  ;;  %v13225_v2 = vpop.f32.mrb[85].mxu0  ;;  %v18346_v7 = vld [vmem:[#allocation29_spill] sm:$0xff] }
0x305c   :  { %v18353_v2 = vld [vmem:[#allocation36_spill] sm:$0xff] }
0x305d   :  { %v7600_v20 = vmax.f32 %v7597_v63, 0.0 }
0x305f   :  { %11469 = vmatmul.mubr.msk.f32.vlgmr.msra.gmra.mrb[84].mxu1 %vm422_vm4, %v7600_v20  ;;  %13235 = vmatmul.mubr.msk.f32.vlgmr.msra.gmra.mrb[86].mxu0 %vm422_vm4, %v7600_v20 }
0x3060   :  { %14728 = vmatpush1.bf16.msra.mxu1 %v16124_v30  ;;  %14759 = vmatpush3.bf16.msra.mxu0 %v16126_v32 }
0x3061   :  { %14730 = vmatprep.subr.bf16.mxu1 %v16128_v35  ;;  %14760 = vmatprep.subr.bf16.mxu0 %v18141_v22 }
0x3062   :  { %7809 = vmatprep.mubr.f32.mxu1 %v18140_v21  ;;  %13269 = vmatprep.mubr.msk.f32.mxu0 %vm15783_vm0, %v18140_v21 }
0x3064   :  { %14732 = vmatpush1.bf16.msra.mxu1 %v16133_v43  ;;  %14762 = vmatpush3.bf16.msra.mxu0 %v16136_v46 }
0x3065   :  { %14734 = vmatprep.subr.bf16.mxu1 %v16139_v47  ;;  %14763 = vmatprep.subr.bf16.mxu0 %v18141_v22 }
0x3068   :  { %14736 = vmatpush1.bf16.msra.mxu1 %v16146_v56  ;;  %14765 = vmatpush3.bf16.msra.mxu0 %v16149_v59 }
0x3069   :  { %14738 = vmatprep.subr.bf16.mxu1 %v16152_v60  ;;  %14766 = vmatprep.subr.bf16.mxu0 %v18141_v22 }
0x306c   :  { %14740 = vmatpush1.bf16.msra.mxu1 %v16156_v11  ;;  %14768 = vmatpush3.bf16.msra.mxu0 %v16159_v18 }
0x306d   :  { %14742 = vmatprep.subr.bf16.mxu1 %v16162_v19  ;;  %14769 = vmatprep.subr.bf16.mxu0 %v18141_v22 }
0x3070   :  { %14744 = vmatpush1.bf16.msra.mxu1 %v16166_v28  ;;  %14771 = vmatpush3.bf16.msra.mxu0 %v16169_v31 }
0x3071   :  { %14746 = vmatprep.subr.bf16.mxu1 %v16172_v33  ;;  %14772 = vmatprep.subr.bf16.mxu0 %v18141_v22 }
0x3074   :  { %14748 = vmatpush1.bf16.msra.mxu1 %v16176_v44  ;;  %14774 = vmatpush3.bf16.msra.mxu0 %v18176_v17 }
0x3075   :  { %14750 = vmatprep.subr.bf16.mxu1 %v18177_v41  ;;  %14775 = vmatprep.subr.bf16.mxu0 %v18141_v22 }
0x3078   :  { %14752 = vmatpush1.bf16.msra.mxu1 %v18262_v42  ;;  %14777 = vmatpush3.bf16.msra.mxu0 %v18346_v7 }
0x3079   :  { %14754 = vmatprep.subr.bf16.mxu1 %v18347_v52  ;;  %14778 = vmatprep.subr.bf16.mxu0 %v18141_v22 }
0x307c   :  { %14756 = vmatpush1.bf16.msra.mxu1 %v18348_v39  ;;  %14780 = vmatpush3.bf16.msra.mxu0 %v18349_v57 }
0x307d   :  { %13272 = vmatprep.subr.mxu1 %v18140_v21  ;;  %14781 = vmatprep.subr.bf16.mxu0 %v18141_v22 }
0x307f   :  { %7810 = vmatmul.mubr.f32.vlgmr.msra.gmra.mrb[84].mxu1 %v17245_v50  ;;  %13270 = vmatmul.mubr.f32.vlgmr.msra.gmra.mrb[88].mxu0 %v17245_v50 }
0x3080   :  { %13273 = vmatpush3.msk.msra.mxu1 %vm341_vm1, %v17413_v38  ;;  %13274 = vmatprep.mubr.msk.f32.mxu1 %vm15783_vm0, %v18140_v21 }
0x3081   :  { %14783 = vmatpush3.bf16.msra.mxu0 %v16011_v8  ;;  %13285 = vmatprep.mubr.msk.f32.mxu0 %vm15783_vm0, %v18140_v21 }
0x3082   :  { %14784 = vmatprep.subr.bf16.mxu0 %v18141_v22  ;;  %14787 = vmatprep.subr.bf16.mxu1 %v18141_v22 }
0x3083   :  { %13275 = vmatmul.mubr.msk.f32.vlgmr.msra.gmra.mrb[86].mxu1 %vm338_vm3, %v7911_v25 }
0x3084   :  { %14789 = vmatpush3.bf16.msra.mxu1 %v16037_v15  ;;  %13296 = vmatprep.mubr.msk.f32.mxu1 %vm15783_vm0, %v18140_v21 }
0x3085   :  { %14786 = vmatpush3.bf16.msra.mxu0 %v16027_v12  ;;  %14790 = vmatprep.subr.bf16.mxu1 %v18141_v22 }
0x3086   :  { %14793 = vmatprep.subr.bf16.mxu0 %v18141_v22 }
0x3088   :  { %14792 = vmatpush3.bf16.msra.mxu1 %v16053_v23 }
0x3089   :  { %14799 = vmatprep.subr.bf16.mxu1 %v18141_v22 }
0x3132   :  { %v7741_v54 = vpop.f32.mrb[86].mxu0 }
0x3133   :  { %v13236_v49 = vpop.f32.mrb[87].mxu0 }
0x3152   :  { %v7811_v61 = vpop.f32.mrb[84].mxu1  ;;  %v7882_v5 = vpop.f32.mrb[88].mxu0 }
0x3153   :  { %v15292_v1 = vadd.f32 %v18352_v27, %v7811_v61  ;;  %v7813_v13 = vpop.f32.mrb[85].mxu1  ;;  %v13271_v55 = vpop.f32.mrb[89].mxu0  ;;  %v18354_v61 = vld [vmem:[#allocation39_spill] sm:$0xff] }
0x3154   :  { %v15294_v20 = vadd.f32 %v18353_v2, %v7813_v13 }
0x3155   :  { %v11471_v63 = vmul.f32 -1.442695, %v15292_v1 }
0x3156   :  { %v7980_v53 = vpop.f32.mrb[86].mxu1  ;;  %v11472_v57 = vmul.f32 -1.442695, %v15294_v20 }
0x3157   :  { %15465 = vpow2.f32 %v11471_v63  ;;  %v7981_v0 = vadd.f32 %v17436_v24, %v7980_v53  ;;  %v13276_v36 = vpop.f32.mrb[87].mxu1  ;;  %v7883_v63 = vadd.f32 %v7882_v5, %v18188_v9  ;;  %v7742_v53 = vadd.f32 %v7741_v54, %v18311_v29 }
0x3158   :  { %15467 = vpow2.f32 %v11472_v57 }
0x3159   :  { %v7984_v25 = vmax.f32 %v7981_v0, 0.0 }
0x315b   :  { %13286 = vmatmul.mubr.msk.f32.vlgmr.msra.gmra.mrb[90].mxu0 %vm422_vm4, %v7984_v25 }
0x315c   :  { %14795 = vmatpush3.bf16.msra.mxu0 %v16057_v26  ;;  %13307 = vmatprep.mubr.msk.f32.mxu0 %vm15783_vm0, %v18140_v21 }
0x315d   :  { %14796 = vmatprep.subr.bf16.mxu0 %v18141_v22 }
0x3160   :  { %14798 = vmatpush3.bf16.msra.mxu0 %v16067_v34 }
0x3161   :  { %v15466_v49 = vpop.eup %15465  ;;  %14806 = vmatprep.subr.bf16.mxu0 %v18354_v61 }
0x3162   :  { %v7890_v1 = vadd.f32 1.0, %v15466_v49  ;;  %v15468_v13 = vpop.eup %15467 }
0x3163   :  { %v7897_v55 = vadd.f32 1.0, %v15468_v13 }
0x3164   :  { %15469 = vrcp.f32 %v7890_v1  ;;  %v17452_v1 = vld [vmem:[#allocation9] ss:$0 sm:$0xff] }
0x3165   :  { %15471 = vrcp.f32 %v7897_v55 }
0x316e   :  { %v15470_v20 = vpop.eup %15469 }
0x316f   :  { %v7900_v0 = vmul.f32 %v15470_v20, %v7883_v63  ;;  %v15472_v25 = vpop.eup %15471  ;;  %v18355_v63 = vld [vmem:[#allocation43_spill] sm:$0xff]  ;;  %v18356_v20 = vld [vmem:[#allocation45_spill] sm:$0xff] }
0x3170   :  { %v7903_v57 = vsub.f32 1.0, %v15472_v25  ;;  %v7905_v39 = vmul.f32 %v15472_v25, %v17245_v50 }
0x3171   :  { %v7901_v36 = vadd.f32 %v7900_v0, %v7742_v53  ;;  %v17477_v0 = vld [vmem:[%s17994_s9] ss:$0 sm:$0xff] }
0x3173   :  { %15473 = vtanh.f32 %v7901_v36 }
0x317d   :  { %v15474_v2 = vpop.eup %15473 }
0x317e   :  { %v7904_v27 = vmul.f32 %v15474_v2, %v7903_v57 }
0x3180   :  { %v17449_v61 = vadd.f32 %v7905_v39, %v7904_v27  ;;  %v17465_v39 = vld [vmem:[%s17992_s7] ss:$0 sm:$0xff] }
0x3182   :  { %7908 = vst [vmem:[#allocation16 + $0xa] sm:$0x3] %v17449_v61 }
0x322e   :  { %v8054_v49 = vpop.f32.mrb[90].mxu0 }
0x322f   :  { %v8055_v5 = vadd.f32 %v17452_v1, %v8054_v49  ;;  %v13287_v54 = vpop.f32.mrb[91].mxu0  ;;  %v18357_v49 = vld [vmem:[#allocation41_spill] sm:$0xff] }
0x3231   :  { %v8058_v13 = vmax.f32 %v8055_v5, 0.0  ;;  %v18358_v5 = vld [vmem:[#allocation44_spill] sm:$0xff] }
0x3233   :  { %13297 = vmatmul.mubr.msk.f32.vlgmr.msra.gmra.mrb[88].mxu1 %vm422_vm4, %v8058_v13  ;;  %v17490_v13 = vld [vmem:[%s17996_s11] ss:$0 sm:$0xff] }
0x3234   :  { %14801 = vmatpush3.bf16.msra.mxu1 %v16070_v37  ;;  %13318 = vmatprep.mubr.msk.f32.mxu1 %vm15783_vm0, %v18140_v21 }
0x3235   :  { %14802 = vmatprep.subr.bf16.mxu1 %v18141_v22 }
0x3238   :  { %14804 = vmatpush3.bf16.msra.mxu1 %v16082_v45 }
0x3239   :  { %14813 = vmatprep.subr.bf16.mxu1 %v18141_v22 }
0x3306   :  { %v8128_v50 = vpop.f32.mrb[88].mxu1 }
0x3307   :  { %v8129_v27 = vadd.f32 %v17465_v39, %v8128_v50  ;;  %v13298_v2 = vpop.f32.mrb[89].mxu1 }
0x3309   :  { %v8132_v55 = vmax.f32 %v8129_v27, 0.0 }
0x330b   :  { %13308 = vmatmul.mubr.msk.f32.vlgmr.msra.gmra.mrb[92].mxu0 %vm422_vm4, %v8132_v55  ;;  %v18359_v55 = vld [vmem:[#allocation46_spill] sm:$0xff] }
0x330c   :  { %14808 = vmatpush1.bf16.msra.mxu0 %v18312_v40  ;;  %8348 = vmatprep.mubr.f32.mxu0 %v18140_v21 }
0x330d   :  { %14810 = vmatprep.subr.bf16.mxu0 %v18313_v4 }
0x3310   :  { %14812 = vmatpush1.bf16.msra.mxu0 %v18355_v63 }
0x3311   :  { %14820 = vmatprep.subr.bf16.mxu0 %v18356_v20 }
0x33de   :  { %v8202_v53 = vpop.f32.mrb[92].mxu0 }
0x33df   :  { %v8203_v36 = vadd.f32 %v17477_v0, %v8202_v53  ;;  %v13309_v25 = vpop.f32.mrb[93].mxu0  ;;  %v18360_v53 = vld [vmem:[#allocation47_spill] sm:$0xff] }
0x33e0   :  { %v18362_v25 = vld [vmem:[#allocation49_spill] sm:$0xff] }
0x33e1   :  { %v8206_v57 = vmax.f32 %v8203_v36, 0.0  ;;  %v18361_v36 = vld [vmem:[#allocation48_spill] sm:$0xff] }
0x33e3   :  { %13319 = vmatmul.mubr.msk.f32.vlgmr.msra.gmra.mrb[90].mxu1 %vm422_vm4, %v8206_v57  ;;  %v18363_v57 = vld [vmem:[#allocation50_spill] sm:$0xff] }
0x33e4   :  { %14815 = vmatpush3.bf16.msra.mxu1 %v18357_v49  ;;  %13329 = vmatprep.mubr.msk.f32.mxu1 %vm15783_vm0, %v18140_v21 }
0x33e5   :  { %14816 = vmatprep.subr.bf16.mxu1 %v18141_v22 }
0x33e8   :  { %14818 = vmatpush3.bf16.msra.mxu1 %v18358_v5  ;;  %v18385_v5 = vld [vmem:[#allocation70_spill] sm:$0xff] }
0x33e9   :  { %14851 = vmatprep.subr.bf16.mxu1 %v18141_v22 }
0x34b6   :  { %v8276_v54 = vpop.f32.mrb[90].mxu1 }
0x34b7   :  { %v8277_v50 = vadd.f32 %v17490_v13, %v8276_v54  ;;  %v13320_v27 = vpop.f32.mrb[91].mxu1  ;;  %v18364_v54 = vld [vmem:[#allocation51_spill] sm:$0xff] }
0x34b8   :  { %v18366_v27 = vld [vmem:[#allocation53_spill] sm:$0xff] }
0x34b9   :  { %v8280_v2 = vmax.f32 %v8277_v50, 0.0  ;;  %v18365_v50 = vld [vmem:[#allocation52_spill] sm:$0xff] }
0x34bb   :  { %11479 = vmatmul.mubr.msk.f32.vlgmr.msra.gmra.mrb[94].mxu0 %vm422_vm4, %v8280_v2  ;;  %13330 = vmatmul.mubr.msk.f32.vlgmr.msra.gmra.mrb[92].mxu1 %vm422_vm4, %v8280_v2  ;;  %v18367_v2 = vld [vmem:[#allocation54_spill] sm:$0xff] }
0x34bc   :  { %14822 = vmatpush1.bf16.msra.mxu0 %v18359_v55  ;;  %14853 = vmatpush3.bf16.msra.mxu1 %v18360_v53  ;;  %v18369_v53 = vld [vmem:[#allocation56_spill] sm:$0xff]  ;;  %v18370_v55 = vld [vmem:[#allocation57_spill] sm:$0xff] }
0x34bd   :  { %14824 = vmatprep.subr.bf16.mxu0 %v18361_v36  ;;  %14854 = vmatprep.subr.bf16.mxu1 %v18141_v22  ;;  %v18368_v36 = vld [vmem:[#allocation55_spill] sm:$0xff] }
0x34be   :  { %8489 = vmatprep.mubr.f32.mxu0 %v18140_v21  ;;  %13364 = vmatprep.mubr.msk.f32.mxu1 %vm15783_vm0, %v18140_v21 }
0x34c0   :  { %14826 = vmatpush1.bf16.msra.mxu0 %v18362_v25  ;;  %14856 = vmatpush3.bf16.msra.mxu1 %v18363_v57  ;;  %v18371_v57 = vld [vmem:[#allocation58_spill] sm:$0xff]  ;;  %v18373_v25 = vld [vmem:[#allocation60_spill] sm:$0xff] }
0x34c1   :  { %14828 = vmatprep.subr.bf16.mxu0 %v18364_v54  ;;  %14857 = vmatprep.subr.bf16.mxu1 %v18141_v22  ;;  %v18372_v54 = vld [vmem:[#allocation59_spill] sm:$0xff] }
0x34c4   :  { %14830 = vmatpush1.bf16.msra.mxu0 %v18365_v50  ;;  %14859 = vmatpush3.bf16.msra.mxu1 %v18366_v27  ;;  %v18374_v27 = vld [vmem:[#allocation61_spill] sm:$0xff]  ;;  %v18376_v50 = vld [vmem:[#allocation63_spill] sm:$0xff] }
0x34c5   :  { %14832 = vmatprep.subr.bf16.mxu0 %v18367_v2  ;;  %14860 = vmatprep.subr.bf16.mxu1 %v18141_v22  ;;  %v18375_v2 = vld [vmem:[#allocation62_spill] sm:$0xff] }
0x34c8   :  { %14834 = vmatpush1.bf16.msra.mxu0 %v18368_v36  ;;  %14862 = vmatpush3.bf16.msra.mxu1 %v18369_v53  ;;  %v18377_v53 = vld [vmem:[#allocation64_spill] sm:$0xff]  ;;  %v18379_v36 = vld [vmem:[#allocation66_spill] sm:$0xff] }
0x34c9   :  { %14836 = vmatprep.subr.bf16.mxu0 %v18370_v55  ;;  %14863 = vmatprep.subr.bf16.mxu1 %v18141_v22  ;;  %v18378_v55 = vld [vmem:[#allocation65_spill] sm:$0xff] }
0x34cc   :  { %14838 = vmatpush1.bf16.msra.mxu0 %v18371_v57  ;;  %14865 = vmatpush3.bf16.msra.mxu1 %v18372_v54  ;;  %v18380_v54 = vld [vmem:[#allocation67_spill] sm:$0xff] }
0x34cd   :  { %14840 = vmatprep.subr.bf16.mxu0 %v18373_v25  ;;  %14866 = vmatprep.subr.bf16.mxu1 %v18141_v22  ;;  %v18381_v25 = vld [vmem:[#allocation68_spill] sm:$0xff] }
0x34d0   :  { %14842 = vmatpush1.bf16.msra.mxu0 %v18374_v27  ;;  %14868 = vmatpush3.bf16.msra.mxu1 %v18375_v2  ;;  %v17531_v2 = vld [vmem:[%s18126_s27] sm:$0xff] }
0x34d1   :  { %14844 = vmatprep.subr.bf16.mxu0 %v18376_v50  ;;  %14869 = vmatprep.subr.bf16.mxu1 %v18141_v22  ;;  %18382 = vst [vmem:[#allocation34_spill] sm:$0xff] %v17531_v2  ;;  %v8589_v50 = vrot.slane %v17531_v2, 6 }
0x34d4   :  { %14846 = vmatpush1.bf16.msra.mxu0 %v18377_v53  ;;  %14871 = vmatpush3.bf16.msra.mxu1 %v18378_v55  ;;  %v17537_v53 = vld [vmem:[%s18126_s27 + $0x8] sm:$0xff] }
0x34d5   :  { %14848 = vmatprep.subr.bf16.mxu0 %v18379_v36  ;;  %14872 = vmatprep.subr.bf16.mxu1 %v18141_v22  ;;  %18383 = vst [vmem:[#allocation26_spill] sm:$0xff] %v17537_v53  ;;  %v8590_v36 = vrot.slane %v17537_v53, 5 }
0x34d7   :  { %v8591_v2 = vsel %vm336_vm2, %v8590_v36, %v8589_v50 }
0x34d8   :  { %14850 = vmatpush1.bf16.msra.mxu0 %v18380_v54  ;;  %14874 = vmatpush3.bf16.msra.mxu1 %v18381_v25 }
0x34d9   :  { %13367 = vmatprep.subr.mxu0 %v18140_v21  ;;  %14875 = vmatprep.subr.bf16.mxu1 %v18141_v22 }
0x34db   :  { %8490 = vmatmul.mubr.f32.vlgmr.msra.gmra.mrb[94].mxu0 %v17345_v3  ;;  %13365 = vmatmul.mubr.f32.vlgmr.msra.gmra.mrb[94].mxu1 %v17345_v3 }
0x34dc   :  { %13368 = vmatpush3.msk.msra.mxu0 %vm341_vm1, %v17413_v38  ;;  %13369 = vmatprep.mubr.msk.f32.mxu0 %vm15783_vm0, %v18140_v21 }
0x34dd   :  { %14877 = vmatpush3.bf16.msra.mxu1 %v16011_v8  ;;  %13380 = vmatprep.mubr.msk.f32.mxu1 %vm15783_vm0, %v18140_v21 }
0x34de   :  { %14878 = vmatprep.subr.bf16.mxu1 %v18141_v22  ;;  %14881 = vmatprep.subr.bf16.mxu0 %v18141_v22 }
0x34df   :  { %13370 = vmatmul.mubr.msk.f32.vlgmr.msra.gmra.mrb[96].mxu0 %vm338_vm3, %v8591_v2  ;;  %v18384_v2 = vld [vmem:[#allocation69_spill] sm:$0xff] }
0x34e0   :  { %14883 = vmatpush3.bf16.msra.mxu0 %v16037_v15  ;;  %13391 = vmatprep.mubr.msk.f32.mxu0 %vm15783_vm0, %v18140_v21 }
0x34e1   :  { %14880 = vmatpush3.bf16.msra.mxu1 %v16027_v12  ;;  %14884 = vmatprep.subr.bf16.mxu0 %v18141_v22 }
0x34e2   :  { %14887 = vmatprep.subr.bf16.mxu1 %v18141_v22 }
0x34e4   :  { %14886 = vmatpush3.bf16.msra.mxu0 %v16053_v23 }
0x34e5   :  { %14893 = vmatprep.subr.bf16.mxu0 %v18141_v22 }
0x358e   :  { %v8421_v36 = vpop.f32.mrb[92].mxu1 }
0x358f   :  { %v13331_v50 = vpop.f32.mrb[93].mxu1 }
0x35ae   :  { %v8491_v53 = vpop.f32.mrb[94].mxu0  ;;  %v8562_v25 = vpop.f32.mrb[94].mxu1 }
0x35af   :  { %v15296_v54 = vadd.f32 %v18384_v2, %v8491_v53  ;;  %v8493_v55 = vpop.f32.mrb[95].mxu0  ;;  %v13366_v27 = vpop.f32.mrb[95].mxu1  ;;  %v18386_v53 = vld [vmem:[#allocation25_spill] sm:$0xff] }
0x35b0   :  { %v15298_v49 = vadd.f32 %v18385_v5, %v8493_v55 }
0x35b1   :  { %v11481_v57 = vmul.f32 -1.442695, %v15296_v54 }
0x35b2   :  { %v8660_v20 = vpop.f32.mrb[96].mxu0  ;;  %v11482_v29 = vmul.f32 -1.442695, %v15298_v49  ;;  %v8422_v49 = vadd.f32 %v8421_v36, %v16458_v48 }
0x35b3   :  { %15475 = vpow2.f32 %v11481_v57  ;;  %v8661_v63 = vadd.f32 %v17436_v24, %v8660_v20  ;;  %v13371_v4 = vpop.f32.mrb[97].mxu0  ;;  %v8563_v20 = vadd.f32 %v8562_v25, %v16455_v16 }
0x35b4   :  { %15477 = vpow2.f32 %v11482_v29 }
0x35b5   :  { %v8664_v40 = vmax.f32 %v8661_v63, 0.0 }
0x35b7   :  { %13381 = vmatmul.mubr.msk.f32.vlgmr.msra.gmra.mrb[96].mxu1 %vm422_vm4, %v8664_v40 }
0x35b8   :  { %14889 = vmatpush3.bf16.msra.mxu1 %v16057_v26  ;;  %13402 = vmatprep.mubr.msk.f32.mxu1 %vm15783_vm0, %v18140_v21 }
0x35b9   :  { %14890 = vmatprep.subr.bf16.mxu1 %v18141_v22 }
0x35bc   :  { %14892 = vmatpush3.bf16.msra.mxu1 %v16067_v34 }
0x35bd   :  { %v15476_v55 = vpop.eup %15475  ;;  %14900 = vmatprep.subr.bf16.mxu1 %v18386_v53 }
0x35be   :  { %v8570_v57 = vadd.f32 1.0, %v15476_v55  ;;  %v15478_v4 = vpop.eup %15477 }
0x35bf   :  { %v8577_v63 = vadd.f32 1.0, %v15478_v4 }
0x35c0   :  { %15479 = vrcp.f32 %v8570_v57 }
0x35c1   :  { %15481 = vrcp.f32 %v8577_v63 }
0x35ca   :  { %v15480_v40 = vpop.eup %15479 }
0x35cb   :  { %v8580_v54 = vmul.f32 %v15480_v40, %v8563_v20  ;;  %v15482_v50 = vpop.eup %15481 }
0x35cc   :  { %v8583_v29 = vsub.f32 1.0, %v15482_v50  ;;  %v8585_v9 = vmul.f32 %v15482_v50, %v17345_v3 }
0x35cd   :  { %v8581_v27 = vadd.f32 %v8580_v54, %v8422_v49 }
0x35cf   :  { %15483 = vtanh.f32 %v8581_v27 }
0x35d9   :  { %v15484_v5 = vpop.eup %15483 }
0x35da   :  { %v8584_v2 = vmul.f32 %v15484_v5, %v8583_v29  ;;  %v18387_v29 = vld [vmem:[#allocation31_spill] sm:$0xff] }
0x35dc   :  { %v17576_v53 = vadd.f32 %v8585_v9, %v8584_v2 }
0x35de   :  { %8588 = vst [vmem:[#allocation17 + $0x4] sm:$0x3] %v17576_v53 }
0x368a   :  { %v8734_v55 = vpop.f32.mrb[96].mxu1 }
0x368b   :  { %v8735_v25 = vadd.f32 %v17452_v1, %v8734_v55  ;;  %v13382_v57 = vpop.f32.mrb[97].mxu1  ;;  %v18388_v55 = vld [vmem:[#allocation32_spill] sm:$0xff] }
0x368d   :  { %v8738_v4 = vmax.f32 %v8735_v25, 0.0  ;;  %v17641_v25 = vld [vmem:[%s18135_s28] sm:$0xff] }
0x368e   :  { %18389 = vst [vmem:[#allocation27_spill] sm:$0xff] %v17641_v25  ;;  %v9269_v57 = vrot.slane %v17641_v25, 1 }
0x368f   :  { %13392 = vmatmul.mubr.msk.f32.vlgmr.msra.gmra.mrb[98].mxu0 %vm422_vm4, %v8738_v4  ;;  %v17655_v4 = vld [vmem:[%s18135_s28 + $0x8] sm:$0xff] }
0x3690   :  { %14895 = vmatpush3.bf16.msra.mxu0 %v16070_v37  ;;  %13413 = vmatprep.mubr.msk.f32.mxu0 %vm15783_vm0, %v18140_v21  ;;  %18390 = vst [vmem:[#allocation28_spill] sm:$0xff] %v17655_v4 }
0x3691   :  { %14896 = vmatprep.subr.bf16.mxu0 %v18141_v22 }
0x3694   :  { %14898 = vmatpush3.bf16.msra.mxu0 %v16082_v45 }
0x3695   :  { %14907 = vmatprep.subr.bf16.mxu0 %v18141_v22 }
0x3762   :  { %v8808_v9 = vpop.f32.mrb[98].mxu0 }
0x3763   :  { %v8809_v3 = vadd.f32 %v17465_v39, %v8808_v9  ;;  %v13393_v5 = vpop.f32.mrb[99].mxu0  ;;  %v9270_v9 = vsel %vm336_vm2, %v17655_v4, %v9269_v57 }
0x3765   :  { %v8812_v36 = vmax.f32 %v8809_v3, 0.0 }
0x3767   :  { %13403 = vmatmul.mubr.msk.f32.vlgmr.msra.gmra.mrb[98].mxu1 %vm422_vm4, %v8812_v36 }
0x3768   :  { %14902 = vmatpush1.bf16.msra.mxu1 %v16088_v51  ;;  %9028 = vmatprep.mubr.f32.mxu1 %v18140_v21 }
0x3769   :  { %14904 = vmatprep.subr.bf16.mxu1 %v16105_v62 }
0x376c   :  { %14906 = vmatpush1.bf16.msra.mxu1 %v16107_v6 }
0x376d   :  { %14914 = vmatprep.subr.bf16.mxu1 %v16114_v14 }
0x383a   :  { %v8882_v2 = vpop.f32.mrb[98].mxu1 }
0x383b   :  { %v8883_v63 = vadd.f32 %v17477_v0, %v8882_v2  ;;  %v13404_v20 = vpop.f32.mrb[99].mxu1 }
0x383d   :  { %v8886_v40 = vmax.f32 %v8883_v63, 0.0  ;;  %v18391_v63 = vld [vmem:[#allocation35_spill] sm:$0xff] }
0x383f   :  { %13414 = vmatmul.mubr.msk.f32.vlgmr.msra.gmra.mrb[100].mxu0 %vm422_vm4, %v8886_v40 }
0x3840   :  { %14909 = vmatpush3.bf16.msra.mxu0 %v16098_v58  ;;  %13424 = vmatprep.mubr.msk.f32.mxu0 %vm15783_vm0, %v18140_v21 }
0x3841   :  { %14910 = vmatprep.subr.bf16.mxu0 %v18141_v22 }
0x3844   :  { %14912 = vmatpush3.bf16.msra.mxu0 %v16110_v10 }
0x3845   :  { %14945 = vmatprep.subr.bf16.mxu0 %v18141_v22 }
0x3912   :  { %v8956_v49 = vpop.f32.mrb[100].mxu0 }
0x3913   :  { %v8957_v54 = vadd.f32 %v17490_v13, %v8956_v49  ;;  %v13415_v27 = vpop.f32.mrb[101].mxu0 }
0x3914   :  { %v18392_v27 = vld [vmem:[#allocation36_spill] sm:$0xff] }
0x3915   :  { %v8960_v50 = vmax.f32 %v8957_v54, 0.0 }
0x3917   :  { %11489 = vmatmul.mubr.msk.f32.vlgmr.msra.gmra.mrb[100].mxu1 %vm422_vm4, %v8960_v50  ;;  %13425 = vmatmul.mubr.msk.f32.vlgmr.msra.gmra.mrb[102].mxu0 %vm422_vm4, %v8960_v50 }
0x3918   :  { %14916 = vmatpush1.bf16.msra.mxu1 %v16124_v30  ;;  %14947 = vmatpush3.bf16.msra.mxu0 %v16126_v32 }
0x3919   :  { %14918 = vmatprep.subr.bf16.mxu1 %v16128_v35  ;;  %14948 = vmatprep.subr.bf16.mxu0 %v18141_v22 }
0x391a   :  { %9169 = vmatprep.mubr.f32.mxu1 %v18140_v21  ;;  %13459 = vmatprep.mubr.msk.f32.mxu0 %vm15783_vm0, %v18140_v21 }
0x391c   :  { %14920 = vmatpush1.bf16.msra.mxu1 %v16133_v43  ;;  %14950 = vmatpush3.bf16.msra.mxu0 %v16136_v46 }
0x391d   :  { %14922 = vmatprep.subr.bf16.mxu1 %v16139_v47  ;;  %14951 = vmatprep.subr.bf16.mxu0 %v18141_v22 }
0x3920   :  { %14924 = vmatpush1.bf16.msra.mxu1 %v16146_v56  ;;  %14953 = vmatpush3.bf16.msra.mxu0 %v16149_v59 }
0x3921   :  { %14926 = vmatprep.subr.bf16.mxu1 %v16152_v60  ;;  %14954 = vmatprep.subr.bf16.mxu0 %v18141_v22 }
0x3924   :  { %14928 = vmatpush1.bf16.msra.mxu1 %v16156_v11  ;;  %14956 = vmatpush3.bf16.msra.mxu0 %v16159_v18 }
0x3925   :  { %14930 = vmatprep.subr.bf16.mxu1 %v16162_v19  ;;  %14957 = vmatprep.subr.bf16.mxu0 %v18141_v22 }
0x3928   :  { %14932 = vmatpush1.bf16.msra.mxu1 %v16166_v28  ;;  %14959 = vmatpush3.bf16.msra.mxu0 %v16169_v31 }
0x3929   :  { %14934 = vmatprep.subr.bf16.mxu1 %v16172_v33  ;;  %14960 = vmatprep.subr.bf16.mxu0 %v18141_v22 }
0x392c   :  { %14936 = vmatpush1.bf16.msra.mxu1 %v16176_v44  ;;  %14962 = vmatpush3.bf16.msra.mxu0 %v18176_v17 }
0x392d   :  { %14938 = vmatprep.subr.bf16.mxu1 %v18177_v41  ;;  %14963 = vmatprep.subr.bf16.mxu0 %v18141_v22 }
0x3930   :  { %14940 = vmatpush1.bf16.msra.mxu1 %v18262_v42  ;;  %14965 = vmatpush3.bf16.msra.mxu0 %v18346_v7 }
0x3931   :  { %14942 = vmatprep.subr.bf16.mxu1 %v18347_v52  ;;  %14966 = vmatprep.subr.bf16.mxu0 %v18141_v22 }
0x3934   :  { %14944 = vmatpush1.bf16.msra.mxu1 %v18387_v29  ;;  %14968 = vmatpush3.bf16.msra.mxu0 %v18388_v55 }
0x3935   :  { %13462 = vmatprep.subr.mxu1 %v18140_v21  ;;  %14969 = vmatprep.subr.bf16.mxu0 %v18141_v22 }
0x3937   :  { %9170 = vmatmul.mubr.f32.vlgmr.msra.gmra.mrb[100].mxu1 %v17449_v61  ;;  %13460 = vmatmul.mubr.f32.vlgmr.msra.gmra.mrb[104].mxu0 %v17449_v61 }
0x3938   :  { %13463 = vmatpush3.msk.msra.mxu1 %vm341_vm1, %v17413_v38  ;;  %13464 = vmatprep.mubr.msk.f32.mxu1 %vm15783_vm0, %v18140_v21 }
0x3939   :  { %14971 = vmatpush3.bf16.msra.mxu0 %v16011_v8  ;;  %13475 = vmatprep.mubr.msk.f32.mxu0 %vm15783_vm0, %v18140_v21 }
0x393a   :  { %14972 = vmatprep.subr.bf16.mxu0 %v18141_v22  ;;  %14975 = vmatprep.subr.bf16.mxu1 %v18141_v22 }
0x393b   :  { %13465 = vmatmul.mubr.msk.f32.vlgmr.msra.gmra.mrb[102].mxu1 %vm338_vm3, %v9270_v9 }
0x393c   :  { %14977 = vmatpush3.bf16.msra.mxu1 %v16037_v15  ;;  %13486 = vmatprep.mubr.msk.f32.mxu1 %vm15783_vm0, %v18140_v21 }
0x393d   :  { %14974 = vmatpush3.bf16.msra.mxu0 %v16027_v12  ;;  %14978 = vmatprep.subr.bf16.mxu1 %v18141_v22 }
0x393e   :  { %14981 = vmatprep.subr.bf16.mxu0 %v18141_v22 }
0x3940   :  { %14980 = vmatpush3.bf16.msra.mxu1 %v16053_v23 }
0x3941   :  { %14987 = vmatprep.subr.bf16.mxu1 %v18141_v22 }
0x39ea   :  { %v9101_v3 = vpop.f32.mrb[102].mxu0 }
0x39eb   :  { %v13426_v5 = vpop.f32.mrb[103].mxu0 }
0x3a0a   :  { %v9171_v36 = vpop.f32.mrb[100].mxu1  ;;  %v9242_v2 = vpop.f32.mrb[104].mxu0 }
0x3a0b   :  { %v15300_v20 = vadd.f32 %v18391_v63, %v9171_v36  ;;  %v9173_v40 = vpop.f32.mrb[101].mxu1  ;;  %v13461_v49 = vpop.f32.mrb[105].mxu0  ;;  %v18393_v36 = vld [vmem:[#allocation39_spill] sm:$0xff] }
0x3a0c   :  { %v15302_v50 = vadd.f32 %v18392_v27, %v9173_v40  ;;  %v18394_v49 = vld [vmem:[#allocation37_spill] sm:$0xff] }
0x3a0d   :  { %v11491_v54 = vmul.f32 -1.442695, %v15300_v20 }
0x3a0e   :  { %v9339_v57 = vpop.f32.mrb[102].mxu1  ;;  %v11492_v55 = vmul.f32 -1.442695, %v15302_v50  ;;  %v18395_v50 = vld [vmem:[#allocation38_spill] sm:$0xff] }
0x3a0f   :  { %15485 = vpow2.f32 %v11491_v54  ;;  %v9340_v9 = vadd.f32 %v17436_v24, %v9339_v57  ;;  %v13466_v25 = vpop.f32.mrb[103].mxu1  ;;  %v9243_v54 = vadd.f32 %v9242_v2, %v18394_v49  ;;  %v9102_v57 = vadd.f32 %v9101_v3, %v18395_v50  ;;  %v18396_v3 = vld [vmem:[#allocation40_spill] sm:$0xff] }
0x3a10   :  { %15487 = vpow2.f32 %v11492_v55 }
0x3a11   :  { %v9343_v4 = vmax.f32 %v9340_v9, 0.0 }
0x3a13   :  { %13476 = vmatmul.mubr.msk.f32.vlgmr.msra.gmra.mrb[106].mxu0 %vm422_vm4, %v9343_v4 }
0x3a14   :  { %14983 = vmatpush3.bf16.msra.mxu0 %v16057_v26  ;;  %13497 = vmatprep.mubr.msk.f32.mxu0 %vm15783_vm0, %v18140_v21 }
0x3a15   :  { %14984 = vmatprep.subr.bf16.mxu0 %v18141_v22 }
0x3a18   :  { %14986 = vmatpush3.bf16.msra.mxu0 %v16067_v34 }
0x3a19   :  { %v15486_v5 = vpop.eup %15485  ;;  %14994 = vmatprep.subr.bf16.mxu0 %v18393_v36 }
0x3a1a   :  { %v9250_v20 = vadd.f32 1.0, %v15486_v5  ;;  %v15488_v25 = vpop.eup %15487 }
0x3a1b   :  { %v9257_v40 = vadd.f32 1.0, %v15488_v25 }
0x3a1c   :  { %15489 = vrcp.f32 %v9250_v20 }
0x3a1d   :  { %15491 = vrcp.f32 %v9257_v40  ;;  %v18399_v40 = vld [vmem:[#allocation45_spill] sm:$0xff] }
0x3a26   :  { %v15490_v4 = vpop.eup %15489 }
0x3a27   :  { %v9260_v9 = vmul.f32 %v15490_v4, %v9243_v54  ;;  %v15492_v63 = vpop.eup %15491 }
0x3a28   :  { %v9263_v55 = vsub.f32 1.0, %v15492_v63  ;;  %v9265_v7 = vmul.f32 %v15492_v63, %v17449_v61  ;;  %v18397_v63 = vld [vmem:[#allocation42_spill] sm:$0xff] }
0x3a29   :  { %v9261_v27 = vadd.f32 %v9260_v9, %v9102_v57 }
0x3a2b   :  { %15493 = vtanh.f32 %v9261_v27  ;;  %v18398_v27 = vld [vmem:[#allocation43_spill] sm:$0xff] }
0x3a35   :  { %v15494_v29 = vpop.eup %15493 }
0x3a36   :  { %v9264_v52 = vmul.f32 %v15494_v29, %v9263_v55  ;;  %v18400_v55 = vld [vmem:[#allocation41_spill] sm:$0xff] }
0x3a38   :  { %v17686_v36 = vadd.f32 %v9265_v7, %v9264_v52 }
0x3a3a   :  { %9268 = vst [vmem:[#allocation16 + $0xc] sm:$0x3] %v17686_v36 }
0x3ae6   :  { %v9413_v5 = vpop.f32.mrb[106].mxu0 }
0x3ae7   :  { %v9414_v2 = vadd.f32 %v17452_v1, %v9413_v5  ;;  %v13477_v20 = vpop.f32.mrb[107].mxu0  ;;  %v18401_v5 = vld [vmem:[#allocation44_spill] sm:$0xff] }
0x3ae9   :  { %v9417_v25 = vmax.f32 %v9414_v2, 0.0 }
0x3aeb   :  { %13487 = vmatmul.mubr.msk.f32.vlgmr.msra.gmra.mrb[104].mxu1 %vm422_vm4, %v9417_v25 }
0x3aec   :  { %14989 = vmatpush3.bf16.msra.mxu1 %v16070_v37  ;;  %13508 = vmatprep.mubr.msk.f32.mxu1 %vm15783_vm0, %v18140_v21 }
0x3aed   :  { %14990 = vmatprep.subr.bf16.mxu1 %v18141_v22 }
0x3af0   :  { %14992 = vmatpush3.bf16.msra.mxu1 %v16082_v45 }
0x3af1   :  { %15001 = vmatprep.subr.bf16.mxu1 %v18141_v22 }
0x3bbe   :  { %v9487_v7 = vpop.f32.mrb[104].mxu1 }
0x3bbf   :  { %v9488_v52 = vadd.f32 %v17465_v39, %v9487_v7  ;;  %v13488_v61 = vpop.f32.mrb[105].mxu1 }
0x3bc0   :  { %v18403_v61 = vld [vmem:[#allocation47_spill] sm:$0xff] }
0x3bc1   :  { %v9491_v29 = vmax.f32 %v9488_v52, 0.0  ;;  %v18402_v52 = vld [vmem:[#allocation46_spill] sm:$0xff] }
0x3bc3   :  { %13498 = vmatmul.mubr.msk.f32.vlgmr.msra.gmra.mrb[108].mxu0 %vm422_vm4, %v9491_v29  ;;  %v18404_v29 = vld [vmem:[#allocation48_spill] sm:$0xff] }
0x3bc4   :  { %14996 = vmatpush1.bf16.msra.mxu0 %v18396_v3  ;;  %9707 = vmatprep.mubr.f32.mxu0 %v18140_v21 }
0x3bc5   :  { %14998 = vmatprep.subr.bf16.mxu0 %v18397_v63 }
0x3bc8   :  { %15000 = vmatpush1.bf16.msra.mxu0 %v18398_v27 }
0x3bc9   :  { %15008 = vmatprep.subr.bf16.mxu0 %v18399_v40 }
0x3c96   :  { %v9561_v54 = vpop.f32.mrb[108].mxu0 }
0x3c97   :  { %v9562_v4 = vadd.f32 %v17477_v0, %v9561_v54  ;;  %v13499_v57 = vpop.f32.mrb[109].mxu0  ;;  %v18405_v54 = vld [vmem:[#allocation49_spill] sm:$0xff] }
0x3c98   :  { %v18407_v57 = vld [vmem:[#allocation51_spill] sm:$0xff] }
0x3c99   :  { %v9565_v9 = vmax.f32 %v9562_v4, 0.0  ;;  %v18406_v4 = vld [vmem:[#allocation50_spill] sm:$0xff] }
0x3c9b   :  { %13509 = vmatmul.mubr.msk.f32.vlgmr.msra.gmra.mrb[106].mxu1 %vm422_vm4, %v9565_v9  ;;  %v18408_v9 = vld [vmem:[#allocation52_spill] sm:$0xff] }
0x3c9c   :  { %15003 = vmatpush3.bf16.msra.mxu1 %v18400_v55  ;;  %13519 = vmatprep.mubr.msk.f32.mxu1 %vm15783_vm0, %v18140_v21 }
0x3c9d   :  { %15004 = vmatprep.subr.bf16.mxu1 %v18141_v22 }
0x3ca0   :  { %15006 = vmatpush3.bf16.msra.mxu1 %v18401_v5 }
0x3ca1   :  { %15039 = vmatprep.subr.bf16.mxu1 %v18141_v22 }
0x3d6e   :  { %v9635_v2 = vpop.f32.mrb[106].mxu1 }
0x3d6f   :  { %v9636_v20 = vadd.f32 %v17490_v13, %v9635_v2  ;;  %v13510_v25 = vpop.f32.mrb[107].mxu1  ;;  %v18409_v2 = vld [vmem:[#allocation53_spill] sm:$0xff] }
0x3d70   :  { %v18411_v25 = vld [vmem:[#allocation55_spill] sm:$0xff] }
0x3d71   :  { %v9639_v7 = vmax.f32 %v9636_v20, 0.0  ;;  %v18410_v20 = vld [vmem:[#allocation54_spill] sm:$0xff] }
0x3d73   :  { %11499 = vmatmul.mubr.msk.f32.vlgmr.msra.gmra.mrb[110].mxu0 %vm422_vm4, %v9639_v7  ;;  %13520 = vmatmul.mubr.msk.f32.vlgmr.msra.gmra.mrb[108].mxu1 %vm422_vm4, %v9639_v7  ;;  %v18412_v7 = vld [vmem:[#allocation56_spill] sm:$0xff] }
0x3d74   :  { %15010 = vmatpush1.bf16.msra.mxu0 %v18402_v52  ;;  %15041 = vmatpush3.bf16.msra.mxu1 %v18403_v61  ;;  %v18426_v61 = vld [vmem:[#allocation26_spill] sm:$0xff] }
0x3d75   :  { %15012 = vmatprep.subr.bf16.mxu0 %v18404_v29  ;;  %15042 = vmatprep.subr.bf16.mxu1 %v18141_v22  ;;  %v18413_v29 = vld [vmem:[#allocation57_spill] sm:$0xff] }
0x3d76   :  { %9848 = vmatprep.mubr.f32.mxu0 %v18140_v21  ;;  %13554 = vmatprep.mubr.msk.f32.mxu1 %vm15783_vm0, %v18140_v21 }
0x3d78   :  { %15014 = vmatpush1.bf16.msra.mxu0 %v18405_v54  ;;  %15044 = vmatpush3.bf16.msra.mxu1 %v18406_v4  ;;  %v18414_v4 = vld [vmem:[#allocation58_spill] sm:$0xff]  ;;  %v18416_v54 = vld [vmem:[#allocation60_spill] sm:$0xff] }
0x3d79   :  { %15016 = vmatprep.subr.bf16.mxu0 %v18407_v57  ;;  %15045 = vmatprep.subr.bf16.mxu1 %v18141_v22  ;;  %v18415_v57 = vld [vmem:[#allocation59_spill] sm:$0xff] }
0x3d7c   :  { %15018 = vmatpush1.bf16.msra.mxu0 %v18408_v9  ;;  %15047 = vmatpush3.bf16.msra.mxu1 %v18409_v2  ;;  %v18417_v2 = vld [vmem:[#allocation61_spill] sm:$0xff]  ;;  %v18419_v9 = vld [vmem:[#allocation63_spill] sm:$0xff] }
0x3d7d   :  { %15020 = vmatprep.subr.bf16.mxu0 %v18410_v20  ;;  %15048 = vmatprep.subr.bf16.mxu1 %v18141_v22  ;;  %v18418_v20 = vld [vmem:[#allocation62_spill] sm:$0xff] }
0x3d80   :  { %15022 = vmatpush1.bf16.msra.mxu0 %v18411_v25  ;;  %15050 = vmatpush3.bf16.msra.mxu1 %v18412_v7  ;;  %v18420_v7 = vld [vmem:[#allocation64_spill] sm:$0xff]  ;;  %v18422_v25 = vld [vmem:[#allocation66_spill] sm:$0xff] }
0x3d81   :  { %15024 = vmatprep.subr.bf16.mxu0 %v18413_v29  ;;  %15051 = vmatprep.subr.bf16.mxu1 %v18141_v22  ;;  %v18421_v29 = vld [vmem:[#allocation65_spill] sm:$0xff] }
0x3d84   :  { %15026 = vmatpush1.bf16.msra.mxu0 %v18414_v4  ;;  %15053 = vmatpush3.bf16.msra.mxu1 %v18415_v57  ;;  %v18423_v57 = vld [vmem:[#allocation67_spill] sm:$0xff]  ;;  %v18425_v4 = vld [vmem:[#allocation34_spill] sm:$0xff] }
0x3d85   :  { %15028 = vmatprep.subr.bf16.mxu0 %v18416_v54  ;;  %15054 = vmatprep.subr.bf16.mxu1 %v18141_v22  ;;  %v18424_v54 = vld [vmem:[#allocation68_spill] sm:$0xff] }
0x3d88   :  { %15030 = vmatpush1.bf16.msra.mxu0 %v18417_v2  ;;  %15056 = vmatpush3.bf16.msra.mxu1 %v18418_v20  ;;  %v9948_v2 = vrot.slane %v18425_v4, 7  ;;  %v9949_v20 = vrot.slane %v18426_v61, 6 }
0x3d89   :  { %15032 = vmatprep.subr.bf16.mxu0 %v18419_v9  ;;  %15057 = vmatprep.subr.bf16.mxu1 %v18141_v22 }
0x3d8c   :  { %15034 = vmatpush1.bf16.msra.mxu0 %v18420_v7  ;;  %15059 = vmatpush3.bf16.msra.mxu1 %v18421_v29  ;;  %v18428_v7 = vld [vmem:[#allocation70_spill] sm:$0xff] }
0x3d8d   :  { %15036 = vmatprep.subr.bf16.mxu0 %v18422_v25  ;;  %15060 = vmatprep.subr.bf16.mxu1 %v18141_v22 }
0x3d90   :  { %15038 = vmatpush1.bf16.msra.mxu0 %v18423_v57  ;;  %15062 = vmatpush3.bf16.msra.mxu1 %v18424_v54  ;;  %v9950_v54 = vsel %vm336_vm2, %v9949_v20, %v9948_v2 }
0x3d91   :  { %13557 = vmatprep.subr.mxu0 %v18140_v21  ;;  %15063 = vmatprep.subr.bf16.mxu1 %v18141_v22 }
0x3d93   :  { %9849 = vmatmul.mubr.f32.vlgmr.msra.gmra.mrb[110].mxu0 %v17576_v53  ;;  %13555 = vmatmul.mubr.f32.vlgmr.msra.gmra.mrb[110].mxu1 %v17576_v53 }
0x3d94   :  { %13558 = vmatpush3.msk.msra.mxu0 %vm341_vm1, %v17413_v38  ;;  %13559 = vmatprep.mubr.msk.f32.mxu0 %vm15783_vm0, %v18140_v21 }
0x3d95   :  { %15065 = vmatpush3.bf16.msra.mxu1 %v16011_v8  ;;  %13570 = vmatprep.mubr.msk.f32.mxu1 %vm15783_vm0, %v18140_v21 }
0x3d96   :  { %15066 = vmatprep.subr.bf16.mxu1 %v18141_v22  ;;  %15069 = vmatprep.subr.bf16.mxu0 %v18141_v22 }
0x3d97   :  { %13560 = vmatmul.mubr.msk.f32.vlgmr.msra.gmra.mrb[112].mxu0 %vm338_vm3, %v9950_v54  ;;  %v18427_v54 = vld [vmem:[#allocation69_spill] sm:$0xff] }
0x3d98   :  { %15071 = vmatpush3.bf16.msra.mxu0 %v16037_v15  ;;  %13581 = vmatprep.mubr.msk.f32.mxu0 %vm15783_vm0, %v18140_v21 }
0x3d99   :  { %15068 = vmatpush3.bf16.msra.mxu1 %v16027_v12  ;;  %15072 = vmatprep.subr.bf16.mxu0 %v18141_v22 }
0x3d9a   :  { %15075 = vmatprep.subr.bf16.mxu1 %v18141_v22 }
0x3d9c   :  { %15074 = vmatpush3.bf16.msra.mxu0 %v16053_v23 }
0x3d9d   :  { %15081 = vmatprep.subr.bf16.mxu0 %v18141_v22 }
0x3e46   :  { %v9780_v38 = vpop.f32.mrb[108].mxu1 }
0x3e47   :  { %v13521_v61 = vpop.f32.mrb[109].mxu1 }
0x3e66   :  { %v9850_v4 = vpop.f32.mrb[110].mxu0  ;;  %v9921_v2 = vpop.f32.mrb[110].mxu1 }
0x3e67   :  { %v15304_v20 = vadd.f32 %v18427_v54, %v9850_v4  ;;  %v9852_v57 = vpop.f32.mrb[111].mxu0  ;;  %v13556_v25 = vpop.f32.mrb[111].mxu1 }
0x3e68   :  { %v15306_v9 = vadd.f32 %v18428_v7, %v9852_v57  ;;  %v18429_v25 = vld [vmem:[#allocation25_spill] sm:$0xff] }
0x3e69   :  { %v11501_v29 = vmul.f32 -1.442695, %v15304_v20 }
0x3e6a   :  { %v10019_v52 = vpop.f32.mrb[112].mxu0  ;;  %v11502_v27 = vmul.f32 -1.442695, %v15306_v9 }
0x3e6b   :  { %15495 = vpow2.f32 %v11501_v29  ;;  %v10020_v5 = vadd.f32 %v17436_v24, %v10019_v52  ;;  %v13561_v55 = vpop.f32.mrb[113].mxu0  ;;  %v9781_v52 = vadd.f32 %v9780_v38, %v16458_v48 }
0x3e6c   :  { %15497 = vpow2.f32 %v11502_v27 }
0x3e6d   :  { %v10023_v40 = vmax.f32 %v10020_v5, 0.0  ;;  %v9922_v5 = vadd.f32 %v9921_v2, %v16455_v16 }
0x3e6f   :  { %13571 = vmatmul.mubr.msk.f32.vlgmr.msra.gmra.mrb[112].mxu1 %vm422_vm4, %v10023_v40 }
0x3e70   :  { %15077 = vmatpush3.bf16.msra.mxu1 %v16057_v26  ;;  %13592 = vmatprep.mubr.msk.f32.mxu1 %vm15783_vm0, %v18140_v21 }
0x3e71   :  { %15078 = vmatprep.subr.bf16.mxu1 %v18141_v22 }
0x3e74   :  { %15080 = vmatpush3.bf16.msra.mxu1 %v16067_v34 }
0x3e75   :  { %v15496_v57 = vpop.eup %15495  ;;  %15088 = vmatprep.subr.bf16.mxu1 %v18429_v25 }
0x3e76   :  { %v9929_v29 = vadd.f32 1.0, %v15496_v57  ;;  %v15498_v24 = vpop.eup %15497 }
0x3e77   :  { %v9936_v55 = vadd.f32 1.0, %v15498_v24 }
0x3e78   :  { %15499 = vrcp.f32 %v9929_v29 }
0x3e79   :  { %15501 = vrcp.f32 %v9936_v55 }
0x3e82   :  { %v15500_v40 = vpop.eup %15499 }
0x3e83   :  { %v9939_v9 = vmul.f32 %v15500_v40, %v9922_v5  ;;  %v15502_v4 = vpop.eup %15501 }
0x3e84   :  { %v9942_v27 = vsub.f32 1.0, %v15502_v4  ;;  %v9944_v54 = vmul.f32 %v15502_v4, %v17576_v53 }
0x3e85   :  { %v9940_v61 = vadd.f32 %v9939_v9, %v9781_v52 }
0x3e87   :  { %15503 = vtanh.f32 %v9940_v61 }
0x3e91   :  { %v15504_v20 = vpop.eup %15503 }
0x3e92   :  { %v9943_v7 = vmul.f32 %v15504_v20, %v9942_v27 }
0x3e94   :  { %v17786_v25 = vadd.f32 %v9944_v54, %v9943_v7 }
0x3e96   :  { %9947 = vst [vmem:[#allocation17 + $0x2] sm:$0x3] %v17786_v25 }
0x3f42   :  { %v10093_v57 = vpop.f32.mrb[112].mxu1 }
0x3f43   :  { %v10094_v2 = vadd.f32 %v17452_v1, %v10093_v57  ;;  %v13572_v29 = vpop.f32.mrb[113].mxu1 }
0x3f45   :  { %v10097_v24 = vmax.f32 %v10094_v2, 0.0 }
0x3f47   :  { %13582 = vmatmul.mubr.msk.f32.vlgmr.msra.gmra.mrb[114].mxu0 %vm422_vm4, %v10097_v24 }
0x3f48   :  { %15083 = vmatpush3.bf16.msra.mxu0 %v16070_v37  ;;  %13603 = vmatprep.mubr.msk.f32.mxu0 %vm15783_vm0, %v18140_v21 }
0x3f49   :  { %15084 = vmatprep.subr.bf16.mxu0 %v18141_v22 }
0x3f4c   :  { %15086 = vmatpush3.bf16.msra.mxu0 %v16082_v45 }
0x3f4d   :  { %15095 = vmatprep.subr.bf16.mxu0 %v18141_v22 }
0x401a   :  { %v10167_v53 = vpop.f32.mrb[114].mxu0 }
0x401b   :  { %v10168_v7 = vadd.f32 %v17465_v39, %v10167_v53  ;;  %v13583_v38 = vpop.f32.mrb[115].mxu0 }
0x401d   :  { %v10171_v1 = vmax.f32 %v10168_v7, 0.0 }
0x401f   :  { %13593 = vmatmul.mubr.msk.f32.vlgmr.msra.gmra.mrb[114].mxu1 %vm422_vm4, %v10171_v1  ;;  %v15557_v1 = vld [vmem:[#allocation9] ss:$0 sm:$0xff] }
0x4020   :  { %15090 = vmatpush1.bf16.msra.mxu1 %v16088_v51  ;;  %10387 = vmatprep.mubr.f32.mxu1 %v18140_v21 }
0x4021   :  { %15092 = vmatprep.subr.bf16.mxu1 %v16105_v62 }
0x4024   :  { %15094 = vmatpush1.bf16.msra.mxu1 %v16107_v6 }
0x4025   :  { %15102 = vmatprep.subr.bf16.mxu1 %v16114_v14 }
0x40f2   :  { %v10241_v54 = vpop.f32.mrb[114].mxu1 }
0x40f3   :  { %v10242_v55 = vadd.f32 %v17477_v0, %v10241_v54  ;;  %v13594_v5 = vpop.f32.mrb[115].mxu1 }
0x40f5   :  { %v10245_v40 = vmax.f32 %v10242_v55, 0.0 }
0x40f7   :  { %13604 = vmatmul.mubr.msk.f32.vlgmr.msra.gmra.mrb[116].mxu0 %vm422_vm4, %v10245_v40 }
0x40f8   :  { %15097 = vmatpush3.bf16.msra.mxu0 %v16098_v58  ;;  %13614 = vmatprep.mubr.msk.f32.mxu0 %vm15783_vm0, %v18140_v21  ;;  %v18430_v58 = vld [vmem:[#allocation29_spill] sm:$0xff] }
0x40f9   :  { %15098 = vmatprep.subr.bf16.mxu0 %v18141_v22 }
0x40fc   :  { %15100 = vmatpush3.bf16.msra.mxu0 %v16110_v10  ;;  %v18431_v10 = vld [vmem:[#allocation30_spill] sm:$0xff] }
0x40fd   :  { %15133 = vmatprep.subr.bf16.mxu0 %v18141_v22 }
0x41ca   :  { %v10315_v51 = vpop.f32.mrb[116].mxu0 }
0x41cb   :  { %v10316_v62 = vadd.f32 %v17490_v13, %v10315_v51  ;;  %v13605_v6 = vpop.f32.mrb[117].mxu0  ;;  %v18438_v13 = vld [vmem:[#allocation39_spill] sm:$0xff] }
0x41cc   :  { %v15559_v6 = vld [vmem:[%s17994_s9] ss:$0 sm:$0xff]  ;;  %s15785_s9 = smov [#allocation16]  }
0x41cd   :  { %v10319_v14 = vmax.f32 %v10316_v62, 0.0 }
0x41cf   :  { %11509 = vmatmul.mubr.msk.f32.vlgmr.msra.gmra.mrb[116].mxu1 %vm422_vm4, %v10319_v14  ;;  %13615 = vmatmul.mubr.msk.f32.vlgmr.msra.gmra.mrb[118].mxu0 %vm422_vm4, %v10319_v14 }
0x41d0   :  { %15104 = vmatpush1.bf16.msra.mxu1 %v16124_v30  ;;  %15135 = vmatpush3.bf16.msra.mxu0 %v16126_v32  ;;  %v18432_v30 = vld [vmem:[#allocation31_spill] sm:$0xff]  ;;  %v18433_v32 = vld [vmem:[#allocation32_spill] sm:$0xff] }
0x41d1   :  { %15106 = vmatprep.subr.bf16.mxu1 %v16128_v35  ;;  %15136 = vmatprep.subr.bf16.mxu0 %v18141_v22  ;;  %v18434_v35 = vld [vmem:[#allocation28_spill] sm:$0xff] }
0x41d2   :  { %10528 = vmatprep.mubr.f32.mxu1 %v18140_v21  ;;  %13649 = vmatprep.mubr.msk.f32.mxu0 %vm15783_vm0, %v18140_v21 }
0x41d4   :  { %15108 = vmatpush1.bf16.msra.mxu1 %v16133_v43  ;;  %15138 = vmatpush3.bf16.msra.mxu0 %v16136_v46  ;;  %v10628_v43 = vrot.slane %v18434_v35, 7  ;;  %v15555_v46 = vld [vmem:[#allocation4] sm:$0x1f] }
0x41d5   :  { %15110 = vmatprep.subr.bf16.mxu1 %v16139_v47  ;;  %15139 = vmatprep.subr.bf16.mxu0 %v18141_v22  ;;  %v18435_v47 = vld [vmem:[#allocation27_spill] sm:$0xff] }
0x41d8   :  { %15112 = vmatpush1.bf16.msra.mxu1 %v16146_v56  ;;  %15141 = vmatpush3.bf16.msra.mxu0 %v16149_v59  ;;  %v10629_v56 = vsel %vm336_vm2, %v10628_v43, %v18435_v47  ;;  %v18443_v47 = vld [vmem:[#allocation46_spill] sm:$0xff] }
0x41d9   :  { %15114 = vmatprep.subr.bf16.mxu1 %v16152_v60  ;;  %15142 = vmatprep.subr.bf16.mxu0 %v18141_v22 }
0x41dc   :  { %15116 = vmatpush1.bf16.msra.mxu1 %v16156_v11  ;;  %15144 = vmatpush3.bf16.msra.mxu0 %v16159_v18  ;;  %v18436_v18 = vld [vmem:[#allocation35_spill] sm:$0xff] }
0x41dd   :  { %15118 = vmatprep.subr.bf16.mxu1 %v16162_v19  ;;  %15145 = vmatprep.subr.bf16.mxu0 %v18141_v22 }
0x41e0   :  { %15120 = vmatpush1.bf16.msra.mxu1 %v16166_v28  ;;  %15147 = vmatpush3.bf16.msra.mxu0 %v16169_v31 }
0x41e1   :  { %15122 = vmatprep.subr.bf16.mxu1 %v16172_v33  ;;  %15148 = vmatprep.subr.bf16.mxu0 %v18141_v22  ;;  %v18437_v33 = vld [vmem:[#allocation36_spill] sm:$0xff] }
0x41e4   :  { %15124 = vmatpush1.bf16.msra.mxu1 %v16176_v44  ;;  %15150 = vmatpush3.bf16.msra.mxu0 %v18176_v17  ;;  %v15556_v17 = vld [vmem:[#allocation7] ss:$0 sm:$0xff] }
0x41e5   :  { %15126 = vmatprep.subr.bf16.mxu1 %v18177_v41  ;;  %15151 = vmatprep.subr.bf16.mxu0 %v18141_v22 }
0x41e8   :  { %15128 = vmatpush1.bf16.msra.mxu1 %v18262_v42  ;;  %15153 = vmatpush3.bf16.msra.mxu0 %v18430_v58 }
0x41e9   :  { %15130 = vmatprep.subr.bf16.mxu1 %v18431_v10  ;;  %15154 = vmatprep.subr.bf16.mxu0 %v18141_v22 }
0x41ec   :  { %15132 = vmatpush1.bf16.msra.mxu1 %v18432_v30  ;;  %15156 = vmatpush3.bf16.msra.mxu0 %v18433_v32  ;;  %v18441_v30 = vld [vmem:[#allocation41_spill] sm:$0xff] }
0x41ed   :  { %13652 = vmatprep.subr.mxu1 %v18140_v21  ;;  %15157 = vmatprep.subr.bf16.mxu0 %v18141_v22  ;;  %v15560_v32 = vld [vmem:[%s17996_s11] ss:$0 sm:$0xff]  ;;  %s11313_s11 = sshll.u32 %s15785_s9, 4  ;;  %s11314_s11 = int_to_ptr.vmem [resolvable:$true] %s11313_s11 }
0x41ee   :  { %s15715_s18 = scalar_lea.vmem %s11314_s11, 256  ;;  %p15720_p1 = scmp.lt.s32.totalorder %s11314_s11, %s11314_s11 }
0x41ef   :  { %10529 = vmatmul.mubr.f32.vlgmr.msra.gmra.mrb[116].mxu1 %v17686_v36  ;;  %13650 = vmatmul.mubr.f32.vlgmr.msra.gmra.mrb[120].mxu0 %v17686_v36  ;;  %p15716_p0 = scmp.ne.s32.totalorder %s11314_s11, %s15715_s18  ;;  %p15721_p2 = scmp.lt.s32.totalorder %s15715_s18, %s15715_s18 }
0x41f0   :  { %13653 = vmatpush3.msk.msra.mxu1 %vm341_vm1, %v15555_v46  ;;  %13654 = vmatprep.mubr.msk.f32.mxu1 %vm15783_vm0, %v18140_v21 }
0x41f1   :  { %15159 = vmatpush3.bf16.msra.mxu0 %v16011_v8  ;;  %13665 = vmatprep.mubr.msk.f32.mxu0 %vm15783_vm0, %v18140_v21  ;;  %p15722_p3 = por %p15721_p2, %p15720_p1 }
0x41f2   :  { %15160 = vmatprep.subr.bf16.mxu0 %v18141_v22  ;;  %15163 = vmatprep.subr.bf16.mxu1 %v18141_v22 }
0x41f3   :  { %13655 = vmatmul.mubr.msk.f32.vlgmr.msra.gmra.mrb[118].mxu1 %vm338_vm3, %v10629_v56  ;;  %v18444_v56 = vld [vmem:[#allocation47_spill] sm:$0xff]  ;;  %p15723_p4 = pnand %p15722_p3, %p15716_p0 }
0x41f4   :  { %15165 = vmatpush3.bf16.msra.mxu1 %v16037_v15  ;;  %13676 = vmatprep.mubr.msk.f32.mxu1 %vm15783_vm0, %v18140_v21 }
0x41f5   :  { %15162 = vmatpush3.bf16.msra.mxu0 %v16027_v12  ;;  %15166 = vmatprep.subr.bf16.mxu1 %v18141_v22 }
0x41f6   :  { %15169 = vmatprep.subr.bf16.mxu0 %v18141_v22 }
0x41f8   :  { %15168 = vmatpush3.bf16.msra.mxu1 %v16053_v23 }
0x41f9   :  { %15175 = vmatprep.subr.bf16.mxu1 %v18141_v22 }
0x42a2   :  { %v10460_v8 = vpop.f32.mrb[118].mxu0 }
0x42a3   :  { %v13616_v59 = vpop.f32.mrb[119].mxu0 }
0x42a4   :  { %v18446_v59 = vld [vmem:[#allocation49_spill] sm:$0xff] }
0x42c2   :  { %v10530_v60 = vpop.f32.mrb[116].mxu1  ;;  %v10601_v11 = vpop.f32.mrb[120].mxu0 }
0x42c3   :  { %v15308_v19 = vadd.f32 %v18436_v18, %v10530_v60  ;;  %v10532_v15 = vpop.f32.mrb[117].mxu1  ;;  %v13651_v28 = vpop.f32.mrb[121].mxu0  ;;  %v10602_v4 = vadd.f32 %v10601_v11, %v18394_v49  ;;  %v18447_v60 = vld [vmem:[#allocation50_spill] sm:$0xff]  ;;  %v18448_v11 = vld [vmem:[#allocation51_spill] sm:$0xff]  ;;  %v18449_v18 = vld [vmem:[#allocation52_spill] sm:$0xff] }
0x42c4   :  { %v15310_v44 = vadd.f32 %v18437_v33, %v10532_v15  ;;  %v18451_v15 = vld [vmem:[#allocation54_spill] sm:$0xff]  ;;  %v18452_v28 = vld [vmem:[#allocation55_spill] sm:$0xff] }
0x42c5   :  { %v11511_v31 = vmul.f32 -1.442695, %v15308_v19  ;;  %v18450_v19 = vld [vmem:[#allocation53_spill] sm:$0xff]  ;;  %v18455_v33 = vld [vmem:[#allocation58_spill] sm:$0xff] }
0x42c6   :  { %v10698_v12 = vpop.f32.mrb[118].mxu1  ;;  %v11512_v23 = vmul.f32 -1.442695, %v15310_v44  ;;  %v18456_v44 = vld [vmem:[#allocation59_spill] sm:$0xff] }
0x42c7   :  { %15505 = vpow2.f32 %v11511_v31  ;;  %v10699_v41 = vadd.f32 %v15556_v17, %v10698_v12  ;;  %v13656_v42 = vpop.f32.mrb[119].mxu1  ;;  %v18453_v31 = vld [vmem:[#allocation56_spill] sm:$0xff]  ;;  %v18458_v17 = vld [vmem:[#allocation61_spill] sm:$0xff] }
0x42c8   :  { %15507 = vpow2.f32 %v11512_v23  ;;  %v18457_v12 = vld [vmem:[#allocation60_spill] sm:$0xff]  ;;  %v18460_v42 = vld [vmem:[#allocation63_spill] sm:$0xff]  ;;  %v18462_v23 = vld [vmem:[#allocation65_spill] sm:$0xff] }
0x42c9   :  { %v10702_v39 = vmax.f32 %v10699_v41, 0.0  ;;  %v18459_v41 = vld [vmem:[#allocation62_spill] sm:$0xff] }
0x42cb   :  { %13666 = vmatmul.mubr.msk.f32.vlgmr.msra.gmra.mrb[122].mxu0 %vm422_vm4, %v10702_v39  ;;  %v18461_v39 = vld [vmem:[#allocation64_spill] sm:$0xff] }
0x42cc   :  { %15171 = vmatpush3.bf16.msra.mxu0 %v16057_v26  ;;  %13687 = vmatprep.mubr.msk.f32.mxu0 %vm15783_vm0, %v18140_v21  ;;  %v10461_v26 = vadd.f32 %v10460_v8, %v18395_v50  ;;  %v15558_v50 = vld [vmem:[%s17992_s7] ss:$0 sm:$0xff]  ;;  %v18445_v8 = vld [vmem:[#allocation48_spill] sm:$0xff] }
0x42cd   :  { %15172 = vmatprep.subr.bf16.mxu0 %v18141_v22 }
0x42d0   :  { %15174 = vmatpush3.bf16.msra.mxu0 %v16067_v34 }
0x42d1   :  { %v15506_v0 = vpop.eup %15505  ;;  %15182 = vmatprep.subr.bf16.mxu0 %v18438_v13  ;;  %v18464_v13 = vld [vmem:[#allocation67_spill] sm:$0xff] }
0x42d2   :  { %v10609_v52 = vadd.f32 1.0, %v15506_v0  ;;  %v15508_v9 = vpop.eup %15507  ;;  %v18463_v0 = vld [vmem:[#allocation66_spill] sm:$0xff] }
0x42d3   :  { %v10616_v61 = vadd.f32 1.0, %v15508_v9 }
0x42d4   :  { %15509 = vrcp.f32 %v10609_v52  ;;  %v18465_v52 = vld [vmem:[#allocation68_spill] sm:$0xff] }
0x42d5   :  { %15511 = vrcp.f32 %v10616_v61 }
0x42de   :  { %v15510_v27 = vpop.eup %15509 }
0x42df   :  { %v10619_v20 = vmul.f32 %v15510_v27, %v10602_v4  ;;  %v15512_v2 = vpop.eup %15511 }
0x42e0   :  { %v10622_v29 = vsub.f32 1.0, %v15512_v2  ;;  %v10624_v53 = vmul.f32 %v15512_v2, %v17686_v36 }
0x42e1   :  { %v10620_v57 = vadd.f32 %v10619_v20, %v10461_v26 }
0x42e3   :  { %15513 = vtanh.f32 %v10620_v57 }
0x42ed   :  { %v15514_v24 = vpop.eup %15513 }
0x42ee   :  { %v10623_v34 = vmul.f32 %v15514_v24, %v10622_v29 }
0x42f0   :  { %v10625_v7 = vadd.f32 %v10624_v53, %v10623_v34 }
0x42f2   :  { %10627 = vst [vmem:[#allocation16 + $0xe] sm:$0x3] %v10625_v7  ;;  %11306 = vst [vmem:[#allocation2] sm:$0x3] %v10625_v7 }
0x439e   :  { %v10772_v38 = vpop.f32.mrb[122].mxu0 }
0x439f   :  { %v10773_v54 = vadd.f32 %v15557_v1, %v10772_v38  ;;  %v13667_v49 = vpop.f32.mrb[123].mxu0 }
0x43a1   :  { %v10776_v55 = vmax.f32 %v10773_v54, 0.0 }
0x43a3   :  { %13677 = vmatmul.mubr.msk.f32.vlgmr.msra.gmra.mrb[120].mxu1 %vm422_vm4, %v10776_v55 }
0x43a4   :  { %15177 = vmatpush3.bf16.msra.mxu1 %v16070_v37  ;;  %13698 = vmatprep.mubr.msk.f32.mxu1 %vm15783_vm0, %v18140_v21  ;;  %v18439_v37 = vld [vmem:[#allocation43_spill] sm:$0xff] }
0x43a5   :  { %15178 = vmatprep.subr.bf16.mxu1 %v18141_v22 }
0x43a8   :  { %15180 = vmatpush3.bf16.msra.mxu1 %v16082_v45  ;;  %v18440_v45 = vld [vmem:[#allocation45_spill] sm:$0xff] }
0x43a9   :  { %15189 = vmatprep.subr.bf16.mxu1 %v18141_v22 }
0x4476   :  { %v10846_v36 = vpop.f32.mrb[120].mxu1 }
0x4477   :  { %v10847_v5 = vadd.f32 %v15558_v50, %v10846_v36  ;;  %v13678_v40 = vpop.f32.mrb[121].mxu1 }
0x4479   :  { %v10850_v51 = vmax.f32 %v10847_v5, 0.0 }
0x447b   :  { %13688 = vmatmul.mubr.msk.f32.vlgmr.msra.gmra.mrb[124].mxu0 %vm422_vm4, %v10850_v51 }
0x447c   :  { %15184 = vmatpush1.bf16.msra.mxu0 %v18396_v3  ;;  %11066 = vmatprep.mubr.f32.mxu0 %v18140_v21  ;;  %v18442_v3 = vld [vmem:[#allocation44_spill] sm:$0xff] }
0x447d   :  { %15186 = vmatprep.subr.bf16.mxu0 %v18397_v63 }
0x4480   :  { %15188 = vmatpush1.bf16.msra.mxu0 %v18439_v37 }
0x4481   :  { %15196 = vmatprep.subr.bf16.mxu0 %v18440_v45 }
0x454e   :  { %v10920_v62 = vpop.f32.mrb[124].mxu0 }
0x454f   :  { %v10921_v14 = vadd.f32 %v15559_v6, %v10920_v62  ;;  %v13689_v58 = vpop.f32.mrb[125].mxu0 }
0x4551   :  { %v10924_v10 = vmax.f32 %v10921_v14, 0.0 }
0x4553   :  { %13699 = vmatmul.mubr.msk.f32.vlgmr.msra.gmra.mrb[122].mxu1 %vm422_vm4, %v10924_v10 }
0x4554   :  { %15191 = vmatpush3.bf16.msra.mxu1 %v18441_v30  ;;  %13709 = vmatprep.mubr.msk.f32.mxu1 %vm15783_vm0, %v18140_v21 }
0x4555   :  { %15192 = vmatprep.subr.bf16.mxu1 %v18141_v22 }
0x4558   :  { %15194 = vmatpush3.bf16.msra.mxu1 %v18442_v3 }
0x4559   :  { %15227 = vmatprep.subr.bf16.mxu1 %v18141_v22 }
0x4626   :  { %v10994_v63 = vpop.f32.mrb[122].mxu1 }
0x4627   :  { %v10995_v35 = vadd.f32 %v15560_v32, %v10994_v63  ;;  %v13700_v43 = vpop.f32.mrb[123].mxu1 }
0x4629   :  { %v10998_v46 = vmax.f32 %v10995_v35, 0.0 }
0x462b   :  { %11519 = vmatmul.mubr.msk.f32.vlgmr.msra.gmra.mrb[126].mxu0 %vm422_vm4, %v10998_v46  ;;  %13710 = vmatmul.mubr.msk.f32.vlgmr.msra.gmra.mrb[124].mxu1 %vm422_vm4, %v10998_v46 }
0x462c   :  { %15198 = vmatpush1.bf16.msra.mxu0 %v18443_v47  ;;  %15229 = vmatpush3.bf16.msra.mxu1 %v18444_v56 }
0x462d   :  { %15200 = vmatprep.subr.bf16.mxu0 %v18445_v8  ;;  %15230 = vmatprep.subr.bf16.mxu1 %v18141_v22 }
0x462e   :  { %11207 = vmatprep.mubr.f32.mxu0 %v18140_v21  ;;  %13744 = vmatprep.mubr.msk.f32.mxu1 %vm15783_vm0, %v18140_v21  ;;  %v18454_v21 = vld [vmem:[#allocation57_spill] sm:$0xff] }
0x4630   :  { %15202 = vmatpush1.bf16.msra.mxu0 %v18446_v59  ;;  %15232 = vmatpush3.bf16.msra.mxu1 %v18447_v60 }
0x4631   :  { %15204 = vmatprep.subr.bf16.mxu0 %v18448_v11  ;;  %15233 = vmatprep.subr.bf16.mxu1 %v18141_v22 }
0x4634   :  { %15206 = vmatpush1.bf16.msra.mxu0 %v18449_v18  ;;  %15235 = vmatpush3.bf16.msra.mxu1 %v18450_v19 }
0x4635   :  { %15208 = vmatprep.subr.bf16.mxu0 %v18451_v15  ;;  %15236 = vmatprep.subr.bf16.mxu1 %v18141_v22 }
0x4638   :  { %15210 = vmatpush1.bf16.msra.mxu0 %v18452_v28  ;;  %15238 = vmatpush3.bf16.msra.mxu1 %v18453_v31 }
0x4639   :  { %15212 = vmatprep.subr.bf16.mxu0 %v18454_v21  ;;  %15239 = vmatprep.subr.bf16.mxu1 %v18141_v22 }
0x463c   :  { %15214 = vmatpush1.bf16.msra.mxu0 %v18455_v33  ;;  %15241 = vmatpush3.bf16.msra.mxu1 %v18456_v44 }
0x463d   :  { %15216 = vmatprep.subr.bf16.mxu0 %v18457_v12  ;;  %15242 = vmatprep.subr.bf16.mxu1 %v18141_v22 }
0x4640   :  { %15218 = vmatpush1.bf16.msra.mxu0 %v18458_v17  ;;  %15244 = vmatpush3.bf16.msra.mxu1 %v18459_v41 }
0x4641   :  { %15220 = vmatprep.subr.bf16.mxu0 %v18460_v42  ;;  %15245 = vmatprep.subr.bf16.mxu1 %v18141_v22 }
0x4644   :  { %15222 = vmatpush1.bf16.msra.mxu0 %v18461_v39  ;;  %15247 = vmatpush3.bf16.msra.mxu1 %v18462_v23 }
0x4645   :  { %15224 = vmatprep.subr.bf16.mxu0 %v18463_v0  ;;  %15248 = vmatprep.subr.bf16.mxu1 %v18141_v22 }
0x4648   :  { %15226 = vmatpush1.bf16.msra.mxu0 %v18464_v13  ;;  %15250 = vmatpush3.bf16.msra.mxu1 %v18465_v52 }
0x464b   :  { %11208 = vmatmul.mubr.f32.vlgmr.msra.gmra.mrb[126].mxu0 %v17786_v25  ;;  %13745 = vmatmul.mubr.f32.vlgmr.msra.gmra.mrb[126].mxu1 %v17786_v25 }
0x464c   :  { %15726 = shalt.err (!%p15723_p4)
}
0x464d   :  { %s15727_s14 = scalar_lea.hbm %s18001_s16, 256 }
0x464e   :  { %p15728_p5 = scmp.ne.s32.totalorder %s18001_s16, %s15727_s14  ;;  %p15731_p6 = scmp.lt.u32.totalorder %s15727_s14, %s18001_s16 }
0x4650   :  { %p15733_p7 = pnand %p15731_p6, %p15728_p5 }
0x4652   :  { %15736 = shalt.err (!%p15733_p7)
}
0x4653   :  { %s15786_s3 = smov 32   ;;  %s15787_s6 = smov 2   ;;  %v18466_v27 = vld [vmem:[#allocation69_spill] sm:$0xff]  ;;  %v18467_v29 = vld [vmem:[#allocation70_spill] sm:$0xff] }
0x4654   :  { %11319 = dma.vmem_to_hbm [thread:$0]  %s11314_s11, 256, %s18001_s16, [#allocation6], %s15786_s3, %s15786_s3, %s15787_s6  }
0x4655   :  { %s15788_s16 = smov [#allocation17]  }
0x4656   :  { %s11329_s13 = sshll.u32 %s15788_s16, 4  ;;  %s11330_s13 = int_to_ptr.vmem [resolvable:$true] %s11329_s13 }
0x4657   :  { %s15737_s8 = scalar_lea.vmem %s11330_s13, 256  ;;  %p15742_p9 = scmp.lt.s32.totalorder %s11330_s13, %s11330_s13 }
0x4658   :  { %p15738_p8 = scmp.ne.s32.totalorder %s11330_s13, %s15737_s8  ;;  %p15743_p10 = scmp.lt.s32.totalorder %s15737_s8, %s15737_s8 }
0x465a   :  { %p15744_p11 = por %p15743_p10, %p15742_p9 }
0x465c   :  { %p15745_p12 = pnand %p15744_p11, %p15738_p8 }
0x46fe   :  { %v11139_v22 = vpop.f32.mrb[124].mxu1 }
0x46ff   :  { %v13711_v9 = vpop.f32.mrb[125].mxu1  ;;  %v11140_v55 = vadd.f32 %v11139_v22, %v16458_v48 }
0x471e   :  { %v11209_v61 = vpop.f32.mrb[126].mxu0  ;;  %v11280_v4 = vpop.f32.mrb[126].mxu1 }
0x471f   :  { %v15312_v26 = vadd.f32 %v18466_v27, %v11209_v61  ;;  %v11211_v20 = vpop.f32.mrb[127].mxu0  ;;  %v13746_v57 = vpop.f32.mrb[127].mxu1  ;;  %v11281_v54 = vadd.f32 %v11280_v4, %v16455_v16 }
0x4720   :  { %v15314_v24 = vadd.f32 %v18467_v29, %v11211_v20 }
0x4721   :  { %v11521_v2 = vmul.f32 -1.442695, %v15312_v26 }
0x4722   :  { %v11522_v34 = vmul.f32 -1.442695, %v15314_v24 }
0x4723   :  { %15515 = vpow2.f32 %v11521_v2 }
0x4724   :  { %15517 = vpow2.f32 %v11522_v34 }
0x472d   :  { %v15516_v53 = vpop.eup %15515 }
0x472e   :  { %v11288_v7 = vadd.f32 1.0, %v15516_v53  ;;  %v15518_v38 = vpop.eup %15517 }
0x472f   :  { %v11295_v1 = vadd.f32 1.0, %v15518_v38 }
0x4730   :  { %15519 = vrcp.f32 %v11288_v7 }
0x4731   :  { %15521 = vrcp.f32 %v11295_v1 }
0x473a   :  { %v15520_v49 = vpop.eup %15519 }
0x473b   :  { %v11298_v36 = vmul.f32 %v15520_v49, %v11281_v54  ;;  %v15522_v5 = vpop.eup %15521 }
0x473c   :  { %v11301_v40 = vsub.f32 1.0, %v15522_v5  ;;  %v11303_v45 = vmul.f32 %v15522_v5, %v17786_v25 }
0x473d   :  { %v11299_v50 = vadd.f32 %v11298_v36, %v11140_v55 }
0x473f   :  { %15523 = vtanh.f32 %v11299_v50 }
0x4749   :  { %v15524_v51 = vpop.eup %15523 }
0x474a   :  { %v11302_v37 = vmul.f32 %v15524_v51, %v11301_v40 }
0x474c   :  { %v11304_v62 = vadd.f32 %v11303_v45, %v11302_v37 }
0x474e   :  { %11305 = vst [vmem:[#allocation17] sm:$0x3] %v11304_v62  ;;  %11307 = vst [vmem:[#allocation3] sm:$0x3] %v11304_v62 }
0x474f   :  { %15748 = shalt.err (!%p15745_p12)
}
0x4750   :  { %s15749_s26 = scalar_lea.hbm %s18002_s17, 256 }
0x4751   :  { %p15750_p13 = scmp.ne.s32.totalorder %s18002_s17, %s15749_s26  ;;  %p15753_p0 = scmp.lt.u32.totalorder %s15749_s26, %s18002_s17 }
0x4753   :  { %p15755_p1 = pnand %p15753_p0, %p15750_p13 }
0x4755   :  { %15758 = shalt.err (!%p15755_p1)
}
0x4756   :  { %11335 = dma.vmem_to_hbm [thread:$0]  %s11330_s13, 256, %s18002_s17, [#allocation18], %s15786_s3, %s15786_s3, %s15787_s6  }
0x4757   :  { %15767 = dma.done.wait [#allocation6], 256  }
0x4758   :  { %15768 = vsyncadd [#allocation6], 4294967040 }
0x4759   :  { %15769 = dma.done.wait [#allocation18], 256  }
0x475a   :  { %15770 = vsyncadd [#allocation18], 4294967040 }
0x475b   :  { %11342 = vsyncpa [#allocation5], 1 }
0x475c   :  { %11343 = vsyncpa [#allocation8], 1 }
0x475d   :  { %11344 = vsyncpa [#allocation11], 1 }
0x475e   :  { %11345 = vsyncpa [#allocation14], 1 }
0x475f   :  { %11346 = vsyncpa [#allocation6], 1 }
0x4760   :  { %11347 = vsyncpa [#allocation18], 1 }

</bundles_post_ra>
